<compile_context>
chip_gen: v7x
topology: tpu7x:2x2x1
jax: 0.10.0
libtpu: 0.0.40
codegen_flags: <defaults>
</compile_context>

<pallas_src>
import jax
import jax.numpy as jnp
from jax.experimental import pallas as pl
from jax.experimental.pallas import tpu as pltpu

N_LAYERS = 12   # BERT-style: hidden_states[1:] -> 12 layer outputs
LANE = 128
SUB = 8         # f32 sublanes per vreg


# ----------------------------- Pallas kernel ------------------------------ #
def _head_kernel(hs1_ref, hs2_ref, cls_ref, w_ref, b_ref, out_ref, acc_ref):
    s = pl.program_id(1)
    lane1 = hs1_ref.shape[-1]

    @pl.when(s == 0)
    def _init():
        acc_ref[...] = jnp.zeros_like(acc_ref)

    def _accumulate(hs_ref, lo, hi):
        tb, nl, ts, lane = hs_ref.shape
        x = hs_ref[...].astype(jnp.float32)                     # bf16 -> f32
        if ts % SUB == 0:
            # Partial sums across whole vregs only (pure VALU); the sublane
            # collapse is deferred to the finalize (done once, on the XLU).
            part = jnp.sum(x.reshape(tb, nl, ts // SUB, SUB, lane), axis=2)
            acc_ref[:, :, :, lo:hi] += part
        else:
            acc_ref[:, :, 0:1, lo:hi] += jnp.sum(x, axis=2, keepdims=True)

    _accumulate(hs1_ref, 0, lane1)
    _accumulate(hs2_ref, lane1, acc_ref.shape[-1])

    # Standard accumulator pattern: the output block index is constant along
    # the (innermost, "arbitrary") seq axis, so it is only written here.
    @pl.when(s == pl.num_programs(1) - 1)
    def _finalize():
        cls = cls_ref[...]                                      # (TB, L, lanecat)
        m = jnp.max(cls, axis=1, keepdims=True)
        e = jnp.exp(cls - m)
        w = e / jnp.sum(e, axis=1, keepdims=True)               # exact layer softmax
        # layer-weighted sum (VALU across vregs), then ONE sublane collapse (XLU)
        t = jnp.sum(acc_ref[...] * w[:, :, None, :], axis=1)    # (TB, SUB, lanecat)
        pooled = jnp.sum(t, axis=1)                             # (TB, lanecat)
        # dropout = identity (eval).  out1/out2/out Linears + 1/S mean are
        # pre-folded into w_ref / b_ref -> a single fused projection.
        out = (jnp.dot(pooled, w_ref[...], preferred_element_type=jnp.float32)
               + b_ref[...])
        out_ref[...] = out.astype(out_ref.dtype)


# ------------------------------- wrapper ----------------------------------- #
def _lane_pack(hs):
    """(B, L, S, H) -> (B, L, R, lane) lane-dense view (pure reshape, no copy)."""
    B, L, S, H = hs.shape
    if H < LANE:
        assert LANE % H == 0, "hidden size must divide 128 for lane packing"
        pack = LANE // H
        assert S % pack == 0, "seq len must be divisible by 128 // hidden"
        return hs.reshape(B, L, S // pack, pack * H), pack
    assert H % LANE == 0, "hidden size must be a multiple of 128"
    return hs, 1


def _vmem_limit_bytes():
    cap = None
    try:
        cap = getattr(pltpu.get_tpu_info(), "vmem_capacity_bytes", None)
    except Exception:
        cap = None
    if not cap:
        cap = 64 * 1024 * 1024          # conservative: v7x per-TensorCore VMEM
    # ~25% headroom for compiler scratch; never request more than 96 MiB.
    return int(min((cap * 3) // 4, 96 * 1024 * 1024))


def _pick_tiling(B, L, R1, lane1, R2, lane2, budget_bytes):
    """Largest contiguous blocks under the VMEM budget; prefer nb >= 2."""
    def step_bytes(bt, ns):
        ts1, ts2 = R1 // ns, R2 // ns
        hs_blocks = 2 * bt * L * (ts1 * lane1 + ts2 * lane2) * 2   # dbl-buffered bf16
        acc = bt * L * SUB * (lane1 + lane2) * 4
        cls = 2 * bt * L * (lane1 + lane2) * 4
        return hs_blocks + acc + cls

    def ts_ok(ts, R):
        return ts == R or ts % 16 == 0      # bf16 native (16, 128) tiles

    divisors = [d for d in range(1, B + 1) if B % d == 0]
    # nb >= 2 keeps both v7x TensorCores busy; the output block's second-to-last
    # dim is the batch tile, so it must be 8-aligned or equal to B.
    bt_candidates = [d for d in reversed(divisors) if d < B and d % 8 == 0] + [B]
    ns_candidates = [n for n in range(1, min(R1, R2) + 1)
                     if R1 % n == 0 and R2 % n == 0
                     and ts_ok(R1 // n, R1) and ts_ok(R2 // n, R2)]

    for bt in bt_candidates:
        for ns in ns_candidates:            # smallest ns first => biggest blocks
            if step_bytes(bt, ns) <= budget_bytes:
                return bt, ns
    fallback_bt = min([d for d in divisors if d % 8 == 0], default=B)
    return fallback_bt, ns_candidates[-1]


def multi_transformer_head(hs1, hs2, params):
    """hs1: (B, 12, S, H1) bf16/f32, hs2: (B, 12, S, H2) -> (B, n_out) f32."""
    B, L, S, H1 = hs1.shape
    assert L == N_LAYERS and hs2.shape[:3] == (B, L, S)
    H2 = hs2.shape[3]
    n_out = params["wo"].shape[1]
    f32 = jnp.float32

    hs1_p, pack1 = _lane_pack(hs1)            # (B, L, R1, lane1)
    hs2_p, pack2 = _lane_pack(hs2)            # (B, L, R2, lane2)
    R1, lane1 = hs1_p.shape[2], hs1_p.shape[3]
    R2, lane2 = hs2_p.shape[2], hs2_p.shape[3]
    lanecat = lane1 + lane2

    vmem_limit = _vmem_limit_bytes()
    budget = min(vmem_limit // 2, 24 * 1024 * 1024)
    batch_tile, ns = _pick_tiling(B, L, R1, lane1, R2, lane2, budget)
    nb = B // batch_tile
    ts1, ts2 = R1 // ns, R2 // ns

    # CLS vectors (token 0) for the per-branch layer softmax, lane-tiled to the
    # packed layout and concatenated along lanes (softmax is per-lane, so the
    # two branches remain independent inside one tensor).
    cls1 = jnp.tile(hs1[:, :, 0, :].astype(f32), (1, 1, pack1))    # (B, L, lane1)
    cls2 = jnp.tile(hs2[:, :, 0, :].astype(f32), (1, 1, pack2))    # (B, L, lane2)
    clscat = jnp.concatenate([cls1, cls2], axis=-1)                # (B, L, lanecat)

    # Fold Linear(out1)/Linear(out2)/Linear(out) and the 1/S mean into a single
    # (lanecat, n_out) matrix + one bias row:
    #   out = pooled_cat @ [[W1@Wo/S],[W2@Wo/S]] + (b1+b2)@Wo + bo
    w1f = jnp.tile((params["w1"] @ params["wo"]) / S, (pack1, 1))
    w2f = jnp.tile((params["w2"] @ params["wo"]) / S, (pack2, 1))
    wcat = jnp.concatenate([w1f, w2f], axis=0).astype(f32)         # (lanecat, n_out)
    bcat = ((params["b1"] + params["b2"]) @ params["wo"] + params["bo"]).astype(f32)

    return pl.pallas_call(
        _head_kernel,
        out_shape=jax.ShapeDtypeStruct((B, n_out), f32),
        grid_spec=pltpu.PrefetchScalarGridSpec(
            num_scalar_prefetch=0,
            grid=(nb, ns),
            in_specs=[
                pl.BlockSpec((batch_tile, L, ts1, lane1), lambda b, s: (b, 0, s, 0)),
                pl.BlockSpec((batch_tile, L, ts2, lane2), lambda b, s: (b, 0, s, 0)),
                pl.BlockSpec((batch_tile, L, lanecat), lambda b, s: (b, 0, 0)),
                pl.BlockSpec((lanecat, n_out), lambda b, s: (0, 0)),
                pl.BlockSpec((1, n_out), lambda b, s: (0, 0)),
            ],
            out_specs=pl.BlockSpec((batch_tile, n_out), lambda b, s: (b, 0)),
            scratch_shapes=[
                pltpu.VMEM((batch_tile, L, SUB, lanecat), jnp.float32),
            ],
        ),
        compiler_params=pltpu.CompilerParams(
            # batch axis sharded across TensorCores (v7x megacore); the seq
            # axis is the reduction -> innermost + "arbitrary" so the
            # last-step-writeback accumulator pattern stays legal.
            dimension_semantics=("parallel", "arbitrary"),
            vmem_limit_bytes=vmem_limit,
        ),
    )(hs1_p, hs2_p, clscat, wcat, bcat)


# ------------------- synthetic base models (plain JAX glue) ---------------- #
def fake_base_model(ids, mask, token_type_ids, bm):
    """Deterministic stand-in for a HF encoder that returns 12 hidden states."""
    h = bm["word_emb"][ids] + bm["type_emb"][token_type_ids]   # (B, S, H)
    h = h * mask[..., None].astype(h.dtype)
    layers = []
    for l in range(N_LAYERS):
        h = jnp.tanh(h @ bm["layer_w"][l] + bm["layer_b"][l])
        layers.append(h)
    # Batch-major stack (B, 12, S, H): a batch-tile slab is contiguous in HBM,
    # so the kernel never needs an extra transpose or strided DMA.
    return jnp.stack(layers, axis=1)


def make_base_params(key, vocab, n_types, hidden):
    k = jax.random.split(key, 4)
    return {
        "word_emb": 0.1 * jax.random.normal(k[0], (vocab, hidden), jnp.float32),
        "type_emb": 0.1 * jax.random.normal(k[1], (n_types, hidden), jnp.float32),
        "layer_w": 0.2 * jax.random.normal(k[2], (N_LAYERS, hidden, hidden),
                                           jnp.float32),
        "layer_b": 0.05 * jax.random.normal(k[3], (N_LAYERS, hidden),
                                            jnp.float32),
    }


# --------------------------- pure-JAX reference ---------------------------- #
def reference_head(hs1, hs2, params):
    """Unfused reference, identical math to the PyTorch forward (eval mode)."""
    def branch(hs, w, b):                                      # hs: (B, L, S, H)
        hs = hs.astype(jnp.float32)
        cls = hs[:, :, 0, :]                                   # (B, L, H)
        wts = jax.nn.softmax(cls, axis=1)[:, :, None, :]       # (B, L, 1, H)
        weighted = jnp.sum(wts * hs, axis=1)                   # (B, S, H)
        pooled = jnp.mean(weighted, axis=1)                    # (B, H)
        return pooled @ w + b
    o1 = branch(hs1, params["w1"], params["b1"])
    o2 = branch(hs2, params["w2"], params["b2"])
    return (o1 + o2) @ params["wo"] + params["bo"]


# ----------------------------------- main ---------------------------------- #
if __name__ == "__main__":
    B, S = 16, 128
    H1, H2 = 32, 64            # base_model1/2 hidden sizes (divide 128)
    HIDDEN, N_OUT = 32, 1      # MultiTransformer(hidden_size, n_out)
    VOCAB, N_TYPES = 50, 2

    root = jax.random.PRNGKey(0)
    k_bm1, k_bm2, k_in, k_head = jax.random.split(root, 4)

    bm1 = make_base_params(k_bm1, VOCAB, N_TYPES, H1)
    bm2 = make_base_params(k_bm2, VOCAB, N_TYPES, H2)

    ki = jax.random.split(k_in, 6)
    ids1 = jax.random.randint(ki[0], (B, S), 0, VOCAB)
    ids2 = jax.random.randint(ki[1], (B, S), 0, VOCAB)
    mask1 = jnp.ones((B, S), jnp.float32)
    mask2 = jnp.ones((B, S), jnp.float32)
    tt1 = jax.random.randint(ki[2], (B, S), 0, N_TYPES)
    tt2 = jax.random.randint(ki[3], (B, S), 0, N_TYPES)

    kh = jax.random.split(k_head, 6)
    params = {
        "w1": 0.1 * jax.random.normal(kh[0], (H1, HIDDEN), jnp.float32),
        "b1": 0.05 * jax.random.normal(kh[1], (1, HIDDEN), jnp.float32),
        "w2": 0.1 * jax.random.normal(kh[2], (H2, HIDDEN), jnp.float32),
        "b2": 0.05 * jax.random.normal(kh[3], (1, HIDDEN), jnp.float32),
        "wo": 0.1 * jax.random.normal(kh[4], (HIDDEN, N_OUT), jnp.float32),
        "bo": 0.05 * jax.random.normal(kh[5], (1, N_OUT), jnp.float32),
    }

    # "base_model1 / base_model2" forward (glue, plain JAX); carry hidden-state
    # stacks in bf16 (HBM-bandwidth-bound kernel), accumulate in f32 in-kernel.
    hs1 = fake_base_model(ids1, mask1, tt1, bm1).astype(jnp.bfloat16)  # (B,12,S,H1)
    hs2 = fake_base_model(ids2, mask2, tt2, bm2).astype(jnp.bfloat16)  # (B,12,S,H2)

    out = multi_transformer_head(hs1, hs2, params)
    out = jax.block_until_ready(out)

    ref = reference_head(hs1, hs2, params)
    assert out.shape == (B, N_OUT)
    assert jnp.allclose(out, ref, atol=1e-3, rtol=1e-3), (out, ref)

    print("KERNEL_OK")
</pallas_src>

<mosaic_0001>
module attributes {stable_mosaic.version = 11 : i64} {
  func.func @_head_kernel(%arg0: i32, %arg1: i32, %arg2: memref<8x12x32x128xbf16, #tpu.memory_space<vmem>>, %arg3: memref<8x12x64x128xbf16, #tpu.memory_space<vmem>>, %arg4: memref<8x12x256xf32, #tpu.memory_space<vmem>>, %arg5: memref<256x1xf32, #tpu.memory_space<vmem>>, %arg6: memref<1x1xf32, #tpu.memory_space<vmem>>, %arg7: memref<8x1xf32, #tpu.memory_space<vmem>>, %arg8: memref<8x12x8x256xf32, #tpu.memory_space<vmem>>) attributes {dimension_semantics = [#tpu.dimension_semantics<parallel>, #tpu.dimension_semantics<arbitrary>], iteration_bounds = array<i64: 2, 1>, scalar_prefetch = 0 : i64, scratch_operands = 1 : i64, tpu.core_type = #tpu.core_type<tc>, window_params = [{transform_indices = @transform_0, window_bounds = array<i64: 8, 12, 32, 128>}, {transform_indices = @transform_1, window_bounds = array<i64: 8, 12, 64, 128>}, {transform_indices = @transform_2, window_bounds = array<i64: 8, 12, 256>}, {pipeline_mode = #tpu.pipeline_mode<synchronous>, transform_indices = @transform_3, window_bounds = array<i64: 256, 1>}, {pipeline_mode = #tpu.pipeline_mode<synchronous>, transform_indices = @transform_4, window_bounds = array<i64: 1, 1>}, {transform_indices = @transform_5, window_bounds = array<i64: 8, 1>}]} {
    %c0_i32 = arith.constant 0 : i32
    %0 = arith.cmpi eq, %arg1, %c0_i32 : i32
    %1 = arith.extui %0 : i1 to i32
    %c0_i32_0 = arith.constant 0 : i32
    %2 = arith.cmpi ne, %1, %c0_i32_0 : i32
    scf.if %2 {
      %cst_26 = arith.constant 0.000000e+00 : f32
      %20 = vector.broadcast %cst_26 : f32 to vector<8x12x8x256xf32>
      %c0_27 = arith.constant 0 : index
      %c0_28 = arith.constant 0 : index
      %c0_29 = arith.constant 0 : index
      %c0_30 = arith.constant 0 : index
      %21 = vector.load %arg8[%c0_27, %c0_28, %c0_29, %c0_30] : memref<8x12x8x256xf32, #tpu.memory_space<vmem>>, vector<8x12x8x256xf32>
      tpu.vector_store %arg8[%c0_27, %c0_28, %c0_29, %c0_30], %20 {strides = array<i32>} : memref<8x12x8x256xf32, #tpu.memory_space<vmem>>, vector<8x12x8x256xf32>,
    } else {
    }
    %c0 = arith.constant 0 : index
    %c0_1 = arith.constant 0 : index
    %c0_2 = arith.constant 0 : index
    %c0_3 = arith.constant 0 : index
    %3 = vector.load %arg2[%c0, %c0_1, %c0_2, %c0_3] : memref<8x12x32x128xbf16, #tpu.memory_space<vmem>>, vector<8x12x32x128xbf16>
    %4 = arith.extf %3 : vector<8x12x32x128xbf16> to vector<8x12x32x128xf32>
    %5 = vector.shape_cast %4 : vector<8x12x32x128xf32> to vector<8x12x4x8x128xf32>
    %cst = arith.constant dense<0.000000e+00> : vector<8x12x8x128xf32>
    %6 = vector.multi_reduction <add>, %5, %cst [2] : vector<8x12x4x8x128xf32> to vector<8x12x8x128xf32>
    %c0_4 = arith.constant 0 : index
    %c0_5 = arith.constant 0 : index
    %c0_6 = arith.constant 0 : index
    %c0_7 = arith.constant 0 : index
    %7 = vector.load %arg8[%c0_4, %c0_5, %c0_6, %c0_7] : memref<8x12x8x256xf32, #tpu.memory_space<vmem>>, vector<8x12x8x128xf32>
    %8 = arith.addf %7, %6 : vector<8x12x8x128xf32>
    %c0_8 = arith.constant 0 : index
    %c0_9 = arith.constant 0 : index
    %c0_10 = arith.constant 0 : index
    %c0_11 = arith.constant 0 : index
    %9 = vector.load %arg8[%c0_8, %c0_9, %c0_10, %c0_11] : memref<8x12x8x256xf32, #tpu.memory_space<vmem>>, vector<8x12x8x128xf32>
    tpu.vector_store %arg8[%c0_8, %c0_9, %c0_10, %c0_11], %8 {strides = array<i32>} : memref<8x12x8x256xf32, #tpu.memory_space<vmem>>, vector<8x12x8x128xf32>,
    %c0_12 = arith.constant 0 : index
    %c0_13 = arith.constant 0 : index
    %c0_14 = arith.constant 0 : index
    %c0_15 = arith.constant 0 : index
    %10 = vector.load %arg3[%c0_12, %c0_13, %c0_14, %c0_15] : memref<8x12x64x128xbf16, #tpu.memory_space<vmem>>, vector<8x12x64x128xbf16>
    %11 = arith.extf %10 : vector<8x12x64x128xbf16> to vector<8x12x64x128xf32>
    %12 = vector.shape_cast %11 : vector<8x12x64x128xf32> to vector<8x12x8x8x128xf32>
    %cst_16 = arith.constant dense<0.000000e+00> : vector<8x12x8x128xf32>
    %13 = vector.multi_reduction <add>, %12, %cst_16 [2] : vector<8x12x8x8x128xf32> to vector<8x12x8x128xf32>
    %c0_17 = arith.constant 0 : index
    %c0_18 = arith.constant 0 : index
    %c0_19 = arith.constant 0 : index
    %c128 = arith.constant 128 : index
    %14 = vector.load %arg8[%c0_17, %c0_18, %c0_19, %c128] : memref<8x12x8x256xf32, #tpu.memory_space<vmem>>, vector<8x12x8x128xf32>
    %15 = arith.addf %14, %13 : vector<8x12x8x128xf32>
    %c0_20 = arith.constant 0 : index
    %c0_21 = arith.constant 0 : index
    %c0_22 = arith.constant 0 : index
    %c128_23 = arith.constant 128 : index
    %16 = vector.load %arg8[%c0_20, %c0_21, %c0_22, %c128_23] : memref<8x12x8x256xf32, #tpu.memory_space<vmem>>, vector<8x12x8x128xf32>
    tpu.vector_store %arg8[%c0_20, %c0_21, %c0_22, %c128_23], %15 {strides = array<i32>} : memref<8x12x8x256xf32, #tpu.memory_space<vmem>>, vector<8x12x8x128xf32>,
    %c0_i32_24 = arith.constant 0 : i32
    %17 = arith.cmpi eq, %arg1, %c0_i32_24 : i32
    %18 = arith.extui %17 : i1 to i32
    %c0_i32_25 = arith.constant 0 : i32
    %19 = arith.cmpi ne, %18, %c0_i32_25 : i32
    scf.if %19 {
      %c0_26 = arith.constant 0 : index
      %c0_27 = arith.constant 0 : index
      %c0_28 = arith.constant 0 : index
      %20 = vector.load %arg4[%c0_26, %c0_27, %c0_28] : memref<8x12x256xf32, #tpu.memory_space<vmem>>, vector<8x12x256xf32>
      %cst_29 = arith.constant dense<0xFF800000> : vector<8x256xf32>
      %21 = vector.multi_reduction <maximumf>, %20, %cst_29 [1] : vector<8x12x256xf32> to vector<8x256xf32>
      %22 = vector.shape_cast %21 : vector<8x256xf32> to vector<8x1x256xf32>
      %23 = vector.broadcast %22 : vector<8x1x256xf32> to vector<8x12x256xf32>
      %24 = arith.subf %20, %23 : vector<8x12x256xf32>
      %25 = math.exp %24 : vector<8x12x256xf32>
      %cst_30 = arith.constant dense<0.000000e+00> : vector<8x256xf32>
      %26 = vector.multi_reduction <add>, %25, %cst_30 [1] : vector<8x12x256xf32> to vector<8x256xf32>
      %27 = vector.shape_cast %26 : vector<8x256xf32> to vector<8x1x256xf32>
      %28 = vector.broadcast %27 : vector<8x1x256xf32> to vector<8x12x256xf32>
      %29 = arith.divf %25, %28 : vector<8x12x256xf32>
      %c0_31 = arith.constant 0 : index
      %c0_32 = arith.constant 0 : index
      %c0_33 = arith.constant 0 : index
      %c0_34 = arith.constant 0 : index
      %30 = vector.load %arg8[%c0_31, %c0_32, %c0_33, %c0_34] : memref<8x12x8x256xf32, #tpu.memory_space<vmem>>, vector<8x12x8x256xf32>
      %31 = vector.shape_cast %29 : vector<8x12x256xf32> to vector<8x12x1x256xf32>
      %32 = vector.broadcast %31 : vector<8x12x1x256xf32> to vector<8x12x8x256xf32>
      %33 = arith.mulf %30, %32 : vector<8x12x8x256xf32>
      %cst_35 = arith.constant dense<0.000000e+00> : vector<8x8x256xf32>
      %34 = vector.multi_reduction <add>, %33, %cst_35 [1] : vector<8x12x8x256xf32> to vector<8x8x256xf32>
      %cst_36 = arith.constant dense<0.000000e+00> : vector<8x256xf32>
      %35 = vector.multi_reduction <add>, %34, %cst_36 [1] : vector<8x8x256xf32> to vector<8x256xf32>
      %c0_37 = arith.constant 0 : index
      %c0_38 = arith.constant 0 : index
      %36 = vector.load %arg5[%c0_37, %c0_38] : memref<256x1xf32, #tpu.memory_space<vmem>>, vector<256x1xf32>
      %cst_39 = arith.constant dense<0.000000e+00> : vector<8x1xf32>
      %37 = tpu.matmul %35, %36, %cst_39 {dimension_numbers = #tpu.dot_dimension_numbers<[1], [0], [0], [1], [0, 0, 1, 1], [], []>} : vector<8x256xf32>, vector<256x1xf32>, vector<8x1xf32> -> vector<8x1xf32>
      %c0_40 = arith.constant 0 : index
      %c0_41 = arith.constant 0 : index
      %38 = vector.load %arg6[%c0_40, %c0_41] : memref<1x1xf32, #tpu.memory_space<vmem>>, vector<1x1xf32>
      %39 = vector.broadcast %38 : vector<1x1xf32> to vector<8x1xf32>
      %40 = arith.addf %37, %39 : vector<8x1xf32>
      %c0_42 = arith.constant 0 : index
      %c0_43 = arith.constant 0 : index
      %41 = vector.load %arg7[%c0_42, %c0_43] : memref<8x1xf32, #tpu.memory_space<vmem>>, vector<8x1xf32>
      tpu.vector_store %arg7[%c0_42, %c0_43], %40 {strides = array<i32>} : memref<8x1xf32, #tpu.memory_space<vmem>>, vector<8x1xf32>,
    } else {
    }
    return
  }
  func.func @transform_0(%arg0: i32, %arg1: i32) -> (i32, i32, i32, i32) {
    %c0_i32 = arith.constant 0 : i32
    %c0_i32_0 = arith.constant 0 : i32
    %c0_i32_1 = arith.constant 0 : i32
    return %arg0, %c0_i32, %arg1, %c0_i32_0 : i32, i32, i32, i32
  }
  func.func @transform_1(%arg0: i32, %arg1: i32) -> (i32, i32, i32, i32) {
    %c0_i32 = arith.constant 0 : i32
    %c0_i32_0 = arith.constant 0 : i32
    %c0_i32_1 = arith.constant 0 : i32
    return %arg0, %c0_i32, %arg1, %c0_i32_0 : i32, i32, i32, i32
  }
  func.func @transform_2(%arg0: i32, %arg1: i32) -> (i32, i32, i32) {
    %c0_i32 = arith.constant 0 : i32
    %c0_i32_0 = arith.constant 0 : i32
    %c0_i32_1 = arith.constant 0 : i32
    return %arg0, %c0_i32, %c0_i32_0 : i32, i32, i32
  }
  func.func @transform_3(%arg0: i32, %arg1: i32) -> (i32, i32) {
    %c0_i32 = arith.constant 0 : i32
    %c0_i32_0 = arith.constant 0 : i32
    %c0_i32_1 = arith.constant 0 : i32
    return %c0_i32, %c0_i32_0 : i32, i32
  }
  func.func @transform_4(%arg0: i32, %arg1: i32) -> (i32, i32) {
    %c0_i32 = arith.constant 0 : i32
    %c0_i32_0 = arith.constant 0 : i32
    %c0_i32_1 = arith.constant 0 : i32
    return %c0_i32, %c0_i32_0 : i32, i32
  }
  func.func @transform_5(%arg0: i32, %arg1: i32) -> (i32, i32) {
    %c0_i32 = arith.constant 0 : i32
    %c0_i32_0 = arith.constant 0 : i32
    return %arg0, %c0_i32 : i32, i32
  }
}

</mosaic_0001>

<bundles_post_ra>
// kernel: tpu_custom_call.1
= control target key start
LH: loop header
LB: loop body
LE: loop exit
PB: predicated region body
PF: predicated region fallthrough
CT: control target
= control target key end

     0   :  { %s19039_s0 = inlined_call_operand.hbm [shape: bf16[16,12,32,128], index: 0, kind: input, shape index: {}]   ;;  %s19040_s1 = inlined_call_operand.hbm [shape: bf16[16,12,64,128], index: 1, kind: input, shape index: {}]   ;;  %s19041_s2 = inlined_call_operand.vmem [shape: f32[16,12,256], index: 2, kind: input, shape index: {}]   ;;  %s19042_s3 = inlined_call_operand.vmem [shape: f32[256,1], index: 3, kind: input, shape index: {}]   ;;  %s19043_s4 = inlined_call_operand.<no memory space> [shape: f32[1,1], index: 4, kind: input, shape index: {}]   ;;  %s19044_s5 = inlined_call_operand.vmem [shape: f32[16,1], index: 5, kind: output, shape index: {}]  }
   0x1   :  { %v10_v0 = vstv %s19043_s4 }
   0x2   :  { %11 = vst [vmem:[#allocation3] sm:$0x1] %v10_v0 }
   0x3   :  { %12 = vsyncpa [#allocation5], 0 }
   0x4   :  { %14 = vsyncpa [#allocation5 + $0x1], 0 }
   0x5   :  { %15 = vsyncpa [#allocation7], 0 }
   0x6   :  { %17 = vsyncpa [#allocation7 + $0x1], 0  ;;  %s10603_s20 = smov 0   ;;  %s10605_s21 = smov 0  }
   0x7   :  { %s10607_s22 = smov 0   ;;  %s10609_s23 = smov 0  }
   0x8   :  { %s10611_s24 = smov 0   ;;  %s10613_s25 = smov 0  }
   0x9 LB: > { %s7320_s4 = sadd.s32 4294967295, %s10563_s25   ;;  %s35_s26 = sadd.s32 1, %s10559_s24  ;;  %s10563_s25 = sphi %s10613_s25, %s23_s25   ;;  %s10559_s24 = sphi %s10611_s24, %s23325_s24   ;;  %s10555_s23 = sphi %s10609_s23, %s23324_s23   ;;  %s10551_s22 = sphi %s10607_s22, %s23323_s22   ;;  %s10547_s21 = sphi %s10605_s21, %s23322_s21   ;;  %s10543_s20 = sphi %s10603_s20, %s23321_s20  }
   0xa   : > { %p37_p0 = scmp.ge.s32.totalorder %s35_s26, 2  ;;  %s44_s27 = sadd.s32 1, %s10551_s22 }
   0xb   : > { %p51_p1 = scmp.ne.s32.totalorder %s10551_s22, %s10547_s21  ;;  %p52_p2 = scmp.eq.s32.totalorder %s10563_s25, 0 }
   0xc   : > { %s23327_s26 = smov (%p37_p0, %s35_s26), 0  ;;  %p57_p4 = scmp.ne.s32.totalorder %s10547_s21, %s10543_s20 }
   0xd   : > { %p53_p3 = por %p52_p2, %p51_p1  ;;  %s39_s28 = ssub.s32 %s10559_s24, %s23327_s26 }
   0xe   : > { %p58_p5 = scmp.eq.s32.totalorder %s7320_s4, 0  ;;  %p42_p6 = scmp.eq.s32.totalorder %s39_s28, 0 }
   0xf   : > { %p10301_p8 = scmp.lt.s32.totalorder %s10563_s25, 2  ;;  %s10651_s6 = sand.u32 1, %s10551_s22  }
  0x10   : > { %p10642_p7 = por %p58_p5, %p57_p4  ;;  %s10285_s7 = smul.u32 24576, %s10559_s24 }
  0x11   : > { %s10648_s30 = scalar_select %p42_p6, %s10551_s22, %s44_s27  }
  0x12   : > { %s20155_s29 = scalar_select %p10642_p7, 1, 0 }
  0x13   : > { %s10284_s8 = smul.u32 1536, %s10651_s6  ;;  %s10658_s11 = scalar_lea.hbm %s19039_s0, %s10285_s7 }
  0x14   : > { %p10660_p9 = pnand %p10301_p8, %p53_p3  ;;  %s210_s15 = scalar_lea.sflag [#allocation5], %s10651_s6 }
  0x15   : > { %s213_s13 = scalar_lea.vmem [#allocation4], %s10284_s8  ;;  %s10449_s16 = scalar_lea.hbm %s10658_s11, 24576 }
  0x16   : > { %s223_s14 = sshll.u32 %s213_s13, 4  ;;  %p10450_p10 = scmp.ne.s32.totalorder %s10658_s11, %s10449_s16  ;;  %s10664_s14 = int_to_ptr.vmem [resolvable:$true] %s223_s14 }
  0x17   : > { %p10451_p11 = pneg %p10660_p9  ;;  %s10454_s19 = scalar_lea.hbm %s19039_s0, 49152 }
  0x18   : > { %p10455_p0 = scmp.lt.u32.totalorder %s10658_s11, %s19039_s0  ;;  %p10456_p1 = scmp.lt.u32.totalorder %s10454_s19, %s10449_s16 }
  0x19   : > { %p10452_p12 = pnand %p10451_p11, %p10450_p10  ;;  %p10458_p3 = scmp.lt.u32.totalorder %s10449_s16, %s10658_s11 }
  0x1a   : > { %p10457_p2 = por %p10456_p1, %p10455_p0 }
  0x1b   : > { %p10453_p13 = pneg %p10452_p12 }
  0x1c   : > { %p10459_p4 = por %p10458_p3, %p10457_p2 }
  0x1e   : > { %p10460_p5 = pnand %p10459_p4, %p10453_p13 }
  0x20   : > { %10463 = shalt.err (!%p10460_p5)
}
  0x21   : > { %s10464_s27 = scalar_lea.vmem %s10664_s14, 24576  ;;  %s10565_s28 = smov [#allocation4]  }
  0x22   : > { %p10465_p6 = scmp.ne.s32.totalorder %s10664_s14, %s10464_s27  ;;  %s10469_s7 = sshll.u32 %s10565_s28, 4  ;;  %s10470_s7 = int_to_ptr.vmem [resolvable:$false] %s10469_s7 }
  0x23   : > { %s10471_s8 = scalar_lea.vmem %s10470_s7, 49152  ;;  %p10472_p12 = scmp.lt.s32.totalorder %s10664_s14, %s10470_s7 }
  0x24   : > { %p10467_p8 = pnand %p10465_p6, %p10451_p11  ;;  %p10473_p0 = scmp.lt.s32.totalorder %s10471_s8, %s10464_s27 }
  0x26   : > { %p10468_p10 = pneg %p10467_p8  ;;  %p10474_p1 = por %p10473_p0, %p10472_p12 }
  0x28   : > { %p10475_p2 = pnand %p10474_p1, %p10468_p10 }
  0x2a   : > { %10478 = shalt.err (!%p10475_p2)
}
  0x2b   : > { %s10566_s9 = smov 64   ;;  %s10567_s10 = smov 4  }
  0x2c   : > { %10297 = dma.hbm_to_vmem [thread:$0]  (!%p10660_p9), %s10658_s11, 24576, %s10664_s14, %s210_s15, %s10566_s9, %s10566_s9, %s10567_s10  }
  0x2d   : > { %p7330_p13 = scmp.ge.s32.totalorder %s10563_s25, 1  ;;  %p265_p3 = scmp.lt.s32.totalorder %s10563_s25, 3 }
  0x2e   : > { %s10286_s13 = smul.u32 3072, %s10651_s6  ;;  %s234_s11 = scalar_lea.sflag [#allocation7], %s10651_s6 }
  0x2f   : > { %p10700_p4 = pnand %p7330_p13, %p265_p3  ;;  %s10287_s17 = smul.u32 49152, %s10559_s24 }
  0x30   : > { %s237_s4 = scalar_lea.vmem [#allocation6], %s10286_s13  ;;  %s10484_s7 = scalar_lea.hbm %s19040_s1, 98304 }
  0x31   : > { %s10708_s20 = scalar_lea.hbm %s19040_s1, %s10287_s17  ;;  %s247_s27 = sshll.u32 %s237_s4, 4  ;;  %s10710_s27 = int_to_ptr.vmem [resolvable:$true] %s247_s27 }
  0x32   : > { %s10479_s14 = scalar_lea.hbm %s10708_s20, 49152  ;;  %p10485_p10 = scmp.lt.u32.totalorder %s10708_s20, %s19040_s1 }
  0x33   : > { %p10480_p5 = scmp.ne.s32.totalorder %s10708_s20, %s10479_s14  ;;  %p10486_p12 = scmp.lt.u32.totalorder %s10484_s7, %s10479_s14 }
  0x34   : > { %p10488_p1 = scmp.lt.u32.totalorder %s10479_s14, %s10708_s20 }
  0x35   : > { %p10482_p6 = pnand %p10480_p5, %p10451_p11  ;;  %p10487_p0 = por %p10486_p12, %p10485_p10 }
  0x37   : > { %p10483_p8 = pneg %p10482_p6  ;;  %p10489_p2 = por %p10488_p1, %p10487_p0 }
  0x39   : > { %p10490_p13 = pnand %p10489_p2, %p10483_p8 }
  0x3b   : > { %10493 = shalt.err (!%p10490_p13)
}
  0x3c   : > { %s10494_s13 = scalar_lea.vmem %s10710_s27, 49152  ;;  %s10568_s18 = smov [#allocation6]  }
  0x3d   : > { %p10495_p3 = scmp.ne.s32.totalorder %s10710_s27, %s10494_s13  ;;  %s10499_s19 = sshll.u32 %s10568_s18, 4  ;;  %s10500_s19 = int_to_ptr.vmem [resolvable:$false] %s10499_s19 }
  0x3e   : > { %s10501_s4 = scalar_lea.vmem %s10500_s19, 98304  ;;  %p10502_p7 = scmp.lt.s32.totalorder %s10710_s27, %s10500_s19 }
  0x3f   : > { %p10497_p5 = pnand %p10495_p3, %p10451_p11  ;;  %p10503_p10 = scmp.lt.s32.totalorder %s10501_s4, %s10494_s13 }
  0x41   : > { %p10498_p6 = pneg %p10497_p5  ;;  %p10504_p12 = por %p10503_p10, %p10502_p7 }
  0x43   : > { %p10505_p0 = pnand %p10504_p12, %p10498_p6 }
  0x45   : > { %10508 = shalt.err (!%p10505_p0)
}
  0x46   : > { %10300 = dma.hbm_to_vmem [thread:$0]  (!%p10660_p9), %s10708_s20, 49152, %s10710_s27, %s234_s11, %s10566_s9, %s10566_s9, %s10567_s10  }
  0x47   : > { %269 = sbr.rel (%p10700_p4) target bundleno = 1437 (0x59d), region = 40 }
  0x4e   : > { %s271_s14 = sand.u32 1, %s10547_s21   ;;  %p20158_p7 = scmp.ne.s32.totalorder %s20155_s29, 0 }
  0x4f   : > { %s10288_s15 = smul.u32 1536, %s271_s14  ;;  %s272_s28 = scalar_lea.sflag [#allocation5], %s271_s14 }
  0x51   : > { %s10744_s7 = scalar_lea.vmem [#allocation4], %s10288_s15 }
  0x52   : > { %10534 = dma.done.wait (%p20158_p7), %s272_s28, 24576  }
  0x53   : > { %10536 = vsyncadd (%p20158_p7), %s272_s28, 4294942720  ;;  %s10289_s6 = smul.u32 3072, %s271_s14  ;;  %s281_s12 = scalar_lea.sflag [#allocation7], %s271_s14 }
  0x55   : > { %s10750_s8 = scalar_lea.vmem [#allocation6], %s10289_s6 }
  0x56   : > { %10538 = dma.done.wait (%p20158_p7), %s281_s12, 49152  }
  0x57   : > { %10540 = vsyncadd (%p20158_p7), %s281_s12, 4294918144  ;;  %v10757_v1 = vld [vmem:[%s10744_s7] sm:$0xff]   ;;  %v10760_v2 = vld [vmem:[%s10744_s7 + $0x8] sm:$0xff]   ;;  %s7331_s29 = sshll.u32 %s10555_s23, 3  ;;  %vm4407_vm0 = vcmask 1043456   ;;  %vm7111_vm1 = vcmask 1041409  }
  0x58   : > { %v10763_v3 = vld [vmem:[%s10744_s7 + $0x10] sm:$0xff]   ;;  %v10766_v4 = vld [vmem:[%s10744_s7 + $0x18] sm:$0xff]   ;;  %v10769_v5 = vld [vmem:[%s10744_s7 + $0x20] sm:$0xff]   ;;  %p16009_p9 = scmp.lt.s32.totalorder %s7331_s29, 15  ;;  %vm7113_vm2 = vcmask 1042434   ;;  %vm7115_vm3 = vcmask 1043459  }
  0x59   : > { %v10773_v7 = vld [vmem:[%s10744_s7 + $0x28] sm:$0xff]   ;;  %v10776_v8 = vld [vmem:[%s10744_s7 + $0x30] sm:$0xff]   ;;  %v10783_v13 = vld [vmem:[%s10744_s7 + $0x38] sm:$0xff]   ;;  %vm7117_vm4 = vcmask 1044484   ;;  %vm7119_vm5 = vcmask 1045509   ;;  %vm7121_vm6 = vcmask 1046534  }
  0x5a   : > { %v10786_v14 = vld [vmem:[%s10744_s7 + $0x40] sm:$0xff]   ;;  %v10793_v19 = vld [vmem:[%s10744_s7 + $0x48] sm:$0xff]   ;;  %v10796_v20 = vld [vmem:[%s10744_s7 + $0x50] sm:$0xff]   ;;  %s23329_s29 = smov (!%p16009_p9, %s7331_s29), 15  ;;  %vm7123_vm7 = vcmask 1047559   ;;  %p332_p11 = scmp.lt.s32.totalorder %s10555_s23, 1 }
  0x5b   : > { %v10803_v25 = vld [vmem:[%s10744_s7 + $0x58] sm:$0xff]   ;;  %v10806_v26 = vld [vmem:[%s10744_s7 + $0x60] sm:$0xff]   ;;  %v10813_v31 = vld [vmem:[%s10744_s7 + $0x68] sm:$0xff]   ;;  %s7338_s10 = sshll.u32 %s23329_s29, 5  ;;  %vm7204_vm8 = vcmask 7168  }
  0x5c   : > { %v10816_v32 = vld [vmem:[%s10744_s7 + $0x70] sm:$0xff]   ;;  %v10823_v37 = vld [vmem:[%s10744_s7 + $0x78] sm:$0xff]   ;;  %v10826_v38 = vld [vmem:[%s10744_s7 + $0x80] sm:$0xff]   ;;  %s16111_s27 = scalar_lea.vmem %s19041_s2, %s7338_s10  ;;  %s23331_s23 = smov (!%p332_p11, %s10555_s23), 1 }
  0x5d   : > { %v10833_v43 = vld [vmem:[%s10744_s7 + $0x88] sm:$0xff]   ;;  %v10836_v44 = vld [vmem:[%s10744_s7 + $0x90] sm:$0xff]   ;;  %v10843_v49 = vld [vmem:[%s10744_s7 + $0x98] sm:$0xff]   ;;  %s7334_s15 = sshll.u32 %s23331_s23, 3 }
  0x5e   : > { %v10846_v50 = vld [vmem:[%s10744_s7 + $0xa0] sm:$0xff]   ;;  %v10853_v55 = vld [vmem:[%s10744_s7 + $0xa8] sm:$0xff]   ;;  %v10856_v56 = vld [vmem:[%s10744_s7 + $0xb0] sm:$0xff]   ;;  %s335_s6 = scalar_lea.vmem %s19044_s5, %s7334_s15 }
  0x5f   : > { %v10863_v61 = vld [vmem:[%s10744_s7 + $0xb8] sm:$0xff]   ;;  %v10866_v62 = vld [vmem:[%s10744_s7 + $0xc0] sm:$0xff]   ;;  %v10873_v41 = vld [vmem:[%s10744_s7 + $0xc8] sm:$0xff]  }
  0x60   : > { %v10876_v35 = vld [vmem:[%s10744_s7 + $0xd0] sm:$0xff]   ;;  %v10883_v11 = vld [vmem:[%s10744_s7 + $0xd8] sm:$0xff]   ;;  %v10886_v0 = vld [vmem:[%s10744_s7 + $0xe0] sm:$0xff]  }
  0x61   : > { %v10893_v29 = vld [vmem:[%s10744_s7 + $0xe8] sm:$0xff]   ;;  %v10896_v40 = vld [vmem:[%s10744_s7 + $0xf0] sm:$0xff]   ;;  %v10903_v58 = vld [vmem:[%s10744_s7 + $0xf8] sm:$0xff]  }
  0x62   : > { %v10906_v16 = vld [vmem:[%s10744_s7 + $0x100] sm:$0xff]   ;;  %v10913_v34 = vld [vmem:[%s10744_s7 + $0x108] sm:$0xff]   ;;  %v10916_v53 = vld [vmem:[%s10744_s7 + $0x110] sm:$0xff]  }
  0x63   : > { %v10923_v10 = vld [vmem:[%s10744_s7 + $0x118] sm:$0xff]   ;;  %v10926_v59 = vld [vmem:[%s10744_s7 + $0x120] sm:$0xff]   ;;  %v10933_v22 = vld [vmem:[%s10744_s7 + $0x128] sm:$0xff]  }
  0x64   : > { %20159 = vst [vmem:[#allocation10_spill] sm:$0xff] %v10923_v10  ;;  %20160 = vst [vmem:[#allocation11_spill] sm:$0xff] %v10933_v22  ;;  %v10936_v63 = vld [vmem:[%s10744_s7 + $0x130] sm:$0xff]   ;;  %v10943_v46 = vld [vmem:[%s10744_s7 + $0x138] sm:$0xff]  }
  0x65   : > { %20161 = vst [vmem:[#allocation12_spill] sm:$0xff] %v10943_v46  ;;  %v10946_v57 = vld [vmem:[%s10744_s7 + $0x140] sm:$0xff]   ;;  %v10953_v17 = vld [vmem:[%s10744_s7 + $0x148] sm:$0xff]   ;;  %v10956_v51 = vld [vmem:[%s10744_s7 + $0x150] sm:$0xff]  }
  0x66   : > { %20162 = vst [vmem:[#allocation13_spill] sm:$0xff] %v10953_v17  ;;  %v10963_v28 = vld [vmem:[%s10744_s7 + $0x158] sm:$0xff]   ;;  %v10966_v45 = vld [vmem:[%s10744_s7 + $0x160] sm:$0xff]   ;;  %v10973_v60 = vld [vmem:[%s10744_s7 + $0x168] sm:$0xff]  }
  0x67   : > { %20163 = vst [vmem:[#allocation14_spill] sm:$0xff] %v10963_v28  ;;  %20164 = vst [vmem:[#allocation15_spill] sm:$0xff] %v10973_v60  ;;  %v10976_v39 = vld [vmem:[%s10744_s7 + $0x170] sm:$0xff]   ;;  %v10983_v54 = vld [vmem:[%s10744_s7 + $0x178] sm:$0xff]  }
  0x68   : > { %20165 = vst [vmem:[#allocation16_spill] sm:$0xff] %v10983_v54  ;;  %v10986_v33 = vld [vmem:[%s10744_s7 + $0x180] sm:$0xff]   ;;  %v10993_v48 = vld [vmem:[%s10744_s7 + $0x188] sm:$0xff]   ;;  %v10996_v27 = vld [vmem:[%s10744_s7 + $0x190] sm:$0xff]  }
  0x69   : > { %20166 = vst [vmem:[#allocation17_spill] sm:$0xff] %v10993_v48  ;;  %v11003_v42 = vld [vmem:[%s10744_s7 + $0x198] sm:$0xff]   ;;  %v11006_v21 = vld [vmem:[%s10744_s7 + $0x1a0] sm:$0xff]   ;;  %v11013_v36 = vld [vmem:[%s10744_s7 + $0x1a8] sm:$0xff]  }
  0x6a   : > { %20167 = vst [vmem:[#allocation18_spill] sm:$0xff] %v11003_v42  ;;  %20168 = vst [vmem:[#allocation19_spill] sm:$0xff] %v11013_v36  ;;  %v11016_v15 = vld [vmem:[%s10744_s7 + $0x1b0] sm:$0xff]   ;;  %v11023_v30 = vld [vmem:[%s10744_s7 + $0x1b8] sm:$0xff]  }
  0x6b   : > { %20169 = vst [vmem:[#allocation20_spill] sm:$0xff] %v11023_v30  ;;  %v11026_v9 = vld [vmem:[%s10744_s7 + $0x1c0] sm:$0xff]   ;;  %v11033_v24 = vld [vmem:[%s10744_s7 + $0x1c8] sm:$0xff]   ;;  %v11036_v54 = vld [vmem:[%s10744_s7 + $0x1d0] sm:$0xff]  }
  0x6c   : > { %20170 = vst [vmem:[#allocation21_spill] sm:$0xff] %v11033_v24  ;;  %20171 = vst [vmem:[#allocation22_spill] sm:$0xff] %v11036_v54  ;;  %v11043_v18 = vld [vmem:[%s10744_s7 + $0x1d8] sm:$0xff]   ;;  %v11046_v60 = vld [vmem:[%s10744_s7 + $0x1e0] sm:$0xff]  }
  0x6d   : > { %20172 = vst [vmem:[#allocation23_spill] sm:$0xff] %v11043_v18  ;;  %20173 = vst [vmem:[#allocation24_spill] sm:$0xff] %v11046_v60  ;;  %v11053_v12 = vld [vmem:[%s10744_s7 + $0x1e8] sm:$0xff]   ;;  %v11056_v28 = vld [vmem:[%s10744_s7 + $0x1f0] sm:$0xff]   ;;  %v20303_v60 = vunpack.c.h.bf16 %v10757_v1 }
  0x6e   : > { %20174 = vst [vmem:[#allocation25_spill] sm:$0xff] %v11053_v12  ;;  %20175 = vst [vmem:[#allocation26_spill] sm:$0xff] %v11056_v28  ;;  %v11063_v6 = vld [vmem:[%s10744_s7 + $0x1f8] sm:$0xff]   ;;  %v11066_v17 = vld [vmem:[%s10744_s7 + $0x200] sm:$0xff]  }
  0x6f   : > { %20176 = vst [vmem:[#allocation27_spill] sm:$0xff] %v11063_v6  ;;  %20177 = vst [vmem:[#allocation28_spill] sm:$0xff] %v11066_v17  ;;  %v11073_v48 = vld [vmem:[%s10744_s7 + $0x208] sm:$0xff]   ;;  %v11076_v46 = vld [vmem:[%s10744_s7 + $0x210] sm:$0xff]  }
  0x70   : > { %20178 = vst [vmem:[#allocation29_spill] sm:$0xff] %v11073_v48  ;;  %20179 = vst [vmem:[#allocation30_spill] sm:$0xff] %v11076_v46  ;;  %v11083_v42 = vld [vmem:[%s10744_s7 + $0x218] sm:$0xff]   ;;  %v11086_v22 = vld [vmem:[%s10744_s7 + $0x220] sm:$0xff]  }
  0x71   : > { %20180 = vst [vmem:[#allocation31_spill] sm:$0xff] %v11083_v42  ;;  %20181 = vst [vmem:[#allocation32_spill] sm:$0xff] %v11086_v22  ;;  %v11093_v36 = vld [vmem:[%s10744_s7 + $0x228] sm:$0xff]   ;;  %v11096_v10 = vld [vmem:[%s10744_s7 + $0x230] sm:$0xff]  }
  0x72   : > { %20182 = vst [vmem:[#allocation33_spill] sm:$0xff] %v11093_v36  ;;  %20183 = vst [vmem:[#allocation34_spill] sm:$0xff] %v11096_v10  ;;  %v11103_v30 = vld [vmem:[%s10744_s7 + $0x238] sm:$0xff]   ;;  %v11106_v28 = vld [vmem:[%s10744_s7 + $0x240] sm:$0xff]  }
  0x73   : > { %20184 = vst [vmem:[#allocation35_spill] sm:$0xff] %v11103_v30  ;;  %20185 = vst [vmem:[#allocation36_spill] sm:$0xff] %v11106_v28  ;;  %v11113_v24 = vld [vmem:[%s10744_s7 + $0x248] sm:$0xff]   ;;  %v11116_v6 = vld [vmem:[%s10744_s7 + $0x250] sm:$0xff]  }
  0x74   : > { %20186 = vst [vmem:[#allocation37_spill] sm:$0xff] %v11113_v24  ;;  %20187 = vst [vmem:[#allocation38_spill] sm:$0xff] %v11116_v6  ;;  %v11123_v23 = vld [vmem:[%s10744_s7 + $0x258] sm:$0xff]   ;;  %v11126_v46 = vld [vmem:[%s10744_s7 + $0x260] sm:$0xff]  }
  0x75   : > { %20188 = vst [vmem:[#allocation39_spill] sm:$0xff] %v11123_v23  ;;  %20189 = vst [vmem:[#allocation40_spill] sm:$0xff] %v11126_v46  ;;  %v11133_v12 = vld [vmem:[%s10744_s7 + $0x268] sm:$0xff]   ;;  %v11136_v22 = vld [vmem:[%s10744_s7 + $0x270] sm:$0xff]  }
  0x76   : > { %20190 = vst [vmem:[#allocation41_spill] sm:$0xff] %v11133_v12  ;;  %20191 = vst [vmem:[#allocation42_spill] sm:$0xff] %v11136_v22  ;;  %v11143_v17 = vld [vmem:[%s10744_s7 + $0x278] sm:$0xff]   ;;  %v11146_v10 = vld [vmem:[%s10744_s7 + $0x280] sm:$0xff]  }
  0x77   : > { %20192 = vst [vmem:[#allocation43_spill] sm:$0xff] %v11143_v17  ;;  %20193 = vst [vmem:[#allocation44_spill] sm:$0xff] %v11146_v10  ;;  %v11153_v48 = vld [vmem:[%s10744_s7 + $0x288] sm:$0xff]   ;;  %v11156_v28 = vld [vmem:[%s10744_s7 + $0x290] sm:$0xff]  }
  0x78   : > { %20194 = vst [vmem:[#allocation45_spill] sm:$0xff] %v11153_v48  ;;  %20195 = vst [vmem:[#allocation46_spill] sm:$0xff] %v11156_v28  ;;  %v11163_v42 = vld [vmem:[%s10744_s7 + $0x298] sm:$0xff]   ;;  %v11166_v6 = vld [vmem:[%s10744_s7 + $0x2a0] sm:$0xff]  }
  0x79   : > { %20196 = vst [vmem:[#allocation47_spill] sm:$0xff] %v11163_v42  ;;  %20197 = vst [vmem:[#allocation48_spill] sm:$0xff] %v11166_v6  ;;  %v11173_v36 = vld [vmem:[%s10744_s7 + $0x2a8] sm:$0xff]   ;;  %v11176_v46 = vld [vmem:[%s10744_s7 + $0x2b0] sm:$0xff]  }
  0x7a   : > { %20198 = vst [vmem:[#allocation49_spill] sm:$0xff] %v11173_v36  ;;  %20199 = vst [vmem:[#allocation50_spill] sm:$0xff] %v11176_v46  ;;  %v11183_v30 = vld [vmem:[%s10744_s7 + $0x2b8] sm:$0xff]   ;;  %v11186_v22 = vld [vmem:[%s10744_s7 + $0x2c0] sm:$0xff]  }
  0x7b   : > { %20200 = vst [vmem:[#allocation51_spill] sm:$0xff] %v11183_v30  ;;  %20201 = vst [vmem:[#allocation52_spill] sm:$0xff] %v11186_v22  ;;  %v11193_v24 = vld [vmem:[%s10744_s7 + $0x2c8] sm:$0xff]   ;;  %v11196_v10 = vld [vmem:[%s10744_s7 + $0x2d0] sm:$0xff]  }
  0x7c   : > { %20202 = vst [vmem:[#allocation53_spill] sm:$0xff] %v11193_v24  ;;  %20203 = vst [vmem:[#allocation54_spill] sm:$0xff] %v11196_v10  ;;  %v11203_v23 = vld [vmem:[%s10744_s7 + $0x2d8] sm:$0xff]   ;;  %v11206_v28 = vld [vmem:[%s10744_s7 + $0x2e0] sm:$0xff]  }
  0x7d   : > { %20204 = vst [vmem:[#allocation55_spill] sm:$0xff] %v11203_v23  ;;  %20205 = vst [vmem:[#allocation56_spill] sm:$0xff] %v11206_v28  ;;  %v11213_v12 = vld [vmem:[%s10744_s7 + $0x2e8] sm:$0xff]   ;;  %v11216_v6 = vld [vmem:[%s10744_s7 + $0x2f0] sm:$0xff]   ;;  %v20304_v23 = vunpack.c.l.bf16 %v10763_v3 }
  0x7e   : > { %20206 = vst [vmem:[#allocation57_spill] sm:$0xff] %v11213_v12  ;;  %20207 = vst [vmem:[#allocation58_spill] sm:$0xff] %v11216_v6  ;;  %v11223_v17 = vld [vmem:[%s10744_s7 + $0x2f8] sm:$0xff]   ;;  %v11226_v46 = vld [vmem:[%s10744_s7 + $0x300] sm:$0xff]  }
  0x7f   : > { %20208 = vst [vmem:[#allocation59_spill] sm:$0xff] %v11223_v17  ;;  %20209 = vst [vmem:[#allocation60_spill] sm:$0xff] %v11226_v46  ;;  %v11233_v48 = vld [vmem:[%s10744_s7 + $0x308] sm:$0xff]   ;;  %v11236_v22 = vld [vmem:[%s10744_s7 + $0x310] sm:$0xff]  }
  0x80   : > { %20210 = vst [vmem:[#allocation61_spill] sm:$0xff] %v11233_v48  ;;  %20211 = vst [vmem:[#allocation62_spill] sm:$0xff] %v11236_v22  ;;  %v11243_v42 = vld [vmem:[%s10744_s7 + $0x318] sm:$0xff]   ;;  %v11246_v10 = vld [vmem:[%s10744_s7 + $0x320] sm:$0xff]  }
  0x81   : > { %20212 = vst [vmem:[#allocation63_spill] sm:$0xff] %v11243_v42  ;;  %20213 = vst [vmem:[#allocation64_spill] sm:$0xff] %v11246_v10  ;;  %v11253_v36 = vld [vmem:[%s10744_s7 + $0x328] sm:$0xff]   ;;  %v11256_v28 = vld [vmem:[%s10744_s7 + $0x330] sm:$0xff]  }
  0x82   : > { %20214 = vst [vmem:[#allocation65_spill] sm:$0xff] %v11253_v36  ;;  %20215 = vst [vmem:[#allocation66_spill] sm:$0xff] %v11256_v28  ;;  %v11263_v30 = vld [vmem:[%s10744_s7 + $0x338] sm:$0xff]   ;;  %v11266_v6 = vld [vmem:[%s10744_s7 + $0x340] sm:$0xff]  }
  0x83   : > { %20216 = vst [vmem:[#allocation67_spill] sm:$0xff] %v11263_v30  ;;  %20217 = vst [vmem:[#allocation68_spill] sm:$0xff] %v11266_v6  ;;  %v11273_v24 = vld [vmem:[%s10744_s7 + $0x348] sm:$0xff]   ;;  %v11276_v17 = vld [vmem:[%s10744_s7 + $0x350] sm:$0xff]  }
  0x84   : > { %20218 = vst [vmem:[#allocation69_spill] sm:$0xff] %v11273_v24  ;;  %20219 = vst [vmem:[#allocation70_spill] sm:$0xff] %v11276_v17  ;;  %v11283_v52 = vld [vmem:[%s10744_s7 + $0x358] sm:$0xff]   ;;  %v11286_v22 = vld [vmem:[%s10744_s7 + $0x360] sm:$0xff]  }
  0x85   : > { %20220 = vst [vmem:[#allocation71_spill] sm:$0xff] %v11283_v52  ;;  %20221 = vst [vmem:[#allocation72_spill] sm:$0xff] %v11286_v22  ;;  %v11293_v12 = vld [vmem:[%s10744_s7 + $0x368] sm:$0xff]   ;;  %v11296_v10 = vld [vmem:[%s10744_s7 + $0x370] sm:$0xff]  }
  0x86   : > { %20222 = vst [vmem:[#allocation73_spill] sm:$0xff] %v11293_v12  ;;  %20223 = vst [vmem:[#allocation74_spill] sm:$0xff] %v11296_v10  ;;  %v11303_v46 = vld [vmem:[%s10744_s7 + $0x378] sm:$0xff]   ;;  %v11306_v28 = vld [vmem:[%s10744_s7 + $0x380] sm:$0xff]  }
  0x87   : > { %20224 = vst [vmem:[#allocation75_spill] sm:$0xff] %v11303_v46  ;;  %20225 = vst [vmem:[#allocation76_spill] sm:$0xff] %v11306_v28  ;;  %v11313_v48 = vld [vmem:[%s10744_s7 + $0x388] sm:$0xff]   ;;  %v11316_v6 = vld [vmem:[%s10744_s7 + $0x390] sm:$0xff]  }
  0x88   : > { %20226 = vst [vmem:[#allocation77_spill] sm:$0xff] %v11313_v48  ;;  %20227 = vst [vmem:[#allocation78_spill] sm:$0xff] %v11316_v6  ;;  %v11323_v42 = vld [vmem:[%s10744_s7 + $0x398] sm:$0xff]   ;;  %v11326_v17 = vld [vmem:[%s10744_s7 + $0x3a0] sm:$0xff]  }
  0x89   : > { %20228 = vst [vmem:[#allocation79_spill] sm:$0xff] %v11323_v42  ;;  %20229 = vst [vmem:[#allocation80_spill] sm:$0xff] %v11326_v17  ;;  %v11333_v36 = vld [vmem:[%s10744_s7 + $0x3a8] sm:$0xff]   ;;  %v11336_v22 = vld [vmem:[%s10744_s7 + $0x3b0] sm:$0xff]  }
  0x8a   : > { %20230 = vst [vmem:[#allocation81_spill] sm:$0xff] %v11333_v36  ;;  %20231 = vst [vmem:[#allocation82_spill] sm:$0xff] %v11336_v22  ;;  %v11343_v30 = vld [vmem:[%s10744_s7 + $0x3b8] sm:$0xff]   ;;  %v11346_v10 = vld [vmem:[%s10744_s7 + $0x3c0] sm:$0xff]  }
  0x8b   : > { %20232 = vst [vmem:[#allocation83_spill] sm:$0xff] %v11343_v30  ;;  %20233 = vst [vmem:[#allocation84_spill] sm:$0xff] %v11346_v10  ;;  %v11353_v24 = vld [vmem:[%s10744_s7 + $0x3c8] sm:$0xff]   ;;  %v11356_v28 = vld [vmem:[%s10744_s7 + $0x3d0] sm:$0xff]  }
  0x8c   : > { %20234 = vst [vmem:[#allocation85_spill] sm:$0xff] %v11353_v24  ;;  %20235 = vst [vmem:[#allocation86_spill] sm:$0xff] %v11356_v28  ;;  %v11363_v52 = vld [vmem:[%s10744_s7 + $0x3d8] sm:$0xff]   ;;  %v11366_v6 = vld [vmem:[%s10744_s7 + $0x3e0] sm:$0xff]  }
  0x8d   : > { %20236 = vst [vmem:[#allocation87_spill] sm:$0xff] %v11363_v52  ;;  %20237 = vst [vmem:[#allocation88_spill] sm:$0xff] %v11366_v6  ;;  %v11373_v12 = vld [vmem:[%s10744_s7 + $0x3e8] sm:$0xff]   ;;  %v11376_v17 = vld [vmem:[%s10744_s7 + $0x3f0] sm:$0xff]   ;;  %v20307_v52 = vunpack.c.h.bf16 %v10769_v5 }
  0x8e   : > { %20238 = vst [vmem:[#allocation89_spill] sm:$0xff] %v11373_v12  ;;  %20239 = vst [vmem:[#allocation90_spill] sm:$0xff] %v11376_v17  ;;  %v11383_v46 = vld [vmem:[%s10744_s7 + $0x3f8] sm:$0xff]   ;;  %v11386_v22 = vld [vmem:[%s10744_s7 + $0x400] sm:$0xff]  }
  0x8f   : > { %20240 = vst [vmem:[#allocation91_spill] sm:$0xff] %v11383_v46  ;;  %20241 = vst [vmem:[#allocation92_spill] sm:$0xff] %v11386_v22  ;;  %v11393_v48 = vld [vmem:[%s10744_s7 + $0x408] sm:$0xff]   ;;  %v11396_v10 = vld [vmem:[%s10744_s7 + $0x410] sm:$0xff]  }
  0x90   : > { %20242 = vst [vmem:[#allocation93_spill] sm:$0xff] %v11393_v48  ;;  %20243 = vst [vmem:[#allocation94_spill] sm:$0xff] %v11396_v10  ;;  %v11403_v42 = vld [vmem:[%s10744_s7 + $0x418] sm:$0xff]   ;;  %v11406_v28 = vld [vmem:[%s10744_s7 + $0x420] sm:$0xff]  }
  0x91   : > { %20244 = vst [vmem:[#allocation95_spill] sm:$0xff] %v11403_v42  ;;  %20245 = vst [vmem:[#allocation96_spill] sm:$0xff] %v11406_v28  ;;  %v11413_v36 = vld [vmem:[%s10744_s7 + $0x428] sm:$0xff]   ;;  %v11416_v6 = vld [vmem:[%s10744_s7 + $0x430] sm:$0xff]  }
  0x92   : > { %20246 = vst [vmem:[#allocation97_spill] sm:$0xff] %v11413_v36  ;;  %20247 = vst [vmem:[#allocation98_spill] sm:$0xff] %v11416_v6  ;;  %v11423_v30 = vld [vmem:[%s10744_s7 + $0x438] sm:$0xff]   ;;  %v11426_v17 = vld [vmem:[%s10744_s7 + $0x440] sm:$0xff]  }
  0x93   : > { %20248 = vst [vmem:[#allocation99_spill] sm:$0xff] %v11423_v30  ;;  %20249 = vst [vmem:[#allocation100_spill] sm:$0xff] %v11426_v17  ;;  %v11433_v24 = vld [vmem:[%s10744_s7 + $0x448] sm:$0xff]   ;;  %v11436_v46 = vld [vmem:[%s10744_s7 + $0x450] sm:$0xff]  }
  0x94   : > { %20250 = vst [vmem:[#allocation101_spill] sm:$0xff] %v11433_v24  ;;  %20251 = vst [vmem:[#allocation102_spill] sm:$0xff] %v11436_v46  ;;  %v11443_v47 = vld [vmem:[%s10744_s7 + $0x458] sm:$0xff]   ;;  %v11446_v10 = vld [vmem:[%s10744_s7 + $0x460] sm:$0xff]  }
  0x95   : > { %20252 = vst [vmem:[#allocation103_spill] sm:$0xff] %v11443_v47  ;;  %20253 = vst [vmem:[#allocation104_spill] sm:$0xff] %v11446_v10  ;;  %v11453_v12 = vld [vmem:[%s10744_s7 + $0x468] sm:$0xff]   ;;  %v11456_v28 = vld [vmem:[%s10744_s7 + $0x470] sm:$0xff]  }
  0x96   : > { %20254 = vst [vmem:[#allocation105_spill] sm:$0xff] %v11453_v12  ;;  %20255 = vst [vmem:[#allocation106_spill] sm:$0xff] %v11456_v28  ;;  %v11463_v22 = vld [vmem:[%s10744_s7 + $0x478] sm:$0xff]   ;;  %v11466_v6 = vld [vmem:[%s10744_s7 + $0x480] sm:$0xff]  }
  0x97   : > { %20256 = vst [vmem:[#allocation107_spill] sm:$0xff] %v11463_v22  ;;  %20257 = vst [vmem:[#allocation108_spill] sm:$0xff] %v11466_v6  ;;  %v11473_v48 = vld [vmem:[%s10744_s7 + $0x488] sm:$0xff]   ;;  %v11476_v17 = vld [vmem:[%s10744_s7 + $0x490] sm:$0xff]  }
  0x98   : > { %20258 = vst [vmem:[#allocation109_spill] sm:$0xff] %v11473_v48  ;;  %20259 = vst [vmem:[#allocation110_spill] sm:$0xff] %v11476_v17  ;;  %v11483_v42 = vld [vmem:[%s10744_s7 + $0x498] sm:$0xff]   ;;  %v11486_v46 = vld [vmem:[%s10744_s7 + $0x4a0] sm:$0xff]  }
  0x99   : > { %20260 = vst [vmem:[#allocation111_spill] sm:$0xff] %v11483_v42  ;;  %20261 = vst [vmem:[#allocation112_spill] sm:$0xff] %v11486_v46  ;;  %v11493_v36 = vld [vmem:[%s10744_s7 + $0x4a8] sm:$0xff]   ;;  %v11496_v10 = vld [vmem:[%s10744_s7 + $0x4b0] sm:$0xff]  }
  0x9a   : > { %20262 = vst [vmem:[#allocation113_spill] sm:$0xff] %v11493_v36  ;;  %20263 = vst [vmem:[#allocation114_spill] sm:$0xff] %v11496_v10  ;;  %v11503_v30 = vld [vmem:[%s10744_s7 + $0x4b8] sm:$0xff]   ;;  %v11506_v28 = vld [vmem:[%s10744_s7 + $0x4c0] sm:$0xff]  }
  0x9b   : > { %20264 = vst [vmem:[#allocation115_spill] sm:$0xff] %v11503_v30  ;;  %20265 = vst [vmem:[#allocation116_spill] sm:$0xff] %v11506_v28  ;;  %v11513_v24 = vld [vmem:[%s10744_s7 + $0x4c8] sm:$0xff]   ;;  %v11516_v6 = vld [vmem:[%s10744_s7 + $0x4d0] sm:$0xff]  }
  0x9c   : > { %20266 = vst [vmem:[#allocation117_spill] sm:$0xff] %v11513_v24  ;;  %20267 = vst [vmem:[#allocation118_spill] sm:$0xff] %v11516_v6  ;;  %v11523_v47 = vld [vmem:[%s10744_s7 + $0x4d8] sm:$0xff]   ;;  %v11526_v17 = vld [vmem:[%s10744_s7 + $0x4e0] sm:$0xff]  }
  0x9d   : > { %20268 = vst [vmem:[#allocation119_spill] sm:$0xff] %v11523_v47  ;;  %20269 = vst [vmem:[#allocation120_spill] sm:$0xff] %v11526_v17  ;;  %v11533_v12 = vld [vmem:[%s10744_s7 + $0x4e8] sm:$0xff]   ;;  %v11536_v46 = vld [vmem:[%s10744_s7 + $0x4f0] sm:$0xff]  }
  0x9e   : > { %20270 = vst [vmem:[#allocation121_spill] sm:$0xff] %v11533_v12  ;;  %20271 = vst [vmem:[#allocation122_spill] sm:$0xff] %v11536_v46  ;;  %v11543_v22 = vld [vmem:[%s10744_s7 + $0x4f8] sm:$0xff]   ;;  %v11546_v10 = vld [vmem:[%s10744_s7 + $0x500] sm:$0xff]  }
  0x9f   : > { %20272 = vst [vmem:[#allocation123_spill] sm:$0xff] %v11543_v22  ;;  %20273 = vst [vmem:[#allocation124_spill] sm:$0xff] %v11546_v10  ;;  %v11553_v48 = vld [vmem:[%s10744_s7 + $0x508] sm:$0xff]   ;;  %v11556_v28 = vld [vmem:[%s10744_s7 + $0x510] sm:$0xff]  }
  0xa0   : > { %20274 = vst [vmem:[#allocation125_spill] sm:$0xff] %v11553_v48  ;;  %20275 = vst [vmem:[#allocation126_spill] sm:$0xff] %v11556_v28  ;;  %v11563_v42 = vld [vmem:[%s10744_s7 + $0x518] sm:$0xff]   ;;  %v11566_v6 = vld [vmem:[%s10744_s7 + $0x520] sm:$0xff]  }
  0xa1   : > { %20276 = vst [vmem:[#allocation127_spill] sm:$0xff] %v11563_v42  ;;  %20277 = vst [vmem:[#allocation128_spill] sm:$0xff] %v11566_v6  ;;  %v11573_v36 = vld [vmem:[%s10744_s7 + $0x528] sm:$0xff]   ;;  %v11576_v17 = vld [vmem:[%s10744_s7 + $0x530] sm:$0xff]  }
  0xa2   : > { %20278 = vst [vmem:[#allocation129_spill] sm:$0xff] %v11573_v36  ;;  %20279 = vst [vmem:[#allocation130_spill] sm:$0xff] %v11576_v17  ;;  %v11583_v30 = vld [vmem:[%s10744_s7 + $0x538] sm:$0xff]   ;;  %v11586_v46 = vld [vmem:[%s10744_s7 + $0x540] sm:$0xff]  }
  0xa3   : > { %20280 = vst [vmem:[#allocation131_spill] sm:$0xff] %v11583_v30  ;;  %20281 = vst [vmem:[#allocation132_spill] sm:$0xff] %v11586_v46  ;;  %v11593_v24 = vld [vmem:[%s10744_s7 + $0x548] sm:$0xff]   ;;  %v11596_v22 = vld [vmem:[%s10744_s7 + $0x550] sm:$0xff]  }
  0xa4   : > { %20282 = vst [vmem:[#allocation133_spill] sm:$0xff] %v11593_v24  ;;  %20283 = vst [vmem:[#allocation134_spill] sm:$0xff] %v11596_v22  ;;  %v11603_v18 = vld [vmem:[%s10744_s7 + $0x558] sm:$0xff]   ;;  %v11606_v28 = vld [vmem:[%s10744_s7 + $0x560] sm:$0xff]  }
  0xa5   : > { %20284 = vst [vmem:[#allocation135_spill] sm:$0xff] %v11603_v18  ;;  %20285 = vst [vmem:[#allocation136_spill] sm:$0xff] %v11606_v28  ;;  %v11613_v12 = vld [vmem:[%s10744_s7 + $0x568] sm:$0xff]   ;;  %v11616_v6 = vld [vmem:[%s10744_s7 + $0x570] sm:$0xff]  }
  0xa6   : > { %20286 = vst [vmem:[#allocation137_spill] sm:$0xff] %v11613_v12  ;;  %20287 = vst [vmem:[#allocation138_spill] sm:$0xff] %v11616_v6  ;;  %v11623_v10 = vld [vmem:[%s10744_s7 + $0x578] sm:$0xff]   ;;  %v11626_v17 = vld [vmem:[%s10744_s7 + $0x580] sm:$0xff]   ;;  %v20306_v12 = vunpack.c.l.bf16 %v10769_v5  ;;  %v20315_v5 = vunpack.c.h.bf16 %v10806_v26 }
  0xa7   : > { %20288 = vst [vmem:[#allocation139_spill] sm:$0xff] %v11623_v10  ;;  %20289 = vst [vmem:[#allocation140_spill] sm:$0xff] %v11626_v17  ;;  %v11633_v48 = vld [vmem:[%s10744_s7 + $0x588] sm:$0xff]   ;;  %v11636_v46 = vld [vmem:[%s10744_s7 + $0x590] sm:$0xff]  }
  0xa8   : > { %20290 = vst [vmem:[#allocation141_spill] sm:$0xff] %v11633_v48  ;;  %20291 = vst [vmem:[#allocation142_spill] sm:$0xff] %v11636_v46  ;;  %v11643_v42 = vld [vmem:[%s10744_s7 + $0x598] sm:$0xff]   ;;  %v11646_v22 = vld [vmem:[%s10744_s7 + $0x5a0] sm:$0xff]  }
  0xa9   : > { %20292 = vst [vmem:[#allocation143_spill] sm:$0xff] %v11643_v42  ;;  %20293 = vst [vmem:[#allocation144_spill] sm:$0xff] %v11646_v22  ;;  %v11653_v36 = vld [vmem:[%s10744_s7 + $0x5a8] sm:$0xff]   ;;  %v11656_v28 = vld [vmem:[%s10744_s7 + $0x5b0] sm:$0xff]   ;;  %v20302_v42 = vunpack.c.l.bf16 %v10757_v1  ;;  %v20311_v1 = vunpack.c.h.bf16 %v10786_v14 }
  0xaa   : > { %20294 = vst [vmem:[#allocation145_spill] sm:$0xff] %v11653_v36  ;;  %v11663_v30 = vld [vmem:[%s10744_s7 + $0x5b8] sm:$0xff]   ;;  %v11666_v6 = vld [vmem:[%s10744_s7 + $0x5c0] sm:$0xff]   ;;  %v11673_v24 = vld [vmem:[%s10744_s7 + $0x5c8] sm:$0xff]   ;;  %v20308_v36 = vunpack.c.l.bf16 %v10776_v8 }
  0xab   : > { %20295 = vst [vmem:[#allocation146_spill] sm:$0xff] %v11663_v30  ;;  %20296 = vst [vmem:[#allocation147_spill] sm:$0xff] %v11673_v24  ;;  %v11676_v17 = vld [vmem:[%s10744_s7 + $0x5d0] sm:$0xff]   ;;  %v11683_v46 = vld [vmem:[%s10744_s7 + $0x5d8] sm:$0xff]   ;;  %v20305_v30 = vunpack.c.h.bf16 %v10763_v3  ;;  %v20309_v24 = vunpack.c.h.bf16 %v10776_v8  ;;  %v20313_v3 = vunpack.c.h.bf16 %v10796_v20  ;;  %v20317_v8 = vunpack.c.h.bf16 %v10816_v32 }
  0xac   : > { %20297 = vst [vmem:[#allocation148_spill] sm:$0xff] %v11683_v46  ;;  %v11686_v18 = vld [vmem:[%s10744_s7 + $0x5e0] sm:$0xff]   ;;  %v11693_v47 = vld [vmem:[%s10744_s7 + $0x5e8] sm:$0xff]   ;;  %v11696_v22 = vld [vmem:[%s10744_s7 + $0x5f0] sm:$0xff]   ;;  %v1300_v46 = vadd.f32 %v20303_v60, %v20302_v42  ;;  %v20312_v60 = vunpack.c.l.bf16 %v10796_v20  ;;  %v20321_v20 = vunpack.c.h.bf16 %v10836_v44 }
  0xad   : > { %20298 = vst [vmem:[#allocation149_spill] sm:$0xff] %v11686_v18  ;;  %20299 = vst [vmem:[#allocation150_spill] sm:$0xff] %v11693_v47  ;;  %v11703_v54 = vld [vmem:[%s10744_s7 + $0x5f8] sm:$0xff]   ;;  %v1303_v48 = vadd.f32 %v20305_v30, %v20304_v23  ;;  %v1306_v47 = vadd.f32 %v20307_v52, %v20306_v12  ;;  %v1309_v10 = vadd.f32 %v20309_v24, %v20308_v36  ;;  %v20314_v30 = vunpack.c.l.bf16 %v10806_v26 }
  0xae   : > { %20300 = vst [vmem:[#allocation151_spill] sm:$0xff] %v11696_v22  ;;  %20301 = vst [vmem:[#allocation152_spill] sm:$0xff] %v11703_v54  ;;  %v20310_v54 = vunpack.c.l.bf16 %v10786_v14  ;;  %v1315_v23 = vadd.f32 %v20313_v3, %v20312_v60  ;;  %v20316_v52 = vunpack.c.l.bf16 %v10816_v32  ;;  %v20318_v36 = vunpack.c.l.bf16 %v10826_v38 }
  0xaf   : > { %v1318_v12 = vadd.f32 %v20315_v5, %v20314_v30  ;;  %v20319_v14 = vunpack.c.h.bf16 %v10826_v38  ;;  %v20322_v3 = vunpack.c.l.bf16 %v10846_v50  ;;  %v20323_v26 = vunpack.c.h.bf16 %v10846_v50 }
  0xb0   : > { %v1312_v42 = vadd.f32 %v20311_v1, %v20310_v54  ;;  %v1321_v24 = vadd.f32 %v20317_v8, %v20316_v52  ;;  %v20320_v1 = vunpack.c.l.bf16 %v10836_v44  ;;  %v20324_v5 = vunpack.c.l.bf16 %v10856_v56 }
  0xb1   : > { %v1324_v54 = vadd.f32 %v20319_v14, %v20318_v36  ;;  %v1330_v30 = vadd.f32 %v20323_v26, %v20322_v3  ;;  %v20325_v32 = vunpack.c.h.bf16 %v10856_v56  ;;  %v20326_v8 = vunpack.c.l.bf16 %v10866_v62 }
  0xb2   : > { %v1327_v60 = vadd.f32 %v20321_v20, %v20320_v1  ;;  %v20327_v38 = vunpack.c.h.bf16 %v10866_v62  ;;  %v20328_v14 = vunpack.c.l.bf16 %v10760_v2  ;;  %v20329_v44 = vunpack.c.l.bf16 %v10876_v35 }
  0xb3   : > { %v1333_v52 = vadd.f32 %v20325_v32, %v20324_v5  ;;  %v20330_v1 = vunpack.c.h.bf16 %v10876_v35  ;;  %v20331_v50 = vunpack.c.l.bf16 %v10886_v0  ;;  %v20332_v3 = vunpack.c.h.bf16 %v10886_v0 }
  0xb4   : > { %v1336_v36 = vadd.f32 %v20327_v38, %v20326_v8  ;;  %v1301_v22 = vadd.f32 %v20328_v14, %v1300_v46  ;;  %v20333_v56 = vunpack.c.l.bf16 %v10896_v40  ;;  %v20334_v5 = vunpack.c.h.bf16 %v10896_v40 }
  0xb5   : > { %v1339_v20 = vadd.f32 %v20330_v1, %v20329_v44  ;;  %v1342_v26 = vadd.f32 %v20332_v3, %v20331_v50  ;;  %v20335_v62 = vunpack.c.l.bf16 %v10766_v4  ;;  %v20336_v46 = vunpack.c.l.bf16 %v10773_v7 }
  0xb6   : > { %v1345_v32 = vadd.f32 %v20334_v5, %v20333_v56  ;;  %v20337_v14 = vunpack.c.l.bf16 %v10783_v13  ;;  %v20338_v44 = vunpack.c.l.bf16 %v10793_v19  ;;  %v20339_v0 = vunpack.c.l.bf16 %v10803_v25 }
  0xb7   : > { %v1304_v8 = vadd.f32 %v20335_v62, %v1303_v48  ;;  %v1307_v38 = vadd.f32 %v20336_v46, %v1306_v47  ;;  %v20340_v3 = vunpack.c.l.bf16 %v10813_v31  ;;  %v20341_v40 = vunpack.c.l.bf16 %v10823_v37 }
  0xb8   : > { %v1310_v35 = vadd.f32 %v20337_v14, %v1309_v10  ;;  %v1313_v1 = vadd.f32 %v20338_v44, %v1312_v42  ;;  %v1316_v50 = vadd.f32 %v20339_v0, %v1315_v23  ;;  %v20342_v48 = vunpack.c.l.bf16 %v10833_v43 }
  0xb9   : > { %v1319_v18 = vadd.f32 %v20340_v3, %v1318_v12  ;;  %v1322_v56 = vadd.f32 %v20341_v40, %v1321_v24  ;;  %v20343_v47 = vunpack.c.l.bf16 %v10843_v49  ;;  %v20344_v10 = vunpack.c.l.bf16 %v10853_v55 }
  0xba   : > { %v1325_v5 = vadd.f32 %v20342_v48, %v1324_v54  ;;  %v20345_v42 = vunpack.c.l.bf16 %v10863_v61  ;;  %v20346_v23 = vunpack.c.l.bf16 %v10873_v41  ;;  %v20347_v12 = vunpack.c.h.bf16 %v10760_v2 }
  0xbb   : > { %v1328_v62 = vadd.f32 %v20343_v47, %v1327_v60  ;;  %v1331_v46 = vadd.f32 %v20344_v10, %v1330_v30  ;;  %v20349_v24 = vunpack.c.l.bf16 %v10883_v11  ;;  %v20350_v54 = vunpack.c.l.bf16 %v10893_v29 }
  0xbc   : > { %v1334_v14 = vadd.f32 %v20345_v42, %v1333_v52  ;;  %v1337_v44 = vadd.f32 %v20346_v23, %v1336_v36  ;;  %v11808_v0 = vadd.f32 %v20347_v12, %v1301_v22  ;;  %v20351_v60 = vunpack.c.l.bf16 %v10903_v58 }
  0xbd   : > { %v1340_v3 = vadd.f32 %v20349_v24, %v1339_v20  ;;  %v1343_v40 = vadd.f32 %v20350_v54, %v1342_v26  ;;  %v20352_v30 = vunpack.c.h.bf16 %v10766_v4  ;;  %v20354_v52 = vunpack.c.h.bf16 %v10773_v7 }
  0xbe   : > { %20348 = vst [vmem:[#allocation153_spill] sm:$0xff] %v11808_v0  ;;  %v1346_v48 = vadd.f32 %v20351_v60, %v1345_v32  ;;  %v20356_v2 = vunpack.c.h.bf16 %v10783_v13  ;;  %v20358_v20 = vunpack.c.h.bf16 %v10793_v19  ;;  %v20360_v26 = vunpack.c.h.bf16 %v10803_v25  ;;  %v12983_v0 = vld [vmem:[%s10750_s8 + $0x1f8] sm:$0xff]  }
  0xbf   : > { %v11818_v47 = vadd.f32 %v20352_v30, %v1304_v8  ;;  %v11822_v36 = vadd.f32 %v20354_v52, %v1307_v38  ;;  %v20362_v4 = vunpack.c.h.bf16 %v10813_v31  ;;  %v20364_v7 = vunpack.c.h.bf16 %v10823_v37 }
  0xc0   : > { %v11826_v22 = vadd.f32 %v20356_v2, %v1310_v35  ;;  %v11830_v10 = vadd.f32 %v20358_v20, %v1313_v1  ;;  %v11834_v42 = vadd.f32 %v20360_v26, %v1316_v50  ;;  %v20366_v13 = vunpack.c.h.bf16 %v10833_v43 }
  0xc1   : > { %20353 = vst [vmem:[#allocation154_spill] sm:$0xff] %v11818_v47  ;;  %20355 = vst [vmem:[#allocation155_spill] sm:$0xff] %v11822_v36  ;;  %v11838_v32 = vadd.f32 %v20362_v4, %v1319_v18  ;;  %v11842_v8 = vadd.f32 %v20364_v7, %v1322_v56  ;;  %v20368_v19 = vunpack.c.h.bf16 %v10843_v49  ;;  %v20370_v25 = vunpack.c.h.bf16 %v10853_v55  ;;  %v12946_v47 = vld [vmem:[%s10750_s8 + $0x1c0] sm:$0xff]   ;;  %v13033_v36 = vld [vmem:[%s10750_s8 + $0x248] sm:$0xff]  }
  0xc2   : > { %20357 = vst [vmem:[#allocation156_spill] sm:$0xff] %v11826_v22  ;;  %20359 = vst [vmem:[#allocation157_spill] sm:$0xff] %v11830_v10  ;;  %v11846_v38 = vadd.f32 %v20366_v13, %v1325_v5  ;;  %v20372_v31 = vunpack.c.h.bf16 %v10863_v61  ;;  %v20374_v37 = vunpack.c.h.bf16 %v10873_v41  ;;  %v20376_v43 = vunpack.c.h.bf16 %v10883_v11  ;;  %v12936_v22 = vld [vmem:[%s10750_s8 + $0x1b0] sm:$0xff]   ;;  %v12963_v10 = vld [vmem:[%s10750_s8 + $0x1d8] sm:$0xff]  }
  0xc3   : > { %20361 = vst [vmem:[#allocation158_spill] sm:$0xff] %v11834_v42  ;;  %20363 = vst [vmem:[#allocation159_spill] sm:$0xff] %v11838_v32  ;;  %v11850_v35 = vadd.f32 %v20368_v19, %v1328_v62  ;;  %v11854_v1 = vadd.f32 %v20370_v25, %v1331_v46  ;;  %v20378_v49 = vunpack.c.h.bf16 %v10893_v29  ;;  %v20380_v55 = vunpack.c.h.bf16 %v10903_v58  ;;  %v12926_v42 = vld [vmem:[%s10750_s8 + $0x1a0] sm:$0xff]   ;;  %v13013_v32 = vld [vmem:[%s10750_s8 + $0x228] sm:$0xff]  }
  0xc4   : > { %20365 = vst [vmem:[#allocation160_spill] sm:$0xff] %v11842_v8  ;;  %20367 = vst [vmem:[#allocation161_spill] sm:$0xff] %v11846_v38  ;;  %v11858_v18 = vadd.f32 %v20372_v31, %v1334_v14  ;;  %v11862_v50 = vadd.f32 %v20374_v37, %v1337_v44  ;;  %v11866_v56 = vadd.f32 %v20376_v43, %v1340_v3  ;;  %v20382_v61 = vunpack.c.l.bf16 %v10906_v16  ;;  %v12916_v8 = vld [vmem:[%s10750_s8 + $0x190] sm:$0xff]   ;;  %v12943_v38 = vld [vmem:[%s10750_s8 + $0x1b8] sm:$0xff]  }
  0xc5   : > { %20369 = vst [vmem:[#allocation162_spill] sm:$0xff] %v11850_v35  ;;  %20371 = vst [vmem:[#allocation163_spill] sm:$0xff] %v11854_v1  ;;  %v11870_v5 = vadd.f32 %v20378_v49, %v1343_v40  ;;  %v11874_v62 = vadd.f32 %v20380_v55, %v1346_v48  ;;  %v20383_v46 = vunpack.c.h.bf16 %v10906_v16  ;;  %v20384_v41 = vunpack.c.l.bf16 %v10916_v53  ;;  %v12906_v35 = vld [vmem:[%s10750_s8 + $0x180] sm:$0xff]   ;;  %v12993_v1 = vld [vmem:[%s10750_s8 + $0x208] sm:$0xff]  }
  0xc6   : > { %20373 = vst [vmem:[#allocation164_spill] sm:$0xff] %v11858_v18  ;;  %20375 = vst [vmem:[#allocation165_spill] sm:$0xff] %v11862_v50  ;;  %v20385_v23 = vunpack.c.h.bf16 %v10916_v53  ;;  %v20386_v44 = vunpack.c.l.bf16 %v10926_v59  ;;  %v20387_v29 = vunpack.c.h.bf16 %v10926_v59  ;;  %v20388_v24 = vunpack.c.l.bf16 %v10936_v63  ;;  %v12896_v18 = vld [vmem:[%s10750_s8 + $0x170] sm:$0xff]   ;;  %v12923_v50 = vld [vmem:[%s10750_s8 + $0x198] sm:$0xff]  }
  0xc7   : > { %20377 = vst [vmem:[#allocation166_spill] sm:$0xff] %v11866_v56  ;;  %20379 = vst [vmem:[#allocation167_spill] sm:$0xff] %v11870_v5  ;;  %v1348_v14 = vadd.f32 %v20383_v46, %v20382_v61  ;;  %v20389_v58 = vunpack.c.h.bf16 %v10936_v63  ;;  %v20390_v54 = vunpack.c.l.bf16 %v10946_v57  ;;  %v20391_v16 = vunpack.c.h.bf16 %v10946_v57  ;;  %v12886_v56 = vld [vmem:[%s10750_s8 + $0x160] sm:$0xff]   ;;  %v12973_v5 = vld [vmem:[%s10750_s8 + $0x1e8] sm:$0xff]  }
  0xc8   : > { %20381 = vst [vmem:[#allocation168_spill] sm:$0xff] %v11874_v62  ;;  %v1351_v11 = vadd.f32 %v20385_v23, %v20384_v41  ;;  %v1354_v12 = vadd.f32 %v20387_v29, %v20386_v44  ;;  %v20392_v60 = vunpack.c.l.bf16 %v10956_v51  ;;  %v20393_v53 = vunpack.c.h.bf16 %v10956_v51 }
  0xc9   : > { %v1357_v3 = vadd.f32 %v20389_v58, %v20388_v24  ;;  %v1360_v40 = vadd.f32 %v20391_v16, %v20390_v54  ;;  %v20394_v30 = vunpack.c.l.bf16 %v10966_v45  ;;  %v20395_v59 = vunpack.c.h.bf16 %v10966_v45 }
  0xca   : > { %v1363_v48 = vadd.f32 %v20393_v53, %v20392_v60  ;;  %v20396_v2 = vunpack.c.l.bf16 %v10976_v39  ;;  %v20397_v63 = vunpack.c.h.bf16 %v10976_v39  ;;  %v20398_v26 = vunpack.c.l.bf16 %v10986_v33 }
  0xcb   : > { %v1366_v52 = vadd.f32 %v20395_v59, %v20394_v30  ;;  %v20399_v57 = vunpack.c.h.bf16 %v10986_v33  ;;  %v20400_v7 = vunpack.c.l.bf16 %v10996_v27  ;;  %v20401_v51 = vunpack.c.h.bf16 %v10996_v27  ;;  %v20409_v27 = vld [vmem:[#allocation22_spill] sm:$0xff]  ;;  %v20420_v30 = vld [vmem:[#allocation11_spill] sm:$0xff] }
  0xcc   : > { %v1369_v20 = vadd.f32 %v20397_v63, %v20396_v2  ;;  %v20402_v19 = vunpack.c.l.bf16 %v11006_v21  ;;  %v20403_v45 = vunpack.c.h.bf16 %v11006_v21  ;;  %v20404_v31 = vunpack.c.l.bf16 %v11016_v15  ;;  %v20412_v21 = vld [vmem:[#allocation24_spill] sm:$0xff] }
  0xcd   : > { %v1372_v4 = vadd.f32 %v20399_v57, %v20398_v26  ;;  %v1375_v13 = vadd.f32 %v20401_v51, %v20400_v7  ;;  %v20405_v39 = vunpack.c.h.bf16 %v11016_v15  ;;  %v20406_v43 = vunpack.c.l.bf16 %v11026_v9  ;;  %v20415_v15 = vld [vmem:[#allocation26_spill] sm:$0xff]  ;;  %v20422_v2 = vld [vmem:[#allocation12_spill] sm:$0xff]  ;;  %v20424_v57 = vld [vmem:[#allocation13_spill] sm:$0xff] }
  0xce   : > { %v1378_v25 = vadd.f32 %v20403_v45, %v20402_v19  ;;  %v20407_v33 = vunpack.c.h.bf16 %v11026_v9  ;;  %v20408_v55 = vunpack.c.l.bf16 %v10913_v34  ;;  %v20410_v46 = vunpack.c.l.bf16 %v20409_v27  ;;  %v20418_v9 = vld [vmem:[#allocation10_spill] sm:$0xff] }
  0xcf   : > { %v1381_v37 = vadd.f32 %v20405_v39, %v20404_v31  ;;  %v20411_v41 = vunpack.c.h.bf16 %v20409_v27  ;;  %v20413_v44 = vunpack.c.l.bf16 %v20412_v21  ;;  %v20414_v29 = vunpack.c.h.bf16 %v20412_v21  ;;  %v20426_v19 = vld [vmem:[#allocation14_spill] sm:$0xff]  ;;  %v20428_v39 = vld [vmem:[#allocation15_spill] sm:$0xff] }
  0xd0   : > { %v1384_v49 = vadd.f32 %v20407_v33, %v20406_v43  ;;  %v1349_v61 = vadd.f32 %v20408_v55, %v1348_v14  ;;  %v20416_v58 = vunpack.c.l.bf16 %v20415_v15  ;;  %v20417_v54 = vunpack.c.h.bf16 %v20415_v15  ;;  %v20430_v55 = vld [vmem:[#allocation16_spill] sm:$0xff]  ;;  %v20436_v15 = vld [vmem:[#allocation19_spill] sm:$0xff] }
  0xd1   : > { %v1387_v23 = vadd.f32 %v20411_v41, %v20410_v46  ;;  %v1390_v24 = vadd.f32 %v20414_v29, %v20413_v44  ;;  %v20419_v60 = vunpack.c.l.bf16 %v20418_v9  ;;  %v20421_v14 = vunpack.c.l.bf16 %v20420_v30  ;;  %v20432_v41 = vld [vmem:[#allocation17_spill] sm:$0xff]  ;;  %v20434_v44 = vld [vmem:[#allocation18_spill] sm:$0xff] }
  0xd2   : > { %v1393_v16 = vadd.f32 %v20417_v54, %v20416_v58  ;;  %v20423_v63 = vunpack.c.l.bf16 %v20422_v2  ;;  %v20425_v7 = vunpack.c.l.bf16 %v20424_v57  ;;  %v20427_v45 = vunpack.c.l.bf16 %v20426_v19  ;;  %v20438_v54 = vld [vmem:[#allocation20_spill] sm:$0xff] }
  0xd3   : > { %v1352_v53 = vadd.f32 %v20419_v60, %v1351_v11  ;;  %v1355_v59 = vadd.f32 %v20421_v14, %v1354_v12  ;;  %v20429_v43 = vunpack.c.l.bf16 %v20428_v39  ;;  %v20431_v27 = vunpack.c.l.bf16 %v20430_v55  ;;  %v20440_v14 = vld [vmem:[#allocation21_spill] sm:$0xff] }
  0xd4   : > { %v1358_v26 = vadd.f32 %v20423_v63, %v1357_v3  ;;  %v1361_v51 = vadd.f32 %v20425_v7, %v1360_v40  ;;  %v1364_v31 = vadd.f32 %v20427_v45, %v1363_v48  ;;  %v20433_v11 = vunpack.c.l.bf16 %v20432_v41 }
  0xd5   : > { %v1367_v33 = vadd.f32 %v20429_v43, %v1366_v52  ;;  %v1370_v46 = vadd.f32 %v20431_v27, %v1369_v20  ;;  %v20435_v12 = vunpack.c.l.bf16 %v20434_v44  ;;  %v20437_v3 = vunpack.c.l.bf16 %v20436_v15  ;;  %v20444_v20 = vld [vmem:[#allocation23_spill] sm:$0xff] }
  0xd6   : > { %v1373_v21 = vadd.f32 %v20433_v11, %v1372_v4  ;;  %v20439_v40 = vunpack.c.l.bf16 %v20438_v54  ;;  %v20441_v48 = vunpack.c.l.bf16 %v20440_v14  ;;  %v20442_v52 = vunpack.c.h.bf16 %v10913_v34  ;;  %v20446_v4 = vld [vmem:[#allocation25_spill] sm:$0xff] }
  0xd7   : > { %v1376_v29 = vadd.f32 %v20435_v12, %v1375_v13  ;;  %v1379_v58 = vadd.f32 %v20437_v3, %v1378_v25  ;;  %v20445_v45 = vunpack.c.l.bf16 %v20444_v20  ;;  %v20447_v27 = vunpack.c.l.bf16 %v20446_v4  ;;  %v20448_v13 = vld [vmem:[#allocation27_spill] sm:$0xff] }
  0xd8   : > { %v1382_v60 = vadd.f32 %v20439_v40, %v1381_v37  ;;  %v1385_v63 = vadd.f32 %v20441_v48, %v1384_v49  ;;  %v11968_v7 = vadd.f32 %v20442_v52, %v1349_v61  ;;  %v20449_v12 = vunpack.c.l.bf16 %v20448_v13 }
  0xd9   : > { %v1388_v43 = vadd.f32 %v20445_v45, %v1387_v23  ;;  %v1391_v11 = vadd.f32 %v20447_v27, %v1390_v24  ;;  %v20450_v25 = vunpack.c.h.bf16 %v20418_v9  ;;  %v20452_v37 = vunpack.c.h.bf16 %v20420_v30 }
  0xda   : > { %20443 = vst [vmem:[#allocation22_spill] sm:$0xff] %v11968_v7  ;;  %v1394_v62 = vadd.f32 %v20449_v12, %v1393_v16  ;;  %v20454_v34 = vunpack.c.h.bf16 %v20422_v2  ;;  %v20456_v23 = vunpack.c.h.bf16 %v20424_v57  ;;  %v20458_v24 = vunpack.c.h.bf16 %v20426_v19  ;;  %v20489_v12 = vld [vmem:[#allocation34_spill] sm:$0xff] }
  0xdb   : > { %v11978_v3 = vadd.f32 %v20450_v25, %v1352_v53  ;;  %v11982_v49 = vadd.f32 %v20452_v37, %v1355_v59  ;;  %v20460_v16 = vunpack.c.h.bf16 %v20428_v39  ;;  %v20462_v53 = vunpack.c.h.bf16 %v20430_v55  ;;  %v20492_v37 = vld [vmem:[#allocation36_spill] sm:$0xff] }
  0xdc   : > { %v11986_v61 = vadd.f32 %v20454_v34, %v1358_v26  ;;  %v11990_v40 = vadd.f32 %v20456_v23, %v1361_v51  ;;  %v11994_v48 = vadd.f32 %v20458_v24, %v1364_v31  ;;  %v20464_v59 = vunpack.c.h.bf16 %v20432_v41 }
  0xdd   : > { %20451 = vst [vmem:[#allocation24_spill] sm:$0xff] %v11978_v3  ;;  %20453 = vst [vmem:[#allocation26_spill] sm:$0xff] %v11982_v49  ;;  %v11998_v9 = vadd.f32 %v20460_v16, %v1367_v33  ;;  %v12002_v30 = vadd.f32 %v20462_v53, %v1370_v46  ;;  %v20466_v26 = vunpack.c.h.bf16 %v20434_v44  ;;  %v20468_v51 = vunpack.c.h.bf16 %v20436_v15  ;;  %v20495_v16 = vld [vmem:[#allocation38_spill] sm:$0xff] }
  0xde   : > { %20455 = vst [vmem:[#allocation10_spill] sm:$0xff] %v11986_v61  ;;  %20457 = vst [vmem:[#allocation11_spill] sm:$0xff] %v11990_v40  ;;  %v12006_v2 = vadd.f32 %v20464_v59, %v1373_v21  ;;  %v20470_v31 = vunpack.c.h.bf16 %v20438_v54  ;;  %v20472_v33 = vunpack.c.h.bf16 %v20440_v14  ;;  %v20474_v46 = vunpack.c.h.bf16 %v20444_v20  ;;  %v20483_v14 = vld [vmem:[#allocation30_spill] sm:$0xff]  ;;  %v20550_v40 = vld [vmem:[#allocation51_spill] sm:$0xff] }
  0xdf   : > { %20459 = vst [vmem:[#allocation12_spill] sm:$0xff] %v11994_v48  ;;  %20461 = vst [vmem:[#allocation13_spill] sm:$0xff] %v11998_v9  ;;  %v12010_v57 = vadd.f32 %v20466_v26, %v1376_v29  ;;  %v12014_v19 = vadd.f32 %v20468_v51, %v1379_v58  ;;  %v20476_v21 = vunpack.c.h.bf16 %v20446_v4  ;;  %v20478_v29 = vunpack.c.h.bf16 %v20448_v13  ;;  %v20480_v58 = vld [vmem:[#allocation28_spill] sm:$0xff]  ;;  %v20546_v9 = vld [vmem:[#allocation47_spill] sm:$0xff] }
  0xe0   : > { %20463 = vst [vmem:[#allocation14_spill] sm:$0xff] %v12002_v30  ;;  %20465 = vst [vmem:[#allocation15_spill] sm:$0xff] %v12006_v2  ;;  %v12018_v39 = vadd.f32 %v20470_v31, %v1382_v60  ;;  %v12022_v55 = vadd.f32 %v20472_v33, %v1385_v63  ;;  %v12026_v41 = vadd.f32 %v20474_v46, %v1388_v43  ;;  %v20481_v54 = vunpack.c.l.bf16 %v20480_v58  ;;  %v20486_v43 = vld [vmem:[#allocation32_spill] sm:$0xff]  ;;  %v20544_v30 = vld [vmem:[#allocation45_spill] sm:$0xff] }
  0xe1   : > { %20467 = vst [vmem:[#allocation16_spill] sm:$0xff] %v12010_v57  ;;  %20469 = vst [vmem:[#allocation17_spill] sm:$0xff] %v12014_v19  ;;  %v12030_v44 = vadd.f32 %v20476_v21, %v1391_v11  ;;  %v12034_v15 = vadd.f32 %v20478_v29, %v1394_v62  ;;  %v20482_v60 = vunpack.c.h.bf16 %v20480_v58  ;;  %v20484_v63 = vunpack.c.l.bf16 %v20483_v14  ;;  %v20498_v51 = vld [vmem:[#allocation40_spill] sm:$0xff]  ;;  %v20501_v21 = vld [vmem:[#allocation42_spill] sm:$0xff] }
  0xe2   : > { %20471 = vst [vmem:[#allocation18_spill] sm:$0xff] %v12018_v39  ;;  %20473 = vst [vmem:[#allocation19_spill] sm:$0xff] %v12022_v55  ;;  %v20485_v45 = vunpack.c.h.bf16 %v20483_v14  ;;  %v20487_v27 = vunpack.c.l.bf16 %v20486_v43  ;;  %v20488_v4 = vunpack.c.h.bf16 %v20486_v43  ;;  %v20490_v25 = vunpack.c.l.bf16 %v20489_v12  ;;  %v20507_v43 = vld [vmem:[#allocation46_spill] sm:$0xff]  ;;  %v20538_v19 = vld [vmem:[#allocation39_spill] sm:$0xff] }
  0xe3   : > { %20475 = vst [vmem:[#allocation20_spill] sm:$0xff] %v12026_v41  ;;  %20477 = vst [vmem:[#allocation21_spill] sm:$0xff] %v12030_v44  ;;  %v1396_v52 = vadd.f32 %v20482_v60, %v20481_v54  ;;  %v20491_v62 = vunpack.c.h.bf16 %v20489_v12  ;;  %v20493_v34 = vunpack.c.l.bf16 %v20492_v37  ;;  %v20494_v23 = vunpack.c.h.bf16 %v20492_v37  ;;  %v20504_v60 = vld [vmem:[#allocation44_spill] sm:$0xff]  ;;  %v20532_v44 = vld [vmem:[#allocation33_spill] sm:$0xff] }
  0xe4   : > { %20479 = vst [vmem:[#allocation23_spill] sm:$0xff] %v12034_v15  ;;  %v1399_v20 = vadd.f32 %v20485_v45, %v20484_v63  ;;  %v1402_v11 = vadd.f32 %v20488_v4, %v20487_v27  ;;  %v20496_v53 = vunpack.c.l.bf16 %v20495_v16  ;;  %v20497_v59 = vunpack.c.h.bf16 %v20495_v16  ;;  %v20534_v41 = vld [vmem:[#allocation35_spill] sm:$0xff]  ;;  %v20548_v48 = vld [vmem:[#allocation49_spill] sm:$0xff] }
  0xe5   : > { %v1405_v13 = vadd.f32 %v20491_v62, %v20490_v25  ;;  %v1408_v24 = vadd.f32 %v20494_v23, %v20493_v34  ;;  %v20499_v31 = vunpack.c.l.bf16 %v20498_v51  ;;  %v20500_v33 = vunpack.c.h.bf16 %v20498_v51  ;;  %v20510_v25 = vld [vmem:[#allocation48_spill] sm:$0xff]  ;;  %v20513_v23 = vld [vmem:[#allocation50_spill] sm:$0xff]  ;;  %v20552_v61 = vld [vmem:[#allocation53_spill] sm:$0xff] }
  0xe6   : > { %v1411_v26 = vadd.f32 %v20497_v59, %v20496_v53  ;;  %v20502_v29 = vunpack.c.l.bf16 %v20501_v21  ;;  %v20503_v58 = vunpack.c.h.bf16 %v20501_v21  ;;  %v20505_v14 = vunpack.c.l.bf16 %v20504_v60  ;;  %v20516_v51 = vld [vmem:[#allocation52_spill] sm:$0xff] }
  0xe7   : > { %v1414_v46 = vadd.f32 %v20500_v33, %v20499_v31  ;;  %v20506_v63 = vunpack.c.h.bf16 %v20504_v60  ;;  %v20508_v27 = vunpack.c.l.bf16 %v20507_v43  ;;  %v20509_v4 = vunpack.c.h.bf16 %v20507_v43 }
  0xe8   : > { %v1417_v54 = vadd.f32 %v20503_v58, %v20502_v29  ;;  %v20511_v62 = vunpack.c.l.bf16 %v20510_v25  ;;  %v20512_v37 = vunpack.c.h.bf16 %v20510_v25  ;;  %v20514_v16 = vunpack.c.l.bf16 %v20513_v23  ;;  %v20519_v29 = vld [vmem:[#allocation29_spill] sm:$0xff] }
  0xe9   : > { %v1420_v45 = vadd.f32 %v20506_v63, %v20505_v14  ;;  %v1423_v12 = vadd.f32 %v20509_v4, %v20508_v27  ;;  %v20515_v53 = vunpack.c.h.bf16 %v20513_v23  ;;  %v20517_v31 = vunpack.c.l.bf16 %v20516_v51  ;;  %v20521_v14 = vld [vmem:[#allocation54_spill] sm:$0xff]  ;;  %v20524_v4 = vld [vmem:[#allocation56_spill] sm:$0xff] }
  0xea   : > { %v1426_v34 = vadd.f32 %v20512_v37, %v20511_v62  ;;  %v20518_v33 = vunpack.c.h.bf16 %v20516_v51  ;;  %v20520_v58 = vunpack.c.l.bf16 %v20519_v29  ;;  %v20522_v63 = vunpack.c.l.bf16 %v20521_v14  ;;  %v20527_v23 = vld [vmem:[#allocation58_spill] sm:$0xff]  ;;  %v20530_v51 = vld [vmem:[#allocation31_spill] sm:$0xff] }
  0xeb   : > { %v1429_v59 = vadd.f32 %v20515_v53, %v20514_v16  ;;  %v20523_v43 = vunpack.c.h.bf16 %v20521_v14  ;;  %v20525_v25 = vunpack.c.l.bf16 %v20524_v4  ;;  %v20526_v62 = vunpack.c.h.bf16 %v20524_v4 }
  0xec   : > { %v1432_v21 = vadd.f32 %v20518_v33, %v20517_v31  ;;  %v1397_v60 = vadd.f32 %v20520_v58, %v1396_v52  ;;  %v20528_v16 = vunpack.c.l.bf16 %v20527_v23  ;;  %v20529_v53 = vunpack.c.h.bf16 %v20527_v23  ;;  %v20542_v23 = vld [vmem:[#allocation43_spill] sm:$0xff] }
  0xed   : > { %v1435_v27 = vadd.f32 %v20523_v43, %v20522_v63  ;;  %v1438_v37 = vadd.f32 %v20526_v62, %v20525_v25  ;;  %v20531_v31 = vunpack.c.l.bf16 %v20530_v51  ;;  %v20533_v52 = vunpack.c.l.bf16 %v20532_v44  ;;  %v20536_v63 = vld [vmem:[#allocation37_spill] sm:$0xff] }
  0xee   : > { %v1441_v15 = vadd.f32 %v20529_v53, %v20528_v16  ;;  %v20535_v55 = vunpack.c.l.bf16 %v20534_v41  ;;  %v20537_v43 = vunpack.c.l.bf16 %v20536_v63  ;;  %v20539_v4 = vunpack.c.l.bf16 %v20538_v19  ;;  %v20540_v62 = vld [vmem:[#allocation41_spill] sm:$0xff] }
  0xef   : > { %v1400_v33 = vadd.f32 %v20531_v31, %v1399_v20  ;;  %v1403_v58 = vadd.f32 %v20533_v52, %v1402_v11  ;;  %v20541_v57 = vunpack.c.l.bf16 %v20540_v62  ;;  %v20543_v16 = vunpack.c.l.bf16 %v20542_v23 }
  0xf0   : > { %v1406_v14 = vadd.f32 %v20535_v55, %v1405_v13  ;;  %v1409_v39 = vadd.f32 %v20537_v43, %v1408_v24  ;;  %v1412_v25 = vadd.f32 %v20539_v4, %v1411_v26  ;;  %v20545_v20 = vunpack.c.l.bf16 %v20544_v30 }
  0xf1   : > { %v1415_v2 = vadd.f32 %v20541_v57, %v1414_v46  ;;  %v1418_v53 = vadd.f32 %v20543_v16, %v1417_v54  ;;  %v20547_v11 = vunpack.c.l.bf16 %v20546_v9  ;;  %v20549_v55 = vunpack.c.l.bf16 %v20548_v48  ;;  %v20556_v54 = vld [vmem:[#allocation55_spill] sm:$0xff] }
  0xf2   : > { %v1421_v31 = vadd.f32 %v20545_v20, %v1420_v45  ;;  %v20551_v24 = vunpack.c.l.bf16 %v20550_v40  ;;  %v20553_v26 = vunpack.c.l.bf16 %v20552_v61  ;;  %v20554_v57 = vunpack.c.h.bf16 %v20519_v29  ;;  %v20558_v45 = vld [vmem:[#allocation57_spill] sm:$0xff] }
  0xf3   : > { %v1424_v52 = vadd.f32 %v20547_v11, %v1423_v12  ;;  %v1427_v13 = vadd.f32 %v20549_v55, %v1426_v34  ;;  %v20557_v16 = vunpack.c.l.bf16 %v20556_v54  ;;  %v20559_v20 = vunpack.c.l.bf16 %v20558_v45  ;;  %v20560_v12 = vld [vmem:[#allocation59_spill] sm:$0xff] }
  0xf4   : > { %v1430_v43 = vadd.f32 %v20551_v24, %v1429_v59  ;;  %v1433_v4 = vadd.f32 %v20553_v26, %v1432_v21  ;;  %v12128_v46 = vadd.f32 %v20554_v57, %v1397_v60  ;;  %v20561_v11 = vunpack.c.l.bf16 %v20560_v12 }
  0xf5   : > { %v1436_v49 = vadd.f32 %v20557_v16, %v1435_v27  ;;  %v1439_v3 = vadd.f32 %v20559_v20, %v1438_v37  ;;  %v20562_v34 = vunpack.c.h.bf16 %v20530_v51  ;;  %v20564_v59 = vunpack.c.h.bf16 %v20532_v44 }
  0xf6   : > { %20555 = vst [vmem:[#allocation25_spill] sm:$0xff] %v12128_v46  ;;  %v1442_v7 = vadd.f32 %v20561_v11, %v1441_v15  ;;  %v20566_v29 = vunpack.c.h.bf16 %v20534_v41  ;;  %v20568_v27 = vunpack.c.h.bf16 %v20536_v63  ;;  %v20570_v37 = vunpack.c.h.bf16 %v20538_v19  ;;  %v20601_v11 = vld [vmem:[#allocation66_spill] sm:$0xff] }
  0xf7   : > { %v12138_v55 = vadd.f32 %v20562_v34, %v1400_v33  ;;  %v12142_v21 = vadd.f32 %v20564_v59, %v1403_v58  ;;  %v20572_v15 = vunpack.c.h.bf16 %v20540_v62  ;;  %v20574_v44 = vunpack.c.h.bf16 %v20542_v23  ;;  %v20604_v59 = vld [vmem:[#allocation68_spill] sm:$0xff] }
  0xf8   : > { %v12146_v60 = vadd.f32 %v20566_v29, %v1406_v14  ;;  %v12150_v24 = vadd.f32 %v20568_v27, %v1409_v39  ;;  %v12154_v26 = vadd.f32 %v20570_v37, %v1412_v25  ;;  %v20576_v41 = vunpack.c.h.bf16 %v20544_v30 }
  0xf9   : > { %20563 = vst [vmem:[#allocation27_spill] sm:$0xff] %v12138_v55  ;;  %20565 = vst [vmem:[#allocation28_spill] sm:$0xff] %v12142_v21  ;;  %v12158_v51 = vadd.f32 %v20572_v15, %v1415_v2  ;;  %v12162_v33 = vadd.f32 %v20574_v44, %v1418_v53  ;;  %v20578_v14 = vunpack.c.h.bf16 %v20546_v9  ;;  %v20580_v19 = vunpack.c.h.bf16 %v20548_v48  ;;  %v20607_v15 = vld [vmem:[#allocation70_spill] sm:$0xff] }
  0xfa   : > { %20567 = vst [vmem:[#allocation30_spill] sm:$0xff] %v12146_v60  ;;  %20569 = vst [vmem:[#allocation32_spill] sm:$0xff] %v12150_v24  ;;  %v12166_v58 = vadd.f32 %v20576_v41, %v1421_v31  ;;  %v20582_v25 = vunpack.c.h.bf16 %v20550_v40  ;;  %v20584_v62 = vunpack.c.h.bf16 %v20552_v61  ;;  %v20586_v30 = vunpack.c.h.bf16 %v20556_v54  ;;  %v20595_v61 = vld [vmem:[#allocation62_spill] sm:$0xff]  ;;  %v20662_v24 = vld [vmem:[#allocation83_spill] sm:$0xff] }
  0xfb   : > { %20571 = vst [vmem:[#allocation34_spill] sm:$0xff] %v12154_v26  ;;  %20573 = vst [vmem:[#allocation36_spill] sm:$0xff] %v12158_v51  ;;  %v12170_v39 = vadd.f32 %v20578_v14, %v1424_v52  ;;  %v12174_v63 = vadd.f32 %v20580_v19, %v1427_v13  ;;  %v20588_v9 = vunpack.c.h.bf16 %v20558_v45  ;;  %v20590_v48 = vunpack.c.h.bf16 %v20560_v12  ;;  %v20592_v13 = vld [vmem:[#allocation60_spill] sm:$0xff]  ;;  %v20658_v51 = vld [vmem:[#allocation79_spill] sm:$0xff] }
  0xfc   : > { %20575 = vst [vmem:[#allocation38_spill] sm:$0xff] %v12162_v33  ;;  %20577 = vst [vmem:[#allocation40_spill] sm:$0xff] %v12166_v58  ;;  %v12178_v2 = vadd.f32 %v20582_v25, %v1430_v43  ;;  %v12182_v23 = vadd.f32 %v20584_v62, %v1433_v4  ;;  %v12186_v53 = vadd.f32 %v20586_v30, %v1436_v49  ;;  %v20593_v40 = vunpack.c.l.bf16 %v20592_v13  ;;  %v20598_v49 = vld [vmem:[#allocation64_spill] sm:$0xff]  ;;  %v20656_v33 = vld [vmem:[#allocation77_spill] sm:$0xff] }
  0xfd   : > { %20579 = vst [vmem:[#allocation42_spill] sm:$0xff] %v12170_v39  ;;  %20581 = vst [vmem:[#allocation44_spill] sm:$0xff] %v12174_v63  ;;  %v12190_v31 = vadd.f32 %v20588_v9, %v1439_v3  ;;  %v12194_v52 = vadd.f32 %v20590_v48, %v1442_v7  ;;  %v20594_v43 = vunpack.c.h.bf16 %v20592_v13  ;;  %v20596_v4 = vunpack.c.l.bf16 %v20595_v61  ;;  %v20610_v19 = vld [vmem:[#allocation72_spill] sm:$0xff]  ;;  %v20613_v9 = vld [vmem:[#allocation74_spill] sm:$0xff] }
  0xfe   : > { %20583 = vst [vmem:[#allocation46_spill] sm:$0xff] %v12178_v2  ;;  %20585 = vst [vmem:[#allocation48_spill] sm:$0xff] %v12182_v23  ;;  %v20597_v16 = vunpack.c.h.bf16 %v20595_v61  ;;  %v20599_v20 = vunpack.c.l.bf16 %v20598_v49  ;;  %v20600_v45 = vunpack.c.h.bf16 %v20598_v49  ;;  %v20602_v34 = vunpack.c.l.bf16 %v20601_v11  ;;  %v20619_v49 = vld [vmem:[#allocation78_spill] sm:$0xff]  ;;  %v20650_v63 = vld [vmem:[#allocation71_spill] sm:$0xff] }
  0xff   : > { %20587 = vst [vmem:[#allocation50_spill] sm:$0xff] %v12186_v53  ;;  %20589 = vst [vmem:[#allocation52_spill] sm:$0xff] %v12190_v31  ;;  %v1444_v57 = vadd.f32 %v20594_v43, %v20593_v40  ;;  %v20603_v7 = vunpack.c.h.bf16 %v20601_v11  ;;  %v20605_v29 = vunpack.c.l.bf16 %v20604_v59  ;;  %v20606_v27 = vunpack.c.h.bf16 %v20604_v59  ;;  %v20616_v43 = vld [vmem:[#allocation76_spill] sm:$0xff]  ;;  %v20644_v31 = vld [vmem:[#allocation65_spill] sm:$0xff] }
 0x100   : > { %20591 = vst [vmem:[#allocation29_spill] sm:$0xff] %v12194_v52  ;;  %v1447_v54 = vadd.f32 %v20597_v16, %v20596_v4  ;;  %v1450_v3 = vadd.f32 %v20600_v45, %v20599_v20  ;;  %v20608_v44 = vunpack.c.l.bf16 %v20607_v15  ;;  %v20609_v41 = vunpack.c.h.bf16 %v20607_v15  ;;  %v20646_v53 = vld [vmem:[#allocation67_spill] sm:$0xff]  ;;  %v20660_v26 = vld [vmem:[#allocation81_spill] sm:$0xff] }
 0x101   : > { %v1453_v12 = vadd.f32 %v20603_v7, %v20602_v34  ;;  %v1456_v37 = vadd.f32 %v20606_v27, %v20605_v29  ;;  %v20611_v25 = vunpack.c.l.bf16 %v20610_v19  ;;  %v20612_v62 = vunpack.c.h.bf16 %v20610_v19  ;;  %v20622_v34 = vld [vmem:[#allocation80_spill] sm:$0xff]  ;;  %v20625_v27 = vld [vmem:[#allocation82_spill] sm:$0xff]  ;;  %v20664_v60 = vld [vmem:[#allocation85_spill] sm:$0xff] }
 0x102   : > { %v1459_v14 = vadd.f32 %v20609_v41, %v20608_v44  ;;  %v20614_v48 = vunpack.c.l.bf16 %v20613_v9  ;;  %v20615_v13 = vunpack.c.h.bf16 %v20613_v9  ;;  %v20617_v61 = vunpack.c.l.bf16 %v20616_v43  ;;  %v20628_v19 = vld [vmem:[#allocation84_spill] sm:$0xff] }
 0x103   : > { %v1462_v30 = vadd.f32 %v20612_v62, %v20611_v25  ;;  %v20618_v4 = vunpack.c.h.bf16 %v20616_v43  ;;  %v20620_v20 = vunpack.c.l.bf16 %v20619_v49  ;;  %v20621_v45 = vunpack.c.h.bf16 %v20619_v49 }
 0x104   : > { %v1465_v40 = vadd.f32 %v20615_v13, %v20614_v48  ;;  %v20623_v7 = vunpack.c.l.bf16 %v20622_v34  ;;  %v20624_v59 = vunpack.c.h.bf16 %v20622_v34  ;;  %v20626_v15 = vunpack.c.l.bf16 %v20625_v27  ;;  %v20631_v48 = vld [vmem:[#allocation61_spill] sm:$0xff] }
 0x105   : > { %v1468_v16 = vadd.f32 %v20618_v4, %v20617_v61  ;;  %v1471_v11 = vadd.f32 %v20621_v45, %v20620_v20  ;;  %v20627_v44 = vunpack.c.h.bf16 %v20625_v27  ;;  %v20629_v25 = vunpack.c.l.bf16 %v20628_v19  ;;  %v20633_v61 = vld [vmem:[#allocation86_spill] sm:$0xff]  ;;  %v20636_v45 = vld [vmem:[#allocation88_spill] sm:$0xff] }
 0x106   : > { %v1474_v29 = vadd.f32 %v20624_v59, %v20623_v7  ;;  %v20630_v62 = vunpack.c.h.bf16 %v20628_v19  ;;  %v20632_v13 = vunpack.c.l.bf16 %v20631_v48  ;;  %v20634_v4 = vunpack.c.l.bf16 %v20633_v61  ;;  %v20639_v27 = vld [vmem:[#allocation90_spill] sm:$0xff]  ;;  %v20642_v19 = vld [vmem:[#allocation63_spill] sm:$0xff] }
 0x107   : > { %v1477_v41 = vadd.f32 %v20627_v44, %v20626_v15  ;;  %v20635_v49 = vunpack.c.h.bf16 %v20633_v61  ;;  %v20637_v34 = vunpack.c.l.bf16 %v20636_v45  ;;  %v20638_v7 = vunpack.c.h.bf16 %v20636_v45 }
 0x108   : > { %v1480_v9 = vadd.f32 %v20630_v62, %v20629_v25  ;;  %v1445_v43 = vadd.f32 %v20632_v13, %v1444_v57  ;;  %v20640_v15 = vunpack.c.l.bf16 %v20639_v27  ;;  %v20641_v44 = vunpack.c.h.bf16 %v20639_v27  ;;  %v20654_v27 = vld [vmem:[#allocation75_spill] sm:$0xff] }
 0x109   : > { %v1483_v20 = vadd.f32 %v20635_v49, %v20634_v4  ;;  %v1486_v59 = vadd.f32 %v20638_v7, %v20637_v34  ;;  %v20643_v25 = vunpack.c.l.bf16 %v20642_v19  ;;  %v20645_v57 = vunpack.c.l.bf16 %v20644_v31  ;;  %v20648_v4 = vld [vmem:[#allocation69_spill] sm:$0xff] }
 0x10a   : > { %v1489_v52 = vadd.f32 %v20641_v44, %v20640_v15  ;;  %v20647_v23 = vunpack.c.l.bf16 %v20646_v53  ;;  %v20649_v49 = vunpack.c.l.bf16 %v20648_v4  ;;  %v20651_v45 = vunpack.c.l.bf16 %v20650_v63  ;;  %v20652_v7 = vld [vmem:[#allocation73_spill] sm:$0xff] }
 0x10b   : > { %v1448_v62 = vadd.f32 %v20643_v25, %v1447_v54  ;;  %v1451_v13 = vadd.f32 %v20645_v57, %v1450_v3  ;;  %v20653_v39 = vunpack.c.l.bf16 %v20652_v7  ;;  %v20655_v15 = vunpack.c.l.bf16 %v20654_v27 }
 0x10c   : > { %v1454_v61 = vadd.f32 %v20647_v23, %v1453_v12  ;;  %v1457_v2 = vadd.f32 %v20649_v49, %v1456_v37  ;;  %v1460_v34 = vadd.f32 %v20651_v45, %v1459_v14  ;;  %v20657_v54 = vunpack.c.l.bf16 %v20656_v33 }
 0x10d   : > { %v1463_v58 = vadd.f32 %v20653_v39, %v1462_v30  ;;  %v1466_v44 = vadd.f32 %v20655_v15, %v1465_v40  ;;  %v20659_v3 = vunpack.c.l.bf16 %v20658_v51  ;;  %v20661_v23 = vunpack.c.l.bf16 %v20660_v26  ;;  %v20668_v40 = vld [vmem:[#allocation87_spill] sm:$0xff] }
 0x10e   : > { %v1469_v25 = vadd.f32 %v20657_v54, %v1468_v16  ;;  %v20663_v37 = vunpack.c.l.bf16 %v20662_v24  ;;  %v20665_v14 = vunpack.c.l.bf16 %v20664_v60  ;;  %v20666_v39 = vunpack.c.h.bf16 %v20631_v48  ;;  %v20670_v16 = vld [vmem:[#allocation89_spill] sm:$0xff] }
 0x10f   : > { %v1472_v57 = vadd.f32 %v20659_v3, %v1471_v11  ;;  %v1475_v12 = vadd.f32 %v20661_v23, %v1474_v29  ;;  %v20669_v15 = vunpack.c.l.bf16 %v20668_v40  ;;  %v20671_v54 = vunpack.c.l.bf16 %v20670_v16  ;;  %v20672_v11 = vld [vmem:[#allocation91_spill] sm:$0xff] }
 0x110   : > { %v1478_v49 = vadd.f32 %v20663_v37, %v1477_v41  ;;  %v1481_v45 = vadd.f32 %v20665_v14, %v1480_v9  ;;  %v12288_v30 = vadd.f32 %v20666_v39, %v1445_v43  ;;  %v20673_v3 = vunpack.c.l.bf16 %v20672_v11 }
 0x111   : > { %v1484_v21 = vadd.f32 %v20669_v15, %v1483_v20  ;;  %v1487_v55 = vadd.f32 %v20671_v54, %v1486_v59  ;;  %v20674_v29 = vunpack.c.h.bf16 %v20642_v19  ;;  %v20676_v41 = vunpack.c.h.bf16 %v20644_v31 }
 0x112   : > { %20667 = vst [vmem:[#allocation54_spill] sm:$0xff] %v12288_v30  ;;  %v1490_v46 = vadd.f32 %v20673_v3, %v1489_v52  ;;  %v20678_v48 = vunpack.c.h.bf16 %v20646_v53  ;;  %v20680_v20 = vunpack.c.h.bf16 %v20648_v4  ;;  %v20682_v59 = vunpack.c.h.bf16 %v20650_v63  ;;  %v20713_v3 = vld [vmem:[#allocation98_spill] sm:$0xff] }
 0x113   : > { %v12298_v23 = vadd.f32 %v20674_v29, %v1448_v62  ;;  %v12302_v9 = vadd.f32 %v20676_v41, %v1451_v13  ;;  %v20684_v52 = vunpack.c.h.bf16 %v20652_v7  ;;  %v20686_v31 = vunpack.c.h.bf16 %v20654_v27  ;;  %v20716_v41 = vld [vmem:[#allocation100_spill] sm:$0xff] }
 0x114   : > { %v12306_v43 = vadd.f32 %v20678_v48, %v1454_v61  ;;  %v12310_v37 = vadd.f32 %v20680_v20, %v1457_v2  ;;  %v12314_v14 = vadd.f32 %v20682_v59, %v1460_v34  ;;  %v20688_v53 = vunpack.c.h.bf16 %v20656_v33 }
 0x115   : > { %20675 = vst [vmem:[#allocation56_spill] sm:$0xff] %v12298_v23  ;;  %20677 = vst [vmem:[#allocation58_spill] sm:$0xff] %v12302_v9  ;;  %v12318_v19 = vadd.f32 %v20684_v52, %v1463_v58  ;;  %v12322_v62 = vadd.f32 %v20686_v31, %v1466_v44  ;;  %v20690_v61 = vunpack.c.h.bf16 %v20658_v51  ;;  %v20692_v63 = vunpack.c.h.bf16 %v20660_v26  ;;  %v20719_v52 = vld [vmem:[#allocation102_spill] sm:$0xff] }
 0x116   : > { %20679 = vst [vmem:[#allocation31_spill] sm:$0xff] %v12306_v43  ;;  %20681 = vst [vmem:[#allocation33_spill] sm:$0xff] %v12310_v37  ;;  %v12326_v13 = vadd.f32 %v20688_v53, %v1469_v25  ;;  %v20694_v34 = vunpack.c.h.bf16 %v20662_v24  ;;  %v20696_v7 = vunpack.c.h.bf16 %v20664_v60  ;;  %v20698_v33 = vunpack.c.h.bf16 %v20668_v40  ;;  %v20707_v60 = vld [vmem:[#allocation94_spill] sm:$0xff]  ;;  %v20774_v37 = vld [vmem:[#allocation115_spill] sm:$0xff] }
 0x117   : > { %20683 = vst [vmem:[#allocation35_spill] sm:$0xff] %v12314_v14  ;;  %20685 = vst [vmem:[#allocation37_spill] sm:$0xff] %v12318_v19  ;;  %v12330_v2 = vadd.f32 %v20690_v61, %v1472_v57  ;;  %v12334_v4 = vadd.f32 %v20692_v63, %v1475_v12  ;;  %v20700_v51 = vunpack.c.h.bf16 %v20670_v16  ;;  %v20702_v26 = vunpack.c.h.bf16 %v20672_v11  ;;  %v20704_v12 = vld [vmem:[#allocation92_spill] sm:$0xff]  ;;  %v20770_v19 = vld [vmem:[#allocation111_spill] sm:$0xff] }
 0x118   : > { %20687 = vst [vmem:[#allocation39_spill] sm:$0xff] %v12322_v62  ;;  %20689 = vst [vmem:[#allocation41_spill] sm:$0xff] %v12326_v13  ;;  %v12338_v58 = vadd.f32 %v20694_v34, %v1478_v49  ;;  %v12342_v27 = vadd.f32 %v20696_v7, %v1481_v45  ;;  %v12346_v44 = vadd.f32 %v20698_v33, %v1484_v21  ;;  %v20705_v24 = vunpack.c.l.bf16 %v20704_v12  ;;  %v20710_v21 = vld [vmem:[#allocation96_spill] sm:$0xff]  ;;  %v20768_v62 = vld [vmem:[#allocation109_spill] sm:$0xff] }
 0x119   : > { %20691 = vst [vmem:[#allocation43_spill] sm:$0xff] %v12330_v2  ;;  %20693 = vst [vmem:[#allocation45_spill] sm:$0xff] %v12334_v4  ;;  %v12350_v25 = vadd.f32 %v20700_v51, %v1487_v55  ;;  %v12354_v57 = vadd.f32 %v20702_v26, %v1490_v46  ;;  %v20706_v49 = vunpack.c.h.bf16 %v20704_v12  ;;  %v20708_v45 = vunpack.c.l.bf16 %v20707_v60  ;;  %v20722_v63 = vld [vmem:[#allocation104_spill] sm:$0xff]  ;;  %v20725_v51 = vld [vmem:[#allocation106_spill] sm:$0xff] }
 0x11a   : > { %20695 = vst [vmem:[#allocation47_spill] sm:$0xff] %v12338_v58  ;;  %20697 = vst [vmem:[#allocation49_spill] sm:$0xff] %v12342_v27  ;;  %v20709_v15 = vunpack.c.h.bf16 %v20707_v60  ;;  %v20711_v54 = vunpack.c.l.bf16 %v20710_v21  ;;  %v20712_v16 = vunpack.c.h.bf16 %v20710_v21  ;;  %v20714_v29 = vunpack.c.l.bf16 %v20713_v3  ;;  %v20731_v21 = vld [vmem:[#allocation110_spill] sm:$0xff]  ;;  %v20762_v4 = vld [vmem:[#allocation103_spill] sm:$0xff] }
 0x11b   : > { %20699 = vst [vmem:[#allocation51_spill] sm:$0xff] %v12346_v44  ;;  %20701 = vst [vmem:[#allocation53_spill] sm:$0xff] %v12350_v25  ;;  %v1492_v39 = vadd.f32 %v20706_v49, %v20705_v24  ;;  %v20715_v46 = vunpack.c.h.bf16 %v20713_v3  ;;  %v20717_v48 = vunpack.c.l.bf16 %v20716_v41  ;;  %v20718_v20 = vunpack.c.h.bf16 %v20716_v41  ;;  %v20728_v49 = vld [vmem:[#allocation108_spill] sm:$0xff]  ;;  %v20756_v25 = vld [vmem:[#allocation97_spill] sm:$0xff] }
 0x11c   : > { %20703 = vst [vmem:[#allocation55_spill] sm:$0xff] %v12354_v57  ;;  %v1495_v40 = vadd.f32 %v20709_v15, %v20708_v45  ;;  %v1498_v55 = vadd.f32 %v20712_v16, %v20711_v54  ;;  %v20720_v31 = vunpack.c.l.bf16 %v20719_v52  ;;  %v20721_v53 = vunpack.c.h.bf16 %v20719_v52  ;;  %v20758_v44 = vld [vmem:[#allocation99_spill] sm:$0xff]  ;;  %v20772_v14 = vld [vmem:[#allocation113_spill] sm:$0xff]  ;;  %20933 = vst [vmem:[#allocation104_spill] sm:$0xff] %v12896_v18 }
 0x11d   : > { %v1501_v11 = vadd.f32 %v20715_v46, %v20714_v29  ;;  %v1504_v59 = vadd.f32 %v20718_v20, %v20717_v48  ;;  %v20723_v34 = vunpack.c.l.bf16 %v20722_v63  ;;  %v20724_v7 = vunpack.c.h.bf16 %v20722_v63  ;;  %v20734_v29 = vld [vmem:[#allocation112_spill] sm:$0xff]  ;;  %v20737_v20 = vld [vmem:[#allocation114_spill] sm:$0xff]  ;;  %v20776_v43 = vld [vmem:[#allocation117_spill] sm:$0xff]  ;;  %20936 = vst [vmem:[#allocation110_spill] sm:$0xff] %v12916_v8 }
 0x11e   : > { %v1507_v61 = vadd.f32 %v20721_v53, %v20720_v31  ;;  %v20726_v26 = vunpack.c.l.bf16 %v20725_v51  ;;  %v20727_v12 = vunpack.c.h.bf16 %v20725_v51  ;;  %v20729_v60 = vunpack.c.l.bf16 %v20728_v49  ;;  %v20740_v63 = vld [vmem:[#allocation116_spill] sm:$0xff]  ;;  %20937 = vst [vmem:[#allocation112_spill] sm:$0xff] %v12923_v50  ;;  %20946 = vst [vmem:[#allocation99_spill] sm:$0xff] %v12983_v0  ;;  %v12986_v8 = vld [vmem:[%s10750_s8 + $0x200] sm:$0xff]  }
 0x11f   : > { %v1510_v33 = vadd.f32 %v20724_v7, %v20723_v34  ;;  %v20730_v45 = vunpack.c.h.bf16 %v20728_v49  ;;  %v20732_v54 = vunpack.c.l.bf16 %v20731_v21  ;;  %v20733_v16 = vunpack.c.h.bf16 %v20731_v21  ;;  %20939 = vst [vmem:[#allocation116_spill] sm:$0xff] %v12936_v22  ;;  %v12996_v18 = vld [vmem:[%s10750_s8 + $0x210] sm:$0xff]   ;;  %v13003_v50 = vld [vmem:[%s10750_s8 + $0x218] sm:$0xff]   ;;  %20953 = vst [vmem:[#allocation113_spill] sm:$0xff] %v13033_v36 }
 0x120   : > { %v1513_v24 = vadd.f32 %v20727_v12, %v20726_v26  ;;  %v20735_v46 = vunpack.c.l.bf16 %v20734_v29  ;;  %v20736_v41 = vunpack.c.h.bf16 %v20734_v29  ;;  %v20738_v52 = vunpack.c.l.bf16 %v20737_v20  ;;  %v20743_v26 = vld [vmem:[#allocation93_spill] sm:$0xff]  ;;  %20948 = vst [vmem:[#allocation103_spill] sm:$0xff] %v12996_v18  ;;  %v13073_v22 = vld [vmem:[%s10750_s8 + $0x288] sm:$0xff]   ;;  %v13086_v36 = vld [vmem:[%s10750_s8 + $0x2a0] sm:$0xff]  }
 0x121   : > { %v1516_v15 = vadd.f32 %v20730_v45, %v20729_v60  ;;  %v1519_v3 = vadd.f32 %v20733_v16, %v20732_v54  ;;  %v20739_v31 = vunpack.c.h.bf16 %v20737_v20  ;;  %v20741_v34 = vunpack.c.l.bf16 %v20740_v63  ;;  %v20745_v60 = vld [vmem:[#allocation118_spill] sm:$0xff]  ;;  %v20748_v16 = vld [vmem:[#allocation120_spill] sm:$0xff]  ;;  %20940 = vst [vmem:[#allocation93_spill] sm:$0xff] %v12943_v38  ;;  %v13023_v38 = vld [vmem:[%s10750_s8 + $0x238] sm:$0xff]  }
 0x122   : > { %v1522_v48 = vadd.f32 %v20736_v41, %v20735_v46  ;;  %v20742_v7 = vunpack.c.h.bf16 %v20740_v63  ;;  %v20744_v12 = vunpack.c.l.bf16 %v20743_v26  ;;  %v20746_v45 = vunpack.c.l.bf16 %v20745_v60  ;;  %v20751_v20 = vld [vmem:[#allocation122_spill] sm:$0xff]  ;;  %v20754_v63 = vld [vmem:[#allocation95_spill] sm:$0xff]  ;;  %20952 = vst [vmem:[#allocation111_spill] sm:$0xff] %v13023_v38  ;;  %v13063_v0 = vld [vmem:[%s10750_s8 + $0x278] sm:$0xff]  }
 0x123   : > { %v1525_v53 = vadd.f32 %v20739_v31, %v20738_v52  ;;  %v20747_v21 = vunpack.c.h.bf16 %v20745_v60  ;;  %v20749_v29 = vunpack.c.l.bf16 %v20748_v16  ;;  %v20750_v46 = vunpack.c.h.bf16 %v20748_v16  ;;  %20943 = vst [vmem:[#allocation122_spill] sm:$0xff] %v12963_v10  ;;  %20944 = vst [vmem:[#allocation95_spill] sm:$0xff] %v12973_v5  ;;  %v13036_v5 = vld [vmem:[%s10750_s8 + $0x250] sm:$0xff]   ;;  %v13043_v10 = vld [vmem:[%s10750_s8 + $0x258] sm:$0xff]  }
 0x124   : > { %v1528_v51 = vadd.f32 %v20742_v7, %v20741_v34  ;;  %v1493_v49 = vadd.f32 %v20744_v12, %v1492_v39  ;;  %v20752_v52 = vunpack.c.l.bf16 %v20751_v20  ;;  %v20753_v31 = vunpack.c.h.bf16 %v20751_v20  ;;  %v20766_v20 = vld [vmem:[#allocation107_spill] sm:$0xff]  ;;  %20954 = vst [vmem:[#allocation115_spill] sm:$0xff] %v13036_v5  ;;  %20955 = vst [vmem:[#allocation117_spill] sm:$0xff] %v13043_v10  ;;  %v13103_v38 = vld [vmem:[%s10750_s8 + $0x2b8] sm:$0xff]  }
 0x125   : > { %v1531_v54 = vadd.f32 %v20747_v21, %v20746_v45  ;;  %v1534_v41 = vadd.f32 %v20750_v46, %v20749_v29  ;;  %v20755_v34 = vunpack.c.l.bf16 %v20754_v63  ;;  %v20757_v39 = vunpack.c.l.bf16 %v20756_v25  ;;  %v20760_v45 = vld [vmem:[#allocation101_spill] sm:$0xff]  ;;  %20950 = vst [vmem:[#allocation107_spill] sm:$0xff] %v13013_v32  ;;  %v13066_v32 = vld [vmem:[%s10750_s8 + $0x280] sm:$0xff]   ;;  %v13133_v18 = vld [vmem:[%s10750_s8 + $0x2e8] sm:$0xff]  }
 0x126   : > { %v1537_v57 = vadd.f32 %v20753_v31, %v20752_v52  ;;  %v20759_v27 = vunpack.c.l.bf16 %v20758_v44  ;;  %v20761_v21 = vunpack.c.l.bf16 %v20760_v45  ;;  %v20763_v16 = vunpack.c.l.bf16 %v20762_v4  ;;  %v20764_v46 = vld [vmem:[#allocation105_spill] sm:$0xff]  ;;  %20947 = vst [vmem:[#allocation101_spill] sm:$0xff] %v12993_v1  ;;  %v13046_v1 = vld [vmem:[%s10750_s8 + $0x260] sm:$0xff]   ;;  %v13173_v5 = vld [vmem:[%s10750_s8 + $0x328] sm:$0xff]  }
 0x127   : > { %v1496_v7 = vadd.f32 %v20755_v34, %v1495_v40  ;;  %v1499_v12 = vadd.f32 %v20757_v39, %v1498_v55  ;;  %v20765_v2 = vunpack.c.l.bf16 %v20764_v46  ;;  %v20767_v52 = vunpack.c.l.bf16 %v20766_v20  ;;  %20949 = vst [vmem:[#allocation105_spill] sm:$0xff] %v13003_v50  ;;  %v13083_v50 = vld [vmem:[%s10750_s8 + $0x298] sm:$0xff]  }
 0x128   : > { %v1502_v60 = vadd.f32 %v20759_v27, %v1501_v11  ;;  %v1505_v58 = vadd.f32 %v20761_v21, %v1504_v59  ;;  %v1508_v29 = vadd.f32 %v20763_v16, %v1507_v61  ;;  %v20769_v40 = vunpack.c.l.bf16 %v20768_v62  ;;  %v13123_v10 = vld [vmem:[%s10750_s8 + $0x2d8] sm:$0xff]  }
 0x129   : > { %v1511_v13 = vadd.f32 %v20765_v2, %v1510_v33  ;;  %v1514_v31 = vadd.f32 %v20767_v52, %v1513_v24  ;;  %v20771_v55 = vunpack.c.l.bf16 %v20770_v19  ;;  %v20773_v27 = vunpack.c.l.bf16 %v20772_v14  ;;  %v20780_v24 = vld [vmem:[#allocation119_spill] sm:$0xff] }
 0x12a   : > { %v1517_v34 = vadd.f32 %v20769_v40, %v1516_v15  ;;  %v20775_v59 = vunpack.c.l.bf16 %v20774_v37  ;;  %v20777_v61 = vunpack.c.l.bf16 %v20776_v43  ;;  %v20778_v2 = vunpack.c.h.bf16 %v20743_v26  ;;  %v20782_v15 = vld [vmem:[#allocation121_spill] sm:$0xff] }
 0x12b   : > { %v1520_v39 = vadd.f32 %v20771_v55, %v1519_v3  ;;  %v1523_v11 = vadd.f32 %v20773_v27, %v1522_v48  ;;  %v20781_v52 = vunpack.c.l.bf16 %v20780_v24  ;;  %v20783_v40 = vunpack.c.l.bf16 %v20782_v15  ;;  %v20784_v3 = vld [vmem:[#allocation123_spill] sm:$0xff] }
 0x12c   : > { %v1526_v21 = vadd.f32 %v20775_v59, %v1525_v53  ;;  %v1529_v16 = vadd.f32 %v20777_v61, %v1528_v51  ;;  %v12448_v33 = vadd.f32 %v20778_v2, %v1493_v49  ;;  %v20785_v55 = vunpack.c.l.bf16 %v20784_v3  ;;  %20958 = vst [vmem:[#allocation123_spill] sm:$0xff] %v13063_v0  ;;  %v13143_v0 = vld [vmem:[%s10750_s8 + $0x2f8] sm:$0xff]  }
 0x12d   : > { %v1532_v9 = vadd.f32 %v20781_v52, %v1531_v54  ;;  %v1535_v23 = vadd.f32 %v20783_v40, %v1534_v41  ;;  %v20786_v48 = vunpack.c.h.bf16 %v20754_v63  ;;  %v20788_v53 = vunpack.c.h.bf16 %v20756_v25 }
 0x12e   : > { %20779 = vst [vmem:[#allocation57_spill] sm:$0xff] %v12448_v33  ;;  %v1538_v30 = vadd.f32 %v20785_v55, %v1537_v57  ;;  %v20790_v26 = vunpack.c.h.bf16 %v20758_v44  ;;  %v20792_v54 = vunpack.c.h.bf16 %v20760_v45  ;;  %v20794_v41 = vunpack.c.h.bf16 %v20762_v4  ;;  %v20825_v55 = vld [vmem:[#allocation130_spill] sm:$0xff]  ;;  %v12876_v33 = vld [vmem:[%s10750_s8 + $0x150] sm:$0xff]  }
 0x12f   : > { %v12458_v27 = vadd.f32 %v20786_v48, %v1496_v7  ;;  %v12462_v51 = vadd.f32 %v20788_v53, %v1499_v12  ;;  %v20796_v57 = vunpack.c.h.bf16 %v20764_v46  ;;  %v20798_v25 = vunpack.c.h.bf16 %v20766_v20  ;;  %v20828_v53 = vld [vmem:[#allocation132_spill] sm:$0xff]  ;;  %20930 = vst [vmem:[#allocation98_spill] sm:$0xff] %v12876_v33  ;;  %v13006_v33 = vld [vmem:[%s10750_s8 + $0x220] sm:$0xff]   ;;  %20962 = vst [vmem:[#allocation130_spill] sm:$0xff] %v13083_v50 }
 0x130   : > { %v12466_v49 = vadd.f32 %v20790_v26, %v1502_v60  ;;  %v12470_v59 = vadd.f32 %v20792_v54, %v1505_v58  ;;  %v12474_v61 = vadd.f32 %v20794_v41, %v1508_v29  ;;  %v20800_v44 = vunpack.c.h.bf16 %v20768_v62  ;;  %20963 = vst [vmem:[#allocation132_spill] sm:$0xff] %v13086_v36  ;;  %v13136_v36 = vld [vmem:[%s10750_s8 + $0x2f0] sm:$0xff]   ;;  %v13163_v50 = vld [vmem:[%s10750_s8 + $0x318] sm:$0xff]  }
 0x131   : > { %20787 = vst [vmem:[#allocation59_spill] sm:$0xff] %v12458_v27  ;;  %20789 = vst [vmem:[#allocation60_spill] sm:$0xff] %v12462_v51  ;;  %v12478_v63 = vadd.f32 %v20796_v57, %v1511_v13  ;;  %v12482_v7 = vadd.f32 %v20798_v25, %v1514_v31  ;;  %v20802_v60 = vunpack.c.h.bf16 %v20770_v19  ;;  %v20804_v4 = vunpack.c.h.bf16 %v20772_v14  ;;  %v20831_v57 = vld [vmem:[#allocation134_spill] sm:$0xff]  ;;  %v12903_v27 = vld [vmem:[%s10750_s8 + $0x178] sm:$0xff]  }
 0x132   : > { %20791 = vst [vmem:[#allocation62_spill] sm:$0xff] %v12466_v49  ;;  %20793 = vst [vmem:[#allocation64_spill] sm:$0xff] %v12470_v59  ;;  %v12486_v12 = vadd.f32 %v20800_v44, %v1517_v34  ;;  %v20806_v29 = vunpack.c.h.bf16 %v20774_v37  ;;  %v20808_v46 = vunpack.c.h.bf16 %v20776_v43  ;;  %v20810_v62 = vunpack.c.h.bf16 %v20780_v24  ;;  %v20819_v43 = vld [vmem:[#allocation126_spill] sm:$0xff]  ;;  %v12953_v49 = vld [vmem:[%s10750_s8 + $0x1c8] sm:$0xff]  }
 0x133   : > { %20795 = vst [vmem:[#allocation66_spill] sm:$0xff] %v12474_v61  ;;  %20797 = vst [vmem:[#allocation68_spill] sm:$0xff] %v12478_v63  ;;  %v12490_v58 = vadd.f32 %v20802_v60, %v1520_v39  ;;  %v12494_v45 = vadd.f32 %v20804_v4, %v1523_v11  ;;  %v20812_v19 = vunpack.c.h.bf16 %v20782_v15  ;;  %v20814_v14 = vunpack.c.h.bf16 %v20784_v3  ;;  %v20816_v11 = vld [vmem:[#allocation124_spill] sm:$0xff]  ;;  %v20891_v63 = vld [vmem:[#allocation150_spill] sm:$0xff] }
 0x134   : > { %20799 = vst [vmem:[#allocation70_spill] sm:$0xff] %v12482_v7  ;;  %20801 = vst [vmem:[#allocation72_spill] sm:$0xff] %v12486_v12  ;;  %v12498_v13 = vadd.f32 %v20806_v29, %v1526_v21  ;;  %v12502_v20 = vadd.f32 %v20808_v46, %v1529_v16  ;;  %v12506_v31 = vadd.f32 %v20810_v62, %v1532_v9  ;;  %v20817_v37 = vunpack.c.l.bf16 %v20816_v11  ;;  %v20822_v9 = vld [vmem:[#allocation128_spill] sm:$0xff]  ;;  %v12866_v51 = vld [vmem:[%s10750_s8 + $0x140] sm:$0xff]  }
 0x135   : > { %20803 = vst [vmem:[#allocation74_spill] sm:$0xff] %v12490_v58  ;;  %20805 = vst [vmem:[#allocation76_spill] sm:$0xff] %v12494_v45  ;;  %v12510_v34 = vadd.f32 %v20812_v19, %v1535_v23  ;;  %v12514_v39 = vadd.f32 %v20814_v14, %v1538_v30  ;;  %v20818_v21 = vunpack.c.h.bf16 %v20816_v11  ;;  %v20820_v16 = vunpack.c.l.bf16 %v20819_v43  ;;  %v20834_v4 = vld [vmem:[#allocation136_spill] sm:$0xff]  ;;  %v20837_v19 = vld [vmem:[#allocation138_spill] sm:$0xff] }
 0x136   : > { %20807 = vst [vmem:[#allocation78_spill] sm:$0xff] %v12498_v13  ;;  %20809 = vst [vmem:[#allocation80_spill] sm:$0xff] %v12502_v20  ;;  %v20821_v52 = vunpack.c.h.bf16 %v20819_v43  ;;  %v20823_v40 = vunpack.c.l.bf16 %v20822_v9  ;;  %v20824_v15 = vunpack.c.h.bf16 %v20822_v9  ;;  %v20826_v48 = vunpack.c.l.bf16 %v20825_v55  ;;  %v20843_v9 = vld [vmem:[#allocation142_spill] sm:$0xff]  ;;  %v20893_v61 = vld [vmem:[#allocation152_spill] sm:$0xff] }
 0x137   : > { %20811 = vst [vmem:[#allocation82_spill] sm:$0xff] %v12506_v31  ;;  %20813 = vst [vmem:[#allocation84_spill] sm:$0xff] %v12510_v34  ;;  %v1540_v2 = vadd.f32 %v20818_v21, %v20817_v37  ;;  %v20827_v30 = vunpack.c.h.bf16 %v20825_v55  ;;  %v20829_v26 = vunpack.c.l.bf16 %v20828_v53  ;;  %v20830_v54 = vunpack.c.h.bf16 %v20828_v53  ;;  %v20840_v21 = vld [vmem:[#allocation140_spill] sm:$0xff]  ;;  %v20871_v31 = vld [vmem:[#allocation135_spill] sm:$0xff] }
 0x138   : > { %20815 = vst [vmem:[#allocation61_spill] sm:$0xff] %v12514_v39  ;;  %v1543_v24 = vadd.f32 %v20821_v52, %v20820_v16  ;;  %v1546_v23 = vadd.f32 %v20824_v15, %v20823_v40  ;;  %v20832_v25 = vunpack.c.l.bf16 %v20831_v57  ;;  %v20833_v44 = vunpack.c.h.bf16 %v20831_v57  ;;  %20934 = vst [vmem:[#allocation106_spill] sm:$0xff] %v12903_v27  ;;  %v12956_v27 = vld [vmem:[%s10750_s8 + $0x1d0] sm:$0xff]  }
 0x139   : > { %v1549_v3 = vadd.f32 %v20827_v30, %v20826_v48  ;;  %v1552_v41 = vadd.f32 %v20830_v54, %v20829_v26  ;;  %v20835_v29 = vunpack.c.l.bf16 %v20834_v4  ;;  %v20836_v46 = vunpack.c.h.bf16 %v20834_v4  ;;  %v20846_v48 = vld [vmem:[#allocation144_spill] sm:$0xff]  ;;  %20941 = vst [vmem:[#allocation118_spill] sm:$0xff] %v12953_v49  ;;  %20942 = vst [vmem:[#allocation120_spill] sm:$0xff] %v12956_v27  ;;  %v13093_v27 = vld [vmem:[%s10750_s8 + $0x2a8] sm:$0xff]  }
 0x13a   : > { %v1555_v60 = vadd.f32 %v20833_v44, %v20832_v25  ;;  %v20838_v14 = vunpack.c.l.bf16 %v20837_v19  ;;  %v20839_v11 = vunpack.c.h.bf16 %v20837_v19  ;;  %v20841_v43 = vunpack.c.l.bf16 %v20840_v21  ;;  %v13056_v49 = vld [vmem:[%s10750_s8 + $0x270] sm:$0xff]   ;;  %20959 = vst [vmem:[#allocation124_spill] sm:$0xff] %v13066_v32  ;;  %20960 = vst [vmem:[#allocation126_spill] sm:$0xff] %v13073_v22  ;;  %v13126_v22 = vld [vmem:[%s10750_s8 + $0x2e0] sm:$0xff]  }
 0x13b   : > { %v1558_v62 = vadd.f32 %v20836_v46, %v20835_v29  ;;  %v20842_v16 = vunpack.c.h.bf16 %v20840_v21  ;;  %v20844_v40 = vunpack.c.l.bf16 %v20843_v9  ;;  %v20845_v15 = vunpack.c.h.bf16 %v20843_v9  ;;  %v20853_v46 = vld [vmem:[#allocation125_spill] sm:$0xff]  ;;  %20957 = vst [vmem:[#allocation121_spill] sm:$0xff] %v13056_v49  ;;  %20964 = vst [vmem:[#allocation134_spill] sm:$0xff] %v13093_v27  ;;  %v13116_v32 = vld [vmem:[%s10750_s8 + $0x2d0] sm:$0xff]  }
 0x13c   : > { %v1561_v37 = vadd.f32 %v20839_v11, %v20838_v14  ;;  %v20847_v30 = vunpack.c.l.bf16 %v20846_v48  ;;  %v20848_v53 = vunpack.c.h.bf16 %v20846_v48  ;;  %v20849_v54 = vunpack.c.l.bf16 %v11656_v28  ;;  %20966 = vst [vmem:[#allocation138_spill] sm:$0xff] %v13103_v38  ;;  %20969 = vst [vmem:[#allocation144_spill] sm:$0xff] %v13116_v32  ;;  %v13146_v27 = vld [vmem:[%s10750_s8 + $0x300] sm:$0xff]   ;;  %v13183_v38 = vld [vmem:[%s10750_s8 + $0x338] sm:$0xff]  }
 0x13d   : > { %v1564_v52 = vadd.f32 %v20842_v16, %v20841_v43  ;;  %v1567_v55 = vadd.f32 %v20845_v15, %v20844_v40  ;;  %v20850_v57 = vunpack.c.h.bf16 %v11656_v28  ;;  %v20851_v44 = vunpack.c.l.bf16 %v11666_v6  ;;  %v20857_v16 = vld [vmem:[#allocation149_spill] sm:$0xff]  ;;  %v20860_v28 = vld [vmem:[#allocation151_spill] sm:$0xff]  ;;  %20970 = vst [vmem:[#allocation125_spill] sm:$0xff] %v13123_v10 }
 0x13e   : > { %v1570_v26 = vadd.f32 %v20848_v53, %v20847_v30  ;;  %v20852_v4 = vunpack.c.h.bf16 %v11666_v6  ;;  %v20854_v19 = vunpack.c.l.bf16 %v20853_v46  ;;  %v20855_v11 = vunpack.c.l.bf16 %v11676_v17  ;;  %v20863_v6 = vld [vmem:[#allocation127_spill] sm:$0xff]  ;;  %20971 = vst [vmem:[#allocation149_spill] sm:$0xff] %v13126_v22  ;;  %20972 = vst [vmem:[#allocation151_spill] sm:$0xff] %v13133_v18  ;;  %v13176_v22 = vld [vmem:[%s10750_s8 + $0x330] sm:$0xff]  }
 0x13f   : > { %v1573_v25 = vadd.f32 %v20850_v57, %v20849_v54  ;;  %v20856_v21 = vunpack.c.h.bf16 %v11676_v17  ;;  %v20858_v9 = vunpack.c.l.bf16 %v20857_v16  ;;  %v20859_v40 = vunpack.c.h.bf16 %v20857_v16  ;;  %20973 = vst [vmem:[#allocation127_spill] sm:$0xff] %v13136_v36  ;;  %v13186_v18 = vld [vmem:[%s10750_s8 + $0x340] sm:$0xff]   ;;  %v13193_v49 = vld [vmem:[%s10750_s8 + $0x348] sm:$0xff]   ;;  %v13203_v10 = vld [vmem:[%s10750_s8 + $0x358] sm:$0xff]  }
 0x140   : > { %v1576_v29 = vadd.f32 %v20852_v4, %v20851_v44  ;;  %v1541_v14 = vadd.f32 %v20854_v19, %v1540_v2  ;;  %v20861_v48 = vunpack.c.l.bf16 %v20860_v28  ;;  %v20862_v30 = vunpack.c.h.bf16 %v20860_v28  ;;  %v20865_v44 = vld [vmem:[#allocation129_spill] sm:$0xff]  ;;  %v20867_v19 = vld [vmem:[#allocation131_spill] sm:$0xff]  ;;  %20986 = vst [vmem:[#allocation150_spill] sm:$0xff] %v13203_v10 }
 0x141   : > { %v1579_v43 = vadd.f32 %v20856_v21, %v20855_v11  ;;  %v1582_v15 = vadd.f32 %v20859_v40, %v20858_v9  ;;  %v20864_v54 = vunpack.c.l.bf16 %v20863_v6  ;;  %v20866_v2 = vunpack.c.l.bf16 %v20865_v44  ;;  %v20869_v11 = vld [vmem:[#allocation133_spill] sm:$0xff]  ;;  %20974 = vst [vmem:[#allocation129_spill] sm:$0xff] %v13143_v0  ;;  %20975 = vst [vmem:[#allocation131_spill] sm:$0xff] %v13146_v27  ;;  %v13196_v0 = vld [vmem:[%s10750_s8 + $0x350] sm:$0xff]  }
 0x142   : > { %v1585_v53 = vadd.f32 %v20862_v30, %v20861_v48  ;;  %v20868_v39 = vunpack.c.l.bf16 %v20867_v19  ;;  %v20870_v21 = vunpack.c.l.bf16 %v20869_v11  ;;  %v20872_v16 = vunpack.c.l.bf16 %v20871_v31  ;;  %v20873_v40 = vld [vmem:[#allocation137_spill] sm:$0xff]  ;;  %v20875_v48 = vld [vmem:[#allocation139_spill] sm:$0xff] }
 0x143   : > { %v1544_v57 = vadd.f32 %v20864_v54, %v1543_v24  ;;  %v1547_v4 = vadd.f32 %v20866_v2, %v1546_v23  ;;  %v20874_v20 = vunpack.c.l.bf16 %v20873_v40  ;;  %v20876_v30 = vunpack.c.l.bf16 %v20875_v48  ;;  %v20877_v24 = vld [vmem:[#allocation141_spill] sm:$0xff]  ;;  %v20879_v23 = vld [vmem:[#allocation143_spill] sm:$0xff]  ;;  %20978 = vst [vmem:[#allocation137_spill] sm:$0xff] %v13163_v50 }
 0x144   : > { %v1550_v17 = vadd.f32 %v20868_v39, %v1549_v3  ;;  %v1553_v34 = vadd.f32 %v20870_v21, %v1552_v41  ;;  %v1556_v9 = vadd.f32 %v20872_v16, %v1555_v60  ;;  %v20878_v54 = vunpack.c.l.bf16 %v20877_v24  ;;  %v20881_v39 = vld [vmem:[#allocation145_spill] sm:$0xff]  ;;  %v20883_v41 = vld [vmem:[#allocation146_spill] sm:$0xff]  ;;  %v20885_v16 = vld [vmem:[#allocation147_spill] sm:$0xff]  ;;  %20980 = vst [vmem:[#allocation141_spill] sm:$0xff] %v13173_v5 }
 0x145   : > { %v1559_v28 = vadd.f32 %v20874_v20, %v1558_v62  ;;  %v1562_v13 = vadd.f32 %v20876_v30, %v1561_v37  ;;  %v20880_v2 = vunpack.c.l.bf16 %v20879_v23  ;;  %v20882_v3 = vunpack.c.l.bf16 %v20881_v39  ;;  %v20889_v30 = vld [vmem:[#allocation148_spill] sm:$0xff]  ;;  %20981 = vst [vmem:[#allocation143_spill] sm:$0xff] %v13176_v22  ;;  %20982 = vst [vmem:[#allocation145_spill] sm:$0xff] %v13183_v38  ;;  %v13223_v27 = vld [vmem:[%s10750_s8 + $0x378] sm:$0xff]  }
 0x146   : > { %v1565_v45 = vadd.f32 %v20878_v54, %v1564_v52  ;;  %v20884_v21 = vunpack.c.l.bf16 %v20883_v41  ;;  %v20886_v7 = vunpack.c.l.bf16 %v20885_v16  ;;  %v20887_v62 = vunpack.c.h.bf16 %v20853_v46  ;;  %20983 = vst [vmem:[#allocation146_spill] sm:$0xff] %v13186_v18  ;;  %20984 = vst [vmem:[#allocation147_spill] sm:$0xff] %v13193_v49  ;;  %v13226_v5 = vld [vmem:[%s10750_s8 + $0x380] sm:$0xff]   ;;  %v13236_v18 = vld [vmem:[%s10750_s8 + $0x390] sm:$0xff]  }
 0x147   : > { %v1568_v58 = vadd.f32 %v20880_v2, %v1567_v55  ;;  %v1571_v12 = vadd.f32 %v20882_v3, %v1570_v26  ;;  %v20890_v52 = vunpack.c.l.bf16 %v20889_v30  ;;  %v20892_v55 = vunpack.c.l.bf16 %v20891_v63  ;;  %20985 = vst [vmem:[#allocation148_spill] sm:$0xff] %v13196_v0  ;;  %20990 = vst [vmem:[#allocation171_spill] sm:$0xff] %v13223_v27  ;;  %v13243_v50 = vld [vmem:[%s10750_s8 + $0x398] sm:$0xff]   ;;  %v13246_v49 = vld [vmem:[%s10750_s8 + $0x3a0] sm:$0xff]  }
 0x148   : > { %v1574_v60 = vadd.f32 %v20884_v21, %v1573_v25  ;;  %v1577_v20 = vadd.f32 %v20886_v7, %v1576_v29  ;;  %v12608_v37 = vadd.f32 %v20887_v62, %v1541_v14  ;;  %v20894_v26 = vunpack.c.l.bf16 %v20893_v61  ;;  %v12633_v21 = vld [vmem:[%s10750_s8] sm:$0xff]   ;;  %v12674_v62 = vld [vmem:[%s10750_s8 + $0x18] sm:$0xff]   ;;  %20991 = vst [vmem:[#allocation172_spill] sm:$0xff] %v13226_v5  ;;  %20993 = vst [vmem:[#allocation174_spill] sm:$0xff] %v13236_v18 }
 0x149   : > { %v1580_v54 = vadd.f32 %v20890_v52, %v1579_v43  ;;  %v1583_v2 = vadd.f32 %v20892_v55, %v1582_v15  ;;  %v20895_v59 = vunpack.c.h.bf16 %v20863_v6  ;;  %v20897_v7 = vunpack.c.h.bf16 %v20865_v44  ;;  %v12677_v52 = vld [vmem:[%s10750_s8 + $0x20] sm:$0xff]   ;;  %v12696_v55 = vld [vmem:[%s10750_s8 + $0x30] sm:$0xff]   ;;  %20994 = vst [vmem:[#allocation175_spill] sm:$0xff] %v13243_v50  ;;  %20995 = vst [vmem:[#allocation176_spill] sm:$0xff] %v13246_v49 }
 0x14a   : > { %20888 = vst [vmem:[#allocation86_spill] sm:$0xff] %v12608_v37  ;;  %v1586_v3 = vadd.f32 %v20894_v26, %v1585_v53  ;;  %v20899_v46 = vunpack.c.h.bf16 %v20867_v19  ;;  %v20901_v43 = vunpack.c.h.bf16 %v20869_v11  ;;  %v20903_v53 = vunpack.c.h.bf16 %v20871_v31  ;;  %v12655_v11 = vld [vmem:[%s10750_s8 + $0x10] sm:$0xff]   ;;  %v12706_v26 = vld [vmem:[%s10750_s8 + $0x40] sm:$0xff]   ;;  %v13253_v32 = vld [vmem:[%s10750_s8 + $0x3a8] sm:$0xff]  }
 0x14b   : > { %v12618_v25 = vadd.f32 %v20895_v59, %v1544_v57  ;;  %v12622_v29 = vadd.f32 %v20897_v7, %v1547_v4  ;;  %v20905_v59 = vunpack.c.h.bf16 %v20873_v40  ;;  %v20907_v44 = vunpack.c.h.bf16 %v20875_v48  ;;  %v12733_v7 = vld [vmem:[%s10750_s8 + $0x68] sm:$0xff]   ;;  %v12856_v37 = vld [vmem:[%s10750_s8 + $0x130] sm:$0xff]   ;;  %20996 = vst [vmem:[#allocation177_spill] sm:$0xff] %v13253_v32  ;;  %v13263_v38 = vld [vmem:[%s10750_s8 + $0x3b8] sm:$0xff]  }
 0x14c   : > { %v12626_v14 = vadd.f32 %v20899_v46, %v1550_v17  ;;  %v12630_v15 = vadd.f32 %v20901_v43, %v1553_v34  ;;  %v12637_v6 = vadd.f32 %v20903_v53, %v1556_v9  ;;  %v20909_v19 = vunpack.c.h.bf16 %v20877_v24  ;;  %v12652_v17 = vld [vmem:[%s10750_s8 + $0x8] sm:$0xff]   ;;  %v12756_v46 = vld [vmem:[%s10750_s8 + $0x90] sm:$0xff]   ;;  %v12766_v43 = vld [vmem:[%s10750_s8 + $0xa0] sm:$0xff]   ;;  %20927 = vst [vmem:[#allocation92_spill] sm:$0xff] %v12856_v37 }
 0x14d   : > { %20896 = vst [vmem:[#allocation88_spill] sm:$0xff] %v12618_v25  ;;  %20898 = vst [vmem:[#allocation90_spill] sm:$0xff] %v12622_v29  ;;  %v12641_v57 = vadd.f32 %v20905_v59, %v1559_v28  ;;  %v12645_v4 = vadd.f32 %v20907_v44, %v1562_v13  ;;  %v20911_v31 = vunpack.c.h.bf16 %v20879_v23  ;;  %v20913_v40 = vunpack.c.h.bf16 %v20881_v39  ;;  %v12713_v53 = vld [vmem:[%s10750_s8 + $0x48] sm:$0xff]   ;;  %v12716_v59 = vld [vmem:[%s10750_s8 + $0x50] sm:$0xff]  }
 0x14e   : > { %20900 = vst [vmem:[#allocation63_spill] sm:$0xff] %v12626_v14  ;;  %20902 = vst [vmem:[#allocation65_spill] sm:$0xff] %v12630_v15  ;;  %v12649_v34 = vadd.f32 %v20909_v19, %v1565_v45  ;;  %v20915_v13 = vunpack.c.h.bf16 %v20883_v41  ;;  %v20917_v45 = vunpack.c.h.bf16 %v20885_v16  ;;  %v20923_v41 = vunpack.c.h.bf16 %v20893_v61  ;;  %v12703_v61 = vld [vmem:[%s10750_s8 + $0x38] sm:$0xff]   ;;  %v12776_v16 = vld [vmem:[%s10750_s8 + $0xb0] sm:$0xff]  }
 0x14f   : > { %20904 = vst [vmem:[#allocation67_spill] sm:$0xff] %v12637_v6  ;;  %20906 = vst [vmem:[#allocation69_spill] sm:$0xff] %v12641_v57  ;;  %v12659_v9 = vadd.f32 %v20911_v31, %v1568_v58  ;;  %v12663_v28 = vadd.f32 %v20913_v40, %v1571_v12  ;;  %v20919_v58 = vunpack.c.h.bf16 %v20889_v30  ;;  %v20921_v12 = vunpack.c.h.bf16 %v20891_v63  ;;  %v12746_v63 = vld [vmem:[%s10750_s8 + $0x80] sm:$0xff]   ;;  %v12763_v19 = vld [vmem:[%s10750_s8 + $0x98] sm:$0xff]  }
 0x150   : > { %20908 = vst [vmem:[#allocation71_spill] sm:$0xff] %v12645_v4  ;;  %20910 = vst [vmem:[#allocation73_spill] sm:$0xff] %v12649_v34  ;;  %v12667_v48 = vadd.f32 %v20915_v13, %v1574_v60  ;;  %v12671_v24 = vadd.f32 %v20917_v45, %v1577_v20  ;;  %v12689_v60 = vadd.f32 %v20923_v41, %v1586_v3  ;;  %v12693_v20 = vld [vmem:[%s10750_s8 + $0x28] sm:$0xff]   ;;  %v12723_v13 = vld [vmem:[%s10750_s8 + $0x58] sm:$0xff]  }
 0x151   : > { %20912 = vst [vmem:[#allocation75_spill] sm:$0xff] %v12659_v9  ;;  %20914 = vst [vmem:[#allocation77_spill] sm:$0xff] %v12663_v28  ;;  %v12681_v23 = vadd.f32 %v20919_v58, %v1580_v54  ;;  %v12685_v39 = vadd.f32 %v20921_v12, %v1583_v2  ;;  %v12726_v45 = vld [vmem:[%s10750_s8 + $0x60] sm:$0xff]   ;;  %v12736_v3 = vld [vmem:[%s10750_s8 + $0x70] sm:$0xff]  }
 0x152   : > { %20916 = vst [vmem:[#allocation79_spill] sm:$0xff] %v12667_v48  ;;  %20918 = vst [vmem:[#allocation81_spill] sm:$0xff] %v12671_v24  ;;  %v12743_v12 = vld [vmem:[%s10750_s8 + $0x78] sm:$0xff]   ;;  %v12753_v2 = vld [vmem:[%s10750_s8 + $0x88] sm:$0xff]  }
 0x153   : > { %20920 = vst [vmem:[#allocation83_spill] sm:$0xff] %v12681_v23  ;;  %20922 = vst [vmem:[#allocation85_spill] sm:$0xff] %v12685_v39  ;;  %v12773_v58 = vld [vmem:[%s10750_s8 + $0xa8] sm:$0xff]   ;;  %v12783_v40 = vld [vmem:[%s10750_s8 + $0xb8] sm:$0xff]  }
 0x154   : > { %20924 = vst [vmem:[#allocation87_spill] sm:$0xff] %v12689_v60  ;;  %v12786_v39 = vld [vmem:[%s10750_s8 + $0xc0] sm:$0xff]   ;;  %v12793_v41 = vld [vmem:[%s10750_s8 + $0xc8] sm:$0xff]   ;;  %v12796_v24 = vld [vmem:[%s10750_s8 + $0xd0] sm:$0xff]  }
 0x155   : > { %v12803_v30 = vld [vmem:[%s10750_s8 + $0xd8] sm:$0xff]   ;;  %v12806_v28 = vld [vmem:[%s10750_s8 + $0xe0] sm:$0xff]   ;;  %v12813_v54 = vld [vmem:[%s10750_s8 + $0xe8] sm:$0xff]   ;;  %20998 = vst [vmem:[#allocation179_spill] sm:$0xff] %v13263_v38 }
 0x156   : > { %v12816_v34 = vld [vmem:[%s10750_s8 + $0xf0] sm:$0xff]   ;;  %v12823_v23 = vld [vmem:[%s10750_s8 + $0xf8] sm:$0xff]   ;;  %v12826_v57 = vld [vmem:[%s10750_s8 + $0x100] sm:$0xff]  }
 0x157   : > { %v12833_v31 = vld [vmem:[%s10750_s8 + $0x108] sm:$0xff]   ;;  %v12836_v15 = vld [vmem:[%s10750_s8 + $0x110] sm:$0xff]   ;;  %v12843_v9 = vld [vmem:[%s10750_s8 + $0x118] sm:$0xff]  }
 0x158   : > { %20925 = vst [vmem:[#allocation89_spill] sm:$0xff] %v12836_v15  ;;  %20926 = vst [vmem:[#allocation91_spill] sm:$0xff] %v12843_v9  ;;  %v12846_v29 = vld [vmem:[%s10750_s8 + $0x120] sm:$0xff]   ;;  %v12853_v44 = vld [vmem:[%s10750_s8 + $0x128] sm:$0xff]  }
 0x159   : > { %v12863_v6 = vld [vmem:[%s10750_s8 + $0x138] sm:$0xff]   ;;  %v12873_v60 = vld [vmem:[%s10750_s8 + $0x148] sm:$0xff]   ;;  %v12976_v9 = vld [vmem:[%s10750_s8 + $0x1f0] sm:$0xff]  }
 0x15a   : > { %20928 = vst [vmem:[#allocation94_spill] sm:$0xff] %v12863_v6  ;;  %20929 = vst [vmem:[#allocation96_spill] sm:$0xff] %v12873_v60  ;;  %v12883_v25 = vld [vmem:[%s10750_s8 + $0x158] sm:$0xff]   ;;  %v12893_v48 = vld [vmem:[%s10750_s8 + $0x168] sm:$0xff]  }
 0x15b   : > { %20931 = vst [vmem:[#allocation100_spill] sm:$0xff] %v12883_v25  ;;  %20932 = vst [vmem:[#allocation102_spill] sm:$0xff] %v12893_v48  ;;  %v12913_v4 = vld [vmem:[%s10750_s8 + $0x188] sm:$0xff]   ;;  %v12966_v6 = vld [vmem:[%s10750_s8 + $0x1e0] sm:$0xff]   ;;  %v21244_v48 = vunpack.c.h.bf16 %v12633_v21 }
 0x15c   : > { %20935 = vst [vmem:[#allocation108_spill] sm:$0xff] %v12913_v4  ;;  %v12933_v14 = vld [vmem:[%s10750_s8 + $0x1a8] sm:$0xff]   ;;  %20945 = vst [vmem:[#allocation97_spill] sm:$0xff] %v12976_v9  ;;  %v13016_v37 = vld [vmem:[%s10750_s8 + $0x230] sm:$0xff]  }
 0x15d   : > { %20938 = vst [vmem:[#allocation114_spill] sm:$0xff] %v12933_v14  ;;  %20951 = vst [vmem:[#allocation109_spill] sm:$0xff] %v13016_v37  ;;  %v13026_v15 = vld [vmem:[%s10750_s8 + $0x240] sm:$0xff]   ;;  %v13053_v25 = vld [vmem:[%s10750_s8 + $0x268] sm:$0xff]  }
 0x15e   : > { %20956 = vst [vmem:[#allocation119_spill] sm:$0xff] %v13053_v25  ;;  %v13076_v14 = vld [vmem:[%s10750_s8 + $0x290] sm:$0xff]   ;;  %v13106_v25 = vld [vmem:[%s10750_s8 + $0x2c0] sm:$0xff]   ;;  %v13113_v9 = vld [vmem:[%s10750_s8 + $0x2c8] sm:$0xff]  }
 0x15f   : > { %20961 = vst [vmem:[#allocation128_spill] sm:$0xff] %v13076_v14  ;;  %v13096_v4 = vld [vmem:[%s10750_s8 + $0x2b0] sm:$0xff]   ;;  %20967 = vst [vmem:[#allocation140_spill] sm:$0xff] %v13106_v25  ;;  %v13153_v37 = vld [vmem:[%s10750_s8 + $0x308] sm:$0xff]  }
 0x160   : > { %20965 = vst [vmem:[#allocation136_spill] sm:$0xff] %v13096_v4  ;;  %20968 = vst [vmem:[#allocation142_spill] sm:$0xff] %v13113_v9  ;;  %v13156_v25 = vld [vmem:[%s10750_s8 + $0x310] sm:$0xff]   ;;  %v13166_v9 = vld [vmem:[%s10750_s8 + $0x320] sm:$0xff]  }
 0x161   : > { %20976 = vst [vmem:[#allocation133_spill] sm:$0xff] %v13153_v37  ;;  %20977 = vst [vmem:[#allocation135_spill] sm:$0xff] %v13156_v25  ;;  %v13206_v37 = vld [vmem:[%s10750_s8 + $0x360] sm:$0xff]   ;;  %v13213_v14 = vld [vmem:[%s10750_s8 + $0x368] sm:$0xff]  }
 0x162   : > { %20979 = vst [vmem:[#allocation139_spill] sm:$0xff] %v13166_v9  ;;  %20987 = vst [vmem:[#allocation152_spill] sm:$0xff] %v13206_v37  ;;  %v13216_v9 = vld [vmem:[%s10750_s8 + $0x370] sm:$0xff]   ;;  %v13233_v4 = vld [vmem:[%s10750_s8 + $0x388] sm:$0xff]  }
 0x163   : > { %20988 = vst [vmem:[#allocation169_spill] sm:$0xff] %v13213_v14  ;;  %20989 = vst [vmem:[#allocation170_spill] sm:$0xff] %v13216_v9  ;;  %v13256_v37 = vld [vmem:[%s10750_s8 + $0x3b0] sm:$0xff]   ;;  %v13266_v14 = vld [vmem:[%s10750_s8 + $0x3c0] sm:$0xff]  }
 0x164   : > { %20992 = vst [vmem:[#allocation173_spill] sm:$0xff] %v13233_v4  ;;  %20997 = vst [vmem:[#allocation178_spill] sm:$0xff] %v13256_v37  ;;  %v13273_v36 = vld [vmem:[%s10750_s8 + $0x3c8] sm:$0xff]   ;;  %v13276_v5 = vld [vmem:[%s10750_s8 + $0x3d0] sm:$0xff]  }
 0x165   : > { %20999 = vst [vmem:[#allocation180_spill] sm:$0xff] %v13266_v14  ;;  %21000 = vst [vmem:[#allocation181_spill] sm:$0xff] %v13273_v36  ;;  %v13283_v10 = vld [vmem:[%s10750_s8 + $0x3d8] sm:$0xff]   ;;  %v13286_v4 = vld [vmem:[%s10750_s8 + $0x3e0] sm:$0xff]  }
 0x166   : > { %21001 = vst [vmem:[#allocation182_spill] sm:$0xff] %v13276_v5  ;;  %21002 = vst [vmem:[#allocation183_spill] sm:$0xff] %v13283_v10  ;;  %v13293_v25 = vld [vmem:[%s10750_s8 + $0x3e8] sm:$0xff]   ;;  %v13296_v49 = vld [vmem:[%s10750_s8 + $0x3f0] sm:$0xff]  }
 0x167   : > { %21003 = vst [vmem:[#allocation184_spill] sm:$0xff] %v13286_v4  ;;  %21004 = vst [vmem:[#allocation185_spill] sm:$0xff] %v13293_v25  ;;  %v13303_v27 = vld [vmem:[%s10750_s8 + $0x3f8] sm:$0xff]   ;;  %v13306_v32 = vld [vmem:[%s10750_s8 + $0x400] sm:$0xff]  }
 0x168   : > { %21005 = vst [vmem:[#allocation186_spill] sm:$0xff] %v13296_v49  ;;  %21006 = vst [vmem:[#allocation187_spill] sm:$0xff] %v13303_v27  ;;  %v13313_v22 = vld [vmem:[%s10750_s8 + $0x408] sm:$0xff]   ;;  %v13316_v14 = vld [vmem:[%s10750_s8 + $0x410] sm:$0xff]  }
 0x169   : > { %21007 = vst [vmem:[#allocation188_spill] sm:$0xff] %v13306_v32  ;;  %21008 = vst [vmem:[#allocation189_spill] sm:$0xff] %v13313_v22  ;;  %v13323_v50 = vld [vmem:[%s10750_s8 + $0x418] sm:$0xff]   ;;  %v13326_v36 = vld [vmem:[%s10750_s8 + $0x420] sm:$0xff]  }
 0x16a   : > { %21009 = vst [vmem:[#allocation190_spill] sm:$0xff] %v13316_v14  ;;  %21010 = vst [vmem:[#allocation191_spill] sm:$0xff] %v13323_v50  ;;  %v13333_v0 = vld [vmem:[%s10750_s8 + $0x428] sm:$0xff]   ;;  %v13336_v4 = vld [vmem:[%s10750_s8 + $0x430] sm:$0xff]  }
 0x16b   : > { %21011 = vst [vmem:[#allocation192_spill] sm:$0xff] %v13326_v36  ;;  %21012 = vst [vmem:[#allocation193_spill] sm:$0xff] %v13333_v0  ;;  %v13343_v38 = vld [vmem:[%s10750_s8 + $0x438] sm:$0xff]   ;;  %v13346_v25 = vld [vmem:[%s10750_s8 + $0x440] sm:$0xff]  }
 0x16c   : > { %21013 = vst [vmem:[#allocation194_spill] sm:$0xff] %v13336_v4  ;;  %21014 = vst [vmem:[#allocation195_spill] sm:$0xff] %v13343_v38  ;;  %v13353_v9 = vld [vmem:[%s10750_s8 + $0x448] sm:$0xff]   ;;  %v13356_v32 = vld [vmem:[%s10750_s8 + $0x450] sm:$0xff]  }
 0x16d   : > { %21015 = vst [vmem:[#allocation196_spill] sm:$0xff] %v13346_v25  ;;  %21016 = vst [vmem:[#allocation197_spill] sm:$0xff] %v13353_v9  ;;  %v13363_v10 = vld [vmem:[%s10750_s8 + $0x458] sm:$0xff]   ;;  %v13366_v22 = vld [vmem:[%s10750_s8 + $0x460] sm:$0xff]  }
 0x16e   : > { %21017 = vst [vmem:[#allocation198_spill] sm:$0xff] %v13356_v32  ;;  %21018 = vst [vmem:[#allocation199_spill] sm:$0xff] %v13363_v10  ;;  %v13373_v18 = vld [vmem:[%s10750_s8 + $0x468] sm:$0xff]   ;;  %v13376_v36 = vld [vmem:[%s10750_s8 + $0x470] sm:$0xff]  }
 0x16f   : > { %21019 = vst [vmem:[#allocation200_spill] sm:$0xff] %v13366_v22  ;;  %21020 = vst [vmem:[#allocation201_spill] sm:$0xff] %v13373_v18  ;;  %v13383_v27 = vld [vmem:[%s10750_s8 + $0x478] sm:$0xff]   ;;  %v13386_v0 = vld [vmem:[%s10750_s8 + $0x480] sm:$0xff]  }
 0x170   : > { %21021 = vst [vmem:[#allocation202_spill] sm:$0xff] %v13376_v36  ;;  %21022 = vst [vmem:[#allocation203_spill] sm:$0xff] %v13383_v27  ;;  %v13393_v37 = vld [vmem:[%s10750_s8 + $0x488] sm:$0xff]   ;;  %v13396_v25 = vld [vmem:[%s10750_s8 + $0x490] sm:$0xff]  }
 0x171   : > { %21023 = vst [vmem:[#allocation204_spill] sm:$0xff] %v13386_v0  ;;  %21024 = vst [vmem:[#allocation205_spill] sm:$0xff] %v13393_v37  ;;  %v13403_v50 = vld [vmem:[%s10750_s8 + $0x498] sm:$0xff]   ;;  %v13406_v9 = vld [vmem:[%s10750_s8 + $0x4a0] sm:$0xff]  }
 0x172   : > { %21025 = vst [vmem:[#allocation206_spill] sm:$0xff] %v13396_v25  ;;  %21026 = vst [vmem:[#allocation207_spill] sm:$0xff] %v13403_v50  ;;  %v13413_v5 = vld [vmem:[%s10750_s8 + $0x4a8] sm:$0xff]   ;;  %v13416_v22 = vld [vmem:[%s10750_s8 + $0x4b0] sm:$0xff]  }
 0x173   : > { %21027 = vst [vmem:[#allocation208_spill] sm:$0xff] %v13406_v9  ;;  %21028 = vst [vmem:[#allocation209_spill] sm:$0xff] %v13413_v5  ;;  %v13423_v38 = vld [vmem:[%s10750_s8 + $0x4b8] sm:$0xff]   ;;  %v13426_v18 = vld [vmem:[%s10750_s8 + $0x4c0] sm:$0xff]  }
 0x174   : > { %21029 = vst [vmem:[#allocation210_spill] sm:$0xff] %v13416_v22  ;;  %21030 = vst [vmem:[#allocation211_spill] sm:$0xff] %v13423_v38  ;;  %v13433_v49 = vld [vmem:[%s10750_s8 + $0x4c8] sm:$0xff]   ;;  %v13436_v0 = vld [vmem:[%s10750_s8 + $0x4d0] sm:$0xff]  }
 0x175   : > { %21031 = vst [vmem:[#allocation212_spill] sm:$0xff] %v13426_v18  ;;  %21032 = vst [vmem:[#allocation213_spill] sm:$0xff] %v13433_v49  ;;  %v13443_v10 = vld [vmem:[%s10750_s8 + $0x4d8] sm:$0xff]   ;;  %v13446_v37 = vld [vmem:[%s10750_s8 + $0x4e0] sm:$0xff]  }
 0x176   : > { %21033 = vst [vmem:[#allocation214_spill] sm:$0xff] %v13436_v0  ;;  %21034 = vst [vmem:[#allocation215_spill] sm:$0xff] %v13443_v10  ;;  %v13453_v14 = vld [vmem:[%s10750_s8 + $0x4e8] sm:$0xff]   ;;  %v13456_v9 = vld [vmem:[%s10750_s8 + $0x4f0] sm:$0xff]  }
 0x177   : > { %21035 = vst [vmem:[#allocation216_spill] sm:$0xff] %v13446_v37  ;;  %21036 = vst [vmem:[#allocation217_spill] sm:$0xff] %v13453_v14  ;;  %v13463_v27 = vld [vmem:[%s10750_s8 + $0x4f8] sm:$0xff]   ;;  %v13466_v5 = vld [vmem:[%s10750_s8 + $0x500] sm:$0xff]  }
 0x178   : > { %21037 = vst [vmem:[#allocation218_spill] sm:$0xff] %v13456_v9  ;;  %21038 = vst [vmem:[#allocation219_spill] sm:$0xff] %v13463_v27  ;;  %v13473_v4 = vld [vmem:[%s10750_s8 + $0x508] sm:$0xff]   ;;  %v13476_v18 = vld [vmem:[%s10750_s8 + $0x510] sm:$0xff]  }
 0x179   : > { %21039 = vst [vmem:[#allocation220_spill] sm:$0xff] %v13466_v5  ;;  %21040 = vst [vmem:[#allocation221_spill] sm:$0xff] %v13473_v4  ;;  %v13483_v50 = vld [vmem:[%s10750_s8 + $0x518] sm:$0xff]   ;;  %v13486_v49 = vld [vmem:[%s10750_s8 + $0x520] sm:$0xff]  }
 0x17a   : > { %21041 = vst [vmem:[#allocation222_spill] sm:$0xff] %v13476_v18  ;;  %21042 = vst [vmem:[#allocation223_spill] sm:$0xff] %v13483_v50  ;;  %v13493_v32 = vld [vmem:[%s10750_s8 + $0x528] sm:$0xff]   ;;  %v13496_v37 = vld [vmem:[%s10750_s8 + $0x530] sm:$0xff]  }
 0x17b   : > { %21043 = vst [vmem:[#allocation224_spill] sm:$0xff] %v13486_v49  ;;  %21044 = vst [vmem:[#allocation225_spill] sm:$0xff] %v13493_v32  ;;  %v13503_v38 = vld [vmem:[%s10750_s8 + $0x538] sm:$0xff]   ;;  %v13506_v14 = vld [vmem:[%s10750_s8 + $0x540] sm:$0xff]  }
 0x17c   : > { %21045 = vst [vmem:[#allocation226_spill] sm:$0xff] %v13496_v37  ;;  %21046 = vst [vmem:[#allocation227_spill] sm:$0xff] %v13503_v38  ;;  %v13513_v36 = vld [vmem:[%s10750_s8 + $0x548] sm:$0xff]   ;;  %v13516_v27 = vld [vmem:[%s10750_s8 + $0x550] sm:$0xff]  }
 0x17d   : > { %21047 = vst [vmem:[#allocation228_spill] sm:$0xff] %v13506_v14  ;;  %21048 = vst [vmem:[#allocation229_spill] sm:$0xff] %v13513_v36  ;;  %v13523_v10 = vld [vmem:[%s10750_s8 + $0x558] sm:$0xff]   ;;  %v13526_v4 = vld [vmem:[%s10750_s8 + $0x560] sm:$0xff]  }
 0x17e   : > { %21049 = vst [vmem:[#allocation230_spill] sm:$0xff] %v13516_v27  ;;  %21050 = vst [vmem:[#allocation231_spill] sm:$0xff] %v13523_v10  ;;  %v13533_v25 = vld [vmem:[%s10750_s8 + $0x568] sm:$0xff]   ;;  %v13536_v49 = vld [vmem:[%s10750_s8 + $0x570] sm:$0xff]  }
 0x17f   : > { %21051 = vst [vmem:[#allocation232_spill] sm:$0xff] %v13526_v4  ;;  %21052 = vst [vmem:[#allocation233_spill] sm:$0xff] %v13533_v25  ;;  %v13543_v5 = vld [vmem:[%s10750_s8 + $0x578] sm:$0xff]   ;;  %v13546_v32 = vld [vmem:[%s10750_s8 + $0x580] sm:$0xff]  }
 0x180   : > { %21053 = vst [vmem:[#allocation234_spill] sm:$0xff] %v13536_v49  ;;  %21054 = vst [vmem:[#allocation235_spill] sm:$0xff] %v13543_v5  ;;  %v13553_v22 = vld [vmem:[%s10750_s8 + $0x588] sm:$0xff]   ;;  %v13556_v14 = vld [vmem:[%s10750_s8 + $0x590] sm:$0xff]  }
 0x181   : > { %21055 = vst [vmem:[#allocation236_spill] sm:$0xff] %v13546_v32  ;;  %21056 = vst [vmem:[#allocation237_spill] sm:$0xff] %v13553_v22  ;;  %v13563_v50 = vld [vmem:[%s10750_s8 + $0x598] sm:$0xff]   ;;  %v13566_v36 = vld [vmem:[%s10750_s8 + $0x5a0] sm:$0xff]  }
 0x182   : > { %21057 = vst [vmem:[#allocation238_spill] sm:$0xff] %v13556_v14  ;;  %21058 = vst [vmem:[#allocation239_spill] sm:$0xff] %v13563_v50  ;;  %v13573_v0 = vld [vmem:[%s10750_s8 + $0x5a8] sm:$0xff]   ;;  %v13576_v4 = vld [vmem:[%s10750_s8 + $0x5b0] sm:$0xff]  }
 0x183   : > { %21059 = vst [vmem:[#allocation240_spill] sm:$0xff] %v13566_v36  ;;  %21060 = vst [vmem:[#allocation241_spill] sm:$0xff] %v13573_v0  ;;  %v13583_v38 = vld [vmem:[%s10750_s8 + $0x5b8] sm:$0xff]   ;;  %v13586_v25 = vld [vmem:[%s10750_s8 + $0x5c0] sm:$0xff]  }
 0x184   : > { %21061 = vst [vmem:[#allocation242_spill] sm:$0xff] %v13576_v4  ;;  %21062 = vst [vmem:[#allocation243_spill] sm:$0xff] %v13583_v38  ;;  %v13593_v9 = vld [vmem:[%s10750_s8 + $0x5c8] sm:$0xff]   ;;  %v13596_v32 = vld [vmem:[%s10750_s8 + $0x5d0] sm:$0xff]  }
 0x185   : > { %21063 = vst [vmem:[#allocation244_spill] sm:$0xff] %v13586_v25  ;;  %21064 = vst [vmem:[#allocation245_spill] sm:$0xff] %v13593_v9  ;;  %v13603_v10 = vld [vmem:[%s10750_s8 + $0x5d8] sm:$0xff]   ;;  %v13606_v22 = vld [vmem:[%s10750_s8 + $0x5e0] sm:$0xff]  }
 0x186   : > { %21065 = vst [vmem:[#allocation246_spill] sm:$0xff] %v13596_v32  ;;  %21066 = vst [vmem:[#allocation247_spill] sm:$0xff] %v13603_v10  ;;  %v13613_v18 = vld [vmem:[%s10750_s8 + $0x5e8] sm:$0xff]   ;;  %v13616_v36 = vld [vmem:[%s10750_s8 + $0x5f0] sm:$0xff]  }
 0x187   : > { %21067 = vst [vmem:[#allocation248_spill] sm:$0xff] %v13606_v22  ;;  %21068 = vst [vmem:[#allocation249_spill] sm:$0xff] %v13613_v18  ;;  %v13623_v5 = vld [vmem:[%s10750_s8 + $0x5f8] sm:$0xff]   ;;  %v13626_v0 = vld [vmem:[%s10750_s8 + $0x600] sm:$0xff]  }
 0x188   : > { %21069 = vst [vmem:[#allocation250_spill] sm:$0xff] %v13616_v36  ;;  %21070 = vst [vmem:[#allocation251_spill] sm:$0xff] %v13623_v5  ;;  %v13633_v37 = vld [vmem:[%s10750_s8 + $0x608] sm:$0xff]   ;;  %v13636_v25 = vld [vmem:[%s10750_s8 + $0x610] sm:$0xff]  }
 0x189   : > { %21071 = vst [vmem:[#allocation252_spill] sm:$0xff] %v13626_v0  ;;  %21072 = vst [vmem:[#allocation253_spill] sm:$0xff] %v13633_v37  ;;  %v13643_v50 = vld [vmem:[%s10750_s8 + $0x618] sm:$0xff]   ;;  %v13646_v9 = vld [vmem:[%s10750_s8 + $0x620] sm:$0xff]  }
 0x18a   : > { %21073 = vst [vmem:[#allocation254_spill] sm:$0xff] %v13636_v25  ;;  %21074 = vst [vmem:[#allocation255_spill] sm:$0xff] %v13643_v50  ;;  %v13653_v27 = vld [vmem:[%s10750_s8 + $0x628] sm:$0xff]   ;;  %v13656_v22 = vld [vmem:[%s10750_s8 + $0x630] sm:$0xff]  }
 0x18b   : > { %21075 = vst [vmem:[#allocation256_spill] sm:$0xff] %v13646_v9  ;;  %21076 = vst [vmem:[#allocation257_spill] sm:$0xff] %v13653_v27  ;;  %v13663_v38 = vld [vmem:[%s10750_s8 + $0x638] sm:$0xff]   ;;  %v13666_v18 = vld [vmem:[%s10750_s8 + $0x640] sm:$0xff]  }
 0x18c   : > { %21077 = vst [vmem:[#allocation258_spill] sm:$0xff] %v13656_v22  ;;  %21078 = vst [vmem:[#allocation259_spill] sm:$0xff] %v13663_v38  ;;  %v13673_v49 = vld [vmem:[%s10750_s8 + $0x648] sm:$0xff]   ;;  %v13676_v0 = vld [vmem:[%s10750_s8 + $0x650] sm:$0xff]  }
 0x18d   : > { %21079 = vst [vmem:[#allocation260_spill] sm:$0xff] %v13666_v18  ;;  %21080 = vst [vmem:[#allocation261_spill] sm:$0xff] %v13673_v49  ;;  %v13683_v10 = vld [vmem:[%s10750_s8 + $0x658] sm:$0xff]   ;;  %v13686_v37 = vld [vmem:[%s10750_s8 + $0x660] sm:$0xff]  }
 0x18e   : > { %21081 = vst [vmem:[#allocation262_spill] sm:$0xff] %v13676_v0  ;;  %21082 = vst [vmem:[#allocation263_spill] sm:$0xff] %v13683_v10  ;;  %v13693_v14 = vld [vmem:[%s10750_s8 + $0x668] sm:$0xff]   ;;  %v13696_v9 = vld [vmem:[%s10750_s8 + $0x670] sm:$0xff]  }
 0x18f   : > { %21083 = vst [vmem:[#allocation264_spill] sm:$0xff] %v13686_v37  ;;  %21084 = vst [vmem:[#allocation265_spill] sm:$0xff] %v13693_v14  ;;  %v13703_v5 = vld [vmem:[%s10750_s8 + $0x678] sm:$0xff]   ;;  %v13706_v27 = vld [vmem:[%s10750_s8 + $0x680] sm:$0xff]  }
 0x190   : > { %21085 = vst [vmem:[#allocation266_spill] sm:$0xff] %v13696_v9  ;;  %21086 = vst [vmem:[#allocation267_spill] sm:$0xff] %v13703_v5  ;;  %v13713_v4 = vld [vmem:[%s10750_s8 + $0x688] sm:$0xff]   ;;  %v13716_v18 = vld [vmem:[%s10750_s8 + $0x690] sm:$0xff]  }
 0x191   : > { %21087 = vst [vmem:[#allocation268_spill] sm:$0xff] %v13706_v27  ;;  %21088 = vst [vmem:[#allocation269_spill] sm:$0xff] %v13713_v4  ;;  %v13723_v50 = vld [vmem:[%s10750_s8 + $0x698] sm:$0xff]   ;;  %v13726_v49 = vld [vmem:[%s10750_s8 + $0x6a0] sm:$0xff]  }
 0x192   : > { %21089 = vst [vmem:[#allocation270_spill] sm:$0xff] %v13716_v18  ;;  %21090 = vst [vmem:[#allocation271_spill] sm:$0xff] %v13723_v50  ;;  %v13733_v32 = vld [vmem:[%s10750_s8 + $0x6a8] sm:$0xff]   ;;  %v13736_v37 = vld [vmem:[%s10750_s8 + $0x6b0] sm:$0xff]  }
 0x193   : > { %21091 = vst [vmem:[#allocation272_spill] sm:$0xff] %v13726_v49  ;;  %21092 = vst [vmem:[#allocation273_spill] sm:$0xff] %v13733_v32  ;;  %v13743_v38 = vld [vmem:[%s10750_s8 + $0x6b8] sm:$0xff]   ;;  %v13746_v14 = vld [vmem:[%s10750_s8 + $0x6c0] sm:$0xff]  }
 0x194   : > { %21093 = vst [vmem:[#allocation274_spill] sm:$0xff] %v13736_v37  ;;  %21094 = vst [vmem:[#allocation275_spill] sm:$0xff] %v13743_v38  ;;  %v13753_v36 = vld [vmem:[%s10750_s8 + $0x6c8] sm:$0xff]   ;;  %v13756_v27 = vld [vmem:[%s10750_s8 + $0x6d0] sm:$0xff]  }
 0x195   : > { %21095 = vst [vmem:[#allocation276_spill] sm:$0xff] %v13746_v14  ;;  %21096 = vst [vmem:[#allocation277_spill] sm:$0xff] %v13753_v36  ;;  %v13763_v10 = vld [vmem:[%s10750_s8 + $0x6d8] sm:$0xff]   ;;  %v13766_v4 = vld [vmem:[%s10750_s8 + $0x6e0] sm:$0xff]  }
 0x196   : > { %21097 = vst [vmem:[#allocation278_spill] sm:$0xff] %v13756_v27  ;;  %21098 = vst [vmem:[#allocation279_spill] sm:$0xff] %v13763_v10  ;;  %v13773_v25 = vld [vmem:[%s10750_s8 + $0x6e8] sm:$0xff]   ;;  %v13776_v49 = vld [vmem:[%s10750_s8 + $0x6f0] sm:$0xff]  }
 0x197   : > { %21099 = vst [vmem:[#allocation280_spill] sm:$0xff] %v13766_v4  ;;  %21100 = vst [vmem:[#allocation281_spill] sm:$0xff] %v13773_v25  ;;  %v13783_v5 = vld [vmem:[%s10750_s8 + $0x6f8] sm:$0xff]   ;;  %v13786_v32 = vld [vmem:[%s10750_s8 + $0x700] sm:$0xff]  }
 0x198   : > { %21101 = vst [vmem:[#allocation282_spill] sm:$0xff] %v13776_v49  ;;  %21102 = vst [vmem:[#allocation283_spill] sm:$0xff] %v13783_v5  ;;  %v13793_v22 = vld [vmem:[%s10750_s8 + $0x708] sm:$0xff]   ;;  %v13796_v14 = vld [vmem:[%s10750_s8 + $0x710] sm:$0xff]  }
 0x199   : > { %21103 = vst [vmem:[#allocation284_spill] sm:$0xff] %v13786_v32  ;;  %21104 = vst [vmem:[#allocation285_spill] sm:$0xff] %v13793_v22  ;;  %v13803_v50 = vld [vmem:[%s10750_s8 + $0x718] sm:$0xff]   ;;  %v13806_v36 = vld [vmem:[%s10750_s8 + $0x720] sm:$0xff]  }
 0x19a   : > { %21105 = vst [vmem:[#allocation286_spill] sm:$0xff] %v13796_v14  ;;  %21106 = vst [vmem:[#allocation287_spill] sm:$0xff] %v13803_v50  ;;  %v13813_v0 = vld [vmem:[%s10750_s8 + $0x728] sm:$0xff]   ;;  %v13816_v4 = vld [vmem:[%s10750_s8 + $0x730] sm:$0xff]  }
 0x19b   : > { %21107 = vst [vmem:[#allocation288_spill] sm:$0xff] %v13806_v36  ;;  %21108 = vst [vmem:[#allocation289_spill] sm:$0xff] %v13813_v0  ;;  %v13823_v38 = vld [vmem:[%s10750_s8 + $0x738] sm:$0xff]   ;;  %v13826_v25 = vld [vmem:[%s10750_s8 + $0x740] sm:$0xff]  }
 0x19c   : > { %21109 = vst [vmem:[#allocation290_spill] sm:$0xff] %v13816_v4  ;;  %21110 = vst [vmem:[#allocation291_spill] sm:$0xff] %v13823_v38  ;;  %v13833_v9 = vld [vmem:[%s10750_s8 + $0x748] sm:$0xff]   ;;  %v13836_v5 = vld [vmem:[%s10750_s8 + $0x750] sm:$0xff]  }
 0x19d   : > { %21111 = vst [vmem:[#allocation292_spill] sm:$0xff] %v13826_v25  ;;  %21112 = vst [vmem:[#allocation293_spill] sm:$0xff] %v13833_v9  ;;  %v13843_v10 = vld [vmem:[%s10750_s8 + $0x758] sm:$0xff]   ;;  %v13846_v22 = vld [vmem:[%s10750_s8 + $0x760] sm:$0xff]  }
 0x19e   : > { %21113 = vst [vmem:[#allocation294_spill] sm:$0xff] %v13836_v5  ;;  %21114 = vst [vmem:[#allocation295_spill] sm:$0xff] %v13843_v10  ;;  %v13853_v18 = vld [vmem:[%s10750_s8 + $0x768] sm:$0xff]   ;;  %v13856_v36 = vld [vmem:[%s10750_s8 + $0x770] sm:$0xff]  }
 0x19f   : > { %21115 = vst [vmem:[#allocation296_spill] sm:$0xff] %v13846_v22  ;;  %21116 = vst [vmem:[#allocation297_spill] sm:$0xff] %v13853_v18  ;;  %v13863_v32 = vld [vmem:[%s10750_s8 + $0x778] sm:$0xff]   ;;  %v13866_v0 = vld [vmem:[%s10750_s8 + $0x780] sm:$0xff]  }
 0x1a0   : > { %21117 = vst [vmem:[#allocation298_spill] sm:$0xff] %v13856_v36  ;;  %21118 = vst [vmem:[#allocation299_spill] sm:$0xff] %v13863_v32  ;;  %v13873_v37 = vld [vmem:[%s10750_s8 + $0x788] sm:$0xff]   ;;  %v13876_v25 = vld [vmem:[%s10750_s8 + $0x790] sm:$0xff]  }
 0x1a1   : > { %21119 = vst [vmem:[#allocation300_spill] sm:$0xff] %v13866_v0  ;;  %21120 = vst [vmem:[#allocation301_spill] sm:$0xff] %v13873_v37  ;;  %v13883_v50 = vld [vmem:[%s10750_s8 + $0x798] sm:$0xff]   ;;  %v13886_v9 = vld [vmem:[%s10750_s8 + $0x7a0] sm:$0xff]  }
 0x1a2   : > { %21121 = vst [vmem:[#allocation302_spill] sm:$0xff] %v13876_v25  ;;  %21122 = vst [vmem:[#allocation303_spill] sm:$0xff] %v13883_v50  ;;  %v13893_v27 = vld [vmem:[%s10750_s8 + $0x7a8] sm:$0xff]   ;;  %v13896_v22 = vld [vmem:[%s10750_s8 + $0x7b0] sm:$0xff]  }
 0x1a3   : > { %21123 = vst [vmem:[#allocation304_spill] sm:$0xff] %v13886_v9  ;;  %21124 = vst [vmem:[#allocation305_spill] sm:$0xff] %v13893_v27  ;;  %v13903_v38 = vld [vmem:[%s10750_s8 + $0x7b8] sm:$0xff]   ;;  %v13906_v18 = vld [vmem:[%s10750_s8 + $0x7c0] sm:$0xff]  }
 0x1a4   : > { %21125 = vst [vmem:[#allocation306_spill] sm:$0xff] %v13896_v22  ;;  %21126 = vst [vmem:[#allocation307_spill] sm:$0xff] %v13903_v38  ;;  %v13913_v49 = vld [vmem:[%s10750_s8 + $0x7c8] sm:$0xff]   ;;  %v13916_v0 = vld [vmem:[%s10750_s8 + $0x7d0] sm:$0xff]  }
 0x1a5   : > { %21127 = vst [vmem:[#allocation308_spill] sm:$0xff] %v13906_v18  ;;  %21128 = vst [vmem:[#allocation309_spill] sm:$0xff] %v13913_v49  ;;  %v13923_v10 = vld [vmem:[%s10750_s8 + $0x7d8] sm:$0xff]   ;;  %v13926_v37 = vld [vmem:[%s10750_s8 + $0x7e0] sm:$0xff]  }
 0x1a6   : > { %21129 = vst [vmem:[#allocation310_spill] sm:$0xff] %v13916_v0  ;;  %21130 = vst [vmem:[#allocation311_spill] sm:$0xff] %v13923_v10  ;;  %v13933_v14 = vld [vmem:[%s10750_s8 + $0x7e8] sm:$0xff]   ;;  %v13936_v9 = vld [vmem:[%s10750_s8 + $0x7f0] sm:$0xff]  }
 0x1a7   : > { %21131 = vst [vmem:[#allocation312_spill] sm:$0xff] %v13926_v37  ;;  %21132 = vst [vmem:[#allocation313_spill] sm:$0xff] %v13933_v14  ;;  %v13943_v32 = vld [vmem:[%s10750_s8 + $0x7f8] sm:$0xff]   ;;  %v13946_v27 = vld [vmem:[%s10750_s8 + $0x800] sm:$0xff]  }
 0x1a8   : > { %21133 = vst [vmem:[#allocation314_spill] sm:$0xff] %v13936_v9  ;;  %21134 = vst [vmem:[#allocation315_spill] sm:$0xff] %v13943_v32  ;;  %v13953_v4 = vld [vmem:[%s10750_s8 + $0x808] sm:$0xff]   ;;  %v13956_v18 = vld [vmem:[%s10750_s8 + $0x810] sm:$0xff]  }
 0x1a9   : > { %21135 = vst [vmem:[#allocation316_spill] sm:$0xff] %v13946_v27  ;;  %21136 = vst [vmem:[#allocation317_spill] sm:$0xff] %v13953_v4  ;;  %v13963_v50 = vld [vmem:[%s10750_s8 + $0x818] sm:$0xff]   ;;  %v13966_v49 = vld [vmem:[%s10750_s8 + $0x820] sm:$0xff]  }
 0x1aa   : > { %21137 = vst [vmem:[#allocation318_spill] sm:$0xff] %v13956_v18  ;;  %21138 = vst [vmem:[#allocation319_spill] sm:$0xff] %v13963_v50  ;;  %v13973_v5 = vld [vmem:[%s10750_s8 + $0x828] sm:$0xff]   ;;  %v13976_v37 = vld [vmem:[%s10750_s8 + $0x830] sm:$0xff]  }
 0x1ab   : > { %21139 = vst [vmem:[#allocation320_spill] sm:$0xff] %v13966_v49  ;;  %21140 = vst [vmem:[#allocation321_spill] sm:$0xff] %v13973_v5  ;;  %v13983_v38 = vld [vmem:[%s10750_s8 + $0x838] sm:$0xff]   ;;  %v13986_v14 = vld [vmem:[%s10750_s8 + $0x840] sm:$0xff]  }
 0x1ac   : > { %21141 = vst [vmem:[#allocation322_spill] sm:$0xff] %v13976_v37  ;;  %21142 = vst [vmem:[#allocation323_spill] sm:$0xff] %v13983_v38  ;;  %v13993_v36 = vld [vmem:[%s10750_s8 + $0x848] sm:$0xff]   ;;  %v13996_v27 = vld [vmem:[%s10750_s8 + $0x850] sm:$0xff]  }
 0x1ad   : > { %21143 = vst [vmem:[#allocation324_spill] sm:$0xff] %v13986_v14  ;;  %21144 = vst [vmem:[#allocation325_spill] sm:$0xff] %v13993_v36  ;;  %v14003_v10 = vld [vmem:[%s10750_s8 + $0x858] sm:$0xff]   ;;  %v14006_v4 = vld [vmem:[%s10750_s8 + $0x860] sm:$0xff]  }
 0x1ae   : > { %21145 = vst [vmem:[#allocation326_spill] sm:$0xff] %v13996_v27  ;;  %21146 = vst [vmem:[#allocation327_spill] sm:$0xff] %v14003_v10  ;;  %v14013_v25 = vld [vmem:[%s10750_s8 + $0x868] sm:$0xff]   ;;  %v14016_v49 = vld [vmem:[%s10750_s8 + $0x870] sm:$0xff]  }
 0x1af   : > { %21147 = vst [vmem:[#allocation328_spill] sm:$0xff] %v14006_v4  ;;  %21148 = vst [vmem:[#allocation329_spill] sm:$0xff] %v14013_v25  ;;  %v14023_v32 = vld [vmem:[%s10750_s8 + $0x878] sm:$0xff]   ;;  %v14026_v5 = vld [vmem:[%s10750_s8 + $0x880] sm:$0xff]  }
 0x1b0   : > { %21149 = vst [vmem:[#allocation330_spill] sm:$0xff] %v14016_v49  ;;  %21150 = vst [vmem:[#allocation331_spill] sm:$0xff] %v14023_v32  ;;  %v14033_v22 = vld [vmem:[%s10750_s8 + $0x888] sm:$0xff]   ;;  %v14036_v14 = vld [vmem:[%s10750_s8 + $0x890] sm:$0xff]  }
 0x1b1   : > { %21151 = vst [vmem:[#allocation332_spill] sm:$0xff] %v14026_v5  ;;  %21152 = vst [vmem:[#allocation333_spill] sm:$0xff] %v14033_v22  ;;  %v14043_v50 = vld [vmem:[%s10750_s8 + $0x898] sm:$0xff]   ;;  %v14046_v36 = vld [vmem:[%s10750_s8 + $0x8a0] sm:$0xff]  }
 0x1b2   : > { %21153 = vst [vmem:[#allocation334_spill] sm:$0xff] %v14036_v14  ;;  %21154 = vst [vmem:[#allocation335_spill] sm:$0xff] %v14043_v50  ;;  %v14053_v0 = vld [vmem:[%s10750_s8 + $0x8a8] sm:$0xff]   ;;  %v14056_v4 = vld [vmem:[%s10750_s8 + $0x8b0] sm:$0xff]  }
 0x1b3   : > { %21155 = vst [vmem:[#allocation336_spill] sm:$0xff] %v14046_v36  ;;  %21156 = vst [vmem:[#allocation337_spill] sm:$0xff] %v14053_v0  ;;  %v14063_v38 = vld [vmem:[%s10750_s8 + $0x8b8] sm:$0xff]   ;;  %v14066_v25 = vld [vmem:[%s10750_s8 + $0x8c0] sm:$0xff]  }
 0x1b4   : > { %21157 = vst [vmem:[#allocation338_spill] sm:$0xff] %v14056_v4  ;;  %21158 = vst [vmem:[#allocation339_spill] sm:$0xff] %v14063_v38  ;;  %v14073_v9 = vld [vmem:[%s10750_s8 + $0x8c8] sm:$0xff]   ;;  %v14076_v5 = vld [vmem:[%s10750_s8 + $0x8d0] sm:$0xff]  }
 0x1b5   : > { %21159 = vst [vmem:[#allocation340_spill] sm:$0xff] %v14066_v25  ;;  %21160 = vst [vmem:[#allocation341_spill] sm:$0xff] %v14073_v9  ;;  %v14083_v10 = vld [vmem:[%s10750_s8 + $0x8d8] sm:$0xff]   ;;  %v14086_v22 = vld [vmem:[%s10750_s8 + $0x8e0] sm:$0xff]  }
 0x1b6   : > { %21161 = vst [vmem:[#allocation342_spill] sm:$0xff] %v14076_v5  ;;  %21162 = vst [vmem:[#allocation343_spill] sm:$0xff] %v14083_v10  ;;  %v14093_v18 = vld [vmem:[%s10750_s8 + $0x8e8] sm:$0xff]   ;;  %v14096_v36 = vld [vmem:[%s10750_s8 + $0x8f0] sm:$0xff]  }
 0x1b7   : > { %21163 = vst [vmem:[#allocation344_spill] sm:$0xff] %v14086_v22  ;;  %21164 = vst [vmem:[#allocation345_spill] sm:$0xff] %v14093_v18  ;;  %v14103_v32 = vld [vmem:[%s10750_s8 + $0x8f8] sm:$0xff]   ;;  %v14106_v0 = vld [vmem:[%s10750_s8 + $0x900] sm:$0xff]  }
 0x1b8   : > { %21165 = vst [vmem:[#allocation346_spill] sm:$0xff] %v14096_v36  ;;  %21166 = vst [vmem:[#allocation347_spill] sm:$0xff] %v14103_v32  ;;  %v14113_v37 = vld [vmem:[%s10750_s8 + $0x908] sm:$0xff]   ;;  %v14116_v25 = vld [vmem:[%s10750_s8 + $0x910] sm:$0xff]  }
 0x1b9   : > { %21167 = vst [vmem:[#allocation348_spill] sm:$0xff] %v14106_v0  ;;  %21168 = vst [vmem:[#allocation349_spill] sm:$0xff] %v14113_v37  ;;  %v14123_v50 = vld [vmem:[%s10750_s8 + $0x918] sm:$0xff]   ;;  %v14126_v9 = vld [vmem:[%s10750_s8 + $0x920] sm:$0xff]  }
 0x1ba   : > { %21169 = vst [vmem:[#allocation350_spill] sm:$0xff] %v14116_v25  ;;  %21170 = vst [vmem:[#allocation351_spill] sm:$0xff] %v14123_v50  ;;  %v14133_v27 = vld [vmem:[%s10750_s8 + $0x928] sm:$0xff]   ;;  %v14136_v22 = vld [vmem:[%s10750_s8 + $0x930] sm:$0xff]  }
 0x1bb   : > { %21171 = vst [vmem:[#allocation352_spill] sm:$0xff] %v14126_v9  ;;  %21172 = vst [vmem:[#allocation353_spill] sm:$0xff] %v14133_v27  ;;  %v14143_v38 = vld [vmem:[%s10750_s8 + $0x938] sm:$0xff]   ;;  %v14146_v18 = vld [vmem:[%s10750_s8 + $0x940] sm:$0xff]  }
 0x1bc   : > { %21173 = vst [vmem:[#allocation354_spill] sm:$0xff] %v14136_v22  ;;  %21174 = vst [vmem:[#allocation355_spill] sm:$0xff] %v14143_v38  ;;  %v14153_v49 = vld [vmem:[%s10750_s8 + $0x948] sm:$0xff]   ;;  %v14156_v32 = vld [vmem:[%s10750_s8 + $0x950] sm:$0xff]  }
 0x1bd   : > { %21175 = vst [vmem:[#allocation356_spill] sm:$0xff] %v14146_v18  ;;  %21176 = vst [vmem:[#allocation357_spill] sm:$0xff] %v14153_v49  ;;  %v14163_v10 = vld [vmem:[%s10750_s8 + $0x958] sm:$0xff]   ;;  %v14166_v37 = vld [vmem:[%s10750_s8 + $0x960] sm:$0xff]  }
 0x1be   : > { %21177 = vst [vmem:[#allocation358_spill] sm:$0xff] %v14156_v32  ;;  %21178 = vst [vmem:[#allocation359_spill] sm:$0xff] %v14163_v10  ;;  %v14173_v14 = vld [vmem:[%s10750_s8 + $0x968] sm:$0xff]   ;;  %v14176_v9 = vld [vmem:[%s10750_s8 + $0x970] sm:$0xff]  }
 0x1bf   : > { %21179 = vst [vmem:[#allocation360_spill] sm:$0xff] %v14166_v37  ;;  %21180 = vst [vmem:[#allocation361_spill] sm:$0xff] %v14173_v14  ;;  %v14183_v0 = vld [vmem:[%s10750_s8 + $0x978] sm:$0xff]   ;;  %v14186_v27 = vld [vmem:[%s10750_s8 + $0x980] sm:$0xff]  }
 0x1c0   : > { %21181 = vst [vmem:[#allocation362_spill] sm:$0xff] %v14176_v9  ;;  %21182 = vst [vmem:[#allocation363_spill] sm:$0xff] %v14183_v0  ;;  %v14193_v4 = vld [vmem:[%s10750_s8 + $0x988] sm:$0xff]   ;;  %v14196_v18 = vld [vmem:[%s10750_s8 + $0x990] sm:$0xff]  }
 0x1c1   : > { %21183 = vst [vmem:[#allocation364_spill] sm:$0xff] %v14186_v27  ;;  %21184 = vst [vmem:[#allocation365_spill] sm:$0xff] %v14193_v4  ;;  %v14203_v50 = vld [vmem:[%s10750_s8 + $0x998] sm:$0xff]   ;;  %v14206_v49 = vld [vmem:[%s10750_s8 + $0x9a0] sm:$0xff]  }
 0x1c2   : > { %21185 = vst [vmem:[#allocation366_spill] sm:$0xff] %v14196_v18  ;;  %21186 = vst [vmem:[#allocation367_spill] sm:$0xff] %v14203_v50  ;;  %v14213_v5 = vld [vmem:[%s10750_s8 + $0x9a8] sm:$0xff]   ;;  %v14216_v37 = vld [vmem:[%s10750_s8 + $0x9b0] sm:$0xff]  }
 0x1c3   : > { %21187 = vst [vmem:[#allocation368_spill] sm:$0xff] %v14206_v49  ;;  %21188 = vst [vmem:[#allocation369_spill] sm:$0xff] %v14213_v5  ;;  %v14223_v38 = vld [vmem:[%s10750_s8 + $0x9b8] sm:$0xff]   ;;  %v14226_v14 = vld [vmem:[%s10750_s8 + $0x9c0] sm:$0xff]  }
 0x1c4   : > { %21189 = vst [vmem:[#allocation370_spill] sm:$0xff] %v14216_v37  ;;  %21190 = vst [vmem:[#allocation371_spill] sm:$0xff] %v14223_v38  ;;  %v14233_v36 = vld [vmem:[%s10750_s8 + $0x9c8] sm:$0xff]   ;;  %v14236_v27 = vld [vmem:[%s10750_s8 + $0x9d0] sm:$0xff]  }
 0x1c5   : > { %21191 = vst [vmem:[#allocation372_spill] sm:$0xff] %v14226_v14  ;;  %21192 = vst [vmem:[#allocation373_spill] sm:$0xff] %v14233_v36  ;;  %v14243_v10 = vld [vmem:[%s10750_s8 + $0x9d8] sm:$0xff]   ;;  %v14246_v4 = vld [vmem:[%s10750_s8 + $0x9e0] sm:$0xff]  }
 0x1c6   : > { %21193 = vst [vmem:[#allocation374_spill] sm:$0xff] %v14236_v27  ;;  %21194 = vst [vmem:[#allocation375_spill] sm:$0xff] %v14243_v10  ;;  %v14253_v25 = vld [vmem:[%s10750_s8 + $0x9e8] sm:$0xff]   ;;  %v14256_v49 = vld [vmem:[%s10750_s8 + $0x9f0] sm:$0xff]  }
 0x1c7   : > { %21195 = vst [vmem:[#allocation376_spill] sm:$0xff] %v14246_v4  ;;  %21196 = vst [vmem:[#allocation377_spill] sm:$0xff] %v14253_v25  ;;  %v14263_v0 = vld [vmem:[%s10750_s8 + $0x9f8] sm:$0xff]   ;;  %v14266_v5 = vld [vmem:[%s10750_s8 + $0xa00] sm:$0xff]  }
 0x1c8   : > { %21197 = vst [vmem:[#allocation378_spill] sm:$0xff] %v14256_v49  ;;  %21198 = vst [vmem:[#allocation379_spill] sm:$0xff] %v14263_v0  ;;  %v14273_v22 = vld [vmem:[%s10750_s8 + $0xa08] sm:$0xff]   ;;  %v14276_v14 = vld [vmem:[%s10750_s8 + $0xa10] sm:$0xff]  }
 0x1c9   : > { %21199 = vst [vmem:[#allocation380_spill] sm:$0xff] %v14266_v5  ;;  %21200 = vst [vmem:[#allocation381_spill] sm:$0xff] %v14273_v22  ;;  %v14283_v50 = vld [vmem:[%s10750_s8 + $0xa18] sm:$0xff]   ;;  %v14286_v36 = vld [vmem:[%s10750_s8 + $0xa20] sm:$0xff]  }
 0x1ca   : > { %21201 = vst [vmem:[#allocation382_spill] sm:$0xff] %v14276_v14  ;;  %21202 = vst [vmem:[#allocation383_spill] sm:$0xff] %v14283_v50  ;;  %v14293_v32 = vld [vmem:[%s10750_s8 + $0xa28] sm:$0xff]   ;;  %v14296_v4 = vld [vmem:[%s10750_s8 + $0xa30] sm:$0xff]  }
 0x1cb   : > { %21203 = vst [vmem:[#allocation384_spill] sm:$0xff] %v14286_v36  ;;  %21204 = vst [vmem:[#allocation385_spill] sm:$0xff] %v14293_v32  ;;  %v14303_v38 = vld [vmem:[%s10750_s8 + $0xa38] sm:$0xff]   ;;  %v14306_v25 = vld [vmem:[%s10750_s8 + $0xa40] sm:$0xff]  }
 0x1cc   : > { %21205 = vst [vmem:[#allocation386_spill] sm:$0xff] %v14296_v4  ;;  %21206 = vst [vmem:[#allocation387_spill] sm:$0xff] %v14303_v38  ;;  %v14313_v9 = vld [vmem:[%s10750_s8 + $0xa48] sm:$0xff]   ;;  %v14316_v5 = vld [vmem:[%s10750_s8 + $0xa50] sm:$0xff]  }
 0x1cd   : > { %21207 = vst [vmem:[#allocation388_spill] sm:$0xff] %v14306_v25  ;;  %21208 = vst [vmem:[#allocation389_spill] sm:$0xff] %v14313_v9  ;;  %v14323_v10 = vld [vmem:[%s10750_s8 + $0xa58] sm:$0xff]   ;;  %v14326_v22 = vld [vmem:[%s10750_s8 + $0xa60] sm:$0xff]  }
 0x1ce   : > { %21209 = vst [vmem:[#allocation390_spill] sm:$0xff] %v14316_v5  ;;  %21210 = vst [vmem:[#allocation391_spill] sm:$0xff] %v14323_v10  ;;  %v14333_v18 = vld [vmem:[%s10750_s8 + $0xa68] sm:$0xff]   ;;  %v14336_v36 = vld [vmem:[%s10750_s8 + $0xa70] sm:$0xff]  }
 0x1cf   : > { %21211 = vst [vmem:[#allocation392_spill] sm:$0xff] %v14326_v22  ;;  %21212 = vst [vmem:[#allocation393_spill] sm:$0xff] %v14333_v18  ;;  %v14343_v0 = vld [vmem:[%s10750_s8 + $0xa78] sm:$0xff]   ;;  %v14346_v32 = vld [vmem:[%s10750_s8 + $0xa80] sm:$0xff]  }
 0x1d0   : > { %21213 = vst [vmem:[#allocation394_spill] sm:$0xff] %v14336_v36  ;;  %21214 = vst [vmem:[#allocation395_spill] sm:$0xff] %v14343_v0  ;;  %v14353_v37 = vld [vmem:[%s10750_s8 + $0xa88] sm:$0xff]   ;;  %v14356_v25 = vld [vmem:[%s10750_s8 + $0xa90] sm:$0xff]  }
 0x1d1   : > { %21215 = vst [vmem:[#allocation396_spill] sm:$0xff] %v14346_v32  ;;  %21216 = vst [vmem:[#allocation397_spill] sm:$0xff] %v14353_v37  ;;  %v14363_v50 = vld [vmem:[%s10750_s8 + $0xa98] sm:$0xff]   ;;  %v14366_v9 = vld [vmem:[%s10750_s8 + $0xaa0] sm:$0xff]  }
 0x1d2   : > { %21217 = vst [vmem:[#allocation398_spill] sm:$0xff] %v14356_v25  ;;  %21218 = vst [vmem:[#allocation399_spill] sm:$0xff] %v14363_v50  ;;  %v14373_v27 = vld [vmem:[%s10750_s8 + $0xaa8] sm:$0xff]   ;;  %v14376_v22 = vld [vmem:[%s10750_s8 + $0xab0] sm:$0xff]  }
 0x1d3   : > { %21219 = vst [vmem:[#allocation400_spill] sm:$0xff] %v14366_v9  ;;  %21220 = vst [vmem:[#allocation401_spill] sm:$0xff] %v14373_v27  ;;  %v14383_v38 = vld [vmem:[%s10750_s8 + $0xab8] sm:$0xff]   ;;  %v14386_v18 = vld [vmem:[%s10750_s8 + $0xac0] sm:$0xff]  }
 0x1d4   : > { %21221 = vst [vmem:[#allocation402_spill] sm:$0xff] %v14376_v22  ;;  %21222 = vst [vmem:[#allocation403_spill] sm:$0xff] %v14383_v38  ;;  %v14393_v49 = vld [vmem:[%s10750_s8 + $0xac8] sm:$0xff]   ;;  %v14396_v32 = vld [vmem:[%s10750_s8 + $0xad0] sm:$0xff]   ;;  %v21245_v22 = vunpack.c.l.bf16 %v12677_v52  ;;  %v21246_v38 = vunpack.c.h.bf16 %v12677_v52  ;;  %v21251_v52 = vunpack.c.l.bf16 %v12746_v63 }
 0x1d5   : > { %21223 = vst [vmem:[#allocation404_spill] sm:$0xff] %v14386_v18  ;;  %21224 = vst [vmem:[#allocation405_spill] sm:$0xff] %v14393_v49  ;;  %v14403_v10 = vld [vmem:[%s10750_s8 + $0xad8] sm:$0xff]   ;;  %v14406_v37 = vld [vmem:[%s10750_s8 + $0xae0] sm:$0xff]  }
 0x1d6   : > { %21225 = vst [vmem:[#allocation406_spill] sm:$0xff] %v14396_v32  ;;  %21226 = vst [vmem:[#allocation407_spill] sm:$0xff] %v14403_v10  ;;  %v14413_v14 = vld [vmem:[%s10750_s8 + $0xae8] sm:$0xff]   ;;  %v14416_v9 = vld [vmem:[%s10750_s8 + $0xaf0] sm:$0xff]  }
 0x1d7   : > { %21227 = vst [vmem:[#allocation408_spill] sm:$0xff] %v14406_v37  ;;  %21228 = vst [vmem:[#allocation409_spill] sm:$0xff] %v14413_v14  ;;  %v14423_v0 = vld [vmem:[%s10750_s8 + $0xaf8] sm:$0xff]   ;;  %v14426_v27 = vld [vmem:[%s10750_s8 + $0xb00] sm:$0xff]  }
 0x1d8   : > { %21229 = vst [vmem:[#allocation410_spill] sm:$0xff] %v14416_v9  ;;  %21230 = vst [vmem:[#allocation411_spill] sm:$0xff] %v14423_v0  ;;  %v14433_v4 = vld [vmem:[%s10750_s8 + $0xb08] sm:$0xff]   ;;  %v14436_v18 = vld [vmem:[%s10750_s8 + $0xb10] sm:$0xff]   ;;  %v21247_v0 = vunpack.c.l.bf16 %v12706_v26 }
 0x1d9   : > { %21231 = vst [vmem:[#allocation412_spill] sm:$0xff] %v14426_v27  ;;  %21232 = vst [vmem:[#allocation413_spill] sm:$0xff] %v14433_v4  ;;  %v14443_v50 = vld [vmem:[%s10750_s8 + $0xb18] sm:$0xff]   ;;  %v14446_v49 = vld [vmem:[%s10750_s8 + $0xb20] sm:$0xff]   ;;  %v21243_v4 = vunpack.c.l.bf16 %v12633_v21  ;;  %v21256_v21 = vunpack.c.l.bf16 %v12766_v43 }
 0x1da   : > { %21233 = vst [vmem:[#allocation414_spill] sm:$0xff] %v14436_v18  ;;  %21234 = vst [vmem:[#allocation415_spill] sm:$0xff] %v14443_v50  ;;  %v14453_v37 = vld [vmem:[%s10750_s8 + $0xb28] sm:$0xff]   ;;  %v14456_v5 = vld [vmem:[%s10750_s8 + $0xb30] sm:$0xff]   ;;  %v21248_v50 = vunpack.c.h.bf16 %v12706_v26  ;;  %v21249_v18 = vunpack.c.l.bf16 %v12726_v45  ;;  %v21261_v26 = vunpack.c.h.bf16 %v12806_v28 }
 0x1db   : > { %21235 = vst [vmem:[#allocation416_spill] sm:$0xff] %v14446_v49  ;;  %21236 = vst [vmem:[#allocation417_spill] sm:$0xff] %v14453_v37  ;;  %v14463_v25 = vld [vmem:[%s10750_s8 + $0xb38] sm:$0xff]   ;;  %v14466_v10 = vld [vmem:[%s10750_s8 + $0xb40] sm:$0xff]   ;;  %v3412_v9 = vadd.f32 %v21244_v48, %v21243_v4  ;;  %v21250_v37 = vunpack.c.h.bf16 %v12726_v45 }
 0x1dc   : > { %21237 = vst [vmem:[#allocation418_spill] sm:$0xff] %v14456_v5  ;;  %21238 = vst [vmem:[#allocation419_spill] sm:$0xff] %v14463_v25  ;;  %v14477_v27 = vld [vmem:[%s10750_s8 + $0xb48] sm:$0xff]   ;;  %v14484_v36 = vld [vmem:[%s10750_s8 + $0xb50] sm:$0xff]   ;;  %v3419_v25 = vadd.f32 %v21246_v38, %v21245_v22  ;;  %v3426_v5 = vadd.f32 %v21248_v50, %v21247_v0  ;;  %v21252_v22 = vunpack.c.h.bf16 %v12746_v63  ;;  %v21257_v63 = vunpack.c.h.bf16 %v12766_v43 }
 0x1dd   : > { %21239 = vst [vmem:[#allocation420_spill] sm:$0xff] %v14466_v10  ;;  %21240 = vst [vmem:[#allocation421_spill] sm:$0xff] %v14477_v27  ;;  %v14487_v32 = vld [vmem:[%s10750_s8 + $0xb58] sm:$0xff]   ;;  %v14490_v14 = vld [vmem:[%s10750_s8 + $0xb60] sm:$0xff]   ;;  %v3433_v49 = vadd.f32 %v21250_v37, %v21249_v18  ;;  %v21259_v0 = vunpack.c.h.bf16 %v12786_v39  ;;  %v21260_v18 = vunpack.c.l.bf16 %v12806_v28  ;;  %v21263_v43 = vunpack.c.l.bf16 %v12693_v20 }
 0x1de   : > { %21241 = vst [vmem:[#allocation422_spill] sm:$0xff] %v14484_v36  ;;  %21242 = vst [vmem:[#allocation423_spill] sm:$0xff] %v14487_v32  ;;  %v3440_v38 = vadd.f32 %v21252_v22, %v21251_v52  ;;  %v14520_v37 = vld [vmem:[%s10750_s8 + $0xb68] sm:$0xff]   ;;  %v14524_v4 = vld [vmem:[%s10750_s8 + $0xb70] sm:$0xff]   ;;  %v3447_v52 = vadd.f32 %v21257_v63, %v21256_v21  ;;  %v21258_v22 = vunpack.c.l.bf16 %v12786_v39  ;;  %v21262_v36 = vunpack.c.l.bf16 %v12652_v17 }
 0x1df   : > { %21253 = vst [vmem:[#allocation424_spill] sm:$0xff] %v14520_v37  ;;  %21254 = vst [vmem:[#allocation425_spill] sm:$0xff] %v14524_v4  ;;  %v14527_v48 = vld [vmem:[%s10750_s8 + $0xb78] sm:$0xff]   ;;  %v3461_v45 = vadd.f32 %v21261_v26, %v21260_v18  ;;  %v14542_v32 = vld [vmem:[%s10750_s8 + $0xb80] sm:$0xff]   ;;  %v3420_v21 = vadd.f32 %v21263_v43, %v3419_v25  ;;  %v21264_v63 = vunpack.c.l.bf16 %v12713_v53  ;;  %v21266_v10 = vunpack.c.l.bf16 %v12753_v2 }
 0x1e0   : > { %21255 = vst [vmem:[#allocation426_spill] sm:$0xff] %v14527_v48  ;;  %v3454_v50 = vadd.f32 %v21259_v0, %v21258_v22  ;;  %v3413_v27 = vadd.f32 %v21262_v36, %v3412_v9  ;;  %v21265_v0 = vunpack.c.l.bf16 %v12733_v7  ;;  %v14562_v43 = vld [vmem:[%s10750_s8 + $0xb88] sm:$0xff]   ;;  %v21269_v18 = vunpack.c.l.bf16 %v12773_v58 }
 0x1e1   : > { %v3427_v39 = vadd.f32 %v21264_v63, %v3426_v5  ;;  %v3441_v60 = vadd.f32 %v21266_v10, %v3440_v38  ;;  %v14566_v63 = vld [vmem:[%s10750_s8 + $0xb90] sm:$0xff]   ;;  %v21270_v10 = vunpack.c.l.bf16 %v12793_v41  ;;  %v21271_v25 = vunpack.c.l.bf16 %v12813_v54  ;;  %v14578_v5 = vld [vmem:[%s10750_s8 + $0xba0] sm:$0xff]  }
 0x1e2   : > { %v3434_v22 = vadd.f32 %v21265_v0, %v3433_v49  ;;  %21267 = vst [vmem:[#allocation427_spill] sm:$0xff] %v14566_v63  ;;  %v14569_v0 = vld [vmem:[%s10750_s8 + $0xb98] sm:$0xff]   ;;  %v3448_v26 = vadd.f32 %v21269_v18, %v3447_v52  ;;  %v21272_v36 = vunpack.c.h.bf16 %v12652_v17  ;;  %v21273_v28 = vunpack.c.h.bf16 %v12693_v20 }
 0x1e3   : > { %21268 = vst [vmem:[#allocation428_spill] sm:$0xff] %v14569_v0  ;;  %v3455_v38 = vadd.f32 %v21270_v10, %v3454_v50  ;;  %v3462_v9 = vadd.f32 %v21271_v25, %v3461_v45  ;;  %v21274_v4 = vunpack.c.h.bf16 %v12713_v53  ;;  %v21275_v18 = vunpack.c.h.bf16 %v12733_v7  ;;  %v14598_v7 = vld [vmem:[%s10750_s8 + $0xba8] sm:$0xff]  }
 0x1e4   : > { %v3414_v49 = vadd.f32 %v21272_v36, %v3413_v27  ;;  %v3421_v48 = vadd.f32 %v21273_v28, %v3420_v21  ;;  %v21276_v17 = vunpack.c.h.bf16 %v12753_v2  ;;  %v21279_v28 = vunpack.c.h.bf16 %v12773_v58 }
 0x1e5   : > { %v3428_v52 = vadd.f32 %v21274_v4, %v3427_v39  ;;  %v3435_v37 = vadd.f32 %v21275_v18, %v3434_v22  ;;  %v14602_v39 = vld [vmem:[%s10750_s8 + $0xbb0] sm:$0xff]   ;;  %v14605_v22 = vld [vmem:[%s10750_s8 + $0xbb8] sm:$0xff]   ;;  %v21281_v18 = vunpack.c.h.bf16 %v12813_v54  ;;  %v14614_v4 = vld [vmem:[%s10750_s8 + $0xbc0] sm:$0xff]   ;;  %v21282_v53 = vunpack.c.l.bf16 %v12655_v11 }
 0x1e6   : > { %v3442_v10 = vadd.f32 %v21276_v17, %v3441_v60  ;;  %21277 = vst [vmem:[#allocation429_spill] sm:$0xff] %v14602_v39  ;;  %21278 = vst [vmem:[#allocation430_spill] sm:$0xff] %v14605_v22  ;;  %v3449_v2 = vadd.f32 %v21279_v28, %v3448_v26  ;;  %v21280_v60 = vunpack.c.h.bf16 %v12793_v41  ;;  %v21283_v27 = vunpack.c.l.bf16 %v12696_v55 }
 0x1e7   : > { %v3463_v17 = vadd.f32 %v21281_v18, %v3462_v9  ;;  %v3415_v20 = vadd.f32 %v21282_v53, %v3414_v49  ;;  %v21284_v58 = vunpack.c.l.bf16 %v12716_v59  ;;  %v21285_v41 = vunpack.c.l.bf16 %v12736_v3  ;;  %v14634_v53 = vld [vmem:[%s10750_s8 + $0xbc8] sm:$0xff]  }
 0x1e8   : > { %v3456_v36 = vadd.f32 %v21280_v60, %v3455_v38  ;;  %v3422_v25 = vadd.f32 %v21283_v27, %v3421_v48  ;;  %v21286_v60 = vunpack.c.l.bf16 %v12756_v46  ;;  %v21289_v38 = vunpack.c.l.bf16 %v12776_v16 }
 0x1e9   : > { %v3429_v26 = vadd.f32 %v21284_v58, %v3428_v52  ;;  %v3436_v28 = vadd.f32 %v21285_v41, %v3435_v37  ;;  %v14638_v58 = vld [vmem:[%s10750_s8 + $0xbd0] sm:$0xff]   ;;  %v14641_v41 = vld [vmem:[%s10750_s8 + $0xbd8] sm:$0xff]   ;;  %v21291_v48 = vunpack.c.l.bf16 %v12816_v34  ;;  %v14650_v52 = vld [vmem:[%s10750_s8 + $0xbe0] sm:$0xff]   ;;  %v21292_v49 = vunpack.c.h.bf16 %v12655_v11 }
 0x1ea   : > { %v3443_v18 = vadd.f32 %v21286_v60, %v3442_v10  ;;  %21287 = vst [vmem:[#allocation431_spill] sm:$0xff] %v14638_v58  ;;  %21288 = vst [vmem:[#allocation432_spill] sm:$0xff] %v14641_v41  ;;  %v3450_v9 = vadd.f32 %v21289_v38, %v3449_v2  ;;  %v21290_v10 = vunpack.c.l.bf16 %v12796_v24  ;;  %v21293_v37 = vunpack.c.h.bf16 %v12696_v55 }
 0x1eb   : > { %v3464_v27 = vadd.f32 %v21291_v48, %v3463_v17  ;;  %v3416_v45 = vadd.f32 %v21292_v49, %v3415_v20  ;;  %v21294_v21 = vunpack.c.h.bf16 %v12716_v59  ;;  %v21295_v38 = vunpack.c.h.bf16 %v12736_v3 }
 0x1ec   : > { %v3457_v60 = vadd.f32 %v21290_v10, %v3456_v36  ;;  %v3423_v54 = vadd.f32 %v21293_v37, %v3422_v25  ;;  %v21296_v10 = vunpack.c.h.bf16 %v12756_v46  ;;  %v21299_v49 = vunpack.c.h.bf16 %v12776_v16  ;;  %v21381_v16 = vld [vmem:[#allocation113_spill] sm:$0xff] }
 0x1ed   : > { %v3430_v2 = vadd.f32 %v21294_v21, %v3429_v26  ;;  %v3437_v50 = vadd.f32 %v21295_v38, %v3436_v28  ;;  %v14670_v21 = vld [vmem:[%s10750_s8 + $0xbe8] sm:$0xff]   ;;  %v14674_v26 = vld [vmem:[%s10750_s8 + $0xbf0] sm:$0xff]   ;;  %v14677_v28 = vld [vmem:[%s10750_s8 + $0xbf8] sm:$0xff]   ;;  %v21301_v38 = vunpack.c.h.bf16 %v12816_v34  ;;  %v21302_v25 = vunpack.c.l.bf16 %v12674_v62 }
 0x1ee   : > { %v3444_v11 = vadd.f32 %v21296_v10, %v3443_v18  ;;  %21297 = vst [vmem:[#allocation433_spill] sm:$0xff] %v14674_v26  ;;  %21298 = vst [vmem:[#allocation434_spill] sm:$0xff] %v14677_v28  ;;  %v3451_v46 = vadd.f32 %v21299_v49, %v3450_v9  ;;  %v21300_v18 = vunpack.c.h.bf16 %v12796_v24  ;;  %v21303_v55 = vunpack.c.l.bf16 %v12703_v61  ;;  %v21377_v24 = vld [vmem:[#allocation101_spill] sm:$0xff] }
 0x1ef   : > { %v3465_v10 = vadd.f32 %v21301_v38, %v3464_v27  ;;  %v3417_v59 = vadd.f32 %v21302_v25, %v3416_v45  ;;  %v21304_v48 = vunpack.c.l.bf16 %v12723_v13  ;;  %v21305_v3 = vunpack.c.l.bf16 %v12743_v12 }
 0x1f0   : > { %v3458_v37 = vadd.f32 %v21300_v18, %v3457_v60  ;;  %v3424_v20 = vadd.f32 %v21303_v55, %v3423_v54  ;;  %v21306_v34 = vunpack.c.l.bf16 %v12763_v19  ;;  %v21308_v55 = vunpack.c.l.bf16 %v12803_v30 }
 0x1f1   : > { %v3431_v17 = vadd.f32 %v21304_v48, %v3430_v2  ;;  %v3438_v36 = vadd.f32 %v21305_v3, %v3437_v50  ;;  %v21307_v48 = vunpack.c.l.bf16 %v12783_v40  ;;  %v21309_v3 = vunpack.c.l.bf16 %v12823_v23 }
 0x1f2   : > { %v3445_v27 = vadd.f32 %v21306_v34, %v3444_v11  ;;  %v3459_v25 = vadd.f32 %v21308_v55, %v3458_v37  ;;  %v21310_v18 = vunpack.c.l.bf16 %v12826_v57  ;;  %v21311_v11 = vunpack.c.h.bf16 %v12826_v57 }
 0x1f3   : > { %v3452_v50 = vadd.f32 %v21307_v48, %v3451_v46  ;;  %v3466_v49 = vadd.f32 %v21309_v3, %v3465_v10  ;;  %v21312_v34 = vunpack.c.h.bf16 %v12674_v62  ;;  %v21314_v2 = vunpack.c.h.bf16 %v12703_v61 }
 0x1f4   : > { %v3468_v38 = vadd.f32 %v21311_v11, %v21310_v18  ;;  %v21316_v46 = vunpack.c.h.bf16 %v12723_v13  ;;  %v21318_v37 = vunpack.c.h.bf16 %v12743_v12  ;;  %v21320_v55 = vunpack.c.h.bf16 %v12763_v19 }
 0x1f5   : > { %v14714_v60 = vadd.f32 %v21312_v34, %v3417_v59  ;;  %v14718_v54 = vadd.f32 %v21314_v2, %v3424_v20  ;;  %v21322_v62 = vunpack.c.l.bf16 %v12846_v29  ;;  %v21323_v59 = vunpack.c.h.bf16 %v12846_v29 }
 0x1f6   : > { %v14722_v48 = vadd.f32 %v21316_v46, %v3431_v17  ;;  %v14726_v10 = vadd.f32 %v21318_v37, %v3438_v36  ;;  %v14730_v57 = vadd.f32 %v21320_v55, %v3445_v27  ;;  %v21324_v61 = vunpack.c.l.bf16 %v12866_v51 }
 0x1f7   : > { %21313 = vst [vmem:[#allocation435_spill] sm:$0xff] %v14714_v60  ;;  %21315 = vst [vmem:[#allocation436_spill] sm:$0xff] %v14718_v54  ;;  %v3475_v3 = vadd.f32 %v21323_v59, %v21322_v62  ;;  %v21325_v20 = vunpack.c.h.bf16 %v12866_v51  ;;  %v21326_v17 = vunpack.c.l.bf16 %v12886_v56  ;;  %v21327_v12 = vunpack.c.h.bf16 %v12886_v56 }
 0x1f8   : > { %21317 = vst [vmem:[#allocation437_spill] sm:$0xff] %v14722_v48  ;;  %21319 = vst [vmem:[#allocation438_spill] sm:$0xff] %v14726_v10  ;;  %v21328_v2 = vunpack.c.l.bf16 %v12906_v35  ;;  %v21329_v19 = vunpack.c.h.bf16 %v12906_v35  ;;  %v21330_v18 = vunpack.c.l.bf16 %v12926_v42  ;;  %v21331_v29 = vunpack.c.h.bf16 %v12926_v42  ;;  %v21429_v10 = vld [vmem:[#allocation115_spill] sm:$0xff] }
 0x1f9   : > { %21321 = vst [vmem:[#allocation439_spill] sm:$0xff] %v14730_v57  ;;  %v3482_v13 = vadd.f32 %v21325_v20, %v21324_v61  ;;  %v3489_v36 = vadd.f32 %v21327_v12, %v21326_v17  ;;  %v21332_v34 = vunpack.c.l.bf16 %v12946_v47  ;;  %v21333_v51 = vunpack.c.h.bf16 %v12946_v47  ;;  %v21427_v57 = vld [vmem:[#allocation109_spill] sm:$0xff] }
 0x1fa   : > { %v3496_v27 = vadd.f32 %v21329_v19, %v21328_v2  ;;  %v3503_v11 = vadd.f32 %v21331_v29, %v21330_v18  ;;  %v21334_v37 = vunpack.c.l.bf16 %v12966_v6  ;;  %v21335_v56 = vunpack.c.h.bf16 %v12966_v6 }
 0x1fb   : > { %v3510_v46 = vadd.f32 %v21333_v51, %v21332_v34  ;;  %v21336_v62 = vunpack.c.h.bf16 %v12783_v40  ;;  %v21338_v35 = vunpack.c.h.bf16 %v12803_v30  ;;  %v21340_v42 = vunpack.c.h.bf16 %v12823_v23 }
 0x1fc   : > { %v3517_v55 = vadd.f32 %v21335_v56, %v21334_v37  ;;  %v21342_v47 = vunpack.c.l.bf16 %v12833_v31  ;;  %v21343_v12 = vunpack.c.l.bf16 %v12986_v8  ;;  %v21344_v6 = vunpack.c.h.bf16 %v12986_v8  ;;  %v21352_v8 = vld [vmem:[#allocation96_spill] sm:$0xff]  ;;  %v21354_v56 = vld [vmem:[#allocation102_spill] sm:$0xff] }
 0x1fd   : > { %v14762_v59 = vadd.f32 %v21336_v62, %v3452_v50  ;;  %v14766_v61 = vadd.f32 %v21338_v35, %v3459_v25  ;;  %v14770_v20 = vadd.f32 %v21340_v42, %v3466_v49  ;;  %v21345_v40 = vunpack.c.l.bf16 %v13006_v33  ;;  %v21356_v35 = vld [vmem:[#allocation124_spill] sm:$0xff] }
 0x1fe   : > { %v3469_v17 = vadd.f32 %v21342_v47, %v3468_v38  ;;  %v3524_v2 = vadd.f32 %v21344_v6, %v21343_v12  ;;  %v21346_v50 = vunpack.c.h.bf16 %v13006_v33  ;;  %v21347_v30 = vunpack.c.l.bf16 %v13026_v15  ;;  %v21359_v12 = vld [vmem:[#allocation108_spill] sm:$0xff] }
 0x1ff   : > { %21337 = vst [vmem:[#allocation440_spill] sm:$0xff] %v14762_v59  ;;  %21339 = vst [vmem:[#allocation441_spill] sm:$0xff] %v14766_v61  ;;  %v21348_v25 = vunpack.c.h.bf16 %v13026_v15  ;;  %v21349_v49 = vunpack.c.l.bf16 %v13046_v1  ;;  %v21350_v18 = vunpack.c.h.bf16 %v13046_v1  ;;  %v21351_v29 = vunpack.c.l.bf16 %v12853_v44 }
 0x200   : > { %21341 = vst [vmem:[#allocation442_spill] sm:$0xff] %v14770_v20  ;;  %v3531_v19 = vadd.f32 %v21346_v50, %v21345_v40  ;;  %v21353_v51 = vunpack.c.l.bf16 %v21352_v8  ;;  %v21355_v62 = vunpack.c.l.bf16 %v21354_v56  ;;  %v21357_v42 = vunpack.c.l.bf16 %v21356_v35  ;;  %v21361_v50 = vld [vmem:[#allocation114_spill] sm:$0xff] }
 0x201   : > { %v3538_v23 = vadd.f32 %v21348_v25, %v21347_v30  ;;  %v3545_v38 = vadd.f32 %v21350_v18, %v21349_v49  ;;  %v3476_v34 = vadd.f32 %v21351_v29, %v3475_v3  ;;  %v21358_v47 = vunpack.c.h.bf16 %v21356_v35  ;;  %v21363_v25 = vld [vmem:[#allocation118_spill] sm:$0xff]  ;;  %v21365_v18 = vld [vmem:[#allocation95_spill] sm:$0xff] }
 0x202   : > { %v3483_v37 = vadd.f32 %v21353_v51, %v3482_v13  ;;  %v3490_v33 = vadd.f32 %v21355_v62, %v3489_v36  ;;  %v21360_v6 = vunpack.c.l.bf16 %v21359_v12  ;;  %v21362_v1 = vunpack.c.l.bf16 %v21361_v50  ;;  %v21368_v62 = vld [vmem:[#allocation132_spill] sm:$0xff] }
 0x203   : > { %v3552_v15 = vadd.f32 %v21358_v47, %v21357_v42  ;;  %v21364_v49 = vunpack.c.l.bf16 %v21363_v25  ;;  %v21366_v29 = vunpack.c.l.bf16 %v21365_v18  ;;  %v21367_v51 = vunpack.c.h.bf16 %v12833_v31  ;;  %v21371_v47 = vld [vmem:[#allocation140_spill] sm:$0xff]  ;;  %v21379_v31 = vld [vmem:[#allocation107_spill] sm:$0xff] }
 0x204   : > { %v3497_v40 = vadd.f32 %v21360_v6, %v3496_v27  ;;  %v3504_v30 = vadd.f32 %v21362_v1, %v3503_v11  ;;  %v21369_v45 = vunpack.c.l.bf16 %v21368_v62  ;;  %v21370_v35 = vunpack.c.h.bf16 %v21368_v62  ;;  %v21374_v11 = vld [vmem:[#allocation149_spill] sm:$0xff] }
 0x205   : > { %v3511_v3 = vadd.f32 %v21364_v49, %v3510_v46  ;;  %v3518_v13 = vadd.f32 %v21366_v29, %v3517_v55  ;;  %v3470_v36 = vadd.f32 %v21367_v51, %v3469_v17  ;;  %v21372_v9 = vunpack.c.l.bf16 %v21371_v47 }
 0x206   : > { %v3559_v42 = vadd.f32 %v21370_v35, %v21369_v45  ;;  %v21373_v27 = vunpack.c.h.bf16 %v21371_v47  ;;  %v21375_v1 = vunpack.c.l.bf16 %v21374_v11  ;;  %v21376_v46 = vunpack.c.h.bf16 %v21374_v11  ;;  %v21383_v45 = vld [vmem:[#allocation119_spill] sm:$0xff] }
 0x207   : > { %v21378_v55 = vunpack.c.l.bf16 %v21377_v24  ;;  %v21380_v17 = vunpack.c.l.bf16 %v21379_v31  ;;  %v21382_v20 = vunpack.c.l.bf16 %v21381_v16  ;;  %v21384_v35 = vunpack.c.l.bf16 %v21383_v45 }
 0x208   : > { %v3566_v6 = vadd.f32 %v21373_v27, %v21372_v9  ;;  %v3573_v49 = vadd.f32 %v21376_v46, %v21375_v1  ;;  %v21385_v47 = vunpack.c.h.bf16 %v12853_v44  ;;  %v21386_v27 = vunpack.c.h.bf16 %v21352_v8  ;;  %v21388_v46 = vld [vmem:[#allocation126_spill] sm:$0xff]  ;;  %v21394_v8 = vld [vmem:[#allocation89_spill] sm:$0xff] }
 0x209   : > { %v3525_v29 = vadd.f32 %v21378_v55, %v3524_v2  ;;  %v3532_v51 = vadd.f32 %v21380_v17, %v3531_v19  ;;  %v3539_v62 = vadd.f32 %v21382_v20, %v3538_v23  ;;  %v3546_v61 = vadd.f32 %v21384_v35, %v3545_v38 }
 0x20a   : > { %v3477_v9 = vadd.f32 %v21385_v47, %v3476_v34  ;;  %v3484_v59 = vadd.f32 %v21386_v27, %v3483_v37  ;;  %v21387_v11 = vunpack.c.h.bf16 %v21354_v56  ;;  %v21389_v2 = vunpack.c.l.bf16 %v21388_v46  ;;  %v21396_v56 = vld [vmem:[#allocation134_spill] sm:$0xff] }
 0x20b   : > { %v21390_v19 = vunpack.c.h.bf16 %v21359_v12  ;;  %v21391_v20 = vunpack.c.h.bf16 %v21361_v50  ;;  %v21392_v38 = vunpack.c.h.bf16 %v21363_v25  ;;  %v21393_v44 = vunpack.c.h.bf16 %v21365_v18  ;;  %v21400_v12 = vld [vmem:[#allocation151_spill] sm:$0xff] }
 0x20c   : > { %v3491_v1 = vadd.f32 %v21387_v11, %v3490_v33  ;;  %v3553_v55 = vadd.f32 %v21389_v2, %v3552_v15  ;;  %v21395_v37 = vunpack.c.l.bf16 %v21394_v8  ;;  %v21397_v33 = vunpack.c.l.bf16 %v21396_v56  ;;  %v21398_v11 = vld [vmem:[#allocation142_spill] sm:$0xff] }
 0x20d   : > { %v3498_v17 = vadd.f32 %v21390_v19, %v3497_v40  ;;  %v3505_v23 = vadd.f32 %v21391_v20, %v3504_v30  ;;  %v3512_v35 = vadd.f32 %v21392_v38, %v3511_v3  ;;  %v3519_v34 = vadd.f32 %v21393_v44, %v3518_v13  ;;  %v21406_v38 = vld [vmem:[#allocation92_spill] sm:$0xff] }
 0x20e   : > { %v3471_v47 = vadd.f32 %v21395_v37, %v3470_v36  ;;  %v3560_v27 = vadd.f32 %v21397_v33, %v3559_v42  ;;  %v21399_v15 = vunpack.c.l.bf16 %v21398_v11  ;;  %v21401_v40 = vunpack.c.l.bf16 %v21400_v12  ;;  %v21408_v37 = vld [vmem:[#allocation98_spill] sm:$0xff] }
 0x20f   : > { %v21402_v50 = vunpack.c.h.bf16 %v21377_v24  ;;  %v21403_v25 = vunpack.c.h.bf16 %v21379_v31  ;;  %v21404_v18 = vunpack.c.h.bf16 %v21381_v16  ;;  %v21405_v36 = vunpack.c.h.bf16 %v21383_v45  ;;  %v21413_v31 = vld [vmem:[#allocation110_spill] sm:$0xff]  ;;  %v21415_v16 = vld [vmem:[#allocation116_spill] sm:$0xff] }
 0x210   : > { %v3567_v2 = vadd.f32 %v21399_v15, %v3566_v6  ;;  %v3574_v19 = vadd.f32 %v21401_v40, %v3573_v49  ;;  %v21407_v42 = vunpack.c.l.bf16 %v21406_v38  ;;  %v21409_v6 = vunpack.c.l.bf16 %v21408_v37  ;;  %v21410_v15 = vld [vmem:[#allocation104_spill] sm:$0xff] }
 0x211   : > { %v3526_v30 = vadd.f32 %v21402_v50, %v3525_v29  ;;  %v3533_v3 = vadd.f32 %v21403_v25, %v3532_v51  ;;  %v3540_v13 = vadd.f32 %v21404_v18, %v3539_v62  ;;  %v3547_v20 = vadd.f32 %v21405_v36, %v3546_v61  ;;  %v21417_v45 = vld [vmem:[#allocation120_spill] sm:$0xff]  ;;  %v21419_v36 = vld [vmem:[#allocation97_spill] sm:$0xff] }
 0x212   : > { %v3478_v44 = vadd.f32 %v21407_v42, %v3477_v9  ;;  %v3485_v33 = vadd.f32 %v21409_v6, %v3484_v59  ;;  %v21411_v49 = vunpack.c.l.bf16 %v21410_v15  ;;  %v21412_v24 = vunpack.c.h.bf16 %v21388_v46 }
 0x213   : > { %v21414_v51 = vunpack.c.l.bf16 %v21413_v31  ;;  %v21416_v62 = vunpack.c.l.bf16 %v21415_v16  ;;  %v21418_v61 = vunpack.c.l.bf16 %v21417_v45  ;;  %v21420_v9 = vunpack.c.l.bf16 %v21419_v36 }
 0x214   : > { %v3492_v40 = vadd.f32 %v21411_v49, %v3491_v1  ;;  %v3554_v29 = vadd.f32 %v21412_v24, %v3553_v55  ;;  %v21421_v59 = vunpack.c.h.bf16 %v21394_v8  ;;  %v21422_v1 = vunpack.c.h.bf16 %v21396_v56  ;;  %v21431_v8 = vld [vmem:[#allocation121_spill] sm:$0xff] }
 0x215   : > { %v3499_v50 = vadd.f32 %v21414_v51, %v3498_v17  ;;  %v3506_v25 = vadd.f32 %v21416_v62, %v3505_v23  ;;  %v3513_v18 = vadd.f32 %v21418_v61, %v3512_v35  ;;  %v3520_v42 = vadd.f32 %v21420_v9, %v3519_v34  ;;  %v21425_v51 = vld [vmem:[#allocation103_spill] sm:$0xff] }
 0x216   : > { %v3472_v6 = vadd.f32 %v21421_v59, %v3471_v47  ;;  %v3561_v49 = vadd.f32 %v21422_v1, %v3560_v27  ;;  %v21423_v46 = vunpack.c.h.bf16 %v21398_v11  ;;  %v21424_v17 = vunpack.c.h.bf16 %v21400_v12  ;;  %v21436_v1 = vld [vmem:[#allocation128_spill] sm:$0xff] }
 0x217   : > { %v21426_v23 = vunpack.c.l.bf16 %v21425_v51  ;;  %v21428_v35 = vunpack.c.l.bf16 %v21427_v57  ;;  %v21430_v34 = vunpack.c.l.bf16 %v21429_v10  ;;  %v21432_v47 = vunpack.c.l.bf16 %v21431_v8 }
 0x218   : > { %v3568_v55 = vadd.f32 %v21423_v46, %v3567_v2  ;;  %v3575_v24 = vadd.f32 %v21424_v17, %v3574_v19  ;;  %v21433_v56 = vunpack.c.h.bf16 %v21406_v38  ;;  %v21434_v11 = vunpack.c.h.bf16 %v21408_v37  ;;  %v21442_v37 = vld [vmem:[#allocation91_spill] sm:$0xff] }
 0x219   : > { %v3527_v62 = vadd.f32 %v21426_v23, %v3526_v30  ;;  %v3534_v61 = vadd.f32 %v21428_v35, %v3533_v3  ;;  %v3541_v9 = vadd.f32 %v21430_v34, %v3540_v13  ;;  %v3548_v59 = vadd.f32 %v21432_v47, %v3547_v20 }
 0x21a   : > { %v3479_v27 = vadd.f32 %v21433_v56, %v3478_v44  ;;  %v3486_v2 = vadd.f32 %v21434_v11, %v3485_v33  ;;  %v21435_v12 = vunpack.c.h.bf16 %v21410_v15  ;;  %v21437_v30 = vunpack.c.l.bf16 %v21436_v1  ;;  %v21444_v15 = vld [vmem:[#allocation136_spill] sm:$0xff] }
 0x21b   : > { %v21438_v3 = vunpack.c.h.bf16 %v21413_v31  ;;  %v21439_v13 = vunpack.c.h.bf16 %v21415_v16  ;;  %v21440_v20 = vunpack.c.h.bf16 %v21417_v45  ;;  %v21441_v38 = vunpack.c.h.bf16 %v21419_v36  ;;  %v21446_v56 = vld [vmem:[#allocation144_spill] sm:$0xff]  ;;  %v21448_v31 = vld [vmem:[#allocation127_spill] sm:$0xff] }
 0x21c   : > { %v3493_v19 = vadd.f32 %v21435_v12, %v3492_v40  ;;  %v3555_v46 = vadd.f32 %v21437_v30, %v3554_v29  ;;  %v21443_v33 = vunpack.c.l.bf16 %v21442_v37  ;;  %v21445_v40 = vunpack.c.l.bf16 %v21444_v15 }
 0x21d   : > { %v3500_v17 = vadd.f32 %v21438_v3, %v3499_v50  ;;  %v3507_v23 = vadd.f32 %v21439_v13, %v3506_v25  ;;  %v3514_v35 = vadd.f32 %v21440_v20, %v3513_v18  ;;  %v3521_v44 = vadd.f32 %v21441_v38, %v3520_v42  ;;  %v21454_v3 = vld [vmem:[#allocation94_spill] sm:$0xff]  ;;  %v21456_v20 = vld [vmem:[#allocation100_spill] sm:$0xff] }
 0x21e   : > { %v3473_v34 = vadd.f32 %v21443_v33, %v3472_v6  ;;  %v3562_v47 = vadd.f32 %v21445_v40, %v3561_v49  ;;  %v21447_v29 = vunpack.c.l.bf16 %v21446_v56  ;;  %v21449_v50 = vunpack.c.l.bf16 %v21448_v31  ;;  %v21458_v33 = vld [vmem:[#allocation106_spill] sm:$0xff] }
 0x21f   : > { %v21450_v16 = vunpack.c.h.bf16 %v21425_v51  ;;  %v21451_v45 = vunpack.c.h.bf16 %v21427_v57  ;;  %v21452_v36 = vunpack.c.h.bf16 %v21429_v10  ;;  %v21453_v6 = vunpack.c.h.bf16 %v21431_v8  ;;  %v21461_v57 = vld [vmem:[#allocation112_spill] sm:$0xff]  ;;  %v21463_v10 = vld [vmem:[#allocation93_spill] sm:$0xff]  ;;  %v21465_v8 = vld [vmem:[#allocation122_spill] sm:$0xff] }
 0x220   : > { %v3569_v11 = vadd.f32 %v21447_v29, %v3568_v55  ;;  %v3576_v12 = vadd.f32 %v21449_v50, %v3575_v24  ;;  %v21455_v49 = vunpack.c.l.bf16 %v21454_v3  ;;  %v21457_v55 = vunpack.c.l.bf16 %v21456_v20 }
 0x221   : > { %v3528_v25 = vadd.f32 %v21450_v16, %v3527_v62  ;;  %v3535_v18 = vadd.f32 %v21451_v45, %v3534_v61  ;;  %v3542_v42 = vadd.f32 %v21452_v36, %v3541_v9  ;;  %v3549_v30 = vadd.f32 %v21453_v6, %v3548_v59  ;;  %v21467_v45 = vld [vmem:[#allocation99_spill] sm:$0xff] }
 0x222   : > { %v3480_v13 = vadd.f32 %v21455_v49, %v3479_v27  ;;  %v3487_v38 = vadd.f32 %v21457_v55, %v3486_v2  ;;  %v21459_v24 = vunpack.c.l.bf16 %v21458_v33  ;;  %v21460_v51 = vunpack.c.h.bf16 %v21436_v1 }
 0x223   : > { %v21462_v61 = vunpack.c.l.bf16 %v21461_v57  ;;  %v21464_v9 = vunpack.c.l.bf16 %v21463_v10  ;;  %v21466_v59 = vunpack.c.l.bf16 %v21465_v8  ;;  %v21468_v27 = vunpack.c.l.bf16 %v21467_v45 }
 0x224   : > { %v3494_v40 = vadd.f32 %v21459_v24, %v3493_v19  ;;  %v3556_v62 = vadd.f32 %v21460_v51, %v3555_v46  ;;  %v21469_v2 = vunpack.c.h.bf16 %v21442_v37  ;;  %v21471_v19 = vunpack.c.h.bf16 %v21444_v15 }
 0x225   : > { %v3501_v29 = vadd.f32 %v21462_v61, %v3500_v17  ;;  %v3508_v50 = vadd.f32 %v21464_v9, %v3507_v23  ;;  %v3515_v16 = vadd.f32 %v21466_v59, %v3514_v35  ;;  %v3522_v36 = vadd.f32 %v21468_v27, %v3521_v44  ;;  %v21474_v23 = vld [vmem:[#allocation105_spill] sm:$0xff]  ;;  %v21476_v35 = vld [vmem:[#allocation111_spill] sm:$0xff] }
 0x226   : > { %v14944_v6 = vadd.f32 %v21469_v2, %v3473_v34  ;;  %v3563_v1 = vadd.f32 %v21471_v19, %v3562_v47  ;;  %v21472_v46 = vunpack.c.h.bf16 %v21446_v56  ;;  %v21473_v17 = vunpack.c.h.bf16 %v21448_v31  ;;  %v21478_v44 = vld [vmem:[#allocation117_spill] sm:$0xff]  ;;  %v21480_v34 = vld [vmem:[#allocation123_spill] sm:$0xff] }
 0x227   : > { %v21475_v24 = vunpack.c.l.bf16 %v21474_v23  ;;  %v21477_v61 = vunpack.c.l.bf16 %v21476_v35  ;;  %v21479_v59 = vunpack.c.l.bf16 %v21478_v44  ;;  %v21481_v27 = vunpack.c.l.bf16 %v21480_v34 }
 0x228   : > { %21470 = vst [vmem:[#allocation96_spill] sm:$0xff] %v14944_v6  ;;  %v3570_v49 = vadd.f32 %v21472_v46, %v3569_v11  ;;  %v3577_v55 = vadd.f32 %v21473_v17, %v3576_v12  ;;  %v21482_v15 = vunpack.c.h.bf16 %v21454_v3  ;;  %v21484_v56 = vunpack.c.h.bf16 %v21456_v20  ;;  %v21637_v6 = vld [vmem:[#allocation198_spill] sm:$0xff] }
 0x229   : > { %v3529_v51 = vadd.f32 %v21475_v24, %v3528_v25  ;;  %v3536_v9 = vadd.f32 %v21477_v61, %v3535_v18  ;;  %v3543_v37 = vadd.f32 %v21479_v59, %v3542_v42  ;;  %v3550_v2 = vadd.f32 %v21481_v27, %v3549_v30  ;;  %v21488_v25 = vld [vmem:[#allocation130_spill] sm:$0xff] }
 0x22a   : > { %v14962_v47 = vadd.f32 %v21482_v15, %v3480_v13  ;;  %v14966_v11 = vadd.f32 %v21484_v56, %v3487_v38  ;;  %v21486_v31 = vunpack.c.h.bf16 %v21458_v33  ;;  %v21489_v18 = vunpack.c.l.bf16 %v21488_v25 }
 0x22b   : > { %v21490_v42 = vunpack.c.h.bf16 %v21461_v57  ;;  %v21492_v30 = vunpack.c.h.bf16 %v21463_v10  ;;  %v21494_v13 = vunpack.c.h.bf16 %v21465_v8  ;;  %v21496_v38 = vunpack.c.h.bf16 %v21467_v45  ;;  %v21504_v10 = vld [vmem:[#allocation131_spill] sm:$0xff] }
 0x22c   : > { %21483 = vst [vmem:[#allocation102_spill] sm:$0xff] %v14962_v47  ;;  %21485 = vst [vmem:[#allocation124_spill] sm:$0xff] %v14966_v11  ;;  %v14970_v12 = vadd.f32 %v21486_v31, %v3494_v40  ;;  %v3557_v19 = vadd.f32 %v21489_v18, %v3556_v62  ;;  %v21498_v40 = vld [vmem:[#allocation138_spill] sm:$0xff]  ;;  %v21500_v62 = vld [vmem:[#allocation125_spill] sm:$0xff]  ;;  %v21506_v15 = vunpack.c.h.bf16 %v21504_v10  ;;  %v21509_v45 = vunpack.c.h.bf16 %v21476_v35 }
 0x22d   : > { %v14976_v46 = vadd.f32 %v21490_v42, %v3501_v29  ;;  %v14980_v3 = vadd.f32 %v21492_v30, %v3508_v50  ;;  %v14984_v20 = vadd.f32 %v21494_v13, %v3515_v16  ;;  %v14988_v33 = vadd.f32 %v21496_v38, %v3522_v36  ;;  %v21502_v29 = vld [vmem:[#allocation129_spill] sm:$0xff]  ;;  %v21517_v30 = vld [vmem:[#allocation139_spill] sm:$0xff]  ;;  %v21520_v35 = vld [vmem:[#allocation146_spill] sm:$0xff] }
 0x22e   : > { %21487 = vst [vmem:[#allocation108_spill] sm:$0xff] %v14970_v12  ;;  %v21499_v17 = vunpack.c.l.bf16 %v21498_v40  ;;  %v21501_v61 = vunpack.c.l.bf16 %v21500_v62  ;;  %v21503_v59 = vunpack.c.l.bf16 %v21502_v29  ;;  %v21505_v50 = vunpack.c.l.bf16 %v21504_v10  ;;  %v21529_v10 = vld [vmem:[#allocation176_spill] sm:$0xff]  ;;  %v21635_v47 = vld [vmem:[#allocation194_spill] sm:$0xff] }
 0x22f   : > { %21491 = vst [vmem:[#allocation114_spill] sm:$0xff] %v14976_v46  ;;  %21493 = vst [vmem:[#allocation118_spill] sm:$0xff] %v14980_v3  ;;  %v21507_v16 = vunpack.c.h.bf16 %v21474_v23  ;;  %v15006_v36 = vadd.f32 %v21509_v45, %v3536_v9  ;;  %v21515_v18 = vunpack.c.h.bf16 %v21488_v25  ;;  %v21518_v23 = vunpack.c.l.bf16 %v21517_v30  ;;  %v21532_v45 = vld [vmem:[#allocation180_spill] sm:$0xff]  ;;  %v21589_v3 = vld [vmem:[#allocation197_spill] sm:$0xff] }
 0x230   : > { %21495 = vst [vmem:[#allocation95_spill] sm:$0xff] %v14984_v20  ;;  %21497 = vst [vmem:[#allocation132_spill] sm:$0xff] %v14988_v33  ;;  %v3564_v24 = vadd.f32 %v21499_v17, %v3563_v1  ;;  %v3571_v57 = vadd.f32 %v21501_v61, %v3570_v49  ;;  %v3578_v27 = vadd.f32 %v21503_v59, %v3577_v55  ;;  %v21511_v1 = vunpack.c.h.bf16 %v21478_v44  ;;  %v21526_v61 = vld [vmem:[#allocation172_spill] sm:$0xff]  ;;  %v21585_v20 = vld [vmem:[#allocation189_spill] sm:$0xff] }
 0x231   : > { %v3580_v8 = vadd.f32 %v21506_v15, %v21505_v50  ;;  %v15002_v56 = vadd.f32 %v21507_v16, %v3529_v51  ;;  %21510 = vst [vmem:[#allocation149_spill] sm:$0xff] %v15006_v36  ;;  %v21513_v49 = vunpack.c.h.bf16 %v21480_v34  ;;  %v15018_v42 = vadd.f32 %v21515_v18, %v3557_v19 }
 0x232   : > { %v15010_v31 = vadd.f32 %v21511_v1, %v3543_v37  ;;  %v21519_v51 = vunpack.c.h.bf16 %v21517_v30  ;;  %v21521_v9 = vunpack.c.l.bf16 %v21520_v35  ;;  %v21522_v38 = vunpack.c.h.bf16 %v21520_v35  ;;  %v21523_v37 = vld [vmem:[#allocation152_spill] sm:$0xff] }
 0x233   : > { %21508 = vst [vmem:[#allocation140_spill] sm:$0xff] %v15002_v56  ;;  %v15014_v55 = vadd.f32 %v21513_v49, %v3550_v2  ;;  %21516 = vst [vmem:[#allocation113_spill] sm:$0xff] %v15018_v42  ;;  %v21524_v17 = vunpack.c.l.bf16 %v21523_v37  ;;  %v21525_v34 = vunpack.c.h.bf16 %v21523_v37  ;;  %v21527_v59 = vunpack.c.l.bf16 %v21526_v61  ;;  %v21535_v30 = vld [vmem:[#allocation184_spill] sm:$0xff] }
 0x234   : > { %21512 = vst [vmem:[#allocation101_spill] sm:$0xff] %v15010_v31  ;;  %v3587_v13 = vadd.f32 %v21519_v51, %v21518_v23  ;;  %v3594_v44 = vadd.f32 %v21522_v38, %v21521_v9  ;;  %v21528_v25 = vunpack.c.h.bf16 %v21526_v61  ;;  %v21530_v50 = vunpack.c.l.bf16 %v21529_v10 }
 0x235   : > { %21514 = vst [vmem:[#allocation107_spill] sm:$0xff] %v15014_v55  ;;  %v3601_v2 = vadd.f32 %v21525_v34, %v21524_v17  ;;  %v21531_v15 = vunpack.c.h.bf16 %v21529_v10  ;;  %v21533_v1 = vunpack.c.l.bf16 %v21532_v45  ;;  %v21534_v49 = vunpack.c.h.bf16 %v21532_v45  ;;  %v21569_v55 = vld [vmem:[#allocation177_spill] sm:$0xff] }
 0x236   : > { %v3608_v19 = vadd.f32 %v21528_v25, %v21527_v59  ;;  %v21536_v23 = vunpack.c.l.bf16 %v21535_v30  ;;  %v21537_v51 = vunpack.c.h.bf16 %v21535_v30  ;;  %v21538_v9 = vunpack.c.h.bf16 %v21498_v40  ;;  %v21544_v59 = vld [vmem:[#allocation133_spill] sm:$0xff] }
 0x237   : > { %v3615_v16 = vadd.f32 %v21531_v15, %v21530_v50  ;;  %v3622_v18 = vadd.f32 %v21534_v49, %v21533_v1  ;;  %v21540_v37 = vunpack.c.h.bf16 %v21500_v62  ;;  %v21542_v34 = vunpack.c.h.bf16 %v21502_v29  ;;  %v21546_v50 = vld [vmem:[#allocation188_spill] sm:$0xff] }
 0x238   : > { %v3629_v35 = vadd.f32 %v21537_v51, %v21536_v23  ;;  %v15050_v38 = vadd.f32 %v21538_v9, %v3564_v24  ;;  %v21545_v25 = vunpack.c.l.bf16 %v21544_v59  ;;  %v21547_v15 = vunpack.c.l.bf16 %v21546_v50  ;;  %v21549_v49 = vld [vmem:[#allocation192_spill] sm:$0xff] }
 0x239   : > { %v15054_v17 = vadd.f32 %v21540_v37, %v3571_v57  ;;  %v15058_v61 = vadd.f32 %v21542_v34, %v3578_v27  ;;  %v21548_v45 = vunpack.c.h.bf16 %v21546_v50  ;;  %v21550_v40 = vunpack.c.l.bf16 %v21549_v49  ;;  %v21552_v62 = vld [vmem:[#allocation196_spill] sm:$0xff]  ;;  %v21558_v37 = vld [vmem:[#allocation141_spill] sm:$0xff]  ;;  %v21560_v50 = vld [vmem:[#allocation147_spill] sm:$0xff] }
 0x23a   : > { %21539 = vst [vmem:[#allocation119_spill] sm:$0xff] %v15050_v38  ;;  %v3581_v10 = vadd.f32 %v21545_v25, %v3580_v8  ;;  %v21551_v24 = vunpack.c.h.bf16 %v21549_v49  ;;  %v21553_v57 = vunpack.c.l.bf16 %v21552_v62  ;;  %v21554_v23 = vunpack.c.h.bf16 %v21552_v62  ;;  %v21555_v27 = vld [vmem:[#allocation200_spill] sm:$0xff] }
 0x23b   : > { %21541 = vst [vmem:[#allocation126_spill] sm:$0xff] %v15054_v17  ;;  %21543 = vst [vmem:[#allocation89_spill] sm:$0xff] %v15058_v61  ;;  %v3636_v1 = vadd.f32 %v21548_v45, %v21547_v15  ;;  %v21556_v51 = vunpack.c.l.bf16 %v21555_v27  ;;  %v21557_v9 = vunpack.c.h.bf16 %v21555_v27  ;;  %v21559_v34 = vunpack.c.l.bf16 %v21558_v37  ;;  %v21562_v61 = vld [vmem:[#allocation169_spill] sm:$0xff] }
 0x23c   : > { %v3643_v30 = vadd.f32 %v21551_v24, %v21550_v40  ;;  %v3650_v29 = vadd.f32 %v21554_v23, %v21553_v57  ;;  %v21561_v15 = vunpack.c.l.bf16 %v21560_v50  ;;  %v21563_v17 = vunpack.c.l.bf16 %v21562_v61  ;;  %v21564_v40 = vld [vmem:[#allocation204_spill] sm:$0xff]  ;;  %v21567_v57 = vld [vmem:[#allocation173_spill] sm:$0xff] }
 0x23d   : > { %v3657_v8 = vadd.f32 %v21557_v9, %v21556_v51  ;;  %v3588_v25 = vadd.f32 %v21559_v34, %v3587_v13  ;;  %v21565_v24 = vunpack.c.l.bf16 %v21564_v40  ;;  %v21566_v38 = vunpack.c.h.bf16 %v21564_v40  ;;  %v21571_v9 = vld [vmem:[#allocation181_spill] sm:$0xff] }
 0x23e   : > { %v3595_v45 = vadd.f32 %v21561_v15, %v3594_v44  ;;  %v3602_v49 = vadd.f32 %v21563_v17, %v3601_v2  ;;  %v21568_v23 = vunpack.c.l.bf16 %v21567_v57  ;;  %v21570_v27 = vunpack.c.l.bf16 %v21569_v55  ;;  %v21573_v34 = vld [vmem:[#allocation185_spill] sm:$0xff]  ;;  %v21576_v17 = vld [vmem:[#allocation208_spill] sm:$0xff] }
 0x23f   : > { %v3664_v62 = vadd.f32 %v21566_v38, %v21565_v24  ;;  %v21572_v31 = vunpack.c.l.bf16 %v21571_v9  ;;  %v21574_v36 = vunpack.c.l.bf16 %v21573_v34  ;;  %v21575_v15 = vunpack.c.h.bf16 %v21544_v59  ;;  %v21579_v24 = vld [vmem:[#allocation212_spill] sm:$0xff]  ;;  %v21587_v59 = vld [vmem:[#allocation193_spill] sm:$0xff] }
 0x240   : > { %v3609_v42 = vadd.f32 %v21568_v23, %v3608_v19  ;;  %v3616_v51 = vadd.f32 %v21570_v27, %v3615_v16  ;;  %v21577_v56 = vunpack.c.l.bf16 %v21576_v17  ;;  %v21578_v40 = vunpack.c.h.bf16 %v21576_v17  ;;  %v21582_v16 = vld [vmem:[#allocation216_spill] sm:$0xff] }
 0x241   : > { %v3623_v13 = vadd.f32 %v21572_v31, %v3622_v18  ;;  %v3630_v44 = vadd.f32 %v21574_v36, %v3629_v35  ;;  %v3582_v2 = vadd.f32 %v21575_v15, %v3581_v10  ;;  %v21580_v33 = vunpack.c.l.bf16 %v21579_v24 }
 0x242   : > { %v3671_v38 = vadd.f32 %v21578_v40, %v21577_v56  ;;  %v21581_v19 = vunpack.c.h.bf16 %v21579_v24  ;;  %v21583_v27 = vunpack.c.l.bf16 %v21582_v16  ;;  %v21584_v31 = vunpack.c.h.bf16 %v21582_v16  ;;  %v21591_v56 = vld [vmem:[#allocation201_spill] sm:$0xff] }
 0x243   : > { %v21586_v36 = vunpack.c.l.bf16 %v21585_v20  ;;  %v21588_v10 = vunpack.c.l.bf16 %v21587_v59  ;;  %v21590_v46 = vunpack.c.l.bf16 %v21589_v3  ;;  %v21592_v40 = vunpack.c.l.bf16 %v21591_v56 }
 0x244   : > { %v3678_v23 = vadd.f32 %v21581_v19, %v21580_v33  ;;  %v3685_v18 = vadd.f32 %v21584_v31, %v21583_v27  ;;  %v21593_v24 = vunpack.c.h.bf16 %v21558_v37  ;;  %v21594_v19 = vunpack.c.h.bf16 %v21560_v50  ;;  %v21596_v31 = vld [vmem:[#allocation205_spill] sm:$0xff]  ;;  %v21602_v50 = vld [vmem:[#allocation135_spill] sm:$0xff] }
 0x245   : > { %v3637_v35 = vadd.f32 %v21586_v36, %v3636_v1  ;;  %v3644_v15 = vadd.f32 %v21588_v10, %v3643_v30  ;;  %v3651_v17 = vadd.f32 %v21590_v46, %v3650_v29  ;;  %v3658_v12 = vadd.f32 %v21592_v40, %v3657_v8 }
 0x246   : > { %v3589_v33 = vadd.f32 %v21593_v24, %v3588_v25  ;;  %v3596_v11 = vadd.f32 %v21594_v19, %v3595_v45  ;;  %v21595_v16 = vunpack.c.h.bf16 %v21562_v61  ;;  %v21597_v1 = vunpack.c.l.bf16 %v21596_v31  ;;  %v21604_v61 = vld [vmem:[#allocation209_spill] sm:$0xff] }
 0x247   : > { %v21598_v30 = vunpack.c.h.bf16 %v21567_v57  ;;  %v21599_v46 = vunpack.c.h.bf16 %v21569_v55  ;;  %v21600_v8 = vunpack.c.h.bf16 %v21571_v9  ;;  %v21601_v37 = vunpack.c.h.bf16 %v21573_v34  ;;  %v21608_v57 = vld [vmem:[#allocation217_spill] sm:$0xff] }
 0x248   : > { %v3603_v27 = vadd.f32 %v21595_v16, %v3602_v49  ;;  %v3665_v36 = vadd.f32 %v21597_v1, %v3664_v62  ;;  %v21603_v45 = vunpack.c.l.bf16 %v21602_v50  ;;  %v21605_v49 = vunpack.c.l.bf16 %v21604_v61  ;;  %v21606_v16 = vld [vmem:[#allocation213_spill] sm:$0xff] }
 0x249   : > { %v3610_v10 = vadd.f32 %v21598_v30, %v3609_v42  ;;  %v3617_v29 = vadd.f32 %v21599_v46, %v3616_v51  ;;  %v3624_v40 = vadd.f32 %v21600_v8, %v3623_v13  ;;  %v3631_v25 = vadd.f32 %v21601_v37, %v3630_v44  ;;  %v21614_v8 = vld [vmem:[#allocation143_spill] sm:$0xff] }
 0x24a   : > { %v3583_v24 = vadd.f32 %v21603_v45, %v3582_v2  ;;  %v3672_v19 = vadd.f32 %v21605_v49, %v3671_v38  ;;  %v21607_v62 = vunpack.c.l.bf16 %v21606_v16  ;;  %v21609_v42 = vunpack.c.l.bf16 %v21608_v57  ;;  %v21616_v45 = vld [vmem:[#allocation148_spill] sm:$0xff] }
 0x24b   : > { %v21610_v55 = vunpack.c.h.bf16 %v21585_v20  ;;  %v21611_v9 = vunpack.c.h.bf16 %v21587_v59  ;;  %v21612_v34 = vunpack.c.h.bf16 %v21589_v3  ;;  %v21613_v2 = vunpack.c.h.bf16 %v21591_v56  ;;  %v21621_v59 = vld [vmem:[#allocation174_spill] sm:$0xff] }
 0x24c   : > { %v3679_v1 = vadd.f32 %v21607_v62, %v3678_v23  ;;  %v3686_v30 = vadd.f32 %v21609_v42, %v3685_v18  ;;  %v21615_v38 = vunpack.c.l.bf16 %v21614_v8  ;;  %v21617_v23 = vunpack.c.l.bf16 %v21616_v45  ;;  %v21618_v62 = vld [vmem:[#allocation170_spill] sm:$0xff] }
 0x24d   : > { %v3638_v51 = vadd.f32 %v21610_v55, %v3637_v35  ;;  %v3645_v13 = vadd.f32 %v21611_v9, %v3644_v15  ;;  %v3652_v44 = vadd.f32 %v21612_v34, %v3651_v17  ;;  %v3659_v46 = vadd.f32 %v21613_v2, %v3658_v12  ;;  %v21623_v3 = vld [vmem:[#allocation178_spill] sm:$0xff] }
 0x24e   : > { %v3590_v37 = vadd.f32 %v21615_v38, %v3589_v33  ;;  %v3597_v49 = vadd.f32 %v21617_v23, %v3596_v11  ;;  %v21619_v18 = vunpack.c.l.bf16 %v21618_v62  ;;  %v21620_v20 = vunpack.c.h.bf16 %v21596_v31  ;;  %v21625_v56 = vld [vmem:[#allocation182_spill] sm:$0xff] }
 0x24f   : > { %v21622_v15 = vunpack.c.l.bf16 %v21621_v59  ;;  %v21624_v17 = vunpack.c.l.bf16 %v21623_v3  ;;  %v21626_v12 = vunpack.c.l.bf16 %v21625_v56  ;;  %v21627_v2 = vld [vmem:[#allocation186_spill] sm:$0xff]  ;;  %v21629_v11 = vunpack.c.h.bf16 %v21602_v50 }
 0x250   : > { %v3604_v42 = vadd.f32 %v21619_v18, %v3603_v27  ;;  %v3666_v35 = vadd.f32 %v21620_v20, %v3665_v36  ;;  %v21628_v33 = vunpack.c.l.bf16 %v21627_v2  ;;  %v21630_v27 = vunpack.c.h.bf16 %v21604_v61  ;;  %v21639_v50 = vld [vmem:[#allocation202_spill] sm:$0xff] }
 0x251   : > { %v3611_v55 = vadd.f32 %v21622_v15, %v3610_v10  ;;  %v3618_v9 = vadd.f32 %v21624_v17, %v3617_v29  ;;  %v3625_v34 = vadd.f32 %v21626_v12, %v3624_v40  ;;  %v3584_v23 = vadd.f32 %v21629_v11, %v3583_v24  ;;  %v21633_v15 = vld [vmem:[#allocation190_spill] sm:$0xff] }
 0x252   : > { %v3632_v38 = vadd.f32 %v21628_v33, %v3631_v25  ;;  %v3673_v18 = vadd.f32 %v21630_v27, %v3672_v19  ;;  %v21631_v31 = vunpack.c.h.bf16 %v21606_v16  ;;  %v21632_v10 = vunpack.c.h.bf16 %v21608_v57  ;;  %v21644_v27 = vld [vmem:[#allocation206_spill] sm:$0xff] }
 0x253   : > { %v21634_v29 = vunpack.c.l.bf16 %v21633_v15  ;;  %v21636_v40 = vunpack.c.l.bf16 %v21635_v47  ;;  %v21638_v25 = vunpack.c.l.bf16 %v21637_v6  ;;  %v21640_v24 = vunpack.c.l.bf16 %v21639_v50 }
 0x254   : > { %v3680_v36 = vadd.f32 %v21631_v31, %v3679_v1  ;;  %v3687_v20 = vadd.f32 %v21632_v10, %v3686_v30  ;;  %v21641_v61 = vunpack.c.h.bf16 %v21614_v8  ;;  %v21642_v16 = vunpack.c.h.bf16 %v21616_v45  ;;  %v21650_v45 = vld [vmem:[#allocation137_spill] sm:$0xff] }
 0x255   : > { %v3639_v17 = vadd.f32 %v21634_v29, %v3638_v51  ;;  %v3646_v12 = vadd.f32 %v21636_v40, %v3645_v13  ;;  %v3653_v33 = vadd.f32 %v21638_v25, %v3652_v44  ;;  %v3660_v11 = vadd.f32 %v21640_v24, %v3659_v46 }
 0x256   : > { %v3591_v19 = vadd.f32 %v21641_v61, %v3590_v37  ;;  %v3598_v1 = vadd.f32 %v21642_v16, %v3597_v49  ;;  %v21643_v57 = vunpack.c.h.bf16 %v21618_v62  ;;  %v21645_v51 = vunpack.c.l.bf16 %v21644_v27  ;;  %v21652_v62 = vld [vmem:[#allocation210_spill] sm:$0xff] }
 0x257   : > { %v21646_v13 = vunpack.c.h.bf16 %v21621_v59  ;;  %v21647_v44 = vunpack.c.h.bf16 %v21623_v3  ;;  %v21648_v46 = vunpack.c.h.bf16 %v21625_v56  ;;  %v21649_v8 = vunpack.c.h.bf16 %v21627_v2  ;;  %v21654_v61 = vld [vmem:[#allocation214_spill] sm:$0xff] }
 0x258   : > { %v3605_v30 = vadd.f32 %v21643_v57, %v3604_v42  ;;  %v3667_v31 = vadd.f32 %v21645_v51, %v3666_v35  ;;  %v21651_v49 = vunpack.c.l.bf16 %v21650_v45  ;;  %v21653_v42 = vunpack.c.l.bf16 %v21652_v62  ;;  %v21656_v59 = vld [vmem:[#allocation218_spill] sm:$0xff] }
 0x259   : > { %v3612_v10 = vadd.f32 %v21646_v13, %v3611_v55  ;;  %v3619_v29 = vadd.f32 %v21647_v44, %v3618_v9  ;;  %v3626_v40 = vadd.f32 %v21648_v46, %v3625_v34  ;;  %v3633_v37 = vadd.f32 %v21649_v8, %v3632_v38  ;;  %v21662_v13 = vld [vmem:[#allocation145_spill] sm:$0xff]  ;;  %v21664_v46 = vld [vmem:[#allocation150_spill] sm:$0xff] }
 0x25a   : > { %v3585_v25 = vadd.f32 %v21651_v49, %v3584_v23  ;;  %v3674_v24 = vadd.f32 %v21653_v42, %v3673_v18  ;;  %v21655_v35 = vunpack.c.l.bf16 %v21654_v61  ;;  %v21657_v55 = vunpack.c.l.bf16 %v21656_v59  ;;  %v21666_v49 = vld [vmem:[#allocation171_spill] sm:$0xff] }
 0x25b   : > { %v21658_v3 = vunpack.c.h.bf16 %v21633_v15  ;;  %v21659_v56 = vunpack.c.h.bf16 %v21635_v47  ;;  %v21660_v2 = vunpack.c.h.bf16 %v21637_v6  ;;  %v21661_v23 = vunpack.c.h.bf16 %v21639_v50  ;;  %v21669_v47 = vld [vmem:[#allocation175_spill] sm:$0xff] }
 0x25c   : > { %v3681_v16 = vadd.f32 %v21655_v35, %v3680_v36  ;;  %v3688_v57 = vadd.f32 %v21657_v55, %v3687_v20  ;;  %v21663_v18 = vunpack.c.l.bf16 %v21662_v13  ;;  %v21665_v36 = vunpack.c.l.bf16 %v21664_v46  ;;  %v21671_v6 = vld [vmem:[#allocation179_spill] sm:$0xff] }
 0x25d   : > { %v3640_v9 = vadd.f32 %v21658_v3, %v3639_v17  ;;  %v3647_v34 = vadd.f32 %v21659_v56, %v3646_v12  ;;  %v3654_v38 = vadd.f32 %v21660_v2, %v3653_v33  ;;  %v3661_v51 = vadd.f32 %v21661_v23, %v3660_v11  ;;  %v21673_v50 = vld [vmem:[#allocation183_spill] sm:$0xff] }
 0x25e   : > { %v3592_v44 = vadd.f32 %v21663_v18, %v3591_v19  ;;  %v3599_v8 = vadd.f32 %v21665_v36, %v3598_v1  ;;  %v21667_v20 = vunpack.c.l.bf16 %v21666_v49  ;;  %v21668_v15 = vunpack.c.h.bf16 %v21644_v27  ;;  %v21675_v56 = vld [vmem:[#allocation187_spill] sm:$0xff] }
 0x25f   : > { %v21670_v12 = vunpack.c.l.bf16 %v21669_v47  ;;  %v21672_v33 = vunpack.c.l.bf16 %v21671_v6  ;;  %v21674_v11 = vunpack.c.l.bf16 %v21673_v50  ;;  %v21676_v19 = vunpack.c.l.bf16 %v21675_v56 }
 0x260   : > { %v3606_v42 = vadd.f32 %v21667_v20, %v3605_v30  ;;  %v3668_v17 = vadd.f32 %v21668_v15, %v3667_v31  ;;  %v21677_v1 = vunpack.c.h.bf16 %v21650_v45  ;;  %v21679_v30 = vunpack.c.h.bf16 %v21652_v62 }
 0x261   : > { %v3613_v35 = vadd.f32 %v21670_v12, %v3612_v10  ;;  %v3620_v55 = vadd.f32 %v21672_v33, %v3619_v29  ;;  %v3627_v3 = vadd.f32 %v21674_v11, %v3626_v40  ;;  %v3634_v2 = vadd.f32 %v21676_v19, %v3633_v37  ;;  %v21682_v29 = vld [vmem:[#allocation191_spill] sm:$0xff] }
 0x262   : > { %v15232_v23 = vadd.f32 %v21677_v1, %v3585_v25  ;;  %v3675_v27 = vadd.f32 %v21679_v30, %v3674_v24  ;;  %v21680_v31 = vunpack.c.h.bf16 %v21654_v61  ;;  %v21681_v10 = vunpack.c.h.bf16 %v21656_v59  ;;  %v21684_v40 = vld [vmem:[#allocation195_spill] sm:$0xff] }
 0x263   : > { %v21683_v20 = vunpack.c.l.bf16 %v21682_v29  ;;  %v21685_v12 = vunpack.c.l.bf16 %v21684_v40  ;;  %v21686_v37 = vld [vmem:[#allocation199_spill] sm:$0xff]  ;;  %v21690_v62 = vunpack.c.h.bf16 %v21662_v13  ;;  %v21692_v61 = vunpack.c.h.bf16 %v21664_v46 }
 0x264   : > { %21678 = vst [vmem:[#allocation134_spill] sm:$0xff] %v15232_v23  ;;  %v3682_v18 = vadd.f32 %v21680_v31, %v3681_v16  ;;  %v3689_v36 = vadd.f32 %v21681_v10, %v3688_v57  ;;  %v21687_v11 = vunpack.c.l.bf16 %v21686_v37  ;;  %v21688_v25 = vld [vmem:[#allocation203_spill] sm:$0xff]  ;;  %v21694_v59 = vunpack.c.h.bf16 %v21666_v49  ;;  %v21845_v23 = vld [vmem:[#allocation262_spill] sm:$0xff] }
 0x265   : > { %v3641_v15 = vadd.f32 %v21683_v20, %v3640_v9  ;;  %v3648_v33 = vadd.f32 %v21685_v12, %v3647_v34  ;;  %v21689_v19 = vunpack.c.l.bf16 %v21688_v25  ;;  %v15250_v24 = vadd.f32 %v21690_v62, %v3592_v44  ;;  %v21696_v9 = vld [vmem:[#allocation207_spill] sm:$0xff] }
 0x266   : > { %v3655_v45 = vadd.f32 %v21687_v11, %v3654_v38  ;;  %v15254_v16 = vadd.f32 %v21692_v61, %v3599_v8  ;;  %v15258_v57 = vadd.f32 %v21694_v59, %v3606_v42  ;;  %v21697_v34 = vunpack.c.l.bf16 %v21696_v9  ;;  %v21706_v42 = vld [vmem:[#allocation211_spill] sm:$0xff] }
 0x267   : > { %v3662_v1 = vadd.f32 %v21689_v19, %v3661_v51  ;;  %21691 = vst [vmem:[#allocation142_spill] sm:$0xff] %v15250_v24  ;;  %v21698_v38 = vunpack.c.h.bf16 %v21669_v47  ;;  %v21700_v51 = vunpack.c.h.bf16 %v21671_v6  ;;  %v21702_v44 = vunpack.c.h.bf16 %v21673_v50  ;;  %v21712_v6 = vld [vmem:[#allocation220_spill] sm:$0xff]  ;;  %v21843_v24 = vld [vmem:[#allocation258_spill] sm:$0xff] }
 0x268   : > { %21693 = vst [vmem:[#allocation151_spill] sm:$0xff] %v15254_v16  ;;  %21695 = vst [vmem:[#allocation92_spill] sm:$0xff] %v15258_v57  ;;  %v3669_v30 = vadd.f32 %v21697_v34, %v3668_v17  ;;  %v21704_v8 = vunpack.c.h.bf16 %v21675_v56  ;;  %v21707_v10 = vunpack.c.l.bf16 %v21706_v42  ;;  %v21708_v17 = vld [vmem:[#allocation215_spill] sm:$0xff]  ;;  %v21714_v62 = vunpack.c.h.bf16 %v21712_v6 }
 0x269   : > { %v15264_v31 = vadd.f32 %v21698_v38, %v3613_v35  ;;  %v15268_v13 = vadd.f32 %v21700_v51, %v3620_v55  ;;  %v15272_v46 = vadd.f32 %v21702_v44, %v3627_v3  ;;  %v21709_v12 = vunpack.c.l.bf16 %v21708_v17  ;;  %v21710_v35 = vld [vmem:[#allocation219_spill] sm:$0xff]  ;;  %v21725_v51 = vld [vmem:[#allocation224_spill] sm:$0xff] }
 0x26a   : > { %v15276_v49 = vadd.f32 %v21704_v8, %v3634_v2  ;;  %v3676_v20 = vadd.f32 %v21707_v10, %v3675_v27  ;;  %v21711_v11 = vunpack.c.l.bf16 %v21710_v35  ;;  %v21713_v55 = vunpack.c.l.bf16 %v21712_v6  ;;  %v21737_v6 = vld [vmem:[#allocation240_spill] sm:$0xff] }
 0x26b   : > { %21699 = vst [vmem:[#allocation98_spill] sm:$0xff] %v15264_v31  ;;  %21701 = vst [vmem:[#allocation104_spill] sm:$0xff] %v15268_v13  ;;  %v3683_v47 = vadd.f32 %v21709_v12, %v3682_v18  ;;  %v21715_v3 = vunpack.c.h.bf16 %v21682_v29  ;;  %v21717_v56 = vunpack.c.h.bf16 %v21684_v40  ;;  %v21719_v27 = vunpack.c.h.bf16 %v21686_v37  ;;  %v21728_v40 = vld [vmem:[#allocation228_spill] sm:$0xff]  ;;  %v21797_v13 = vld [vmem:[#allocation261_spill] sm:$0xff] }
 0x26c   : > { %21703 = vst [vmem:[#allocation110_spill] sm:$0xff] %v15272_v46  ;;  %21705 = vst [vmem:[#allocation116_spill] sm:$0xff] %v15276_v49  ;;  %v3690_v19 = vadd.f32 %v21711_v11, %v3689_v36  ;;  %v3692_v50 = vadd.f32 %v21714_v62, %v21713_v55  ;;  %v21721_v18 = vunpack.c.h.bf16 %v21688_v25  ;;  %v21723_v34 = vunpack.c.h.bf16 %v21696_v9  ;;  %v21734_v12 = vld [vmem:[#allocation236_spill] sm:$0xff]  ;;  %v21793_v46 = vld [vmem:[#allocation253_spill] sm:$0xff] }
 0x26d   : > { %v15290_v61 = vadd.f32 %v21715_v3, %v3641_v15  ;;  %v15294_v2 = vadd.f32 %v21717_v56, %v3648_v33  ;;  %v15298_v59 = vadd.f32 %v21719_v27, %v3655_v45  ;;  %v21726_v29 = vunpack.c.l.bf16 %v21725_v51  ;;  %v21731_v45 = vld [vmem:[#allocation232_spill] sm:$0xff] }
 0x26e   : > { %v15302_v36 = vadd.f32 %v21721_v18, %v3662_v1  ;;  %v15306_v38 = vadd.f32 %v21723_v34, %v3669_v30  ;;  %v21727_v15 = vunpack.c.h.bf16 %v21725_v51  ;;  %v21729_v33 = vunpack.c.l.bf16 %v21728_v40  ;;  %v21740_v56 = vld [vmem:[#allocation244_spill] sm:$0xff] }
 0x26f   : > { %21716 = vst [vmem:[#allocation120_spill] sm:$0xff] %v15290_v61  ;;  %21718 = vst [vmem:[#allocation97_spill] sm:$0xff] %v15294_v2  ;;  %v21730_v8 = vunpack.c.h.bf16 %v21728_v40  ;;  %v21732_v10 = vunpack.c.l.bf16 %v21731_v45  ;;  %v21733_v25 = vunpack.c.h.bf16 %v21731_v45  ;;  %v21735_v11 = vunpack.c.l.bf16 %v21734_v12  ;;  %v21743_v51 = vld [vmem:[#allocation248_spill] sm:$0xff] }
 0x270   : > { %21720 = vst [vmem:[#allocation103_spill] sm:$0xff] %v15298_v59  ;;  %21722 = vst [vmem:[#allocation109_spill] sm:$0xff] %v15302_v36  ;;  %v3699_v44 = vadd.f32 %v21727_v15, %v21726_v29  ;;  %v21736_v9 = vunpack.c.h.bf16 %v21734_v12  ;;  %v21738_v55 = vunpack.c.l.bf16 %v21737_v6  ;;  %v21739_v62 = vunpack.c.h.bf16 %v21737_v6  ;;  %v21777_v36 = vld [vmem:[#allocation241_spill] sm:$0xff] }
 0x271   : > { %21724 = vst [vmem:[#allocation115_spill] sm:$0xff] %v15306_v38  ;;  %v3706_v37 = vadd.f32 %v21730_v8, %v21729_v33  ;;  %v3713_v1 = vadd.f32 %v21733_v25, %v21732_v10  ;;  %v21741_v27 = vunpack.c.l.bf16 %v21740_v56  ;;  %v21742_v18 = vunpack.c.h.bf16 %v21740_v56 }
 0x272   : > { %v3720_v30 = vadd.f32 %v21736_v9, %v21735_v11  ;;  %v3727_v3 = vadd.f32 %v21739_v62, %v21738_v55  ;;  %v21744_v29 = vunpack.c.l.bf16 %v21743_v51  ;;  %v21745_v15 = vunpack.c.h.bf16 %v21743_v51  ;;  %v21752_v11 = vld [vmem:[#allocation221_spill] sm:$0xff]  ;;  %v21754_v55 = vld [vmem:[#allocation252_spill] sm:$0xff] }
 0x273   : > { %v3734_v34 = vadd.f32 %v21742_v18, %v21741_v27  ;;  %v21746_v33 = vunpack.c.h.bf16 %v21706_v42  ;;  %v21748_v45 = vunpack.c.h.bf16 %v21708_v17  ;;  %v21750_v25 = vunpack.c.h.bf16 %v21710_v35  ;;  %v21757_v18 = vld [vmem:[#allocation256_spill] sm:$0xff] }
 0x274   : > { %v3741_v40 = vadd.f32 %v21745_v15, %v21744_v29  ;;  %v21753_v9 = vunpack.c.l.bf16 %v21752_v11  ;;  %v21755_v62 = vunpack.c.l.bf16 %v21754_v55  ;;  %v21756_v56 = vunpack.c.h.bf16 %v21754_v55  ;;  %v21760_v17 = vld [vmem:[#allocation260_spill] sm:$0xff]  ;;  %v21768_v55 = vld [vmem:[#allocation229_spill] sm:$0xff] }
 0x275   : > { %v15338_v8 = vadd.f32 %v21746_v33, %v3676_v20  ;;  %v15342_v10 = vadd.f32 %v21748_v45, %v3683_v47  ;;  %v15346_v12 = vadd.f32 %v21750_v25, %v3690_v19  ;;  %v21758_v42 = vunpack.c.l.bf16 %v21757_v18  ;;  %v21763_v19 = vld [vmem:[#allocation264_spill] sm:$0xff]  ;;  %v21766_v45 = vld [vmem:[#allocation225_spill] sm:$0xff] }
 0x276   : > { %v3693_v6 = vadd.f32 %v21753_v9, %v3692_v50  ;;  %v3748_v27 = vadd.f32 %v21756_v56, %v21755_v62  ;;  %v21759_v20 = vunpack.c.h.bf16 %v21757_v18  ;;  %v21761_v47 = vunpack.c.l.bf16 %v21760_v17 }
 0x277   : > { %21747 = vst [vmem:[#allocation121_spill] sm:$0xff] %v15338_v8  ;;  %21749 = vst [vmem:[#allocation128_spill] sm:$0xff] %v15342_v10  ;;  %v21762_v29 = vunpack.c.h.bf16 %v21760_v17  ;;  %v21764_v15 = vunpack.c.l.bf16 %v21763_v19  ;;  %v21765_v33 = vunpack.c.h.bf16 %v21763_v19  ;;  %v21767_v25 = vunpack.c.l.bf16 %v21766_v45 }
 0x278   : > { %21751 = vst [vmem:[#allocation91_spill] sm:$0xff] %v15346_v12  ;;  %v3755_v51 = vadd.f32 %v21759_v20, %v21758_v42  ;;  %v21769_v62 = vunpack.c.l.bf16 %v21768_v55  ;;  %v21770_v12 = vld [vmem:[#allocation233_spill] sm:$0xff]  ;;  %v21772_v42 = vld [vmem:[#allocation268_spill] sm:$0xff]  ;;  %v21778_v19 = vunpack.c.l.bf16 %v21777_v36  ;;  %v21798_v31 = vunpack.c.l.bf16 %v21797_v13 }
 0x279   : > { %v3762_v35 = vadd.f32 %v21762_v29, %v21761_v47  ;;  %v3769_v50 = vadd.f32 %v21765_v33, %v21764_v15  ;;  %v3700_v9 = vadd.f32 %v21767_v25, %v3699_v44  ;;  %v21771_v10 = vunpack.c.l.bf16 %v21770_v12  ;;  %v21775_v47 = vld [vmem:[#allocation237_spill] sm:$0xff] }
 0x27a   : > { %v3707_v56 = vadd.f32 %v21769_v62, %v3706_v37  ;;  %v21773_v20 = vunpack.c.l.bf16 %v21772_v42  ;;  %v21774_v8 = vunpack.c.h.bf16 %v21772_v42  ;;  %v21776_v29 = vunpack.c.l.bf16 %v21775_v47  ;;  %v21779_v33 = vld [vmem:[#allocation245_spill] sm:$0xff] }
 0x27b   : > { %v3714_v18 = vadd.f32 %v21771_v10, %v3713_v1  ;;  %v3728_v15 = vadd.f32 %v21778_v19, %v3727_v3  ;;  %v21780_v59 = vunpack.c.l.bf16 %v21779_v33  ;;  %v21781_v25 = vld [vmem:[#allocation249_spill] sm:$0xff]  ;;  %v21783_v62 = vunpack.c.h.bf16 %v21752_v11  ;;  %v21784_v10 = vld [vmem:[#allocation272_spill] sm:$0xff] }
 0x27c   : > { %v3776_v17 = vadd.f32 %v21774_v8, %v21773_v20  ;;  %v3721_v38 = vadd.f32 %v21776_v29, %v3720_v30  ;;  %v21782_v2 = vunpack.c.l.bf16 %v21781_v25  ;;  %v21785_v61 = vunpack.c.l.bf16 %v21784_v10  ;;  %v21787_v20 = vld [vmem:[#allocation276_spill] sm:$0xff]  ;;  %v21795_v11 = vld [vmem:[#allocation257_spill] sm:$0xff] }
 0x27d   : > { %v3735_v44 = vadd.f32 %v21780_v59, %v3734_v34  ;;  %v3694_v1 = vadd.f32 %v21783_v62, %v3693_v6  ;;  %v21786_v42 = vunpack.c.h.bf16 %v21784_v10  ;;  %v21788_v49 = vunpack.c.l.bf16 %v21787_v20  ;;  %v21790_v3 = vld [vmem:[#allocation280_spill] sm:$0xff] }
 0x27e   : > { %v3742_v37 = vadd.f32 %v21782_v2, %v3741_v40  ;;  %v21789_v30 = vunpack.c.h.bf16 %v21787_v20  ;;  %v21791_v19 = vunpack.c.l.bf16 %v21790_v3  ;;  %v21792_v59 = vunpack.c.h.bf16 %v21790_v3 }
 0x27f   : > { %v3783_v8 = vadd.f32 %v21786_v42, %v21785_v61  ;;  %v21794_v2 = vunpack.c.l.bf16 %v21793_v46  ;;  %v21796_v6 = vunpack.c.l.bf16 %v21795_v11  ;;  %v3763_v10 = vadd.f32 %v21798_v31, %v3762_v35  ;;  %v21799_v61 = vld [vmem:[#allocation265_spill] sm:$0xff] }
 0x280   : > { %v3790_v29 = vadd.f32 %v21789_v30, %v21788_v49  ;;  %v3797_v34 = vadd.f32 %v21792_v59, %v21791_v19  ;;  %v21800_v42 = vunpack.c.l.bf16 %v21799_v61  ;;  %v21801_v20 = vunpack.c.h.bf16 %v21766_v45  ;;  %v21804_v59 = vld [vmem:[#allocation269_spill] sm:$0xff] }
 0x281   : > { %v3749_v40 = vadd.f32 %v21794_v2, %v3748_v27  ;;  %v3756_v62 = vadd.f32 %v21796_v6, %v3755_v51  ;;  %v21802_v30 = vunpack.c.h.bf16 %v21768_v55  ;;  %v21803_v3 = vunpack.c.h.bf16 %v21770_v12  ;;  %v21810_v55 = vld [vmem:[#allocation222_spill] sm:$0xff]  ;;  %v21812_v12 = vld [vmem:[#allocation273_spill] sm:$0xff] }
 0x282   : > { %v3770_v57 = vadd.f32 %v21800_v42, %v3769_v50  ;;  %v3701_v49 = vadd.f32 %v21801_v20, %v3700_v9  ;;  %v21805_v27 = vunpack.c.l.bf16 %v21804_v59  ;;  %v21806_v51 = vunpack.c.h.bf16 %v21775_v47  ;;  %v21816_v47 = vld [vmem:[#allocation281_spill] sm:$0xff] }
 0x283   : > { %v3708_v16 = vadd.f32 %v21802_v30, %v3707_v56  ;;  %v3715_v19 = vadd.f32 %v21803_v3, %v3714_v18  ;;  %v21807_v31 = vunpack.c.h.bf16 %v21777_v36  ;;  %v21808_v50 = vunpack.c.h.bf16 %v21779_v33  ;;  %v21814_v3 = vld [vmem:[#allocation277_spill] sm:$0xff] }
 0x284   : > { %v3777_v2 = vadd.f32 %v21805_v27, %v3776_v17  ;;  %v3722_v6 = vadd.f32 %v21806_v51, %v3721_v38  ;;  %v21809_v45 = vunpack.c.h.bf16 %v21781_v25  ;;  %v21811_v56 = vunpack.c.l.bf16 %v21810_v55 }
 0x285   : > { %v3729_v35 = vadd.f32 %v21807_v31, %v3728_v15  ;;  %v3736_v42 = vadd.f32 %v21808_v50, %v3735_v44  ;;  %v21813_v18 = vunpack.c.l.bf16 %v21812_v12  ;;  %v21815_v17 = vunpack.c.l.bf16 %v21814_v3  ;;  %v21822_v50 = vld [vmem:[#allocation226_spill] sm:$0xff] }
 0x286   : > { %v3743_v9 = vadd.f32 %v21809_v45, %v3742_v37  ;;  %v3695_v20 = vadd.f32 %v21811_v56, %v3694_v1  ;;  %v21817_v38 = vunpack.c.l.bf16 %v21816_v47  ;;  %v21818_v36 = vunpack.c.h.bf16 %v21793_v46  ;;  %v21824_v56 = vld [vmem:[#allocation230_spill] sm:$0xff] }
 0x287   : > { %v3784_v30 = vadd.f32 %v21813_v18, %v3783_v8  ;;  %v3791_v27 = vadd.f32 %v21815_v17, %v3790_v29  ;;  %v21819_v33 = vunpack.c.h.bf16 %v21795_v11  ;;  %v21820_v25 = vunpack.c.h.bf16 %v21797_v13  ;;  %v21826_v17 = vld [vmem:[#allocation234_spill] sm:$0xff] }
 0x288   : > { %v3798_v51 = vadd.f32 %v21817_v38, %v3797_v34  ;;  %v3750_v15 = vadd.f32 %v21818_v36, %v3749_v40  ;;  %v21821_v1 = vunpack.c.h.bf16 %v21799_v61  ;;  %v21823_v8 = vunpack.c.l.bf16 %v21822_v50  ;;  %v21829_v11 = vld [vmem:[#allocation238_spill] sm:$0xff] }
 0x289   : > { %v3757_v44 = vadd.f32 %v21819_v33, %v3756_v62  ;;  %v3764_v37 = vadd.f32 %v21820_v25, %v3763_v10  ;;  %v21825_v29 = vunpack.c.l.bf16 %v21824_v56  ;;  %v21827_v34 = vunpack.c.l.bf16 %v21826_v17  ;;  %v21831_v13 = vld [vmem:[#allocation242_spill] sm:$0xff] }
 0x28a   : > { %v3771_v31 = vadd.f32 %v21821_v1, %v3770_v57  ;;  %v3702_v45 = vadd.f32 %v21823_v8, %v3701_v49  ;;  %v21828_v46 = vunpack.c.h.bf16 %v21804_v59  ;;  %v21830_v62 = vunpack.c.l.bf16 %v21829_v11  ;;  %v21833_v61 = vld [vmem:[#allocation246_spill] sm:$0xff] }
 0x28b   : > { %v3709_v18 = vadd.f32 %v21825_v29, %v3708_v16  ;;  %v3716_v38 = vadd.f32 %v21827_v34, %v3715_v19  ;;  %v21832_v10 = vunpack.c.l.bf16 %v21831_v13  ;;  %v21834_v57 = vunpack.c.l.bf16 %v21833_v61  ;;  %v21835_v1 = vld [vmem:[#allocation250_spill] sm:$0xff] }
 0x28c   : > { %v3778_v40 = vadd.f32 %v21828_v46, %v3777_v2  ;;  %v3723_v36 = vadd.f32 %v21830_v62, %v3722_v6  ;;  %v21836_v49 = vunpack.c.l.bf16 %v21835_v1  ;;  %v21837_v16 = vunpack.c.h.bf16 %v21810_v55  ;;  %v21841_v62 = vld [vmem:[#allocation254_spill] sm:$0xff] }
 0x28d   : > { %v3730_v33 = vadd.f32 %v21832_v10, %v3729_v35  ;;  %v3737_v25 = vadd.f32 %v21834_v57, %v3736_v42  ;;  %v21838_v19 = vunpack.c.h.bf16 %v21812_v12  ;;  %v21839_v59 = vunpack.c.h.bf16 %v21814_v3  ;;  %v21847_v55 = vld [vmem:[#allocation266_spill] sm:$0xff] }
 0x28e   : > { %v3744_v8 = vadd.f32 %v21836_v49, %v3743_v9  ;;  %v3696_v29 = vadd.f32 %v21837_v16, %v3695_v20  ;;  %v21840_v6 = vunpack.c.h.bf16 %v21816_v47  ;;  %v21842_v35 = vunpack.c.l.bf16 %v21841_v62 }
 0x28f   : > { %v3785_v34 = vadd.f32 %v21838_v19, %v3784_v30  ;;  %v3792_v2 = vadd.f32 %v21839_v59, %v3791_v27  ;;  %v21844_v42 = vunpack.c.l.bf16 %v21843_v24  ;;  %v21846_v9 = vunpack.c.l.bf16 %v21845_v23  ;;  %v21852_v19 = vld [vmem:[#allocation270_spill] sm:$0xff] }
 0x290   : > { %v3799_v46 = vadd.f32 %v21840_v6, %v3798_v51  ;;  %v3751_v10 = vadd.f32 %v21842_v35, %v3750_v15  ;;  %v21848_v20 = vunpack.c.l.bf16 %v21847_v55  ;;  %v21849_v12 = vunpack.c.h.bf16 %v21822_v50 }
 0x291   : > { %v3758_v57 = vadd.f32 %v21844_v42, %v3757_v44  ;;  %v3765_v49 = vadd.f32 %v21846_v9, %v3764_v37  ;;  %v21850_v3 = vunpack.c.h.bf16 %v21824_v56  ;;  %v21851_v47 = vunpack.c.h.bf16 %v21826_v17  ;;  %v21858_v56 = vld [vmem:[#allocation223_spill] sm:$0xff]  ;;  %v21860_v17 = vld [vmem:[#allocation274_spill] sm:$0xff] }
 0x292   : > { %v3772_v16 = vadd.f32 %v21848_v20, %v3771_v31  ;;  %v3703_v30 = vadd.f32 %v21849_v12, %v3702_v45  ;;  %v21853_v15 = vunpack.c.l.bf16 %v21852_v19  ;;  %v21854_v44 = vunpack.c.h.bf16 %v21829_v11  ;;  %v21862_v12 = vld [vmem:[#allocation278_spill] sm:$0xff] }
 0x293   : > { %v3710_v27 = vadd.f32 %v21850_v3, %v3709_v18  ;;  %v3717_v51 = vadd.f32 %v21851_v47, %v3716_v38  ;;  %v21855_v37 = vunpack.c.h.bf16 %v21831_v13  ;;  %v21856_v31 = vunpack.c.h.bf16 %v21833_v61  ;;  %v21864_v11 = vld [vmem:[#allocation282_spill] sm:$0xff] }
 0x294   : > { %v3779_v59 = vadd.f32 %v21853_v15, %v3778_v40  ;;  %v3724_v6 = vadd.f32 %v21854_v44, %v3723_v36  ;;  %v21857_v50 = vunpack.c.h.bf16 %v21835_v1  ;;  %v21859_v18 = vunpack.c.l.bf16 %v21858_v56  ;;  %v21870_v44 = vld [vmem:[#allocation227_spill] sm:$0xff] }
 0x295   : > { %v3731_v35 = vadd.f32 %v21855_v37, %v3730_v33  ;;  %v3738_v42 = vadd.f32 %v21856_v31, %v3737_v25  ;;  %v21861_v38 = vunpack.c.l.bf16 %v21860_v17  ;;  %v21863_v40 = vunpack.c.l.bf16 %v21862_v12  ;;  %v21872_v31 = vld [vmem:[#allocation231_spill] sm:$0xff] }
 0x296   : > { %v3745_v45 = vadd.f32 %v21857_v50, %v3744_v8  ;;  %v3697_v9 = vadd.f32 %v21859_v18, %v3696_v29  ;;  %v21865_v36 = vunpack.c.l.bf16 %v21864_v11  ;;  %v21866_v13 = vunpack.c.h.bf16 %v21841_v62  ;;  %v21874_v18 = vld [vmem:[#allocation235_spill] sm:$0xff] }
 0x297   : > { %v3786_v20 = vadd.f32 %v21861_v38, %v3785_v34  ;;  %v3793_v3 = vadd.f32 %v21863_v40, %v3792_v2  ;;  %v21867_v61 = vunpack.c.h.bf16 %v21843_v24  ;;  %v21868_v1 = vunpack.c.h.bf16 %v21845_v23  ;;  %v21877_v24 = vld [vmem:[#allocation239_spill] sm:$0xff] }
 0x298   : > { %v3800_v47 = vadd.f32 %v21865_v36, %v3799_v46  ;;  %v3752_v33 = vadd.f32 %v21866_v13, %v3751_v10  ;;  %v21869_v29 = vunpack.c.h.bf16 %v21847_v55  ;;  %v21871_v34 = vunpack.c.l.bf16 %v21870_v44  ;;  %v21879_v23 = vld [vmem:[#allocation243_spill] sm:$0xff] }
 0x299   : > { %v3759_v25 = vadd.f32 %v21867_v61, %v3758_v57  ;;  %v3766_v8 = vadd.f32 %v21868_v1, %v3765_v49  ;;  %v21873_v2 = vunpack.c.l.bf16 %v21872_v31  ;;  %v21875_v46 = vunpack.c.l.bf16 %v21874_v18  ;;  %v21881_v55 = vld [vmem:[#allocation247_spill] sm:$0xff] }
 0x29a   : > { %v3773_v15 = vadd.f32 %v21869_v29, %v3772_v16  ;;  %v3704_v37 = vadd.f32 %v21871_v34, %v3703_v30  ;;  %v21876_v62 = vunpack.c.h.bf16 %v21852_v19  ;;  %v21878_v57 = vunpack.c.l.bf16 %v21877_v24  ;;  %v21883_v61 = vld [vmem:[#allocation251_spill] sm:$0xff] }
 0x29b   : > { %v3711_v50 = vadd.f32 %v21873_v2, %v3710_v27  ;;  %v3718_v38 = vadd.f32 %v21875_v46, %v3717_v51  ;;  %v21880_v49 = vunpack.c.l.bf16 %v21879_v23  ;;  %v21882_v16 = vunpack.c.l.bf16 %v21881_v55 }
 0x29c   : > { %v3780_v10 = vadd.f32 %v21876_v62, %v3779_v59  ;;  %v3725_v40 = vadd.f32 %v21878_v57, %v3724_v6  ;;  %v21884_v30 = vunpack.c.l.bf16 %v21883_v61  ;;  %v21885_v27 = vunpack.c.h.bf16 %v21858_v56 }
 0x29d   : > { %v3732_v36 = vadd.f32 %v21880_v49, %v3731_v35  ;;  %v3739_v13 = vadd.f32 %v21882_v16, %v3738_v42  ;;  %v21887_v51 = vunpack.c.h.bf16 %v21860_v17  ;;  %v21888_v59 = vunpack.c.h.bf16 %v21862_v12  ;;  %v21890_v35 = vld [vmem:[#allocation255_spill] sm:$0xff] }
 0x29e   : > { %v3746_v1 = vadd.f32 %v21884_v30, %v3745_v45  ;;  %v15520_v29 = vadd.f32 %v21885_v27, %v3697_v9  ;;  %v21889_v6 = vunpack.c.h.bf16 %v21864_v11  ;;  %v21891_v46 = vunpack.c.l.bf16 %v21890_v35  ;;  %v21892_v42 = vld [vmem:[#allocation259_spill] sm:$0xff] }
 0x29f   : > { %v3787_v19 = vadd.f32 %v21887_v51, %v3786_v20  ;;  %v3794_v34 = vadd.f32 %v21888_v59, %v3793_v3  ;;  %v21893_v57 = vunpack.c.l.bf16 %v21892_v42  ;;  %v21894_v45 = vld [vmem:[#allocation263_spill] sm:$0xff]  ;;  %v21898_v17 = vunpack.c.h.bf16 %v21870_v44 }
 0x2a0   : > { %21886 = vst [vmem:[#allocation136_spill] sm:$0xff] %v15520_v29  ;;  %v3801_v2 = vadd.f32 %v21889_v6, %v3800_v47  ;;  %v3753_v62 = vadd.f32 %v21891_v46, %v3752_v33  ;;  %v21895_v16 = vunpack.c.l.bf16 %v21894_v45  ;;  %v21896_v9 = vld [vmem:[#allocation267_spill] sm:$0xff]  ;;  %v21900_v12 = vunpack.c.h.bf16 %v21872_v31  ;;  %v22053_v29 = vld [vmem:[#allocation326_spill] sm:$0xff] }
 0x2a1   : > { %v3760_v49 = vadd.f32 %v21893_v57, %v3759_v25  ;;  %v21897_v30 = vunpack.c.l.bf16 %v21896_v9  ;;  %v15538_v20 = vadd.f32 %v21898_v17, %v3704_v37  ;;  %v21902_v11 = vunpack.c.h.bf16 %v21874_v18  ;;  %v21904_v33 = vld [vmem:[#allocation271_spill] sm:$0xff] }
 0x2a2   : > { %v3767_v56 = vadd.f32 %v21895_v16, %v3766_v8  ;;  %v15542_v3 = vadd.f32 %v21900_v12, %v3711_v50  ;;  %v21905_v25 = vunpack.c.l.bf16 %v21904_v33  ;;  %v21906_v8 = vunpack.c.h.bf16 %v21877_v24 }
 0x2a3   : > { %v3774_v27 = vadd.f32 %v21897_v30, %v3773_v15  ;;  %21899 = vst [vmem:[#allocation144_spill] sm:$0xff] %v15538_v20  ;;  %v15546_v47 = vadd.f32 %v21902_v11, %v3718_v38  ;;  %v21908_v15 = vunpack.c.h.bf16 %v21879_v23  ;;  %v21910_v37 = vunpack.c.h.bf16 %v21881_v55  ;;  %v21914_v38 = vld [vmem:[#allocation275_spill] sm:$0xff]  ;;  %v21920_v23 = vld [vmem:[#allocation284_spill] sm:$0xff]  ;;  %v22051_v20 = vld [vmem:[#allocation322_spill] sm:$0xff] }
 0x2a4   : > { %21901 = vst [vmem:[#allocation127_spill] sm:$0xff] %v15542_v3  ;;  %v3781_v51 = vadd.f32 %v21905_v25, %v3780_v10  ;;  %v15552_v59 = vadd.f32 %v21906_v8, %v3725_v40  ;;  %v21912_v50 = vunpack.c.h.bf16 %v21883_v61  ;;  %v21915_v6 = vunpack.c.l.bf16 %v21914_v38  ;;  %v21916_v10 = vld [vmem:[#allocation279_spill] sm:$0xff] }
 0x2a5   : > { %21903 = vst [vmem:[#allocation94_spill] sm:$0xff] %v15546_v47  ;;  %v15556_v44 = vadd.f32 %v21908_v15, %v3732_v36  ;;  %v15560_v31 = vadd.f32 %v21910_v37, %v3739_v13  ;;  %v21917_v57 = vunpack.c.l.bf16 %v21916_v10  ;;  %v21918_v40 = vld [vmem:[#allocation283_spill] sm:$0xff]  ;;  %v21921_v36 = vunpack.c.l.bf16 %v21920_v23  ;;  %v21933_v15 = vld [vmem:[#allocation288_spill] sm:$0xff] }
 0x2a6   : > { %21907 = vst [vmem:[#allocation100_spill] sm:$0xff] %v15552_v59  ;;  %v15564_v18 = vadd.f32 %v21912_v50, %v3746_v1  ;;  %v3788_v46 = vadd.f32 %v21915_v6, %v3787_v19  ;;  %v21919_v16 = vunpack.c.l.bf16 %v21918_v40  ;;  %v21922_v17 = vunpack.c.h.bf16 %v21920_v23  ;;  %v21945_v23 = vld [vmem:[#allocation304_spill] sm:$0xff] }
 0x2a7   : > { %21909 = vst [vmem:[#allocation106_spill] sm:$0xff] %v15556_v44  ;;  %21911 = vst [vmem:[#allocation112_spill] sm:$0xff] %v15560_v31  ;;  %v3795_v24 = vadd.f32 %v21917_v57, %v3794_v34  ;;  %v21923_v13 = vunpack.c.h.bf16 %v21890_v35  ;;  %v21925_v61 = vunpack.c.h.bf16 %v21892_v42  ;;  %v21927_v19 = vunpack.c.h.bf16 %v21894_v45  ;;  %v21936_v42 = vld [vmem:[#allocation292_spill] sm:$0xff]  ;;  %v22001_v31 = vld [vmem:[#allocation317_spill] sm:$0xff] }
 0x2a8   : > { %21913 = vst [vmem:[#allocation93_spill] sm:$0xff] %v15564_v18  ;;  %v3802_v30 = vadd.f32 %v21919_v16, %v3801_v2  ;;  %v3804_v55 = vadd.f32 %v21922_v17, %v21921_v36  ;;  %v21929_v34 = vunpack.c.h.bf16 %v21896_v9  ;;  %v21931_v25 = vunpack.c.h.bf16 %v21904_v33  ;;  %v21942_v57 = vld [vmem:[#allocation300_spill] sm:$0xff]  ;;  %v22005_v44 = vld [vmem:[#allocation325_spill] sm:$0xff] }
 0x2a9   : > { %v15578_v12 = vadd.f32 %v21923_v13, %v3753_v62  ;;  %v15582_v1 = vadd.f32 %v21925_v61, %v3760_v49  ;;  %v15586_v11 = vadd.f32 %v21927_v19, %v3767_v56  ;;  %v21934_v35 = vunpack.c.l.bf16 %v21933_v15  ;;  %v21939_v56 = vld [vmem:[#allocation296_spill] sm:$0xff] }
 0x2aa   : > { %v15590_v2 = vadd.f32 %v21929_v34, %v3774_v27  ;;  %v15594_v8 = vadd.f32 %v21931_v25, %v3781_v51  ;;  %v21935_v62 = vunpack.c.h.bf16 %v21933_v15  ;;  %v21937_v49 = vunpack.c.l.bf16 %v21936_v42  ;;  %v21948_v61 = vld [vmem:[#allocation308_spill] sm:$0xff] }
 0x2ab   : > { %21924 = vst [vmem:[#allocation122_spill] sm:$0xff] %v15578_v12  ;;  %21926 = vst [vmem:[#allocation99_spill] sm:$0xff] %v15582_v1  ;;  %v21938_v50 = vunpack.c.h.bf16 %v21936_v42  ;;  %v21940_v6 = vunpack.c.l.bf16 %v21939_v56  ;;  %v21941_v9 = vunpack.c.h.bf16 %v21939_v56  ;;  %v21943_v16 = vunpack.c.l.bf16 %v21942_v57  ;;  %v21951_v15 = vld [vmem:[#allocation312_spill] sm:$0xff] }
 0x2ac   : > { %21928 = vst [vmem:[#allocation105_spill] sm:$0xff] %v15586_v11  ;;  %21930 = vst [vmem:[#allocation111_spill] sm:$0xff] %v15590_v2  ;;  %v3811_v37 = vadd.f32 %v21935_v62, %v21934_v35  ;;  %v21944_v33 = vunpack.c.h.bf16 %v21942_v57  ;;  %v21946_v36 = vunpack.c.l.bf16 %v21945_v23  ;;  %v21947_v17 = vunpack.c.h.bf16 %v21945_v23  ;;  %v21985_v2 = vld [vmem:[#allocation305_spill] sm:$0xff] }
 0x2ad   : > { %21932 = vst [vmem:[#allocation117_spill] sm:$0xff] %v15594_v8  ;;  %v3818_v45 = vadd.f32 %v21938_v50, %v21937_v49  ;;  %v3825_v27 = vadd.f32 %v21941_v9, %v21940_v6  ;;  %v21949_v19 = vunpack.c.l.bf16 %v21948_v61  ;;  %v21950_v34 = vunpack.c.h.bf16 %v21948_v61 }
 0x2ae   : > { %v3832_v51 = vadd.f32 %v21944_v33, %v21943_v16  ;;  %v3839_v13 = vadd.f32 %v21947_v17, %v21946_v36  ;;  %v21952_v35 = vunpack.c.l.bf16 %v21951_v15  ;;  %v21953_v62 = vunpack.c.h.bf16 %v21951_v15  ;;  %v21960_v16 = vld [vmem:[#allocation285_spill] sm:$0xff]  ;;  %v21962_v36 = vld [vmem:[#allocation316_spill] sm:$0xff] }
 0x2af   : > { %v3846_v25 = vadd.f32 %v21950_v34, %v21949_v19  ;;  %v21954_v49 = vunpack.c.h.bf16 %v21914_v38  ;;  %v21956_v56 = vunpack.c.h.bf16 %v21916_v10  ;;  %v21958_v9 = vunpack.c.h.bf16 %v21918_v40  ;;  %v21965_v34 = vld [vmem:[#allocation320_spill] sm:$0xff] }
 0x2b0   : > { %v3853_v42 = vadd.f32 %v21953_v62, %v21952_v35  ;;  %v21961_v33 = vunpack.c.l.bf16 %v21960_v16  ;;  %v21963_v17 = vunpack.c.l.bf16 %v21962_v36  ;;  %v21964_v61 = vunpack.c.h.bf16 %v21962_v36  ;;  %v21968_v10 = vld [vmem:[#allocation324_spill] sm:$0xff]  ;;  %v21976_v36 = vld [vmem:[#allocation293_spill] sm:$0xff] }
 0x2b1   : > { %v15626_v50 = vadd.f32 %v21954_v49, %v3788_v46  ;;  %v15630_v6 = vadd.f32 %v21956_v56, %v3795_v24  ;;  %v15634_v57 = vadd.f32 %v21958_v9, %v3802_v30  ;;  %v21966_v38 = vunpack.c.l.bf16 %v21965_v34  ;;  %v21971_v30 = vld [vmem:[#allocation328_spill] sm:$0xff]  ;;  %v21974_v56 = vld [vmem:[#allocation289_spill] sm:$0xff] }
 0x2b2   : > { %v3805_v23 = vadd.f32 %v21961_v33, %v3804_v55  ;;  %v3860_v19 = vadd.f32 %v21964_v61, %v21963_v17  ;;  %v21967_v46 = vunpack.c.h.bf16 %v21965_v34  ;;  %v21969_v24 = vunpack.c.l.bf16 %v21968_v10 }
 0x2b3   : > { %21955 = vst [vmem:[#allocation123_spill] sm:$0xff] %v15626_v50  ;;  %21957 = vst [vmem:[#allocation130_spill] sm:$0xff] %v15630_v6  ;;  %v21970_v35 = vunpack.c.h.bf16 %v21968_v10  ;;  %v21972_v62 = vunpack.c.l.bf16 %v21971_v30  ;;  %v21973_v49 = vunpack.c.h.bf16 %v21971_v30  ;;  %v21975_v9 = vunpack.c.l.bf16 %v21974_v56 }
 0x2b4   : > { %21959 = vst [vmem:[#allocation138_spill] sm:$0xff] %v15634_v57  ;;  %v3867_v15 = vadd.f32 %v21967_v46, %v21966_v38  ;;  %v21977_v17 = vunpack.c.l.bf16 %v21976_v36  ;;  %v21978_v57 = vld [vmem:[#allocation297_spill] sm:$0xff]  ;;  %v21980_v38 = vld [vmem:[#allocation332_spill] sm:$0xff]  ;;  %v21986_v30 = vunpack.c.l.bf16 %v21985_v2  ;;  %v22006_v59 = vunpack.c.l.bf16 %v22005_v44 }
 0x2b5   : > { %v3874_v40 = vadd.f32 %v21970_v35, %v21969_v24  ;;  %v3881_v55 = vadd.f32 %v21973_v49, %v21972_v62  ;;  %v3812_v33 = vadd.f32 %v21975_v9, %v3811_v37  ;;  %v21979_v6 = vunpack.c.l.bf16 %v21978_v57  ;;  %v21983_v24 = vld [vmem:[#allocation301_spill] sm:$0xff] }
 0x2b6   : > { %v3819_v61 = vadd.f32 %v21977_v17, %v3818_v45  ;;  %v21981_v46 = vunpack.c.l.bf16 %v21980_v38  ;;  %v21982_v50 = vunpack.c.h.bf16 %v21980_v38  ;;  %v21984_v35 = vunpack.c.l.bf16 %v21983_v24  ;;  %v21987_v49 = vld [vmem:[#allocation309_spill] sm:$0xff] }
 0x2b7   : > { %v3826_v34 = vadd.f32 %v21979_v6, %v3825_v27  ;;  %v3840_v62 = vadd.f32 %v21986_v30, %v3839_v13  ;;  %v21988_v11 = vunpack.c.l.bf16 %v21987_v49  ;;  %v21989_v9 = vld [vmem:[#allocation313_spill] sm:$0xff]  ;;  %v21991_v17 = vunpack.c.h.bf16 %v21960_v16  ;;  %v21992_v6 = vld [vmem:[#allocation336_spill] sm:$0xff] }
 0x2b8   : > { %v3888_v10 = vadd.f32 %v21982_v50, %v21981_v46  ;;  %v3833_v8 = vadd.f32 %v21984_v35, %v3832_v51  ;;  %v21990_v1 = vunpack.c.l.bf16 %v21989_v9  ;;  %v21993_v12 = vunpack.c.l.bf16 %v21992_v6  ;;  %v21995_v46 = vld [vmem:[#allocation340_spill] sm:$0xff]  ;;  %v22003_v16 = vld [vmem:[#allocation321_spill] sm:$0xff] }
 0x2b9   : > { %v3847_v37 = vadd.f32 %v21988_v11, %v3846_v25  ;;  %v3806_v27 = vadd.f32 %v21991_v17, %v3805_v23  ;;  %v21994_v38 = vunpack.c.h.bf16 %v21992_v6  ;;  %v21996_v18 = vunpack.c.l.bf16 %v21995_v46  ;;  %v21998_v13 = vld [vmem:[#allocation344_spill] sm:$0xff] }
 0x2ba   : > { %v3854_v45 = vadd.f32 %v21990_v1, %v3853_v42  ;;  %v21997_v51 = vunpack.c.h.bf16 %v21995_v46  ;;  %v21999_v30 = vunpack.c.l.bf16 %v21998_v13  ;;  %v22000_v11 = vunpack.c.h.bf16 %v21998_v13 }
 0x2bb   : > { %v3895_v50 = vadd.f32 %v21994_v38, %v21993_v12  ;;  %v22002_v1 = vunpack.c.l.bf16 %v22001_v31  ;;  %v22004_v23 = vunpack.c.l.bf16 %v22003_v16  ;;  %v3875_v6 = vadd.f32 %v22006_v59, %v3874_v40  ;;  %v22007_v12 = vld [vmem:[#allocation329_spill] sm:$0xff] }
 0x2bc   : > { %v3902_v35 = vadd.f32 %v21997_v51, %v21996_v18  ;;  %v3909_v25 = vadd.f32 %v22000_v11, %v21999_v30  ;;  %v22008_v38 = vunpack.c.l.bf16 %v22007_v12  ;;  %v22009_v46 = vunpack.c.h.bf16 %v21974_v56  ;;  %v22012_v11 = vld [vmem:[#allocation333_spill] sm:$0xff] }
 0x2bd   : > { %v3861_v42 = vadd.f32 %v22002_v1, %v3860_v19  ;;  %v3868_v17 = vadd.f32 %v22004_v23, %v3867_v15  ;;  %v22010_v51 = vunpack.c.h.bf16 %v21976_v36  ;;  %v22011_v13 = vunpack.c.h.bf16 %v21978_v57  ;;  %v22018_v36 = vld [vmem:[#allocation286_spill] sm:$0xff]  ;;  %v22020_v57 = vld [vmem:[#allocation337_spill] sm:$0xff] }
 0x2be   : > { %v3882_v47 = vadd.f32 %v22008_v38, %v3881_v55  ;;  %v3813_v18 = vadd.f32 %v22009_v46, %v3812_v33  ;;  %v22013_v19 = vunpack.c.l.bf16 %v22012_v11  ;;  %v22014_v15 = vunpack.c.h.bf16 %v21983_v24  ;;  %v22024_v24 = vld [vmem:[#allocation345_spill] sm:$0xff] }
 0x2bf   : > { %v3820_v3 = vadd.f32 %v22010_v51, %v3819_v61  ;;  %v3827_v30 = vadd.f32 %v22011_v13, %v3826_v34  ;;  %v22015_v59 = vunpack.c.h.bf16 %v21985_v2  ;;  %v22016_v55 = vunpack.c.h.bf16 %v21987_v49  ;;  %v22022_v13 = vld [vmem:[#allocation341_spill] sm:$0xff] }
 0x2c0   : > { %v3889_v1 = vadd.f32 %v22013_v19, %v3888_v10  ;;  %v3834_v23 = vadd.f32 %v22014_v15, %v3833_v8  ;;  %v22017_v56 = vunpack.c.h.bf16 %v21989_v9  ;;  %v22019_v61 = vunpack.c.l.bf16 %v22018_v36 }
 0x2c1   : > { %v3841_v40 = vadd.f32 %v22015_v59, %v3840_v62  ;;  %v3848_v38 = vadd.f32 %v22016_v55, %v3847_v37  ;;  %v22021_v34 = vunpack.c.l.bf16 %v22020_v57  ;;  %v22023_v10 = vunpack.c.l.bf16 %v22022_v13  ;;  %v22030_v55 = vld [vmem:[#allocation290_spill] sm:$0xff] }
 0x2c2   : > { %v3855_v33 = vadd.f32 %v22017_v56, %v3854_v45  ;;  %v3807_v46 = vadd.f32 %v22019_v61, %v3806_v27  ;;  %v22025_v8 = vunpack.c.l.bf16 %v22024_v24  ;;  %v22026_v2 = vunpack.c.h.bf16 %v22001_v31  ;;  %v22032_v61 = vld [vmem:[#allocation294_spill] sm:$0xff] }
 0x2c3   : > { %v3896_v51 = vadd.f32 %v22021_v34, %v3895_v50  ;;  %v3903_v19 = vadd.f32 %v22023_v10, %v3902_v35  ;;  %v22027_v49 = vunpack.c.h.bf16 %v22003_v16  ;;  %v22028_v9 = vunpack.c.h.bf16 %v22005_v44  ;;  %v22034_v10 = vld [vmem:[#allocation298_spill] sm:$0xff] }
 0x2c4   : > { %v3910_v15 = vadd.f32 %v22025_v8, %v3909_v25  ;;  %v3862_v62 = vadd.f32 %v22026_v2, %v3861_v42  ;;  %v22029_v27 = vunpack.c.h.bf16 %v22007_v12  ;;  %v22031_v50 = vunpack.c.l.bf16 %v22030_v55  ;;  %v22037_v16 = vld [vmem:[#allocation302_spill] sm:$0xff] }
 0x2c5   : > { %v3869_v37 = vadd.f32 %v22027_v49, %v3868_v17  ;;  %v3876_v45 = vadd.f32 %v22028_v9, %v3875_v6  ;;  %v22033_v35 = vunpack.c.l.bf16 %v22032_v61  ;;  %v22035_v25 = vunpack.c.l.bf16 %v22034_v10  ;;  %v22039_v44 = vld [vmem:[#allocation306_spill] sm:$0xff] }
 0x2c6   : > { %v3883_v59 = vadd.f32 %v22029_v27, %v3882_v47  ;;  %v3814_v56 = vadd.f32 %v22031_v50, %v3813_v18  ;;  %v22036_v31 = vunpack.c.h.bf16 %v22012_v11  ;;  %v22038_v17 = vunpack.c.l.bf16 %v22037_v16  ;;  %v22041_v12 = vld [vmem:[#allocation310_spill] sm:$0xff] }
 0x2c7   : > { %v3821_v34 = vadd.f32 %v22033_v35, %v3820_v3  ;;  %v3828_v8 = vadd.f32 %v22035_v25, %v3827_v30  ;;  %v22040_v6 = vunpack.c.l.bf16 %v22039_v44  ;;  %v22042_v47 = vunpack.c.l.bf16 %v22041_v12  ;;  %v22043_v27 = vld [vmem:[#allocation314_spill] sm:$0xff] }
 0x2c8   : > { %v3890_v42 = vadd.f32 %v22036_v31, %v3889_v1  ;;  %v3835_v2 = vadd.f32 %v22038_v17, %v3834_v23  ;;  %v22044_v18 = vunpack.c.l.bf16 %v22043_v27  ;;  %v22045_v3 = vunpack.c.h.bf16 %v22018_v36  ;;  %v22049_v17 = vld [vmem:[#allocation318_spill] sm:$0xff] }
 0x2c9   : > { %v3842_v49 = vadd.f32 %v22040_v6, %v3841_v40  ;;  %v3849_v9 = vadd.f32 %v22042_v47, %v3848_v38  ;;  %v22046_v30 = vunpack.c.h.bf16 %v22020_v57  ;;  %v22047_v11 = vunpack.c.h.bf16 %v22022_v13  ;;  %v22055_v36 = vld [vmem:[#allocation330_spill] sm:$0xff] }
 0x2ca   : > { %v3856_v50 = vadd.f32 %v22044_v18, %v3855_v33  ;;  %v3808_v35 = vadd.f32 %v22045_v3, %v3807_v46  ;;  %v22048_v23 = vunpack.c.h.bf16 %v22024_v24  ;;  %v22050_v40 = vunpack.c.l.bf16 %v22049_v17 }
 0x2cb   : > { %v3897_v25 = vadd.f32 %v22046_v30, %v3896_v51  ;;  %v3904_v1 = vadd.f32 %v22047_v11, %v3903_v19  ;;  %v22052_v38 = vunpack.c.l.bf16 %v22051_v20  ;;  %v22054_v33 = vunpack.c.l.bf16 %v22053_v29  ;;  %v22060_v30 = vld [vmem:[#allocation334_spill] sm:$0xff] }
 0x2cc   : > { %v3911_v31 = vadd.f32 %v22048_v23, %v3910_v15  ;;  %v3863_v6 = vadd.f32 %v22050_v40, %v3862_v62  ;;  %v22056_v46 = vunpack.c.l.bf16 %v22055_v36  ;;  %v22057_v57 = vunpack.c.h.bf16 %v22030_v55 }
 0x2cd   : > { %v3870_v47 = vadd.f32 %v22052_v38, %v3869_v37  ;;  %v3877_v18 = vadd.f32 %v22054_v33, %v3876_v45  ;;  %v22058_v13 = vunpack.c.h.bf16 %v22032_v61  ;;  %v22059_v24 = vunpack.c.h.bf16 %v22034_v10  ;;  %v22066_v61 = vld [vmem:[#allocation287_spill] sm:$0xff]  ;;  %v22068_v10 = vld [vmem:[#allocation338_spill] sm:$0xff] }
 0x2ce   : > { %v3884_v3 = vadd.f32 %v22056_v46, %v3883_v59  ;;  %v3815_v51 = vadd.f32 %v22057_v57, %v3814_v56  ;;  %v22061_v62 = vunpack.c.l.bf16 %v22060_v30  ;;  %v22062_v37 = vunpack.c.h.bf16 %v22037_v16  ;;  %v22070_v57 = vld [vmem:[#allocation342_spill] sm:$0xff] }
 0x2cf   : > { %v3822_v19 = vadd.f32 %v22058_v13, %v3821_v34  ;;  %v3829_v15 = vadd.f32 %v22059_v24, %v3828_v8  ;;  %v22063_v45 = vunpack.c.h.bf16 %v22039_v44  ;;  %v22064_v59 = vunpack.c.h.bf16 %v22041_v12  ;;  %v22072_v16 = vld [vmem:[#allocation346_spill] sm:$0xff] }
 0x2d0   : > { %v3891_v11 = vadd.f32 %v22061_v62, %v3890_v42  ;;  %v3836_v23 = vadd.f32 %v22062_v37, %v3835_v2  ;;  %v22065_v55 = vunpack.c.h.bf16 %v22043_v27  ;;  %v22067_v34 = vunpack.c.l.bf16 %v22066_v61  ;;  %v22078_v37 = vld [vmem:[#allocation291_spill] sm:$0xff] }
 0x2d1   : > { %v3843_v40 = vadd.f32 %v22063_v45, %v3842_v49  ;;  %v3850_v38 = vadd.f32 %v22064_v59, %v3849_v9  ;;  %v22069_v8 = vunpack.c.l.bf16 %v22068_v10  ;;  %v22071_v42 = vunpack.c.l.bf16 %v22070_v57  ;;  %v22080_v59 = vld [vmem:[#allocation295_spill] sm:$0xff] }
 0x2d2   : > { %v3857_v56 = vadd.f32 %v22065_v55, %v3856_v50  ;;  %v3809_v33 = vadd.f32 %v22067_v34, %v3808_v35  ;;  %v22073_v2 = vunpack.c.l.bf16 %v22072_v16  ;;  %v22074_v44 = vunpack.c.h.bf16 %v22049_v17  ;;  %v22082_v34 = vld [vmem:[#allocation299_spill] sm:$0xff] }
 0x2d3   : > { %v3898_v46 = vadd.f32 %v22069_v8, %v3897_v25  ;;  %v3905_v13 = vadd.f32 %v22071_v42, %v3904_v1  ;;  %v22075_v12 = vunpack.c.h.bf16 %v22051_v20  ;;  %v22076_v27 = vunpack.c.h.bf16 %v22053_v29  ;;  %v22085_v20 = vld [vmem:[#allocation303_spill] sm:$0xff] }
 0x2d4   : > { %v3912_v24 = vadd.f32 %v22073_v2, %v3911_v31  ;;  %v3864_v49 = vadd.f32 %v22074_v44, %v3863_v6  ;;  %v22077_v35 = vunpack.c.h.bf16 %v22055_v36  ;;  %v22079_v25 = vunpack.c.l.bf16 %v22078_v37  ;;  %v22087_v29 = vld [vmem:[#allocation307_spill] sm:$0xff] }
 0x2d5   : > { %v3871_v9 = vadd.f32 %v22075_v12, %v3870_v47  ;;  %v3878_v50 = vadd.f32 %v22076_v27, %v3877_v18  ;;  %v22081_v1 = vunpack.c.l.bf16 %v22080_v59  ;;  %v22083_v31 = vunpack.c.l.bf16 %v22082_v34  ;;  %v22089_v36 = vld [vmem:[#allocation311_spill] sm:$0xff] }
 0x2d6   : > { %v3885_v62 = vadd.f32 %v22077_v35, %v3884_v3  ;;  %v3816_v45 = vadd.f32 %v22079_v25, %v3815_v51  ;;  %v22084_v17 = vunpack.c.h.bf16 %v22060_v30  ;;  %v22086_v47 = vunpack.c.l.bf16 %v22085_v20  ;;  %v22091_v12 = vld [vmem:[#allocation315_spill] sm:$0xff] }
 0x2d7   : > { %v3823_v55 = vadd.f32 %v22081_v1, %v3822_v19  ;;  %v3830_v8 = vadd.f32 %v22083_v31, %v3829_v15  ;;  %v22088_v18 = vunpack.c.l.bf16 %v22087_v29  ;;  %v22090_v3 = vunpack.c.l.bf16 %v22089_v36 }
 0x2d8   : > { %v3892_v6 = vadd.f32 %v22084_v17, %v3891_v11  ;;  %v3837_v42 = vadd.f32 %v22086_v47, %v3836_v23  ;;  %v22092_v51 = vunpack.c.l.bf16 %v22091_v12  ;;  %v22093_v19 = vunpack.c.h.bf16 %v22066_v61 }
 0x2d9   : > { %v3844_v2 = vadd.f32 %v22088_v18, %v3843_v40  ;;  %v3851_v44 = vadd.f32 %v22090_v3, %v3850_v38  ;;  %v22095_v15 = vunpack.c.h.bf16 %v22068_v10  ;;  %v22096_v11 = vunpack.c.h.bf16 %v22070_v57  ;;  %v22098_v40 = vld [vmem:[#allocation319_spill] sm:$0xff] }
 0x2da   : > { %v3858_v27 = vadd.f32 %v22092_v51, %v3857_v56  ;;  %v15808_v35 = vadd.f32 %v22093_v19, %v3809_v33  ;;  %v22097_v23 = vunpack.c.h.bf16 %v22072_v16  ;;  %v22099_v31 = vunpack.c.l.bf16 %v22098_v40  ;;  %v22100_v38 = vld [vmem:[#allocation323_spill] sm:$0xff] }
 0x2db   : > { %v3899_v30 = vadd.f32 %v22095_v15, %v3898_v46  ;;  %v3906_v25 = vadd.f32 %v22096_v11, %v3905_v13  ;;  %v22101_v47 = vunpack.c.l.bf16 %v22100_v38  ;;  %v22102_v56 = vld [vmem:[#allocation327_spill] sm:$0xff]  ;;  %v22106_v10 = vunpack.c.h.bf16 %v22078_v37 }
 0x2dc   : > { %22094 = vst [vmem:[#allocation125_spill] sm:$0xff] %v15808_v35  ;;  %v3913_v1 = vadd.f32 %v22097_v23, %v3912_v24  ;;  %v3865_v17 = vadd.f32 %v22099_v31, %v3864_v49  ;;  %v22103_v3 = vunpack.c.l.bf16 %v22102_v56  ;;  %v22104_v33 = vld [vmem:[#allocation331_spill] sm:$0xff]  ;;  %v22108_v57 = vunpack.c.h.bf16 %v22080_v59 }
 0x2dd   : > { %v3872_v18 = vadd.f32 %v22101_v47, %v3871_v9  ;;  %v22105_v51 = vunpack.c.l.bf16 %v22104_v33  ;;  %v15826_v46 = vadd.f32 %v22106_v10, %v3816_v45  ;;  %v22110_v16 = vunpack.c.h.bf16 %v22082_v34  ;;  %v22112_v49 = vld [vmem:[#allocation335_spill] sm:$0xff] }
 0x2de   : > { %v3879_v61 = vadd.f32 %v22103_v3, %v3878_v50  ;;  %v15830_v13 = vadd.f32 %v22108_v57, %v3823_v55  ;;  %v22113_v9 = vunpack.c.l.bf16 %v22112_v49  ;;  %v22114_v50 = vunpack.c.h.bf16 %v22085_v20 }
 0x2df   : > { %v3886_v19 = vadd.f32 %v22105_v51, %v3885_v62  ;;  %22107 = vst [vmem:[#allocation129_spill] sm:$0xff] %v15826_v46  ;;  %v15834_v24 = vadd.f32 %v22110_v16, %v3830_v8  ;;  %v22116_v62 = vunpack.c.h.bf16 %v22087_v29  ;;  %v22118_v45 = vunpack.c.h.bf16 %v22089_v36  ;;  %v22122_v8 = vld [vmem:[#allocation339_spill] sm:$0xff]  ;;  %v22128_v29 = vld [vmem:[#allocation348_spill] sm:$0xff] }
 0x2e0   : > { %22109 = vst [vmem:[#allocation131_spill] sm:$0xff] %v15830_v13  ;;  %v3893_v15 = vadd.f32 %v22113_v9, %v3892_v6  ;;  %v15840_v11 = vadd.f32 %v22114_v50, %v3837_v42  ;;  %v22120_v55 = vunpack.c.h.bf16 %v22091_v12  ;;  %v22123_v23 = vunpack.c.l.bf16 %v22122_v8  ;;  %v22124_v6 = vld [vmem:[#allocation343_spill] sm:$0xff] }
 0x2e1   : > { %22111 = vst [vmem:[#allocation139_spill] sm:$0xff] %v15834_v24  ;;  %v15844_v37 = vadd.f32 %v22116_v62, %v3844_v2  ;;  %v15848_v59 = vadd.f32 %v22118_v45, %v3851_v44  ;;  %v22125_v47 = vunpack.c.l.bf16 %v22124_v6  ;;  %v22126_v42 = vld [vmem:[#allocation347_spill] sm:$0xff]  ;;  %v22129_v2 = vunpack.c.l.bf16 %v22128_v29  ;;  %v22141_v62 = vld [vmem:[#allocation352_spill] sm:$0xff] }
 0x2e2   : > { %22115 = vst [vmem:[#allocation146_spill] sm:$0xff] %v15840_v11  ;;  %v15852_v34 = vadd.f32 %v22120_v55, %v3858_v27  ;;  %v3900_v31 = vadd.f32 %v22123_v23, %v3899_v30  ;;  %v22127_v3 = vunpack.c.l.bf16 %v22126_v42  ;;  %v22130_v10 = vunpack.c.h.bf16 %v22128_v29  ;;  %v22153_v29 = vld [vmem:[#allocation368_spill] sm:$0xff] }
 0x2e3   : > { %22117 = vst [vmem:[#allocation152_spill] sm:$0xff] %v15844_v37  ;;  %22119 = vst [vmem:[#allocation172_spill] sm:$0xff] %v15848_v59  ;;  %v3907_v20 = vadd.f32 %v22125_v47, %v3906_v25  ;;  %v22131_v44 = vunpack.c.h.bf16 %v22098_v40  ;;  %v22133_v12 = vunpack.c.h.bf16 %v22100_v38  ;;  %v22135_v30 = vunpack.c.h.bf16 %v22102_v56  ;;  %v22144_v38 = vld [vmem:[#allocation356_spill] sm:$0xff]  ;;  %v22209_v59 = vld [vmem:[#allocation381_spill] sm:$0xff] }
 0x2e4   : > { %22121 = vst [vmem:[#allocation176_spill] sm:$0xff] %v15852_v34  ;;  %v3914_v51 = vadd.f32 %v22127_v3, %v3913_v1  ;;  %v3916_v36 = vadd.f32 %v22130_v10, %v22129_v2  ;;  %v22137_v25 = vunpack.c.h.bf16 %v22104_v33  ;;  %v22139_v9 = vunpack.c.h.bf16 %v22112_v49  ;;  %v22150_v47 = vld [vmem:[#allocation364_spill] sm:$0xff]  ;;  %v22213_v37 = vld [vmem:[#allocation389_spill] sm:$0xff] }
 0x2e5   : > { %v15866_v57 = vadd.f32 %v22131_v44, %v3865_v17  ;;  %v15870_v27 = vadd.f32 %v22133_v12, %v3872_v18  ;;  %v15874_v16 = vadd.f32 %v22135_v30, %v3879_v61  ;;  %v22142_v40 = vunpack.c.l.bf16 %v22141_v62  ;;  %v22147_v61 = vld [vmem:[#allocation360_spill] sm:$0xff] }
 0x2e6   : > { %v15878_v1 = vadd.f32 %v22137_v25, %v3886_v19  ;;  %v15882_v50 = vadd.f32 %v22139_v9, %v3893_v15  ;;  %v22143_v17 = vunpack.c.h.bf16 %v22141_v62  ;;  %v22145_v18 = vunpack.c.l.bf16 %v22144_v38  ;;  %v22156_v12 = vld [vmem:[#allocation372_spill] sm:$0xff] }
 0x2e7   : > { %22132 = vst [vmem:[#allocation180_spill] sm:$0xff] %v15866_v57  ;;  %22134 = vst [vmem:[#allocation184_spill] sm:$0xff] %v15870_v27  ;;  %v22146_v55 = vunpack.c.h.bf16 %v22144_v38  ;;  %v22148_v23 = vunpack.c.l.bf16 %v22147_v61  ;;  %v22149_v33 = vunpack.c.h.bf16 %v22147_v61  ;;  %v22151_v3 = vunpack.c.l.bf16 %v22150_v47  ;;  %v22159_v62 = vld [vmem:[#allocation376_spill] sm:$0xff] }
 0x2e8   : > { %22136 = vst [vmem:[#allocation133_spill] sm:$0xff] %v15874_v16  ;;  %22138 = vst [vmem:[#allocation188_spill] sm:$0xff] %v15878_v1  ;;  %v3923_v45 = vadd.f32 %v22143_v17, %v22142_v40  ;;  %v22152_v49 = vunpack.c.h.bf16 %v22150_v47  ;;  %v22154_v2 = vunpack.c.l.bf16 %v22153_v29  ;;  %v22155_v10 = vunpack.c.h.bf16 %v22153_v29  ;;  %v22195_v1 = vld [vmem:[#allocation373_spill] sm:$0xff] }
 0x2e9   : > { %22140 = vst [vmem:[#allocation192_spill] sm:$0xff] %v15882_v50  ;;  %v3930_v56 = vadd.f32 %v22146_v55, %v22145_v18  ;;  %v3937_v19 = vadd.f32 %v22149_v33, %v22148_v23  ;;  %v22157_v30 = vunpack.c.l.bf16 %v22156_v12  ;;  %v22158_v25 = vunpack.c.h.bf16 %v22156_v12  ;;  %v22197_v16 = vld [vmem:[#allocation377_spill] sm:$0xff] }
 0x2ea   : > { %v3944_v15 = vadd.f32 %v22152_v49, %v22151_v3  ;;  %v3951_v44 = vadd.f32 %v22155_v10, %v22154_v2  ;;  %v22160_v40 = vunpack.c.l.bf16 %v22159_v62  ;;  %v22161_v17 = vunpack.c.h.bf16 %v22159_v62  ;;  %v22168_v3 = vld [vmem:[#allocation349_spill] sm:$0xff]  ;;  %v22170_v2 = vld [vmem:[#allocation380_spill] sm:$0xff] }
 0x2eb   : > { %v3958_v9 = vadd.f32 %v22158_v25, %v22157_v30  ;;  %v22162_v18 = vunpack.c.h.bf16 %v22122_v8  ;;  %v22164_v61 = vunpack.c.h.bf16 %v22124_v6  ;;  %v22166_v33 = vunpack.c.h.bf16 %v22126_v42  ;;  %v22173_v25 = vld [vmem:[#allocation384_spill] sm:$0xff] }
 0x2ec   : > { %v3965_v38 = vadd.f32 %v22161_v17, %v22160_v40  ;;  %v22169_v49 = vunpack.c.l.bf16 %v22168_v3  ;;  %v22171_v10 = vunpack.c.l.bf16 %v22170_v2  ;;  %v22172_v12 = vunpack.c.h.bf16 %v22170_v2  ;;  %v22176_v6 = vld [vmem:[#allocation388_spill] sm:$0xff]  ;;  %v22184_v2 = vld [vmem:[#allocation357_spill] sm:$0xff] }
 0x2ed   : > { %v15914_v55 = vadd.f32 %v22162_v18, %v3900_v31  ;;  %v15918_v23 = vadd.f32 %v22164_v61, %v3907_v20  ;;  %v15922_v47 = vadd.f32 %v22166_v33, %v3914_v51  ;;  %v22174_v8 = vunpack.c.l.bf16 %v22173_v25  ;;  %v22179_v51 = vld [vmem:[#allocation392_spill] sm:$0xff]  ;;  %v22182_v61 = vld [vmem:[#allocation353_spill] sm:$0xff] }
 0x2ee   : > { %v3917_v29 = vadd.f32 %v22169_v49, %v3916_v36  ;;  %v3972_v30 = vadd.f32 %v22172_v12, %v22171_v10  ;;  %v22175_v31 = vunpack.c.h.bf16 %v22173_v25  ;;  %v22177_v20 = vunpack.c.l.bf16 %v22176_v6 }
 0x2ef   : > { %22163 = vst [vmem:[#allocation196_spill] sm:$0xff] %v15914_v55  ;;  %22165 = vst [vmem:[#allocation200_spill] sm:$0xff] %v15918_v23  ;;  %v22178_v40 = vunpack.c.h.bf16 %v22176_v6  ;;  %v22180_v17 = vunpack.c.l.bf16 %v22179_v51  ;;  %v22181_v18 = vunpack.c.h.bf16 %v22179_v51  ;;  %v22183_v33 = vunpack.c.l.bf16 %v22182_v61  ;;  %v22193_v51 = vld [vmem:[#allocation369_spill] sm:$0xff] }
 0x2f0   : > { %22167 = vst [vmem:[#allocation141_spill] sm:$0xff] %v15922_v47  ;;  %v3979_v62 = vadd.f32 %v22175_v31, %v22174_v8  ;;  %v22185_v10 = vunpack.c.l.bf16 %v22184_v2  ;;  %v22186_v47 = vld [vmem:[#allocation361_spill] sm:$0xff]  ;;  %v22188_v31 = vld [vmem:[#allocation396_spill] sm:$0xff]  ;;  %v22198_v27 = vunpack.c.l.bf16 %v22197_v16  ;;  %v22214_v11 = vunpack.c.l.bf16 %v22213_v37 }
 0x2f1   : > { %v3986_v42 = vadd.f32 %v22178_v40, %v22177_v20  ;;  %v3993_v36 = vadd.f32 %v22181_v18, %v22180_v17  ;;  %v3924_v49 = vadd.f32 %v22183_v33, %v3923_v45  ;;  %v22187_v25 = vunpack.c.l.bf16 %v22186_v47  ;;  %v22191_v40 = vld [vmem:[#allocation365_spill] sm:$0xff] }
 0x2f2   : > { %v3931_v12 = vadd.f32 %v22185_v10, %v3930_v56  ;;  %v22189_v23 = vunpack.c.l.bf16 %v22188_v31  ;;  %v22190_v6 = vunpack.c.h.bf16 %v22188_v31  ;;  %v22192_v55 = vunpack.c.l.bf16 %v22191_v40 }
 0x2f3   : > { %v3938_v8 = vadd.f32 %v22187_v25, %v3937_v19  ;;  %v22194_v17 = vunpack.c.l.bf16 %v22193_v51  ;;  %v22196_v45 = vunpack.c.l.bf16 %v22195_v1  ;;  %v3966_v56 = vadd.f32 %v22198_v27, %v3965_v38  ;;  %v22200_v25 = vld [vmem:[#allocation400_spill] sm:$0xff] }
 0x2f4   : > { %v4000_v20 = vadd.f32 %v22190_v6, %v22189_v23  ;;  %v3945_v50 = vadd.f32 %v22192_v55, %v3944_v15  ;;  %v22199_v10 = vunpack.c.h.bf16 %v22168_v3  ;;  %v22201_v57 = vunpack.c.l.bf16 %v22200_v25  ;;  %v22203_v6 = vld [vmem:[#allocation404_spill] sm:$0xff]  ;;  %v22211_v3 = vld [vmem:[#allocation385_spill] sm:$0xff] }
 0x2f5   : > { %v3952_v18 = vadd.f32 %v22194_v17, %v3951_v44  ;;  %v3959_v33 = vadd.f32 %v22196_v45, %v3958_v9  ;;  %v22202_v31 = vunpack.c.h.bf16 %v22200_v25  ;;  %v22204_v34 = vunpack.c.l.bf16 %v22203_v6  ;;  %v22206_v44 = vld [vmem:[#allocation408_spill] sm:$0xff]  ;;  %v22215_v25 = vld [vmem:[#allocation393_spill] sm:$0xff] }
 0x2f6   : > { %v3918_v19 = vadd.f32 %v22199_v10, %v3917_v29  ;;  %v22205_v15 = vunpack.c.h.bf16 %v22203_v6  ;;  %v22207_v17 = vunpack.c.l.bf16 %v22206_v44  ;;  %v22208_v9 = vunpack.c.h.bf16 %v22206_v44 }
 0x2f7   : > { %v4007_v23 = vadd.f32 %v22202_v31, %v22201_v57  ;;  %v22210_v27 = vunpack.c.l.bf16 %v22209_v59  ;;  %v22212_v29 = vunpack.c.l.bf16 %v22211_v3  ;;  %v3987_v57 = vadd.f32 %v22214_v11, %v3986_v42 }
 0x2f8   : > { %v4014_v55 = vadd.f32 %v22205_v15, %v22204_v34  ;;  %v4021_v45 = vadd.f32 %v22208_v9, %v22207_v17  ;;  %v22216_v31 = vunpack.c.l.bf16 %v22215_v25  ;;  %v22217_v34 = vunpack.c.h.bf16 %v22182_v61  ;;  %v22220_v9 = vld [vmem:[#allocation397_spill] sm:$0xff] }
 0x2f9   : > { %v3973_v38 = vadd.f32 %v22210_v27, %v3972_v30  ;;  %v3980_v10 = vadd.f32 %v22212_v29, %v3979_v62  ;;  %v22218_v15 = vunpack.c.h.bf16 %v22184_v2  ;;  %v22219_v17 = vunpack.c.h.bf16 %v22186_v47  ;;  %v22226_v2 = vld [vmem:[#allocation350_spill] sm:$0xff]  ;;  %v22228_v47 = vld [vmem:[#allocation401_spill] sm:$0xff] }
 0x2fa   : > { %v3994_v24 = vadd.f32 %v22216_v31, %v3993_v36  ;;  %v3925_v6 = vadd.f32 %v22217_v34, %v3924_v49  ;;  %v22221_v27 = vunpack.c.l.bf16 %v22220_v9  ;;  %v22222_v29 = vunpack.c.h.bf16 %v22191_v40  ;;  %v22232_v40 = vld [vmem:[#allocation409_spill] sm:$0xff] }
 0x2fb   : > { %v3932_v44 = vadd.f32 %v22218_v15, %v3931_v12  ;;  %v3939_v30 = vadd.f32 %v22219_v17, %v3938_v8  ;;  %v22223_v11 = vunpack.c.h.bf16 %v22193_v51  ;;  %v22224_v36 = vunpack.c.h.bf16 %v22195_v1  ;;  %v22230_v17 = vld [vmem:[#allocation405_spill] sm:$0xff] }
 0x2fc   : > { %v4001_v62 = vadd.f32 %v22221_v27, %v4000_v20  ;;  %v3946_v13 = vadd.f32 %v22222_v29, %v3945_v50  ;;  %v22225_v61 = vunpack.c.h.bf16 %v22197_v16  ;;  %v22227_v12 = vunpack.c.l.bf16 %v22226_v2 }
 0x2fd   : > { %v3953_v42 = vadd.f32 %v22223_v11, %v3952_v18  ;;  %v3960_v31 = vadd.f32 %v22224_v36, %v3959_v33  ;;  %v22229_v8 = vunpack.c.l.bf16 %v22228_v47  ;;  %v22231_v20 = vunpack.c.l.bf16 %v22230_v17  ;;  %v22241_v36 = vld [vmem:[#allocation358_spill] sm:$0xff] }
 0x2fe   : > { %v3967_v49 = vadd.f32 %v22225_v61, %v3966_v56  ;;  %v3919_v34 = vadd.f32 %v22227_v12, %v3918_v19  ;;  %v22233_v50 = vunpack.c.l.bf16 %v22232_v40  ;;  %v22235_v16 = vunpack.c.h.bf16 %v22209_v59 }
 0x2ff   : > { %v4008_v15 = vadd.f32 %v22229_v8, %v4007_v23  ;;  %v4015_v27 = vadd.f32 %v22231_v20, %v4014_v55  ;;  %v22236_v51 = vunpack.c.h.bf16 %v22211_v3  ;;  %v22237_v33 = vunpack.c.h.bf16 %v22213_v37  ;;  %v22239_v55 = vld [vmem:[#allocation354_spill] sm:$0xff] }
 0x300   : > { %v4022_v29 = vadd.f32 %v22233_v50, %v4021_v45  ;;  %v3974_v1 = vadd.f32 %v22235_v16, %v3973_v38  ;;  %v22238_v19 = vunpack.c.h.bf16 %v22215_v25  ;;  %v22240_v45 = vunpack.c.l.bf16 %v22239_v55  ;;  %v22243_v8 = vld [vmem:[#allocation362_spill] sm:$0xff] }
 0x301   : > { %v3981_v18 = vadd.f32 %v22236_v51, %v3980_v10  ;;  %v3988_v56 = vadd.f32 %v22237_v33, %v3987_v57  ;;  %v22242_v61 = vunpack.c.l.bf16 %v22241_v36  ;;  %v22244_v59 = vunpack.c.l.bf16 %v22243_v8  ;;  %v22246_v50 = vld [vmem:[#allocation366_spill] sm:$0xff] }
 0x302   : > { %v3995_v23 = vadd.f32 %v22238_v19, %v3994_v24  ;;  %v3926_v11 = vadd.f32 %v22240_v45, %v3925_v6  ;;  %v22245_v3 = vunpack.c.h.bf16 %v22220_v9  ;;  %v22247_v10 = vunpack.c.l.bf16 %v22246_v50  ;;  %v22248_v37 = vld [vmem:[#allocation370_spill] sm:$0xff] }
 0x303   : > { %v3933_v12 = vadd.f32 %v22242_v61, %v3932_v44  ;;  %v3940_v38 = vadd.f32 %v22244_v59, %v3939_v30  ;;  %v22249_v57 = vunpack.c.l.bf16 %v22248_v37  ;;  %v22250_v25 = vld [vmem:[#allocation374_spill] sm:$0xff]  ;;  %v22254_v44 = vunpack.c.h.bf16 %v22226_v2 }
 0x304   : > { %v4002_v20 = vadd.f32 %v22245_v3, %v4001_v62  ;;  %v3947_v16 = vadd.f32 %v22247_v10, %v3946_v13  ;;  %v22251_v24 = vunpack.c.l.bf16 %v22250_v25  ;;  %v22252_v19 = vld [vmem:[#allocation378_spill] sm:$0xff]  ;;  %v22255_v30 = vunpack.c.h.bf16 %v22228_v47 }
 0x305   : > { %v3954_v51 = vadd.f32 %v22249_v57, %v3953_v42  ;;  %v22253_v6 = vunpack.c.l.bf16 %v22252_v19  ;;  %v3920_v61 = vadd.f32 %v22254_v44, %v3919_v34  ;;  %v22256_v9 = vunpack.c.h.bf16 %v22230_v17  ;;  %v22258_v42 = vld [vmem:[#allocation382_spill] sm:$0xff] }
 0x306   : > { %v3961_v33 = vadd.f32 %v22251_v24, %v3960_v31  ;;  %v4009_v59 = vadd.f32 %v22255_v30, %v4008_v15  ;;  %v22257_v13 = vunpack.c.h.bf16 %v22232_v40  ;;  %v22259_v31 = vunpack.c.l.bf16 %v22258_v42  ;;  %v22262_v34 = vld [vmem:[#allocation390_spill] sm:$0xff] }
 0x307   : > { %v3968_v45 = vadd.f32 %v22253_v6, %v3967_v49  ;;  %v4016_v62 = vadd.f32 %v22256_v9, %v4015_v27  ;;  %v22260_v49 = vld [vmem:[#allocation386_spill] sm:$0xff]  ;;  %v22263_v47 = vunpack.c.l.bf16 %v22262_v34  ;;  %v22266_v40 = vunpack.c.h.bf16 %v22239_v55 }
 0x308   : > { %v4023_v3 = vadd.f32 %v22257_v13, %v4022_v29  ;;  %v3975_v10 = vadd.f32 %v22259_v31, %v3974_v1  ;;  %v22261_v57 = vunpack.c.l.bf16 %v22260_v49  ;;  %v22264_v24 = vld [vmem:[#allocation394_spill] sm:$0xff]  ;;  %v22267_v6 = vunpack.c.h.bf16 %v22241_v36  ;;  %v22275_v36 = vld [vmem:[#allocation351_spill] sm:$0xff] }
 0x309   : > { %v3989_v15 = vadd.f32 %v22263_v47, %v3988_v56  ;;  %v22265_v17 = vunpack.c.l.bf16 %v22264_v24  ;;  %v3927_v29 = vadd.f32 %v22266_v40, %v3926_v11  ;;  %v22268_v30 = vunpack.c.h.bf16 %v22243_v8  ;;  %v22269_v1 = vld [vmem:[#allocation398_spill] sm:$0xff] }
 0x30a   : > { %v3982_v2 = vadd.f32 %v22261_v57, %v3981_v18  ;;  %v3934_v44 = vadd.f32 %v22267_v6, %v3933_v12  ;;  %v22270_v13 = vunpack.c.l.bf16 %v22269_v1  ;;  %v22271_v18 = vunpack.c.h.bf16 %v22246_v50  ;;  %v22277_v8 = vld [vmem:[#allocation402_spill] sm:$0xff] }
 0x30b   : > { %v3996_v27 = vadd.f32 %v22265_v17, %v3995_v23  ;;  %v3941_v9 = vadd.f32 %v22268_v30, %v3940_v38  ;;  %v22272_v56 = vunpack.c.h.bf16 %v22248_v37  ;;  %v22273_v23 = vunpack.c.h.bf16 %v22250_v25  ;;  %v22279_v30 = vld [vmem:[#allocation406_spill] sm:$0xff] }
 0x30c   : > { %v4003_v31 = vadd.f32 %v22270_v13, %v4002_v20  ;;  %v3948_v57 = vadd.f32 %v22271_v18, %v3947_v16  ;;  %v22274_v55 = vunpack.c.h.bf16 %v22252_v19  ;;  %v22276_v12 = vunpack.c.l.bf16 %v22275_v36  ;;  %v22281_v50 = vld [vmem:[#allocation410_spill] sm:$0xff] }
 0x30d   : > { %v3955_v47 = vadd.f32 %v22272_v56, %v3954_v51  ;;  %v3962_v17 = vadd.f32 %v22273_v23, %v3961_v33  ;;  %v22278_v38 = vunpack.c.l.bf16 %v22277_v8  ;;  %v22280_v20 = vunpack.c.l.bf16 %v22279_v30 }
 0x30e   : > { %v3969_v11 = vadd.f32 %v22274_v55, %v3968_v45  ;;  %v3921_v40 = vadd.f32 %v22276_v12, %v3920_v61  ;;  %v22282_v16 = vunpack.c.l.bf16 %v22281_v50  ;;  %v22283_v37 = vunpack.c.h.bf16 %v22258_v42 }
 0x30f   : > { %v4010_v6 = vadd.f32 %v22278_v38, %v4009_v59  ;;  %v4017_v13 = vadd.f32 %v22280_v20, %v4016_v62  ;;  %v22284_v25 = vunpack.c.h.bf16 %v22260_v49  ;;  %v22285_v19 = vunpack.c.h.bf16 %v22262_v34  ;;  %v22287_v59 = vld [vmem:[#allocation355_spill] sm:$0xff] }
 0x310   : > { %v4024_v18 = vadd.f32 %v22282_v16, %v4023_v3  ;;  %v3976_v51 = vadd.f32 %v22283_v37, %v3975_v10  ;;  %v22286_v61 = vunpack.c.h.bf16 %v22264_v24  ;;  %v22288_v23 = vunpack.c.l.bf16 %v22287_v59  ;;  %v22289_v62 = vld [vmem:[#allocation359_spill] sm:$0xff] }
 0x311   : > { %v3983_v33 = vadd.f32 %v22284_v25, %v3982_v2  ;;  %v3990_v45 = vadd.f32 %v22285_v19, %v3989_v15  ;;  %v22290_v12 = vunpack.c.l.bf16 %v22289_v62  ;;  %v22291_v3 = vld [vmem:[#allocation363_spill] sm:$0xff]  ;;  %v22293_v42 = vunpack.c.h.bf16 %v22269_v1 }
 0x312   : > { %v3997_v56 = vadd.f32 %v22286_v61, %v3996_v27  ;;  %v3928_v55 = vadd.f32 %v22288_v23, %v3927_v29  ;;  %v22292_v20 = vunpack.c.l.bf16 %v22291_v3  ;;  %v22294_v49 = vld [vmem:[#allocation367_spill] sm:$0xff]  ;;  %v22304_v1 = vunpack.c.h.bf16 %v22277_v8 }
 0x313   : > { %v3935_v38 = vadd.f32 %v22290_v12, %v3934_v44  ;;  %v4004_v10 = vadd.f32 %v22293_v42, %v4003_v31  ;;  %v22295_v2 = vunpack.c.l.bf16 %v22294_v49  ;;  %v22296_v34 = vld [vmem:[#allocation371_spill] sm:$0xff]  ;;  %v22302_v44 = vunpack.c.h.bf16 %v22275_v36 }
 0x314   : > { %v3942_v16 = vadd.f32 %v22292_v20, %v3941_v9  ;;  %v22297_v15 = vunpack.c.l.bf16 %v22296_v34  ;;  %v22298_v24 = vld [vmem:[#allocation375_spill] sm:$0xff]  ;;  %v4011_v31 = vadd.f32 %v22304_v1, %v4010_v6  ;;  %v22315_v6 = vunpack.c.h.bf16 %v22287_v59 }
 0x315   : > { %v3949_v37 = vadd.f32 %v22295_v2, %v3948_v57  ;;  %v22299_v27 = vunpack.c.l.bf16 %v22298_v24  ;;  %v22300_v61 = vld [vmem:[#allocation379_spill] sm:$0xff]  ;;  %v16115_v9 = vadd.f32 %v22302_v44, %v3921_v40  ;;  %v22305_v57 = vunpack.c.h.bf16 %v22279_v30 }
 0x316   : > { %v3956_v25 = vadd.f32 %v22297_v15, %v3955_v47  ;;  %v22301_v29 = vunpack.c.l.bf16 %v22300_v61  ;;  %v22309_v2 = vld [vmem:[#allocation387_spill] sm:$0xff]  ;;  %v16133_v30 = vadd.f32 %v22315_v6, %v3928_v55  ;;  %v22327_v55 = vunpack.c.h.bf16 %v22298_v24 }
 0x317   : > { %v3963_v19 = vadd.f32 %v22299_v27, %v3962_v17  ;;  %22303 = vst [vmem:[#allocation147_spill] sm:$0xff] %v16115_v9  ;;  %v4018_v47 = vadd.f32 %v22305_v57, %v4017_v13  ;;  %v22306_v17 = vunpack.c.h.bf16 %v22281_v50  ;;  %v22310_v15 = vunpack.c.l.bf16 %v22309_v2  ;;  %v22313_v44 = vld [vmem:[#allocation395_spill] sm:$0xff] }
 0x318   : > { %v3970_v23 = vadd.f32 %v22301_v29, %v3969_v11  ;;  %v22307_v11 = vld [vmem:[#allocation383_spill] sm:$0xff]  ;;  %v22314_v9 = vunpack.c.l.bf16 %v22313_v44  ;;  %22316 = vst [vmem:[#allocation169_spill] sm:$0xff] %v16133_v30  ;;  %v22317_v13 = vunpack.c.h.bf16 %v22289_v62  ;;  %v22410_v28 = vunpack.c.l.bf16 %v14566_v63 }
 0x319   : > { %v4025_v12 = vadd.f32 %v22306_v17, %v4024_v18  ;;  %v22308_v20 = vunpack.c.l.bf16 %v22307_v11  ;;  %v3984_v27 = vadd.f32 %v22310_v15, %v3983_v33  ;;  %v22311_v29 = vld [vmem:[#allocation391_spill] sm:$0xff]  ;;  %v22319_v18 = vunpack.c.h.bf16 %v22291_v3 }
 0x31a   : > { %v22312_v36 = vunpack.c.l.bf16 %v22311_v29  ;;  %v3998_v8 = vadd.f32 %v22314_v9, %v3997_v56  ;;  %v16137_v50 = vadd.f32 %v22317_v13, %v3935_v38  ;;  %v22321_v33 = vld [vmem:[#allocation399_spill] sm:$0xff]  ;;  %v22325_v56 = vunpack.c.h.bf16 %v22296_v34 }
 0x31b   : > { %v3977_v42 = vadd.f32 %v22308_v20, %v3976_v51  ;;  %v16141_v51 = vadd.f32 %v22319_v18, %v3942_v16  ;;  %v22322_v1 = vunpack.c.l.bf16 %v22321_v33  ;;  %v16155_v62 = vadd.f32 %v22327_v55, %v3963_v19  ;;  %v16158_v38 = vld [vmem:[%s16111_s27 + $0x10] sm:$0xf]  ;;  %v16171_v19 = vld [vmem:[%s16111_s27 + $0x18] sm:$0xf] }
 0x31c   : > { %v3991_v40 = vadd.f32 %v22312_v36, %v3990_v45  ;;  %22318 = vst [vmem:[#allocation204_spill] sm:$0xff] %v16137_v50  ;;  %v22323_v45 = vunpack.c.h.bf16 %v22294_v49  ;;  %v16151_v59 = vadd.f32 %v22325_v56, %v3956_v25  ;;  %v22329_v3 = vunpack.c.h.bf16 %v22300_v61  ;;  %v22333_v9 = vld [vmem:[#allocation407_spill] sm:$0xff]  ;;  %v22347_v56 = vld [vmem:[#allocation412_spill] sm:$0xff] }
 0x31d   : > { %22320 = vst [vmem:[#allocation173_spill] sm:$0xff] %v16141_v51  ;;  %v4005_v57 = vadd.f32 %v22322_v1, %v4004_v10  ;;  %22328 = vst [vmem:[#allocation185_spill] sm:$0xff] %v16155_v62  ;;  %v22331_v10 = vld [vmem:[#allocation403_spill] sm:$0xff]  ;;  %v22334_v34 = vunpack.c.l.bf16 %v22333_v9  ;;  %v22337_v6 = vunpack.c.h.bf16 %v22307_v11  ;;  %v22343_v18 = vunpack.c.h.bf16 %v22313_v44  ;;  %v16208_v44 = vld [vmem:[%s16111_s27 + $0x38] sm:$0xf] }
 0x31e   : > { %v16147_v17 = vadd.f32 %v22323_v45, %v3949_v37  ;;  %22326 = vst [vmem:[#allocation181_spill] sm:$0xff] %v16151_v59  ;;  %v16162_v16 = vadd.f32 %v22329_v3, %v3970_v23  ;;  %v22332_v49 = vunpack.c.l.bf16 %v22331_v10  ;;  %v22335_v20 = vld [vmem:[#allocation411_spill] sm:$0xff]  ;;  %v22339_v23 = vunpack.c.h.bf16 %v22309_v2  ;;  %v16205_v3 = vld [vmem:[%s16111_s27] sm:$0xff] }
 0x31f   : > { %v4019_v25 = vadd.f32 %v22334_v34, %v4018_v47  ;;  %v22336_v15 = vunpack.c.l.bf16 %v22335_v20  ;;  %v16174_v36 = vld [vmem:[%s16111_s27 + $0x30] sm:$0xf]  ;;  %v16178_v61 = vadd.f32 %v22337_v6, %v3977_v42  ;;  %v22345_v1 = vunpack.c.h.bf16 %v22321_v33  ;;  %v16306_v62 = vld [vmem:[%s16111_s27 + $0x60] sm:$0xff] }
 0x320   : > { %22324 = vst [vmem:[#allocation177_spill] sm:$0xff] %v16147_v17  ;;  %22330 = vst [vmem:[#allocation208_spill] sm:$0xff] %v16162_v16  ;;  %v4012_v37 = vadd.f32 %v22332_v49, %v4011_v31  ;;  %v16182_v13 = vadd.f32 %v22339_v23, %v3984_v27  ;;  %v22341_v31 = vunpack.c.h.bf16 %v22311_v29  ;;  %v22348_v11 = vunpack.c.l.bf16 %v22347_v56  ;;  %v22350_v27 = vld [vmem:[#allocation416_spill] sm:$0xff] }
 0x321   : > { %v4026_v24 = vadd.f32 %v22336_v15, %v4025_v12  ;;  %22338 = vst [vmem:[#allocation212_spill] sm:$0xff] %v16178_v61  ;;  %v16190_v12 = vadd.f32 %v22343_v18, %v3998_v8  ;;  %v16194_v45 = vadd.f32 %v22345_v1, %v4005_v57  ;;  %v22349_v42 = vunpack.c.h.bf16 %v22347_v56  ;;  %v22353_v33 = vld [vmem:[#allocation420_spill] sm:$0xff]  ;;  %v16224_v18 = vld [vmem:[%s16111_s27 + $0x20] sm:$0xff] }
 0x322   : > { %22340 = vst [vmem:[#allocation216_spill] sm:$0xff] %v16182_v13  ;;  %v16186_v47 = vadd.f32 %v22341_v31, %v3991_v40  ;;  %v22351_v55 = vunpack.c.l.bf16 %v22350_v27  ;;  %v22352_v29 = vunpack.c.h.bf16 %v22350_v27  ;;  %v4408_v8 = vsel %vm4407_vm0, %v16158_v38, -inf  ;;  %v16221_v31 = vld [vmem:[%s16111_s27 + $0x8] sm:$0xff] }
 0x323   : > { %22344 = vst [vmem:[#allocation193_spill] sm:$0xff] %v16190_v12  ;;  %22346 = vst [vmem:[#allocation197_spill] sm:$0xff] %v16194_v45  ;;  %v4028_v2 = vadd.f32 %v22349_v42, %v22348_v11  ;;  %v22354_v57 = vunpack.c.l.bf16 %v22353_v33  ;;  %v22355_v49 = vunpack.c.h.bf16 %v22353_v33  ;;  %v22356_v15 = vunpack.c.l.bf16 %v14490_v14  ;;  %v22376_v45 = vld [vmem:[#allocation421_spill] sm:$0xff] }
 0x324   : > { %22342 = vst [vmem:[#allocation189_spill] sm:$0xff] %v16186_v47  ;;  %v4035_v40 = vadd.f32 %v22352_v29, %v22351_v55  ;;  %v22357_v6 = vunpack.c.h.bf16 %v14490_v14  ;;  %v4416_v1 = vsel %vm4407_vm0, %v16171_v19, -inf  ;;  %v4424_v56 = vsel %vm4407_vm0, %v16174_v36, -inf }
 0x325   : > { %v4042_v34 = vadd.f32 %v22355_v49, %v22354_v57  ;;  %v22358_v11 = vunpack.c.h.bf16 %v22331_v10  ;;  %v22360_v27 = vunpack.c.h.bf16 %v22333_v9  ;;  %v22362_v14 = vunpack.c.l.bf16 %v14542_v32 }
 0x326   : > { %v4049_v23 = vadd.f32 %v22357_v6, %v22356_v15  ;;  %v22363_v29 = vunpack.c.h.bf16 %v14542_v32  ;;  %v22364_v57 = vunpack.c.l.bf16 %v14578_v5  ;;  %v22365_v49 = vunpack.c.h.bf16 %v14578_v5  ;;  %v16247_v6 = vld [vmem:[%s16111_s27 + $0x50] sm:$0xf] }
 0x327   : > { %v16232_v42 = vadd.f32 %v22358_v11, %v4012_v37  ;;  %v16236_v55 = vadd.f32 %v22360_v27, %v4019_v25  ;;  %v22366_v10 = vunpack.c.l.bf16 %v14614_v4  ;;  %v22367_v37 = vunpack.c.h.bf16 %v14614_v4  ;;  %v16258_v27 = vld [vmem:[%s16111_s27 + $0x28] sm:$0xff] }
 0x328   : > { %v4056_v33 = vadd.f32 %v22363_v29, %v22362_v14  ;;  %v4063_v15 = vadd.f32 %v22365_v49, %v22364_v57  ;;  %v22368_v25 = vunpack.c.l.bf16 %v14650_v52  ;;  %v22369_v11 = vunpack.c.h.bf16 %v14650_v52  ;;  %v16261_v14 = vld [vmem:[%s16111_s27 + $0x58] sm:$0xf] }
 0x329   : > { %22359 = vst [vmem:[#allocation201_spill] sm:$0xff] %v16232_v42  ;;  %22361 = vst [vmem:[#allocation205_spill] sm:$0xff] %v16236_v55  ;;  %v4070_v9 = vadd.f32 %v22367_v37, %v22366_v10  ;;  %v4409_v5 = vmax.f32 %v16205_v3, %v4408_v8  ;;  %v4432_v29 = vsel %vm4407_vm0, %v16208_v44, -inf  ;;  %v22370_v57 = vunpack.c.h.bf16 %v22335_v20  ;;  %v22372_v49 = vld [vmem:[#allocation413_spill] sm:$0xff]  ;;  %v16273_v55 = vld [vmem:[%s16111_s27 + $0x70] sm:$0xf] }
 0x32a   : > { %v4077_v32 = vadd.f32 %v22369_v11, %v22368_v25  ;;  %v22373_v10 = vunpack.c.l.bf16 %v22372_v49  ;;  %v4417_v52 = vmax.f32 %v16221_v31, %v4416_v1  ;;  %v4425_v25 = vmax.f32 %v16224_v18, %v4424_v56  ;;  %v22374_v11 = vld [vmem:[#allocation417_spill] sm:$0xff]  ;;  %v22378_v20 = vld [vmem:[#allocation424_spill] sm:$0xff] }
 0x32b   : > { %v16268_v4 = vadd.f32 %v22370_v57, %v4026_v24  ;;  %v22375_v42 = vunpack.c.l.bf16 %v22374_v11  ;;  %v22377_v12 = vunpack.c.l.bf16 %v22376_v45  ;;  %v22379_v24 = vunpack.c.l.bf16 %v22378_v20 }
 0x32c   : > { %v4029_v37 = vadd.f32 %v22373_v10, %v4028_v2  ;;  %v16287_v2 = vld [vmem:[%s16111_s27 + $0x78] sm:$0xf]  ;;  %v4440_v10 = vsel %vm4407_vm0, %v16247_v6, -inf  ;;  %v22380_v1 = vunpack.c.l.bf16 %v14562_v43  ;;  %v22381_v13 = vunpack.c.l.bf16 %v14598_v7 }
 0x32d   : > { %22371 = vst [vmem:[#allocation135_spill] sm:$0xff] %v16268_v4  ;;  %v4036_v8 = vadd.f32 %v22375_v42, %v4035_v40  ;;  %v4043_v47 = vadd.f32 %v22377_v12, %v4042_v34  ;;  %v4050_v57 = vadd.f32 %v22379_v24, %v4049_v23  ;;  %v16284_v4 = vld [vmem:[%s16111_s27 + $0x40] sm:$0xff]  ;;  %v16296_v42 = vld [vmem:[%s16111_s27 + $0x48] sm:$0xff]  ;;  %v4433_v12 = vmax.f32 %v16258_v27, %v4432_v29 }
 0x32e   : > { %v4057_v56 = vadd.f32 %v22380_v1, %v4056_v33  ;;  %v4064_v40 = vadd.f32 %v22381_v13, %v4063_v15  ;;  %v4448_v34 = vsel %vm4407_vm0, %v16261_v14, -inf  ;;  %v22382_v23 = vunpack.c.l.bf16 %v14634_v53  ;;  %v16311_v13 = vld [vmem:[%s16111_s27 + $0x68] sm:$0xff] }
 0x32f   : > { %v22383_v61 = vunpack.c.l.bf16 %v14670_v21  ;;  %v4410_v59 = vrot.slane %v4409_v5, 4  ;;  %v4456_v33 = vsel %vm4407_vm0, %v16273_v55, -inf  ;;  %v4418_v15 = vrot.slane %v4417_v52, 4 }
 0x330   : > { %v4071_v24 = vadd.f32 %v22382_v23, %v4070_v9  ;;  %v4426_v29 = vrot.slane %v4425_v25, 4  ;;  %v4441_v1 = vmax.f32 %v16284_v4, %v4440_v10  ;;  %v4464_v9 = vsel %vm4407_vm0, %v16287_v2, -inf }
 0x331   : > { %v4078_v16 = vadd.f32 %v22383_v61, %v4077_v32  ;;  %v22384_v23 = vunpack.c.h.bf16 %v22372_v49  ;;  %v22385_v32 = vunpack.c.h.bf16 %v22374_v11  ;;  %v22386_v51 = vunpack.c.h.bf16 %v22376_v45 }
 0x332   : > { %v4449_v30 = vmax.f32 %v16296_v42, %v4448_v34  ;;  %v22387_v46 = vunpack.c.h.bf16 %v22378_v20  ;;  %v22388_v10 = vunpack.c.h.bf16 %v14562_v43  ;;  %v4434_v54 = vrot.slane %v4433_v12, 4  ;;  %v16341_v20 = vld [vmem:[%s16111_s27 + $0x98] sm:$0xf] }
 0x333   : > { %v4030_v61 = vadd.f32 %v22384_v23, %v4029_v37  ;;  %v4037_v17 = vadd.f32 %v22385_v32, %v4036_v8  ;;  %v4044_v50 = vadd.f32 %v22386_v51, %v4043_v47  ;;  %v4457_v49 = vmax.f32 %v16306_v62, %v4456_v33  ;;  %v16333_v51 = vld [vmem:[%s16111_s27 + $0x90] sm:$0xf]  ;;  %22393 = vst [vmem:[#allocation213_spill] sm:$0xff] %v16341_v20  ;;  %v16359_v32 = vld [vmem:[%s16111_s27 + $0xb8] sm:$0xf] }
 0x334   : > { %v4051_v35 = vadd.f32 %v22387_v46, %v4050_v57  ;;  %v4058_v48 = vadd.f32 %v22388_v10, %v4057_v56  ;;  %v22389_v37 = vunpack.c.h.bf16 %v14598_v7  ;;  %v22390_v11 = vunpack.c.h.bf16 %v14634_v53  ;;  %v16344_v57 = vld [vmem:[%s16111_s27 + $0xb0] sm:$0xf]  ;;  %22404 = vst [vmem:[#allocation174_spill] sm:$0xff] %v16359_v32 }
 0x335   : > { %v4411_v47 = vmax.f32 %v4409_v5, %v4410_v59  ;;  %v4465_v45 = vmax.f32 %v16311_v13, %v4464_v9  ;;  %v22391_v46 = vunpack.c.h.bf16 %v14670_v21  ;;  %22394 = vst [vmem:[#allocation217_spill] sm:$0xff] %v16344_v57  ;;  %v4419_v7 = vmax.f32 %v4417_v52, %v4418_v15  ;;  %v22398_v59 = vld [vmem:[#allocation418_spill] sm:$0xff] }
 0x336   : > { %v4065_v23 = vadd.f32 %v22389_v37, %v4064_v40  ;;  %v4072_v8 = vadd.f32 %v22390_v11, %v4071_v24  ;;  %v4427_v56 = vmax.f32 %v4425_v25, %v4426_v29  ;;  %v4442_v53 = vrot.slane %v4441_v1, 4  ;;  %v22395_v40 = vld [vmem:[#allocation414_spill] sm:$0xff]  ;;  %v22405_v37 = vld [vmem:[#allocation425_spill] sm:$0xff] }
 0x337   : > { %v16338_v43 = vadd.f32 %v22391_v46, %v4078_v16  ;;  %v22396_v34 = vunpack.c.l.bf16 %v22395_v40  ;;  %v22399_v5 = vunpack.c.l.bf16 %v22398_v59  ;;  %v22401_v21 = vld [vmem:[#allocation422_spill] sm:$0xff]  ;;  %v4450_v10 = vrot.slane %v4449_v30, 4 }
 0x338   : > { %v22402_v16 = vunpack.c.l.bf16 %v22401_v21  ;;  %v22406_v52 = vunpack.c.l.bf16 %v22405_v37  ;;  %v16366_v15 = vld [vmem:[%s16111_s27 + $0x80] sm:$0xff]  ;;  %v4435_v29 = vmax.f32 %v4433_v12, %v4434_v54  ;;  %v16371_v11 = vld [vmem:[%s16111_s27 + $0x88] sm:$0xff]  ;;  %v4420_v12 = vrot.slane %v4419_v7, 2  ;;  %v16394_v37 = vld [vmem:[%s16111_s27 + $0xd0] sm:$0xf] }
 0x339   : > { %22392 = vst [vmem:[#allocation209_spill] sm:$0xff] %v16338_v43  ;;  %v16348_v24 = vadd.f32 %v22396_v34, %v4030_v61  ;;  %v16352_v33 = vadd.f32 %v22399_v5, %v4037_v17  ;;  %v4458_v61 = vrot.slane %v4457_v49, 4  ;;  %v4472_v17 = vsel %vm4407_vm0, %v16333_v51, -inf  ;;  %v16374_v46 = vld [vmem:[%s16111_s27 + $0xa0] sm:$0xff]  ;;  %v16381_v54 = vld [vmem:[%s16111_s27 + $0xa8] sm:$0xff]  ;;  %22414 = vst [vmem:[#allocation198_spill] sm:$0xff] %v16394_v37 }
 0x33a   : > { %v16356_v9 = vadd.f32 %v22402_v16, %v4044_v50  ;;  %v16363_v25 = vadd.f32 %v22406_v52, %v4051_v35  ;;  %22408 = vst [vmem:[#allocation182_spill] sm:$0xff] %v16374_v46  ;;  %v4412_v50 = vrot.slane %v4411_v47, 2  ;;  %v4466_v34 = vrot.slane %v4465_v45, 4  ;;  %22409 = vst [vmem:[#allocation186_spill] sm:$0xff] %v16381_v54 }
 0x33b   : > { %22397 = vst [vmem:[#allocation143_spill] sm:$0xff] %v16348_v24  ;;  %22400 = vst [vmem:[#allocation148_spill] sm:$0xff] %v16352_v33  ;;  %v4480_v35 = vsel %vm4407_vm0, %v16341_v20, -inf  ;;  %v4488_v5 = vsel %vm4407_vm0, %v16344_v57, -inf  ;;  %v4428_v16 = vrot.slane %v4427_v56, 2  ;;  %v4443_v52 = vmax.f32 %v4441_v1, %v4442_v53 }
 0x33c   : > { %22403 = vst [vmem:[#allocation170_spill] sm:$0xff] %v16356_v9  ;;  %22407 = vst [vmem:[#allocation178_spill] sm:$0xff] %v16363_v25  ;;  %v4496_v60 = vsel %vm4407_vm0, %v16359_v32, -inf  ;;  %v16387_v41 = vadd.f32 %v22410_v28, %v4058_v48  ;;  %v22412_v22 = vunpack.c.l.bf16 %v14602_v39  ;;  %v4451_v25 = vmax.f32 %v4449_v30, %v4450_v10  ;;  %v16402_v53 = vld [vmem:[%s16111_s27 + $0xd8] sm:$0xf] }
 0x33d   : > { %v4473_v21 = vmax.f32 %v16366_v15, %v4472_v17  ;;  %v22415_v9 = vunpack.c.l.bf16 %v14638_v58  ;;  %22417 = vst [vmem:[#allocation206_spill] sm:$0xff] %v16402_v53  ;;  %v16405_v28 = vld [vmem:[%s16111_s27 + $0xf0] sm:$0xf]  ;;  %v4459_v48 = vmax.f32 %v4457_v49, %v4458_v61  ;;  %v4481_v39 = vmax.f32 %v16371_v11, %v4480_v35  ;;  %v16419_v61 = vld [vmem:[%s16111_s27 + $0xc8] sm:$0xff]  ;;  %v16422_v35 = vld [vmem:[%s16111_s27 + $0xe0] sm:$0xff] }
 0x33e   : > { %22411 = vst [vmem:[#allocation190_spill] sm:$0xff] %v16387_v41  ;;  %v16391_v0 = vadd.f32 %v22412_v22, %v4065_v23  ;;  %22418 = vst [vmem:[#allocation137_spill] sm:$0xff] %v16405_v28  ;;  %v4489_v22 = vmax.f32 %v16374_v46, %v4488_v5  ;;  %v16410_v23 = vld [vmem:[%s16111_s27 + $0xf8] sm:$0xf]  ;;  %v4413_v30 = vmax.f32 %v4411_v47, %v4412_v50  ;;  %v4436_v10 = vrot.slane %v4435_v29, 2 }
 0x33f   : > { %v16399_v1 = vadd.f32 %v22415_v9, %v4072_v8  ;;  %22419 = vst [vmem:[#allocation210_spill] sm:$0xff] %v16410_v23  ;;  %v4467_v17 = vmax.f32 %v4465_v45, %v4466_v34  ;;  %v4497_v8 = vmax.f32 %v16381_v54, %v4496_v60  ;;  %v16414_v9 = vld [vmem:[%s16111_s27 + $0xc0] sm:$0xff]  ;;  %v4421_v58 = vmax.f32 %v4419_v7, %v4420_v12  ;;  %v16429_v45 = vld [vmem:[%s16111_s27 + $0xe8] sm:$0xff] }
 0x340   : > { %22413 = vst [vmem:[#allocation194_spill] sm:$0xff] %v16391_v0  ;;  %22420 = vst [vmem:[#allocation214_spill] sm:$0xff] %v16414_v9  ;;  %v4444_v0 = vrot.slane %v4443_v52, 2  ;;  %v4504_v49 = vsel %vm4407_vm0, %v16394_v37, -inf  ;;  %v4452_v5 = vrot.slane %v4451_v25, 2  ;;  %v4474_v63 = vrot.slane %v4473_v21, 4 }
 0x341   : > { %22416 = vst [vmem:[#allocation202_spill] sm:$0xff] %v16399_v1  ;;  %v4429_v1 = vmax.f32 %v4427_v56, %v4428_v16  ;;  %22421 = vst [vmem:[#allocation218_spill] sm:$0xff] %v16419_v61  ;;  %v4512_v47 = vsel %vm4407_vm0, %v16402_v53, -inf  ;;  %v4520_v60 = vsel %vm4407_vm0, %v16405_v28, -inf  ;;  %v4460_v7 = vrot.slane %v4459_v48, 2 }
 0x342   : > { %22422 = vst [vmem:[#allocation145_spill] sm:$0xff] %v16422_v35  ;;  %v4482_v56 = vrot.slane %v4481_v39, 4  ;;  %v4490_v50 = vrot.slane %v4489_v22, 4  ;;  %v4528_v34 = vsel %vm4407_vm0, %v16410_v23, -inf  ;;  %v4437_v12 = vmax.f32 %v4435_v29, %v4436_v10 }
 0x343   : > { %v4468_v16 = vrot.slane %v4467_v17, 2  ;;  %v4498_v41 = vrot.slane %v4497_v8, 4  ;;  %v4505_v59 = vmax.f32 %v16414_v9, %v4504_v49  ;;  %v4414_v33 = vrot.slane %v4413_v30, 1 }
 0x344   : > { %v4445_v40 = vmax.f32 %v4443_v52, %v4444_v0  ;;  %v4513_v24 = vmax.f32 %v16419_v61, %v4512_v47  ;;  %v4521_v26 = vmax.f32 %v16422_v35, %v4520_v60  ;;  %v4422_v28 = vrot.slane %v4421_v58, 1 }
 0x345   : > { %v4453_v43 = vmax.f32 %v4451_v25, %v4452_v5  ;;  %v4475_v53 = vmax.f32 %v4473_v21, %v4474_v63  ;;  %v4529_v37 = vmax.f32 %v16429_v45, %v4528_v34  ;;  %v4430_v54 = vrot.slane %v4429_v1, 1 }
 0x346   : > { %v4461_v32 = vmax.f32 %v4459_v48, %v4460_v7  ;;  %v4483_v57 = vmax.f32 %v4481_v39, %v4482_v56  ;;  %v4491_v23 = vmax.f32 %v4489_v22, %v4490_v50  ;;  %v4438_v29 = vrot.slane %v4437_v12, 1 }
 0x347   : > { %v4469_v10 = vmax.f32 %v4467_v17, %v4468_v16  ;;  %v4499_v46 = vmax.f32 %v4497_v8, %v4498_v41  ;;  %v4506_v20 = vrot.slane %v4505_v59, 4  ;;  %v4415_v49 = vmax.f32 %v4413_v30, %v4414_v33 }
 0x348   : > { %v4446_v9 = vrot.slane %v4445_v40, 1  ;;  %v4514_v0 = vrot.slane %v4513_v24, 4  ;;  %v4522_v52 = vrot.slane %v4521_v26, 4  ;;  %v4423_v47 = vmax.f32 %v4421_v58, %v4422_v28 }
 0x349   : > { %v4454_v61 = vrot.slane %v4453_v43, 1  ;;  %v4476_v60 = vrot.slane %v4475_v53, 2  ;;  %v4530_v35 = vrot.slane %v4529_v37, 4  ;;  %v4431_v25 = vmax.f32 %v4429_v1, %v4430_v54 }
 0x34a   : > { %v4462_v63 = vrot.slane %v4461_v32, 1  ;;  %v4484_v21 = vrot.slane %v4483_v57, 2  ;;  %v4492_v5 = vrot.slane %v4491_v23, 2  ;;  %v4439_v34 = vmax.f32 %v4437_v12, %v4438_v29 }
 0x34b   : > { %v4470_v48 = vrot.slane %v4469_v10, 1  ;;  %v4500_v39 = vrot.slane %v4499_v46, 2  ;;  %v4507_v22 = vmax.f32 %v4505_v59, %v4506_v20  ;;  %v4447_v7 = vmax.f32 %v4445_v40, %v4446_v9 }
 0x34c   : > { %v4515_v17 = vmax.f32 %v4513_v24, %v4514_v0  ;;  %v4523_v41 = vmax.f32 %v4521_v26, %v4522_v52  ;;  %v4538_v33 = vsub.f32 %v16158_v38, %v4415_v49  ;;  %v4455_v30 = vmax.f32 %v4453_v43, %v4454_v61 }
 0x34d   : > { %v4477_v8 = vmax.f32 %v4475_v53, %v4476_v60  ;;  %v4531_v56 = vmax.f32 %v4529_v37, %v4530_v35  ;;  %v4539_v58 = vsub.f32 %v16171_v19, %v4423_v47  ;;  %v16439_v28 = vmax.f32 %v4461_v32, %v4462_v63 }
 0x34e   : > { %v4485_v54 = vmax.f32 %v4483_v57, %v4484_v21  ;;  %v4493_v1 = vmax.f32 %v4491_v23, %v4492_v5  ;;  %v4536_v50 = vsub.f32 %v16205_v3, %v4415_v49  ;;  %v16442_v12 = vmax.f32 %v4469_v10, %v4470_v48 }
 0x34f   : > { %v4501_v16 = vmax.f32 %v4499_v46, %v4500_v39  ;;  %v4508_v20 = vrot.slane %v4507_v22, 2  ;;  %v4537_v40 = vsub.f32 %v16221_v31, %v4423_v47  ;;  %v4516_v26 = vrot.slane %v4515_v17, 2 }
 0x350   : > { %v4524_v24 = vrot.slane %v4523_v41, 2  ;;  %v4540_v38 = vsub.f32 %v16224_v18, %v4431_v25  ;;  %v4572_v43 = vmul.f32 1.442695, %v4538_v33  ;;  %v4478_v59 = vrot.slane %v4477_v8, 1 }
 0x351   : > { %v4532_v37 = vrot.slane %v4531_v56, 2  ;;  %v4541_v19 = vsub.f32 %v16258_v27, %v4439_v34  ;;  %v4574_v32 = vmul.f32 1.442695, %v4539_v58  ;;  %v4486_v57 = vrot.slane %v4485_v54, 1 }
 0x352   : > { %v4494_v53 = vrot.slane %v4493_v1, 1  ;;  %v4542_v3 = vsub.f32 %v16174_v36, %v4431_v25  ;;  %v4568_v23 = vmul.f32 1.442695, %v4536_v50  ;;  %v4502_v9 = vrot.slane %v4501_v16, 1  ;;  %v22424_v50 = vld [vmem:[#allocation182_spill] sm:$0xff] }
 0x353   : > { %v4509_v46 = vmax.f32 %v4507_v22, %v4508_v20  ;;  %v4543_v61 = vsub.f32 %v16208_v44, %v4439_v34  ;;  %v4570_v31 = vmul.f32 1.442695, %v4537_v40  ;;  %v4517_v35 = vmax.f32 %v4515_v17, %v4516_v26  ;;  %v22425_v40 = vld [vmem:[#allocation217_spill] sm:$0xff] }
 0x354   : > { %v4544_v29 = vsub.f32 %v16284_v4, %v4447_v7  ;;  %10353 = vpow2.f32 %v4572_v43  ;;  %v4576_v18 = vmul.f32 1.442695, %v4540_v38  ;;  %v4525_v10 = vmax.f32 %v4523_v41, %v4524_v24  ;;  %v22426_v43 = vld [vmem:[#allocation174_spill] sm:$0xff] }
 0x355   : > { %v4545_v49 = vsub.f32 %v16296_v42, %v4455_v30  ;;  %10355 = vpow2.f32 %v4574_v32  ;;  %v4578_v27 = vmul.f32 1.442695, %v4541_v19  ;;  %v16451_v0 = vmax.f32 %v4531_v56, %v4532_v37 }
 0x356   : > { %v4546_v36 = vsub.f32 %v16247_v6, %v4447_v7  ;;  %10357 = vpow2.f32 %v4568_v23  ;;  %v4580_v52 = vmul.f32 1.442695, %v4542_v3  ;;  %v4479_v47 = vmax.f32 %v4477_v8, %v4478_v59 }
 0x357   : > { %v4547_v44 = vsub.f32 %v16261_v14, %v4455_v30  ;;  %10359 = vpow2.f32 %v4570_v31  ;;  %v4582_v60 = vmul.f32 1.442695, %v4543_v61  ;;  %v4487_v25 = vmax.f32 %v4485_v54, %v4486_v57 }
 0x358   : > { %v4548_v4 = vsub.f32 %v16306_v62, %v16439_v28  ;;  %10361 = vpow2.f32 %v4576_v18  ;;  %v4584_v63 = vmul.f32 1.442695, %v4544_v29  ;;  %v4495_v42 = vmax.f32 %v4493_v1, %v4494_v53  ;;  %v22427_v53 = vld [vmem:[#allocation186_spill] sm:$0xff] }
 0x359   : > { %v4549_v21 = vsub.f32 %v16311_v13, %v16442_v12  ;;  %10363 = vpow2.f32 %v4578_v27  ;;  %v4586_v5 = vmul.f32 1.442695, %v4545_v49  ;;  %v16459_v6 = vmax.f32 %v4501_v16, %v4502_v9  ;;  %v22429_v18 = vld [vmem:[#allocation206_spill] sm:$0xff] }
 0x35a   : > { %v4550_v34 = vsub.f32 %v16273_v55, %v16439_v28  ;;  %10365 = vpow2.f32 %v4580_v52  ;;  %v4588_v14 = vmul.f32 1.442695, %v4546_v36  ;;  %v4510_v48 = vrot.slane %v4509_v46, 1  ;;  %v22423_v28 = vld [vmem:[#allocation213_spill] sm:$0xff] }
 0x35b   : > { %v4551_v39 = vsub.f32 %v16287_v2, %v16442_v12  ;;  %10367 = vpow2.f32 %v4582_v60  ;;  %v4590_v62 = vmul.f32 1.442695, %v4547_v44  ;;  %v4518_v22 = vrot.slane %v4517_v35, 1  ;;  %v22430_v52 = vld [vmem:[#allocation209_spill] sm:$0xff] }
 0x35c   : > { %v4552_v7 = vsub.f32 %v16366_v15, %v4479_v47  ;;  %10369 = vpow2.f32 %v4584_v63  ;;  %v4592_v13 = vmul.f32 1.442695, %v4548_v4  ;;  %v4526_v17 = vrot.slane %v4525_v10, 1 }
 0x35d   : > { %v4553_v41 = vsub.f32 %v16371_v11, %v4487_v25  ;;  %10371 = vpow2.f32 %v4586_v5  ;;  %v4594_v33 = vmul.f32 1.442695, %v4549_v21  ;;  %v4534_v55 = vrot.slane %v16451_v0, 1  ;;  %v22434_v5 = vld [vmem:[#allocation218_spill] sm:$0xff] }
 0x35e   : > { %v16467_v30 = vpop.eup %10353  ;;  %v4554_v8 = vsub.f32 %v16333_v51, %v4479_v47  ;;  %10373 = vpow2.f32 %v4588_v14  ;;  %v4596_v2 = vmul.f32 1.442695, %v4550_v34  ;;  %v4511_v58 = vmax.f32 %v4509_v46, %v4510_v48  ;;  %v22428_v46 = vld [vmem:[#allocation198_spill] sm:$0xff]  ;;  %v22431_v47 = vld [vmem:[#allocation433_spill] sm:$0xff] }
 0x35f   : > { %v16471_v56 = vpop.eup %10355  ;;  %v4555_v15 = vsub.f32 %v22423_v28, %v4487_v25  ;;  %10375 = vpow2.f32 %v4590_v62  ;;  %v4598_v54 = vmul.f32 1.442695, %v4551_v39  ;;  %v4519_v11 = vmax.f32 %v4517_v35, %v4518_v22  ;;  %v22433_v25 = vld [vmem:[#allocation214_spill] sm:$0xff]  ;;  %v22435_v48 = vld [vmem:[#allocation137_spill] sm:$0xff] }
 0x360   : > { %v16474_v1 = vpop.eup %10357  ;;  %v4556_v12 = vsub.f32 %v22424_v50, %v4495_v42  ;;  %10377 = vpow2.f32 %v4592_v13  ;;  %v4600_v16 = vmul.f32 1.442695, %v4552_v7  ;;  %v4558_v51 = vsub.f32 %v22425_v40, %v4495_v42  ;;  %v22437_v13 = vld [vmem:[#allocation143_spill] sm:$0xff]  ;;  %v22443_v50 = vld [vmem:[#allocation210_spill] sm:$0xff] }
 0x361   : > { %v16477_v20 = vpop.eup %10359  ;;  %10379 = vpow2.f32 %v4594_v33  ;;  %v4602_v26 = vmul.f32 1.442695, %v4553_v41  ;;  %v4632_v24 = vsel %vm4407_vm0, %v16467_v30, 0.0  ;;  %v4559_v59 = vsub.f32 %v22426_v43, %v16459_v6 }
 0x362   : > { %v16482_v38 = vpop.eup %10361  ;;  %10381 = vpow2.f32 %v4596_v2  ;;  %v4604_v37 = vmul.f32 1.442695, %v4554_v8  ;;  %v4640_v19 = vsel %vm4407_vm0, %v16471_v56, 0.0  ;;  %v4527_v57 = vmax.f32 %v4525_v10, %v4526_v17  ;;  %v22438_v17 = vld [vmem:[#allocation414_spill] sm:$0xff]  ;;  %v22441_v2 = vld [vmem:[#allocation145_spill] sm:$0xff] }
 0x363   : > { %v16488_v32 = vpop.eup %10363  ;;  %v4557_v3 = vsub.f32 %v22427_v53, %v16459_v6  ;;  %10383 = vpow2.f32 %v4598_v54  ;;  %v4606_v23 = vmul.f32 1.442695, %v4555_v15  ;;  %v4562_v61 = vsub.f32 %v22428_v46, %v4511_v58  ;;  %v22451_v46 = vld [vmem:[#allocation422_spill] sm:$0xff] }
 0x364   : > { %v16492_v9 = vpop.eup %10365  ;;  %10385 = vpow2.f32 %v4600_v16  ;;  %v4608_v31 = vmul.f32 1.442695, %v4556_v12  ;;  %v4633_v35 = vadd.f32 %v16474_v1, %v4632_v24  ;;  %v4563_v49 = vsub.f32 %v22429_v18, %v4519_v11  ;;  %v22454_v18 = vld [vmem:[#allocation425_spill] sm:$0xff] }
 0x365   : > { %v16496_v29 = vpop.eup %10367  ;;  %10387 = vpow2.f32 %v4602_v26  ;;  %v4612_v27 = vmul.f32 1.442695, %v4558_v51  ;;  %v4641_v10 = vadd.f32 %v16477_v20, %v4640_v19  ;;  %v22432_v44 = vunpack.c.l.bf16 %v22431_v47 }
 0x366   : > { %v16500_v36 = vpop.eup %10369  ;;  %v4560_v4 = vsub.f32 %v22433_v25, %v4511_v58  ;;  %10389 = vpow2.f32 %v4604_v37  ;;  %v4614_v63 = vmul.f32 1.442695, %v4559_v59  ;;  %v4535_v21 = vmax.f32 %v16451_v0, %v4534_v55  ;;  %v22446_v59 = vld [vmem:[#allocation148_spill] sm:$0xff]  ;;  %v22447_v37 = vld [vmem:[#allocation418_spill] sm:$0xff] }
 0x367   : > { %v16505_v60 = vadd.f32 %v22432_v44, %v22430_v52  ;;  %v16508_v42 = vpop.eup %10371  ;;  %v4561_v6 = vsub.f32 %v22434_v5, %v4519_v11  ;;  %10391 = vpow2.f32 %v4606_v23  ;;  %v4610_v34 = vmul.f32 1.442695, %v4557_v3  ;;  %v22450_v23 = vld [vmem:[#allocation170_spill] sm:$0xff] }
 0x368   : > { %v16512_v14 = vpop.eup %10373  ;;  %v4566_v39 = vsub.f32 %v22435_v48, %v4527_v57  ;;  %10393 = vpow2.f32 %v4608_v31  ;;  %v4620_v62 = vmul.f32 1.442695, %v4562_v61  ;;  %v4634_v22 = vrot.slane %v4633_v35, 4  ;;  %v22459_v48 = vld [vmem:[#allocation190_spill] sm:$0xff] }
 0x369   : > { %v16515_v7 = vpop.eup %10375  ;;  %v22439_v41 = vunpack.c.h.bf16 %v22438_v17  ;;  %10395 = vpow2.f32 %v4612_v27  ;;  %v4622_v0 = vmul.f32 1.442695, %v4563_v49  ;;  %v4642_v55 = vrot.slane %v4641_v10, 4 }
 0x36a   : > { %22436 = vst [vmem:[#allocation150_spill] sm:$0xff] %v16515_v7  ;;  %v16522_v8 = vpop.eup %10377  ;;  %v4564_v58 = vsub.f32 %v22441_v2, %v4527_v57  ;;  %10397 = vpow2.f32 %v4614_v63  ;;  %v4616_v28 = vmul.f32 1.442695, %v4560_v4  ;;  %v4648_v15 = vsel %vm4407_vm0, %v16492_v9, 0.0  ;;  %v22464_v2 = vld [vmem:[#allocation429_spill] sm:$0xff] }
 0x36b   : > { %v16520_v33 = vadd.f32 %v22439_v41, %v22437_v13  ;;  %22440 = vst [vmem:[#allocation171_spill] sm:$0xff] %v16522_v8  ;;  %v16527_v54 = vpop.eup %10379  ;;  %v4565_v11 = vsub.f32 %v16429_v45, %v4535_v21  ;;  %v4567_v12 = vsub.f32 %v22443_v50, %v4535_v21  ;;  %10399 = vpow2.f32 %v4610_v34 }
 0x36c   : > { %22442 = vst [vmem:[#allocation175_spill] sm:$0xff] %v16527_v54  ;;  %v4618_v16 = vmul.f32 1.442695, %v4561_v6  ;;  %v16531_v40 = vpop.eup %10381  ;;  %10401 = vpow2.f32 %v4620_v62  ;;  %v4628_v51 = vmul.f32 1.442695, %v4566_v39  ;;  %v4635_v26 = vadd.f32 %v4634_v22, %v4633_v35  ;;  %v22453_v35 = vld [vmem:[#allocation178_spill] sm:$0xff] }
 0x36d   : > { %22444 = vst [vmem:[#allocation179_spill] sm:$0xff] %v16531_v40  ;;  %v4656_v24 = vsel %vm4407_vm0, %v16496_v29, 0.0  ;;  %v16535_v43 = vpop.eup %10383  ;;  %v22448_v19 = vunpack.c.h.bf16 %v22447_v37  ;;  %10403 = vpow2.f32 %v4622_v0  ;;  %v4643_v45 = vadd.f32 %v4642_v55, %v4641_v10  ;;  %v22460_v39 = vld [vmem:[#allocation427_spill] sm:$0xff]  ;;  %v22463_v55 = vld [vmem:[#allocation194_spill] sm:$0xff] }
 0x36e   : > { %22445 = vst [vmem:[#allocation183_spill] sm:$0xff] %v16535_v43  ;;  %v4649_v53 = vadd.f32 %v16482_v38, %v4648_v15  ;;  %v16543_v3 = vpop.eup %10385  ;;  %v22452_v61 = vunpack.c.h.bf16 %v22451_v46  ;;  %v22455_v49 = vunpack.c.h.bf16 %v22454_v18  ;;  %10405 = vpow2.f32 %v4616_v28  ;;  %v22469_v46 = vld [vmem:[#allocation202_spill] sm:$0xff] }
 0x36f   : > { %v16540_v57 = vadd.f32 %v22448_v19, %v22446_v59  ;;  %22449 = vst [vmem:[#allocation187_spill] sm:$0xff] %v16543_v3  ;;  %v4624_v52 = vmul.f32 1.442695, %v4564_v58  ;;  %v16555_v44 = vpop.eup %10387  ;;  %10407 = vpow2.f32 %v4618_v16  ;;  %v4630_v10 = vmul.f32 1.442695, %v4567_v12 }
 0x370   : > { %v16548_v31 = vadd.f32 %v22452_v61, %v22450_v23  ;;  %v16553_v27 = vadd.f32 %v22455_v49, %v22453_v35  ;;  %22456 = vst [vmem:[#allocation191_spill] sm:$0xff] %v16555_v44  ;;  %v4657_v25 = vadd.f32 %v16488_v32, %v4656_v24  ;;  %v4664_v4 = vsel %vm4407_vm0, %v16512_v14, 0.0  ;;  %v16560_v63 = vpop.eup %10389  ;;  %v22470_v61 = vld [vmem:[#allocation431_spill] sm:$0xff] }
 0x371   : > { %22457 = vst [vmem:[#allocation195_spill] sm:$0xff] %v16560_v63  ;;  %v4626_v21 = vmul.f32 1.442695, %v4565_v11  ;;  %10409 = vpow2.f32 %v4628_v51  ;;  %v4636_v5 = vrot.slane %v4635_v26, 2  ;;  %v4672_v6 = vsel %vm4407_vm0, %v16515_v7, 0.0  ;;  %v16564_v34 = vpop.eup %10391 }
 0x372   : > { %22458 = vst [vmem:[#allocation199_spill] sm:$0xff] %v16564_v34  ;;  %v22461_v62 = vunpack.c.h.bf16 %v22460_v39  ;;  %v4644_v13 = vrot.slane %v4643_v45, 2  ;;  %v4650_v17 = vrot.slane %v4649_v53, 4  ;;  %v4680_v41 = vsel %vm4407_vm0, %v16531_v40, 0.0  ;;  %v16573_v0 = vpop.eup %10393 }
 0x373   : > { %22462 = vst [vmem:[#allocation203_spill] sm:$0xff] %v16573_v0  ;;  %v22465_v58 = vunpack.c.h.bf16 %v22464_v2  ;;  %10411 = vpow2.f32 %v4624_v52  ;;  %v4665_v15 = vadd.f32 %v16500_v36, %v4664_v4  ;;  %v4688_v11 = vsel %vm4407_vm0, %v16535_v43, 0.0  ;;  %v16583_v50 = vpop.eup %10395 }
 0x374   : > { %v16569_v22 = vadd.f32 %v22461_v62, %v22459_v48  ;;  %22466 = vst [vmem:[#allocation207_spill] sm:$0xff] %v16583_v50  ;;  %10413 = vpow2.f32 %v4630_v10  ;;  %v4658_v12 = vrot.slane %v4657_v25, 4  ;;  %v4673_v16 = vadd.f32 %v16508_v42, %v4672_v6  ;;  %v16588_v24 = vpop.eup %10397 }
 0x375   : > { %v16578_v28 = vadd.f32 %v22465_v58, %v22463_v55  ;;  %v4696_v51 = vsel %vm4407_vm0, %v16560_v63, 0.0  ;;  %22467 = vst [vmem:[#allocation211_spill] sm:$0xff] %v16588_v24  ;;  %10415 = vpow2.f32 %v4626_v21  ;;  %v4637_v59 = vadd.f32 %v4636_v5, %v4635_v26  ;;  %v16593_v23 = vpop.eup %10399 }
 0x376   : > { %v4681_v37 = vadd.f32 %v16522_v8, %v4680_v41  ;;  %v4704_v19 = vsel %vm4407_vm0, %v16564_v34, 0.0  ;;  %22468 = vst [vmem:[#allocation215_spill] sm:$0xff] %v16593_v23  ;;  %v22471_v35 = vunpack.c.h.bf16 %v22470_v61  ;;  %v4645_v49 = vadd.f32 %v4644_v13, %v4643_v45  ;;  %v16601_v4 = vpop.eup %10401  ;;  %v22475_v45 = vld [vmem:[#allocation415_spill] sm:$0xff] }
 0x377   : > { %v4651_v52 = vadd.f32 %v4650_v17, %v4649_v53  ;;  %v4689_v10 = vadd.f32 %v16527_v54, %v4688_v11  ;;  %22472 = vst [vmem:[#allocation219_spill] sm:$0xff] %v16601_v4  ;;  %v22473_v26 = vunpack.c.h.bf16 %v22431_v47  ;;  %v4666_v5 = vrot.slane %v4665_v15, 4  ;;  %v16611_v39 = vpop.eup %10403 }
 0x378   : > { %v16598_v18 = vadd.f32 %v22471_v35, %v22469_v46  ;;  %v4697_v6 = vadd.f32 %v16543_v3, %v4696_v51  ;;  %v4712_v48 = vsel %vm4407_vm0, %v16583_v50, 0.0  ;;  %22474 = vst [vmem:[#allocation220_spill] sm:$0xff] %v16611_v39  ;;  %v22476_v53 = vunpack.c.l.bf16 %v22475_v45 }
 0x379   : > { %v16606_v21 = vadd.f32 %v22473_v26, %v16505_v60  ;;  %v4674_v13 = vrot.slane %v4673_v16, 4  ;;  %v4705_v17 = vadd.f32 %v16555_v44, %v4704_v19  ;;  %v4720_v47 = vsel %vm4407_vm0, %v16588_v24, 0.0  ;;  %v16621_v60 = vpop.eup %10405 }
 0x37a   : > { %v16616_v62 = vadd.f32 %v22476_v53, %v16520_v33  ;;  %22477 = vst [vmem:[#allocation224_spill] sm:$0xff] %v16621_v60  ;;  %v4638_v41 = vrot.slane %v4637_v59, 1  ;;  %v4659_v55 = vadd.f32 %v4658_v12, %v4657_v25  ;;  %v4682_v2 = vrot.slane %v4681_v37, 4  ;;  %v16625_v11 = vpop.eup %10407 }
 0x37b   : > { %v4728_v58 = vsel %vm4407_vm0, %v16601_v4, 0.0  ;;  %22478 = vst [vmem:[#allocation228_spill] sm:$0xff] %v16625_v11  ;;  %v4646_v51 = vrot.slane %v4645_v49, 1  ;;  %v4652_v46 = vrot.slane %v4651_v52, 2  ;;  %v4690_v33 = vrot.slane %v4689_v10, 4  ;;  %v16628_v35 = vpop.eup %10409 }
 0x37c   : > { %v4713_v61 = vadd.f32 %v16573_v0, %v4712_v48  ;;  %22479 = vst [vmem:[#allocation232_spill] sm:$0xff] %v16628_v35  ;;  %v4667_v19 = vadd.f32 %v4666_v5, %v4665_v15  ;;  %v4698_v26 = vrot.slane %v4697_v6, 4  ;;  %v4721_v53 = vadd.f32 %v16593_v23, %v4720_v47 }
 0x37d   : > { %v4736_v25 = vsel %vm4407_vm0, %v16611_v39, 0.0  ;;  %v4675_v12 = vadd.f32 %v4674_v13, %v4673_v16  ;;  %v4706_v24 = vrot.slane %v4705_v17, 4  ;;  %v4729_v4 = vadd.f32 %v16621_v60, %v4728_v58  ;;  %v16634_v50 = vpop.eup %10411 }
 0x37e   : > { %22480 = vst [vmem:[#allocation236_spill] sm:$0xff] %v16634_v50  ;;  %v4639_v34 = vadd.f32 %v4638_v41, %v4637_v59  ;;  %v4660_v44 = vrot.slane %v4659_v55, 2  ;;  %v4683_v63 = vadd.f32 %v4682_v2, %v4681_v37  ;;  %v4737_v48 = vadd.f32 %v16625_v11, %v4736_v25  ;;  %v16637_v0 = vpop.eup %10413 }
 0x37f   : > { %22481 = vst [vmem:[#allocation240_spill] sm:$0xff] %v16637_v0  ;;  %v4653_v15 = vadd.f32 %v4652_v46, %v4651_v52  ;;  %v4691_v5 = vadd.f32 %v4690_v33, %v4689_v10  ;;  %v4714_v3 = vrot.slane %v4713_v61, 4  ;;  %v4744_v47 = vsel %vm4407_vm0, %v16628_v35, 0.0  ;;  %v16641_v39 = vpop.eup %10415 }
 0x380   : > { %22482 = vst [vmem:[#allocation244_spill] sm:$0xff] %v16641_v39  ;;  %v4647_v16 = vadd.f32 %v4646_v51, %v4645_v49  ;;  %v4668_v13 = vrot.slane %v4667_v19, 2  ;;  %v4699_v58 = vadd.f32 %v4698_v26, %v4697_v6  ;;  %v4722_v60 = vrot.slane %v4721_v53, 4 }
 0x381   : > { %v4676_v23 = vrot.slane %v4675_v12, 2  ;;  %v4707_v59 = vadd.f32 %v4706_v24, %v4705_v17  ;;  %v4730_v41 = vrot.slane %v4729_v4, 4  ;;  %v4745_v37 = vadd.f32 %v16634_v50, %v4744_v47 }
 0x382   : > { %v4661_v2 = vadd.f32 %v4660_v44, %v4659_v55  ;;  %v4684_v25 = vrot.slane %v4683_v63, 2  ;;  %v4738_v11 = vrot.slane %v4737_v48, 4  ;;  %v4752_v52 = vsel %vm4407_vm0, %v16637_v0, 0.0 }
 0x383   : > { %v4692_v10 = vrot.slane %v4691_v5, 2  ;;  %v4715_v46 = vadd.f32 %v4714_v3, %v4713_v61  ;;  %v4746_v33 = vrot.slane %v4745_v37, 4  ;;  %v4753_v35 = vadd.f32 %v16641_v39, %v4752_v52  ;;  %v22483_v3 = vld [vmem:[#allocation419_spill] sm:$0xff] }
 0x384   : > { %v4669_v49 = vadd.f32 %v4668_v13, %v4667_v19  ;;  %v4700_v51 = vrot.slane %v4699_v58, 2  ;;  %v4723_v6 = vadd.f32 %v4722_v60, %v4721_v53  ;;  %10417 = vrcp.f32 %v4639_v34 }
 0x385   : > { %v4677_v26 = vadd.f32 %v4676_v23, %v4675_v12  ;;  %v4708_v24 = vrot.slane %v4707_v59, 2  ;;  %v4731_v17 = vadd.f32 %v4730_v41, %v4729_v4  ;;  %10419 = vrcp.f32 %v4647_v16 }
 0x386   : > { %v4654_v47 = vrot.slane %v4653_v15, 1  ;;  %v4685_v44 = vadd.f32 %v4684_v25, %v4683_v63  ;;  %v4739_v55 = vadd.f32 %v4738_v11, %v4737_v48  ;;  %v4754_v50 = vrot.slane %v4753_v35, 4 }
 0x387   : > { %v4662_v43 = vrot.slane %v4661_v2, 1  ;;  %v4693_v40 = vadd.f32 %v4692_v10, %v4691_v5  ;;  %v4716_v0 = vrot.slane %v4715_v46, 2  ;;  %v4747_v54 = vadd.f32 %v4746_v33, %v4745_v37 }
 0x388   : > { %v22484_v61 = vunpack.c.l.bf16 %v22483_v3  ;;  %v4670_v19 = vrot.slane %v4669_v49, 1  ;;  %v4701_v60 = vadd.f32 %v4700_v51, %v4699_v58  ;;  %v4724_v34 = vrot.slane %v4723_v6, 2 }
 0x389   : > { %v4678_v23 = vrot.slane %v4677_v26, 1  ;;  %v4709_v53 = vadd.f32 %v4708_v24, %v4707_v59  ;;  %v4732_v4 = vrot.slane %v4731_v17, 2  ;;  %v10569_v12 = vmov 1966171168  }
 0x38a   : > { %v16650_v52 = vadd.f32 %v22484_v61, %v16540_v57  ;;  %v5035_v16 = vunpack.c.l.s4 %v10569_v12  ;;  %v4655_v63 = vadd.f32 %v4654_v47, %v4653_v15  ;;  %v4686_v11 = vrot.slane %v4685_v44, 1 }
 0x38b   : > { %v4740_v48 = vrot.slane %v4739_v55, 2  ;;  %v4755_v13 = vadd.f32 %v4754_v50, %v4753_v35  ;;  %v4663_v5 = vadd.f32 %v4662_v43, %v4661_v2  ;;  %v4694_v41 = vrot.slane %v4693_v40, 1 }
 0x38c   : > { %v4717_v37 = vadd.f32 %v4716_v0, %v4715_v46  ;;  %v4748_v25 = vrot.slane %v4747_v54, 2  ;;  %v4671_v10 = vadd.f32 %v4670_v19, %v4669_v49  ;;  %v4702_v33 = vrot.slane %v4701_v60, 1 }
 0x38d   : > { %v4725_v57 = vadd.f32 %v4724_v34, %v4723_v6  ;;  %v5037_v61 = vlaneseq  ;;  %v4679_v39 = vadd.f32 %v4678_v23, %v4677_v26  ;;  %v4710_v58 = vrot.slane %v4709_v53, 1 }
 0x38e   : > { %v4733_v51 = vadd.f32 %v4732_v4, %v4731_v17  ;;  %v5036_v8 = vunpack.c.0.s8 %v5035_v16  ;;  %v10418_v59 = vpop.eup %10417  ;;  %v4687_v24 = vadd.f32 %v4686_v11, %v4685_v44  ;;  %v4741_v7 = vadd.f32 %v4740_v48, %v4739_v55  ;;  %v22485_v55 = vld [vmem:[#allocation423_spill] sm:$0xff]  ;;  %v22489_v4 = vld [vmem:[#allocation428_spill] sm:$0xff] }
 0x38f   : > { %v4756_v12 = vrot.slane %v4755_v13, 2  ;;  %10421 = vrcp.f32 %v4655_v63  ;;  %v10420_v15 = vpop.eup %10419  ;;  %v4695_v47 = vadd.f32 %v4694_v41, %v4693_v40  ;;  %v4718_v50 = vrot.slane %v4717_v37, 1  ;;  %v22493_v48 = vld [vmem:[#allocation432_spill] sm:$0xff] }
 0x390   : > { %v4749_v43 = vadd.f32 %v4748_v25, %v4747_v54  ;;  %10423 = vrcp.f32 %v4663_v5  ;;  %v4703_v0 = vadd.f32 %v4702_v33, %v4701_v60  ;;  %v4726_v35 = vrot.slane %v4725_v57, 1  ;;  %v22487_v60 = vld [vmem:[#allocation426_spill] sm:$0xff] }
 0x391   : > { %10425 = vrcp.f32 %v4671_v10  ;;  %v5038_v2 = vshrl.u32 %v5037_v61, 7  ;;  %v4711_v46 = vadd.f32 %v4710_v58, %v4709_v53  ;;  %v4734_v49 = vrot.slane %v4733_v51, 1  ;;  %v22495_v10 = vld [vmem:[#allocation434_spill] sm:$0xff] }
 0x392   : > { %v4761_v6 = vmul.f32 %v10418_v59, %v16474_v1  ;;  %10427 = vrcp.f32 %v4679_v39  ;;  %v4742_v26 = vrot.slane %v4741_v7, 1  ;;  %v4757_v17 = vadd.f32 %v4756_v12, %v4755_v13 }
 0x393   : > { %v4763_v44 = vmul.f32 %v10420_v15, %v16477_v20  ;;  %10429 = vrcp.f32 %v4687_v24  ;;  %v22486_v40 = vunpack.c.l.bf16 %v22485_v55  ;;  %v4719_v54 = vadd.f32 %v4718_v50, %v4717_v37  ;;  %v22491_v20 = vld [vmem:[#allocation430_spill] sm:$0xff] }
 0x394   : > { %v4750_v34 = vrot.slane %v4749_v43, 1  ;;  %10431 = vrcp.f32 %v4695_v47  ;;  %v22488_v23 = vunpack.c.l.bf16 %v22487_v60  ;;  %v22490_v1 = vunpack.c.l.bf16 %v22489_v4 }
 0x395   : > { %v4047_v19 = vadd.f32 %v22486_v40, %v16548_v31  ;;  %v4727_v16 = vadd.f32 %v4726_v35, %v4725_v57  ;;  %10433 = vrcp.f32 %v4703_v0  ;;  %v22492_v63 = vunpack.c.l.bf16 %v22491_v20 }
 0x396   : > { %v4054_v53 = vadd.f32 %v22488_v23, %v16553_v27  ;;  %v4061_v39 = vadd.f32 %v22490_v1, %v16569_v22  ;;  %v22494_v31 = vunpack.c.l.bf16 %v22493_v48  ;;  %v4735_v5 = vadd.f32 %v4734_v49, %v4733_v51 }
 0x397   : > { %v4068_v11 = vadd.f32 %v22492_v63, %v16578_v28  ;;  %v16669_v41 = vsub.s32 %v5036_v8, %v5038_v2  ;;  %v4743_v37 = vadd.f32 %v4742_v26, %v4741_v7  ;;  %v4758_v25 = vrot.slane %v4757_v17, 1 }
 0x398   : > { %v4075_v13 = vadd.f32 %v22494_v31, %v16598_v18  ;;  %10435 = vrcp.f32 %v4711_v46  ;;  %v5032_v27 = vcombine.low %v4761_v6, %v4763_v44  ;;  %v22496_v22 = vunpack.c.l.bf16 %v22495_v10 }
 0x399   : > { %v4751_v57 = vadd.f32 %v4750_v34, %v4749_v43  ;;  %10437 = vrcp.f32 %v4719_v54  ;;  %v5033_v61 = vcombine.high %v4761_v6, %v4763_v44  ;;  %v10422_v58 = vpop.eup %10421  ;;  %v22497_v28 = vunpack.c.h.bf16 %v22475_v45 }
 0x39a   : > { %v4082_v33 = vadd.f32 %v22496_v22, %v16606_v21  ;;  %v22499_v8 = vunpack.c.h.bf16 %v22483_v3  ;;  %v22501_v18 = vunpack.c.h.bf16 %v22485_v55  ;;  %10439 = vrcp.f32 %v4727_v16  ;;  %v10424_v21 = vpop.eup %10423  ;;  %v22521_v22 = vld [vmem:[#allocation195_spill] sm:$0xff] }
 0x39b   : > { %v16677_v24 = vadd.f32 %v22497_v28, %v16616_v62  ;;  %v22503_v12 = vunpack.c.h.bf16 %v22487_v60  ;;  %v22505_v50 = vunpack.c.h.bf16 %v22489_v4  ;;  %v4764_v62 = vmul.f32 %v10418_v59, %v16467_v30  ;;  %v10426_v3 = vpop.eup %10425 }
 0x39c   : > { %v16682_v7 = vadd.f32 %v22499_v8, %v16650_v52  ;;  %v16686_v51 = vadd.f32 %v22501_v18, %v4047_v19  ;;  %10441 = vrcp.f32 %v4735_v5  ;;  %v4759_v52 = vadd.f32 %v4758_v25, %v4757_v17  ;;  %v10428_v35 = vpop.eup %10427  ;;  %v22518_v5 = vld [vmem:[#allocation183_spill] sm:$0xff] }
 0x39d   : > { %22498 = vst [vmem:[#allocation248_spill] sm:$0xff] %v16677_v24  ;;  %v16690_v47 = vadd.f32 %v22503_v12, %v4054_v53  ;;  %v16694_v45 = vadd.f32 %v22505_v50, %v4061_v39  ;;  %v4765_v43 = vmul.f32 %v10420_v15, %v16471_v56  ;;  %10443 = vrcp.f32 %v4743_v37  ;;  %v10430_v59 = vpop.eup %10429  ;;  %v22514_v39 = vld [vmem:[#allocation150_spill] sm:$0xff]  ;;  %v22524_v8 = vld [vmem:[#allocation191_spill] sm:$0xff] }
 0x39e   : > { %22500 = vst [vmem:[#allocation221_spill] sm:$0xff] %v16682_v7  ;;  %22502 = vst [vmem:[#allocation252_spill] sm:$0xff] %v16686_v51  ;;  %v5040_v0 = vrot.slane %v5032_v27, %v16669_v41  ;;  %v22507_v46 = vunpack.c.h.bf16 %v22491_v20  ;;  %v22509_v6 = vunpack.c.h.bf16 %v22493_v48  ;;  %10445 = vrcp.f32 %v4751_v57  ;;  %v10432_v40 = vpop.eup %10431 }
 0x39f   : > { %22504 = vst [vmem:[#allocation256_spill] sm:$0xff] %v16690_v47  ;;  %22506 = vst [vmem:[#allocation260_spill] sm:$0xff] %v16694_v45  ;;  %v5047_v30 = vrot.slane %v5033_v61, %v16669_v41  ;;  %v22511_v17 = vunpack.c.h.bf16 %v22495_v10  ;;  %v4767_v56 = vmul.f32 %v10422_v58, %v16482_v38  ;;  %v4769_v15 = vmul.f32 %v10424_v21, %v16488_v32  ;;  %v10434_v23 = vpop.eup %10433 }
 0x3a0   : > { %v16701_v49 = vadd.f32 %v22507_v46, %v4068_v11  ;;  %v16705_v26 = vadd.f32 %v22509_v6, %v4075_v13  ;;  %v16714_v55 = vsub.s32 0, %v5038_v2  ;;  %v4770_v19 = vmul.f32 %v10422_v58, %v16492_v9  ;;  %v22517_v11 = vld [vmem:[#allocation179_spill] sm:$0xff] }
 0x3a1   : > { %v16710_v44 = vadd.f32 %v22511_v17, %v4082_v33  ;;  %v4771_v54 = vmul.f32 %v10424_v21, %v16496_v29  ;;  %v4773_v34 = vmul.f32 %v10426_v3, %v16500_v36  ;;  %v16719_v60 = vsub.s32 1, %v5038_v2  ;;  %v22515_v29 = vld [vmem:[#allocation171_spill] sm:$0xff] }
 0x3a2   : > { %22508 = vst [vmem:[#allocation264_spill] sm:$0xff] %v16701_v49  ;;  %22510 = vst [vmem:[#allocation225_spill] sm:$0xff] %v16705_v26  ;;  %10447 = vrcp.f32 %v4759_v52  ;;  %v5048_v53 = vcombine.high %v5040_v0, %v5040_v0  ;;  %v16722_v4 = vrot.slane %v5040_v0, %v16669_v41  ;;  %v5082_v38 = vcombine.low %v4764_v62, %v4765_v43  ;;  %v10436_v20 = vpop.eup %10435  ;;  %v22516_v36 = vld [vmem:[#allocation175_spill] sm:$0xff] }
 0x3a3   : > { %22512 = vst [vmem:[#allocation229_spill] sm:$0xff] %v16710_v44  ;;  %v4775_v32 = vmul.f32 %v10428_v35, %v16508_v42  ;;  %v4776_v1 = vmul.f32 %v10426_v3, %v16512_v14  ;;  %v4777_v16 = vmul.f32 %v10428_v35, %v22514_v39  ;;  %v5049_v9 = vcombine.high %v5047_v30, %v5047_v30  ;;  %v10438_v13 = vpop.eup %10437  ;;  %v22519_v42 = vld [vmem:[#allocation187_spill] sm:$0xff] }
 0x3a4   : > { %22513 = vst [vmem:[#allocation233_spill] sm:$0xff] %v16722_v4  ;;  %v16728_v63 = vmul.f32 %v10430_v59, %v22515_v29  ;;  %v16731_v2 = vmul.f32 %v10432_v40, %v22516_v36  ;;  %v16734_v48 = vmul.f32 %v10430_v59, %v22517_v11  ;;  %v5107_v31 = vcombine.low %v4767_v56, %v4769_v15  ;;  %v10440_v10 = vpop.eup %10439  ;;  %v22525_v21 = vld [vmem:[#allocation199_spill] sm:$0xff]  ;;  %v22532_v36 = vld [vmem:[#allocation228_spill] sm:$0xff] }
 0x3a5   : > { %v16737_v37 = vmul.f32 %v10432_v40, %v22518_v5  ;;  %v16740_v14 = vmul.f32 %v10434_v23, %v22519_v42  ;;  %v16743_v25 = vrot.slane %v5047_v30, %v16669_v41  ;;  %v5108_v27 = vcombine.high %v4767_v56, %v4769_v15  ;;  %v22526_v52 = vld [vmem:[#allocation203_spill] sm:$0xff] }
 0x3a6   : > { %v16746_v33 = vmul.f32 %v10434_v23, %v22521_v22  ;;  %v16749_v57 = vrot.slane %v5048_v53, %v16669_v41  ;;  %v16753_v61 = vcombine.high %v16722_v4, %v16722_v4  ;;  %v5089_v58 = vrot.slane %v5082_v38, %v16669_v41  ;;  %v10442_v28 = vpop.eup %10441  ;;  %v22527_v0 = vld [vmem:[#allocation207_spill] sm:$0xff]  ;;  %v22536_v22 = vld [vmem:[#allocation232_spill] sm:$0xff] }
 0x3a7   : > { %22520 = vst [vmem:[#allocation268_spill] sm:$0xff] %v16743_v25  ;;  %v16757_v18 = vmul.f32 %v10436_v20, %v22524_v8  ;;  %v16760_v12 = vmul.f32 %v10436_v20, %v22525_v21  ;;  %v16763_v50 = vrot.slane %v5049_v9, %v16669_v41  ;;  %v16767_v62 = vcombine.high %v16743_v25, %v16743_v25  ;;  %v10444_v3 = vpop.eup %10443  ;;  %v22529_v59 = vld [vmem:[#allocation215_spill] sm:$0xff]  ;;  %v22531_v20 = vld [vmem:[#allocation224_spill] sm:$0xff] }
 0x3a8   : > { %22522 = vst [vmem:[#allocation237_spill] sm:$0xff] %v16749_v57  ;;  %22523 = vst [vmem:[#allocation241_spill] sm:$0xff] %v16753_v61  ;;  %v16770_v43 = vmul.f32 %v10438_v13, %v22526_v52  ;;  %v16773_v35 = vmul.f32 %v10438_v13, %v22527_v0  ;;  %v16777_v46 = vcombine.high %v16749_v57, %v16749_v57  ;;  %v10446_v30 = vpop.eup %10445  ;;  %v22530_v56 = vld [vmem:[#allocation211_spill] sm:$0xff] }
 0x3a9   : > { %v5115_v6 = vrot.slane %v5107_v31, %v16669_v41  ;;  %v16781_v17 = vmul.f32 %v10440_v10, %v22529_v59  ;;  %v16784_v15 = vmul.f32 %v10440_v10, %v22530_v56  ;;  %v5122_v40 = vrot.slane %v5108_v27, %v16669_v41  ;;  %v22533_v31 = vld [vmem:[#allocation219_spill] sm:$0xff]  ;;  %v22535_v27 = vld [vmem:[#allocation236_spill] sm:$0xff] }
 0x3aa   : > { %22528 = vst [vmem:[#allocation245_spill] sm:$0xff] %v16777_v46  ;;  %v5157_v23 = vcombine.low %v4770_v19, %v4771_v54  ;;  %v16789_v53 = vcombine.high %v16763_v50, %v16763_v50  ;;  %v5090_v38 = vcombine.high %v5089_v58, %v5089_v58  ;;  %v5182_v39 = vcombine.low %v4773_v34, %v4775_v32  ;;  %v22534_v54 = vld [vmem:[#allocation220_spill] sm:$0xff] }
 0x3ab   : > { %v5183_v9 = vcombine.high %v4773_v34, %v4775_v32  ;;  %v16792_v29 = vmul.f32 %v10442_v28, %v22531_v20  ;;  %v16795_v11 = vmul.f32 %v10444_v3, %v22532_v36  ;;  %v16798_v13 = vmul.f32 %v10442_v28, %v22533_v31  ;;  %v22538_v59 = vld [vmem:[#allocation240_spill] sm:$0xff] }
 0x3ac   : > { %v16801_v5 = vrot.slane %v5089_v58, %v16669_v41  ;;  %v10448_v19 = vpop.eup %10447  ;;  %v16804_v42 = vmul.f32 %v10444_v3, %v22534_v54  ;;  %v16807_v10 = vmul.f32 %v10446_v30, %v22535_v27  ;;  %v5123_v34 = vcombine.high %v5115_v6, %v5115_v6 }
 0x3ad   : > { %v5232_v32 = vcombine.low %v4776_v1, %v4777_v16  ;;  %v16810_v8 = vmul.f32 %v10446_v30, %v22536_v22  ;;  %v5124_v21 = vcombine.high %v5122_v40, %v5122_v40  ;;  %v16813_v52 = vrot.slane %v5115_v6, %v16669_v41  ;;  %v22537_v16 = vld [vmem:[#allocation244_spill] sm:$0xff] }
 0x3ae   : > { %v5164_v28 = vrot.slane %v5157_v23, %v16669_v41  ;;  %v16817_v58 = vrot.slane %v5090_v38, %v16669_v41  ;;  %v16821_v3 = vcombine.high %v16801_v5, %v16801_v5  ;;  %v5190_v0 = vrot.slane %v5182_v39, %v16669_v41 }
 0x3af   : > { %v5197_v1 = vrot.slane %v5183_v9, %v16669_v41  ;;  %v16826_v30 = vmul.f32 %v10448_v19, %v22537_v16  ;;  %v16829_v56 = vmul.f32 %v10448_v19, %v22538_v59  ;;  %v5257_v6 = vcombine.low %v16728_v63, %v16731_v2 }
 0x3b0   : > { %v5258_v23 = vcombine.high %v16728_v63, %v16731_v2  ;;  %v16837_v38 = vcombine.high %v16817_v58, %v16817_v58  ;;  %v16840_v39 = vrot.slane %v5122_v40, %v16669_v41  ;;  %v16843_v9 = vrot.slane %v5123_v34, %v16669_v41 }
 0x3b1   : > { %v5239_v20 = vrot.slane %v5232_v32, %v16669_v41  ;;  %v16847_v36 = vrot.slane %v5124_v21, %v16669_v41  ;;  %v16851_v31 = vcombine.high %v16813_v52, %v16813_v52  ;;  %v5165_v63 = vcombine.high %v5164_v28, %v5164_v28 }
 0x3b2   : > { %v5307_v2 = vcombine.low %v16734_v48, %v16737_v37  ;;  %v16857_v40 = vcombine.high %v16840_v39, %v16840_v39  ;;  %v5198_v19 = vcombine.high %v5190_v0, %v5190_v0  ;;  %v5199_v54 = vcombine.high %v5197_v1, %v5197_v1 }
 0x3b3   : > { %v16860_v27 = vrot.slane %v5190_v0, %v16669_v41  ;;  %v16864_v34 = vcombine.high %v16843_v9, %v16843_v9  ;;  %v16867_v32 = vrot.slane %v5164_v28, %v16669_v41  ;;  %v5265_v22 = vrot.slane %v5257_v6, %v16669_v41 }
 0x3b4   : > { %v5272_v48 = vrot.slane %v5258_v23, %v16669_v41  ;;  %v16873_v37 = vcombine.high %v16847_v36, %v16847_v36  ;;  %v16876_v21 = vrot.slane %v5197_v1, %v16669_v41  ;;  %v5240_v0 = vcombine.high %v5239_v20, %v5239_v20 }
 0x3b5   : > { %v5332_v16 = vcombine.low %v16740_v14, %v16757_v18  ;;  %v16881_v59 = vrot.slane %v5165_v63, %v16669_v41  ;;  %v16885_v28 = vcombine.high %v16867_v32, %v16867_v32  ;;  %v5314_v6 = vrot.slane %v5307_v2, %v16669_v41 }
 0x3b6   : > { %22539 = vst [vmem:[#allocation249_spill] sm:$0xff] %v16876_v21  ;;  %v5333_v23 = vcombine.high %v16740_v14, %v16757_v18  ;;  %v16891_v44 = vrot.slane %v5198_v19, %v16669_v41  ;;  %v16894_v1 = vrot.slane %v5199_v54, %v16669_v41  ;;  %v16898_v26 = vcombine.high %v16860_v27, %v16860_v27 }
 0x3b7   : > { %v16902_v63 = vcombine.high %v16876_v21, %v16876_v21  ;;  %v16906_v2 = vcombine.high %v16881_v59, %v16881_v59  ;;  %v16909_v14 = vrot.slane %v5239_v20, %v16669_v41  ;;  %v5273_v18 = vcombine.high %v5265_v22, %v5265_v22 }
 0x3b8   : > { %22540 = vst [vmem:[#allocation272_spill] sm:$0xff] %v16894_v1  ;;  %v5274_v19 = vcombine.high %v5272_v48, %v5272_v48  ;;  %v16912_v54 = vrot.slane %v5240_v0, %v16669_v41  ;;  %v16915_v49 = vrot.slane %v5265_v22, %v16669_v41  ;;  %v5340_v45 = vrot.slane %v5332_v16, %v16669_v41 }
 0x3b9   : > { %22541 = vst [vmem:[#allocation276_spill] sm:$0xff] %v16902_v63  ;;  %22542 = vst [vmem:[#allocation280_spill] sm:$0xff] %v16909_v14  ;;  %v5382_v47 = vcombine.low %v16746_v33, %v16760_v12  ;;  %v16922_v51 = vcombine.high %v16891_v44, %v16891_v44  ;;  %v16926_v20 = vcombine.high %v16894_v1, %v16894_v1 }
 0x3ba   : > { %22543 = vst [vmem:[#allocation253_spill] sm:$0xff] %v16912_v54  ;;  %22544 = vst [vmem:[#allocation257_spill] sm:$0xff] %v16915_v49  ;;  %v5315_v7 = vcombine.high %v5314_v6, %v5314_v6  ;;  %v5347_v0 = vrot.slane %v5333_v23, %v16669_v41  ;;  %v16931_v22 = vcombine.high %v16909_v14, %v16909_v14 }
 0x3bb   : > { %22545 = vst [vmem:[#allocation261_spill] sm:$0xff] %v16922_v51  ;;  %22546 = vst [vmem:[#allocation265_spill] sm:$0xff] %v16926_v20  ;;  %v16935_v16 = vcombine.high %v16912_v54, %v16912_v54  ;;  %v16938_v33 = vrot.slane %v5272_v48, %v16669_v41  ;;  %v5407_v12 = vcombine.low %v16770_v43, %v16781_v17 }
 0x3bc   : > { %22547 = vst [vmem:[#allocation269_spill] sm:$0xff] %v16931_v22  ;;  %v16943_v24 = vrot.slane %v5273_v18, %v16669_v41  ;;  %v16946_v20 = vrot.slane %v5274_v19, %v16669_v41  ;;  %v16949_v23 = vrot.slane %v5314_v6, %v16669_v41  ;;  %v5408_v22 = vcombine.high %v16770_v43, %v16781_v17 }
 0x3bd   : > { %22548 = vst [vmem:[#allocation222_spill] sm:$0xff] %v16935_v16  ;;  %22549 = vst [vmem:[#allocation273_spill] sm:$0xff] %v16938_v33  ;;  %v16955_v16 = vcombine.high %v16915_v49, %v16915_v49  ;;  %v16959_v48 = vcombine.high %v16938_v33, %v16938_v33  ;;  %v5348_v54 = vcombine.high %v5340_v45, %v5340_v45 }
 0x3be   : > { %22550 = vst [vmem:[#allocation277_spill] sm:$0xff] %v16946_v20  ;;  %22551 = vst [vmem:[#allocation281_spill] sm:$0xff] %v16949_v23  ;;  %v5389_v18 = vrot.slane %v5382_v47, %v16669_v41  ;;  %v16963_v19 = vrot.slane %v5315_v7, %v16669_v41  ;;  %v5349_v14 = vcombine.high %v5347_v0, %v5347_v0 }
 0x3bf   : > { %22552 = vst [vmem:[#allocation226_spill] sm:$0xff] %v16955_v16  ;;  %22553 = vst [vmem:[#allocation230_spill] sm:$0xff] %v16959_v48  ;;  %v16966_v6 = vrot.slane %v5340_v45, %v16669_v41  ;;  %v5457_v43 = vcombine.low %v16773_v35, %v16784_v15  ;;  %v16972_v17 = vcombine.high %v16949_v23, %v16949_v23 }
 0x3c0   : > { %22554 = vst [vmem:[#allocation234_spill] sm:$0xff] %v16963_v19  ;;  %v5415_v33 = vrot.slane %v5407_v12, %v16669_v41  ;;  %v5482_v48 = vcombine.low %v16792_v29, %v16795_v11  ;;  %v5483_v7 = vcombine.high %v16792_v29, %v16795_v11  ;;  %v16981_v47 = vcombine.high %v16943_v24, %v16943_v24  ;;  %v22602_v57 = vld [vmem:[#allocation280_spill] sm:$0xff] }
 0x3c1   : > { %22555 = vst [vmem:[#allocation238_spill] sm:$0xff] %v16966_v6  ;;  %22556 = vst [vmem:[#allocation242_spill] sm:$0xff] %v16972_v17  ;;  %v16985_v45 = vcombine.high %v16946_v20, %v16946_v20  ;;  %v16988_v35 = vrot.slane %v5347_v0, %v16669_v41  ;;  %v5422_v15 = vrot.slane %v5408_v22, %v16669_v41 }
 0x3c2   : > { %22557 = vst [vmem:[#allocation246_spill] sm:$0xff] %v16981_v47  ;;  %v16993_v12 = vcombine.high %v16963_v19, %v16963_v19  ;;  %v16996_v17 = vrot.slane %v5348_v54, %v16669_v41  ;;  %v5390_v29 = vcombine.high %v5389_v18, %v5389_v18  ;;  %v5532_v11 = vcombine.low %v16798_v13, %v16804_v42 }
 0x3c3   : > { %22558 = vst [vmem:[#allocation250_spill] sm:$0xff] %v16985_v45  ;;  %22559 = vst [vmem:[#allocation254_spill] sm:$0xff] %v16988_v35  ;;  %v17001_v23 = vrot.slane %v5349_v14, %v16669_v41  ;;  %v17005_v0 = vcombine.high %v16966_v6, %v16966_v6  ;;  %v17008_v22 = vrot.slane %v5389_v18, %v16669_v41 }
 0x3c4   : > { %22560 = vst [vmem:[#allocation258_spill] sm:$0xff] %v16993_v12  ;;  %22561 = vst [vmem:[#allocation262_spill] sm:$0xff] %v16996_v17  ;;  %v5464_v19 = vrot.slane %v5457_v43, %v16669_v41  ;;  %v5423_v12 = vcombine.high %v5415_v33, %v5415_v33  ;;  %v17012_v54 = vrot.slane %v5415_v33, %v16669_v41  ;;  %v22605_v25 = vld [vmem:[#allocation222_spill] sm:$0xff] }
 0x3c5   : > { %22562 = vst [vmem:[#allocation266_spill] sm:$0xff] %v17001_v23  ;;  %22563 = vst [vmem:[#allocation270_spill] sm:$0xff] %v17005_v0  ;;  %v5490_v45 = vrot.slane %v5482_v48, %v16669_v41  ;;  %v5497_v13 = vrot.slane %v5483_v7, %v16669_v41  ;;  %v17018_v42 = vcombine.high %v16988_v35, %v16988_v35  ;;  %v22609_v46 = vld [vmem:[#allocation281_spill] sm:$0xff] }
 0x3c6   : > { %22564 = vst [vmem:[#allocation223_spill] sm:$0xff] %v17008_v22  ;;  %22565 = vst [vmem:[#allocation274_spill] sm:$0xff] %v17012_v54  ;;  %v17022_v14 = vcombine.high %v16996_v17, %v16996_v17  ;;  %v17026_v18 = vcombine.high %v17001_v23, %v17001_v23  ;;  %v5424_v43 = vcombine.high %v5422_v15, %v5422_v15 }
 0x3c7   : > { %22566 = vst [vmem:[#allocation278_spill] sm:$0xff] %v17018_v42  ;;  %v17029_v33 = vrot.slane %v5390_v29, %v16669_v41  ;;  %v17033_v48 = vcombine.high %v17008_v22, %v17008_v22  ;;  %v5539_v7 = vrot.slane %v5532_v11, %v16669_v41  ;;  %v5557_v42 = vcombine.low %v16807_v10, %v16826_v30  ;;  %v22610_v51 = vld [vmem:[#allocation234_spill] sm:$0xff] }
 0x3c8   : > { %22567 = vst [vmem:[#allocation282_spill] sm:$0xff] %v17022_v14  ;;  %22568 = vst [vmem:[#allocation227_spill] sm:$0xff] %v17026_v18  ;;  %v17039_v35 = vrot.slane %v5422_v15, %v16669_v41  ;;  %v5465_v14 = vcombine.high %v5464_v19, %v5464_v19  ;;  %v5558_v18 = vcombine.high %v16807_v10, %v16826_v30 }
 0x3c9   : > { %22569 = vst [vmem:[#allocation231_spill] sm:$0xff] %v17033_v48  ;;  %v5607_v29 = vcombine.low %v16810_v8, %v16829_v56  ;;  %v17046_v23 = vrot.slane %v5423_v12, %v16669_v41  ;;  %v17050_v48 = vcombine.high %v17012_v54, %v17012_v54  ;;  %v5498_v11 = vcombine.high %v5490_v45, %v5490_v45 }
 0x3ca   : > { %22570 = vst [vmem:[#allocation235_spill] sm:$0xff] %v17039_v35  ;;  %v5499_v22 = vcombine.high %v5497_v13, %v5497_v13  ;;  %v17054_v15 = vcombine.high %v17029_v33, %v17029_v33  ;;  %v17057_v0 = vrot.slane %v5424_v43, %v16669_v41  ;;  %v17061_v10 = vcombine.high %v17039_v35, %v17039_v35 }
 0x3cb   : > { %22571 = vst [vmem:[#allocation239_spill] sm:$0xff] %v17050_v48  ;;  %v17064_v8 = vrot.slane %v5490_v45, %v16669_v41  ;;  %v17068_v30 = vcombine.high %v17046_v23, %v17046_v23  ;;  %v17071_v56 = vrot.slane %v5464_v19, %v16669_v41  ;;  %v5540_v12 = vcombine.high %v5539_v7, %v5539_v7 }
 0x3cc   : > { %22572 = vst [vmem:[#allocation243_spill] sm:$0xff] %v17057_v0  ;;  %22573 = vst [vmem:[#allocation247_spill] sm:$0xff] %v17061_v10  ;;  %v5565_v48 = vrot.slane %v5557_v42, %v16669_v41  ;;  %v17075_v43 = vrot.slane %v5465_v14, %v16669_v41  ;;  %v17078_v54 = vrot.slane %v5497_v13, %v16669_v41  ;;  %v22616_v61 = vld [vmem:[#allocation266_spill] sm:$0xff] }
 0x3cd   : > { %22574 = vst [vmem:[#allocation251_spill] sm:$0xff] %v17064_v8  ;;  %v5572_v10 = vrot.slane %v5558_v18, %v16669_v41  ;;  %v5614_v45 = vrot.slane %v5607_v29, %v16669_v41  ;;  %v17084_v35 = vcombine.high %v17057_v0, %v17057_v0  ;;  %v17088_v19 = vcombine.high %v17071_v56, %v17071_v56 }
 0x3ce   : > { %22575 = vst [vmem:[#allocation255_spill] sm:$0xff] %v17075_v43  ;;  %22576 = vst [vmem:[#allocation259_spill] sm:$0xff] %v17078_v54  ;;  %v17091_v42 = vrot.slane %v5498_v11, %v16669_v41  ;;  %v17094_v14 = vrot.slane %v5499_v22, %v16669_v41  ;;  %v17098_v13 = vcombine.high %v17075_v43, %v17075_v43 }
 0x3cf   : > { %22577 = vst [vmem:[#allocation263_spill] sm:$0xff] %v17084_v35  ;;  %22578 = vst [vmem:[#allocation267_spill] sm:$0xff] %v17088_v19  ;;  %v17102_v18 = vcombine.high %v17064_v8, %v17064_v8  ;;  %v17106_v29 = vcombine.high %v17078_v54, %v17078_v54  ;;  %v17109_v19 = vrot.slane %v5539_v7, %v16669_v41  ;;  %v22618_v63 = vld [vmem:[#allocation227_spill] sm:$0xff]  ;;  %v22638_v35 = vld [vmem:[#allocation233_spill] sm:$0xff] }
 0x3d0   : > { %22579 = vst [vmem:[#allocation271_spill] sm:$0xff] %v17091_v42  ;;  %22580 = vst [vmem:[#allocation275_spill] sm:$0xff] %v17094_v14  ;;  %v17113_v11 = vcombine.high %v17091_v42, %v17091_v42  ;;  %v17116_v22 = vrot.slane %v5540_v12, %v16669_v41  ;;  %v5573_v43 = vcombine.high %v5565_v48, %v5565_v48  ;;  %v22643_v42 = vld [vmem:[#allocation237_spill] sm:$0xff] }
 0x3d1   : > { %22581 = vst [vmem:[#allocation279_spill] sm:$0xff] %v17098_v13  ;;  %22582 = vst [vmem:[#allocation283_spill] sm:$0xff] %v17102_v18  ;;  %v17119_v13 = vrot.slane %v5565_v48, %v16669_v41  ;;  %v17123_v18 = vcombine.high %v17094_v14, %v17094_v14  ;;  %v5574_v7 = vcombine.high %v5572_v10, %v5572_v10  ;;  %v22623_v21 = vld [vmem:[#allocation235_spill] sm:$0xff] }
 0x3d2   : > { %22583 = vst [vmem:[#allocation284_spill] sm:$0xff] %v17106_v29  ;;  %22584 = vst [vmem:[#allocation288_spill] sm:$0xff] %v17109_v19  ;;  %v17127_v29 = vcombine.high %v17109_v19, %v17109_v19  ;;  %v5615_v54 = vcombine.high %v5614_v45, %v5614_v45  ;;  %v17149_v12 = vrot.slane %v5573_v43, %v16669_v41 }
 0x3d3   : > { %22585 = vst [vmem:[#allocation292_spill] sm:$0xff] %v17113_v11  ;;  %22586 = vst [vmem:[#allocation296_spill] sm:$0xff] %v17119_v13  ;;  %v17131_v11 = vcombine.high %v17116_v22, %v17116_v22  ;;  %v17153_v48 = vcombine.high %v17119_v13, %v17119_v13  ;;  %v17156_v14 = vrot.slane %v5614_v45, %v16669_v41 }
 0x3d4   : > { %22587 = vst [vmem:[#allocation300_spill] sm:$0xff] %v17123_v18  ;;  %22588 = vst [vmem:[#allocation304_spill] sm:$0xff] %v17127_v29  ;;  %v17140_v18 = vrot.slane %v5572_v10, %v16669_v41  ;;  %v17161_v29 = vrot.slane %v5574_v7, %v16669_v41  ;;  %v17168_v43 = vrot.slane %v5615_v54, %v16669_v41  ;;  %v22604_v7 = vld [vmem:[#allocation269_spill] sm:$0xff] }
 0x3d5   : > { %22589 = vst [vmem:[#allocation308_spill] sm:$0xff] %v17131_v11  ;;  %22591 = vst [vmem:[#allocation285_spill] sm:$0xff] %v17149_v12  ;;  %v17174_v45 = vcombine.high %v17149_v12, %v17149_v12  ;;  %v17178_v10 = vcombine.high %v17156_v14, %v17156_v14  ;;  %v22603_v11 = vld [vmem:[#allocation253_spill] sm:$0xff]  ;;  %v22625_v49 = vld [vmem:[#allocation255_spill] sm:$0xff]  ;;  %v22641_v4 = vrot.slane %v22638_v35, %v16719_v60 }
 0x3d6   : > { %22590 = vst [vmem:[#allocation312_spill] sm:$0xff] %v17140_v18  ;;  %22592 = vst [vmem:[#allocation316_spill] sm:$0xff] %v17153_v48  ;;  %v17165_v19 = vcombine.high %v17140_v18, %v17140_v18  ;;  %v17186_v41 = vcombine.high %v17161_v29, %v17161_v29  ;;  %v17190_v54 = vcombine.high %v17168_v43, %v17168_v43 }
 0x3d7   : > { %22593 = vst [vmem:[#allocation320_spill] sm:$0xff] %v17156_v14  ;;  %22594 = vst [vmem:[#allocation324_spill] sm:$0xff] %v17161_v29  ;;  %v22631_v6 = vld [vmem:[#allocation275_spill] sm:$0xff]  ;;  %v22639_v14 = vrot.slane %v22638_v35, %v16714_v55  ;;  %v22645_v29 = vld [vmem:[#allocation436_spill] sm:$0xff]  ;;  %v22646_v16 = vrot.slane %v22643_v42, %v16719_v60 }
 0x3d8   : > { %22595 = vst [vmem:[#allocation328_spill] sm:$0xff] %v17165_v19  ;;  %22596 = vst [vmem:[#allocation289_spill] sm:$0xff] %v17168_v43  ;;  %v22640_v19 = vld [vmem:[#allocation435_spill] sm:$0xff]  ;;  %v22642_v43 = vld [vmem:[#allocation154_spill] sm:$0xff] }
 0x3d9   : > { %22597 = vst [vmem:[#allocation293_spill] sm:$0xff] %v17174_v45  ;;  %22598 = vst [vmem:[#allocation297_spill] sm:$0xff] %v17178_v10  ;;  %v22634_v1 = vld [vmem:[#allocation288_spill] sm:$0xff]  ;;  %v17566_v0 = vmul.f32 %v22641_v4, %v22640_v19  ;;  %v22644_v10 = vrot.slane %v22643_v42, %v16714_v55  ;;  %v22650_v4 = vld [vmem:[#allocation437_spill] sm:$0xff] }
 0x3da   : > { %22599 = vst [vmem:[#allocation332_spill] sm:$0xff] %v17186_v41  ;;  %22600 = vst [vmem:[#allocation301_spill] sm:$0xff] %v17190_v54  ;;  %v22637_v41 = vld [vmem:[#allocation153_spill] sm:$0xff]  ;;  %v17578_v54 = vmul.f32 %v22646_v16, %v22645_v29  ;;  %v22656_v16 = vld [vmem:[#allocation438_spill] sm:$0xff] }
 0x3db   : > { %v22635_v17 = vld [vmem:[#allocation304_spill] sm:$0xff]  ;;  %v17560_v47 = vmul.f32 %v22639_v14, %v22637_v41  ;;  %v17572_v20 = vmul.f32 %v22644_v10, %v22642_v43  ;;  %v22647_v14 = vld [vmem:[#allocation155_spill] sm:$0xff]  ;;  %v22648_v41 = vld [vmem:[#allocation241_spill] sm:$0xff] }
 0x3dc   : > { %v22649_v18 = vrot.slane %v22648_v41, %v16714_v55  ;;  %v22651_v35 = vrot.slane %v22648_v41, %v16719_v60  ;;  %v22652_v10 = vld [vmem:[#allocation156_spill] sm:$0xff]  ;;  %v22653_v43 = vld [vmem:[#allocation245_spill] sm:$0xff]  ;;  %v22662_v41 = vld [vmem:[#allocation439_spill] sm:$0xff] }
 0x3dd   : > { %v22654_v48 = vrot.slane %v22653_v43, %v16714_v55  ;;  %v22657_v42 = vrot.slane %v22653_v43, %v16719_v60  ;;  %v22667_v43 = vld [vmem:[#allocation440_spill] sm:$0xff] }
 0x3de   : > { %v17584_v45 = vmul.f32 %v22649_v18, %v22647_v14  ;;  %v17590_v19 = vmul.f32 %v22651_v35, %v22650_v4  ;;  %v22658_v18 = vld [vmem:[#allocation157_spill] sm:$0xff]  ;;  %v22659_v14 = vld [vmem:[#allocation268_spill] sm:$0xff] }
 0x3df   : > { %v17596_v12 = vmul.f32 %v22654_v48, %v22652_v10  ;;  %v17602_v29 = vmul.f32 %v22657_v42, %v22656_v16  ;;  %v22660_v13 = vrot.slane %v22659_v14, %v16714_v55  ;;  %v22663_v4 = vrot.slane %v22659_v14, %v16719_v60  ;;  %v22664_v48 = vld [vmem:[#allocation158_spill] sm:$0xff]  ;;  %v22673_v14 = vld [vmem:[#allocation441_spill] sm:$0xff] }
 0x3e0   : > { %v22665_v10 = vrot.slane %v16763_v50, %v16714_v55  ;;  %v22668_v16 = vrot.slane %v16763_v50, %v16719_v60  ;;  %v22679_v50 = vld [vmem:[#allocation442_spill] sm:$0xff] }
 0x3e1   : > { %22655 = vst [vmem:[#allocation305_spill] sm:$0xff] %v17596_v12  ;;  %v17608_v8 = vmul.f32 %v22660_v13, %v22658_v18  ;;  %v17614_v35 = vmul.f32 %v22663_v4, %v22662_v41  ;;  %v22670_v13 = vld [vmem:[#allocation159_spill] sm:$0xff]  ;;  %v22671_v18 = vrot.slane %v16767_v62, %v16714_v55  ;;  %v22674_v41 = vrot.slane %v16767_v62, %v16719_v60  ;;  %v22685_v62 = vld [vmem:[#allocation96_spill] sm:$0xff] }
 0x3e2   : > { %v17620_v12 = vmul.f32 %v22665_v10, %v22664_v48  ;;  %v17626_v42 = vmul.f32 %v22668_v16, %v22667_v43  ;;  %v22676_v48 = vld [vmem:[#allocation160_spill] sm:$0xff]  ;;  %v22677_v10 = vrot.slane %v16789_v53, %v16714_v55  ;;  %v22680_v43 = vrot.slane %v16789_v53, %v16719_v60  ;;  %v22691_v53 = vld [vmem:[#allocation102_spill] sm:$0xff] }
 0x3e3   : > { %22661 = vst [vmem:[#allocation309_spill] sm:$0xff] %v17608_v8  ;;  %v17632_v8 = vmul.f32 %v22671_v18, %v22670_v13  ;;  %v17638_v4 = vmul.f32 %v22674_v41, %v22673_v14  ;;  %v22682_v13 = vld [vmem:[#allocation161_spill] sm:$0xff]  ;;  %v22683_v18 = vrot.slane %v16801_v5, %v16714_v55  ;;  %v22686_v14 = vrot.slane %v16801_v5, %v16719_v60  ;;  %v22697_v5 = vld [vmem:[#allocation124_spill] sm:$0xff] }
 0x3e4   : > { %22666 = vst [vmem:[#allocation313_spill] sm:$0xff] %v17620_v12  ;;  %22669 = vst [vmem:[#allocation336_spill] sm:$0xff] %v17626_v42  ;;  %v17644_v12 = vmul.f32 %v22677_v10, %v22676_v48  ;;  %v17650_v16 = vmul.f32 %v22680_v43, %v22679_v50  ;;  %v22688_v48 = vld [vmem:[#allocation162_spill] sm:$0xff]  ;;  %v22689_v10 = vrot.slane %v16817_v58, %v16714_v55 }
 0x3e5   : > { %22672 = vst [vmem:[#allocation340_spill] sm:$0xff] %v17632_v8  ;;  %22675 = vst [vmem:[#allocation344_spill] sm:$0xff] %v17638_v4  ;;  %v17656_v8 = vmul.f32 %v22683_v18, %v22682_v13  ;;  %v17662_v41 = vmul.f32 %v22686_v14, %v22685_v62  ;;  %v22692_v50 = vrot.slane %v16817_v58, %v16719_v60  ;;  %v22694_v13 = vld [vmem:[#allocation163_spill] sm:$0xff]  ;;  %v22703_v58 = vld [vmem:[#allocation108_spill] sm:$0xff] }
 0x3e6   : > { %22678 = vst [vmem:[#allocation317_spill] sm:$0xff] %v17644_v12  ;;  %22681 = vst [vmem:[#allocation321_spill] sm:$0xff] %v17650_v16  ;;  %v17668_v12 = vmul.f32 %v22689_v10, %v22688_v48  ;;  %v22695_v18 = vrot.slane %v16821_v3, %v16714_v55  ;;  %v22698_v62 = vrot.slane %v16821_v3, %v16719_v60  ;;  %v22700_v48 = vld [vmem:[#allocation164_spill] sm:$0xff]  ;;  %v22708_v3 = vld [vmem:[#allocation114_spill] sm:$0xff] }
 0x3e7   : > { %22684 = vst [vmem:[#allocation325_spill] sm:$0xff] %v17656_v8  ;;  %22687 = vst [vmem:[#allocation329_spill] sm:$0xff] %v17662_v41  ;;  %v17674_v43 = vmul.f32 %v22692_v50, %v22691_v53  ;;  %v22701_v10 = vrot.slane %v16837_v38, %v16714_v55  ;;  %v22704_v53 = vrot.slane %v16837_v38, %v16719_v60  ;;  %v22712_v38 = vld [vmem:[#allocation118_spill] sm:$0xff] }
 0x3e8   : > { %22690 = vst [vmem:[#allocation333_spill] sm:$0xff] %v17668_v12  ;;  %v17680_v8 = vmul.f32 %v22695_v18, %v22694_v13  ;;  %v17686_v14 = vmul.f32 %v22698_v62, %v22697_v5  ;;  %v22706_v13 = vld [vmem:[#allocation165_spill] sm:$0xff]  ;;  %v22707_v18 = vrot.slane %v16813_v52, %v16714_v55  ;;  %v22709_v5 = vrot.slane %v16813_v52, %v16719_v60  ;;  %v22716_v52 = vld [vmem:[#allocation95_spill] sm:$0xff] }
 0x3e9   : > { %22693 = vst [vmem:[#allocation286_spill] sm:$0xff] %v17674_v43  ;;  %v17692_v12 = vmul.f32 %v22701_v10, %v22700_v48  ;;  %v17698_v50 = vmul.f32 %v22704_v53, %v22703_v58  ;;  %v22710_v48 = vld [vmem:[#allocation166_spill] sm:$0xff]  ;;  %v22711_v10 = vrot.slane %v16843_v9, %v16714_v55  ;;  %v22713_v58 = vrot.slane %v16843_v9, %v16719_v60  ;;  %v22720_v9 = vld [vmem:[#allocation132_spill] sm:$0xff] }
 0x3ea   : > { %22696 = vst [vmem:[#allocation337_spill] sm:$0xff] %v17680_v8  ;;  %22699 = vst [vmem:[#allocation341_spill] sm:$0xff] %v17686_v14  ;;  %v17704_v8 = vmul.f32 %v22707_v18, %v22706_v13  ;;  %v17710_v62 = vmul.f32 %v22709_v5, %v22708_v3  ;;  %v22714_v13 = vld [vmem:[#allocation167_spill] sm:$0xff]  ;;  %v22715_v18 = vrot.slane %v16851_v31, %v16714_v55 }
 0x3eb   : > { %22702 = vst [vmem:[#allocation345_spill] sm:$0xff] %v17692_v12  ;;  %22705 = vst [vmem:[#allocation290_spill] sm:$0xff] %v17698_v50  ;;  %v17716_v12 = vmul.f32 %v22711_v10, %v22710_v48  ;;  %v17722_v53 = vmul.f32 %v22713_v58, %v22712_v38  ;;  %v22717_v3 = vrot.slane %v16851_v31, %v16719_v60  ;;  %v22718_v48 = vld [vmem:[#allocation168_spill] sm:$0xff] }
 0x3ec   : > { %v17728_v50 = vmul.f32 %v22715_v18, %v22714_v13  ;;  %v22719_v10 = vrot.slane %v16864_v34, %v16714_v55  ;;  %v22721_v38 = vrot.slane %v16864_v34, %v16719_v60  ;;  %v22722_v13 = vld [vmem:[#allocation22_spill] sm:$0xff]  ;;  %v22723_v18 = vrot.slane %v16840_v39, %v16714_v55  ;;  %v22724_v31 = vld [vmem:[#allocation140_spill] sm:$0xff]  ;;  %v22730_v34 = vld [vmem:[#allocation149_spill] sm:$0xff] }
 0x3ed   : > { %v17734_v5 = vmul.f32 %v22717_v3, %v22716_v52  ;;  %v22725_v52 = vrot.slane %v16840_v39, %v16719_v60  ;;  %v22736_v39 = vld [vmem:[#allocation101_spill] sm:$0xff] }
 0x3ee   : > { %v17740_v14 = vmul.f32 %v22719_v10, %v22718_v48  ;;  %v17746_v58 = vmul.f32 %v22721_v38, %v22720_v9  ;;  %v17752_v43 = vmul.f32 %v22723_v18, %v22722_v13  ;;  %v22727_v48 = vld [vmem:[#allocation24_spill] sm:$0xff]  ;;  %v22728_v10 = vrot.slane %v16847_v36, %v16714_v55  ;;  %v22733_v13 = vld [vmem:[#allocation26_spill] sm:$0xff] }
 0x3ef   : > { %v17758_v3 = vmul.f32 %v22725_v52, %v22724_v31  ;;  %v22731_v9 = vrot.slane %v16847_v36, %v16719_v60  ;;  %v22734_v18 = vrot.slane %v16857_v40, %v16714_v55  ;;  %v22737_v31 = vrot.slane %v16857_v40, %v16719_v60  ;;  %v22742_v36 = vld [vmem:[#allocation107_spill] sm:$0xff]  ;;  %v22748_v40 = vld [vmem:[#allocation113_spill] sm:$0xff] }
 0x3f0   : > { %v17764_v41 = vmul.f32 %v22728_v10, %v22727_v48  ;;  %v22739_v48 = vld [vmem:[#allocation10_spill] sm:$0xff]  ;;  %v22740_v10 = vrot.slane %v16873_v37, %v16714_v55 }
 0x3f1   : > { %22726 = vst [vmem:[#allocation294_spill] sm:$0xff] %v17758_v3  ;;  %v17770_v38 = vmul.f32 %v22731_v9, %v22730_v34  ;;  %v17776_v16 = vmul.f32 %v22734_v18, %v22733_v13  ;;  %v17782_v52 = vmul.f32 %v22737_v31, %v22736_v39  ;;  %v22743_v34 = vrot.slane %v16873_v37, %v16719_v60  ;;  %v22745_v13 = vld [vmem:[#allocation11_spill] sm:$0xff] }
 0x3f2   : > { %22729 = vst [vmem:[#allocation298_spill] sm:$0xff] %v17764_v41  ;;  %v17788_v4 = vmul.f32 %v22740_v10, %v22739_v48  ;;  %v22746_v18 = vrot.slane %v16867_v32, %v16714_v55  ;;  %v22749_v39 = vrot.slane %v16867_v32, %v16719_v60  ;;  %v22751_v48 = vld [vmem:[#allocation12_spill] sm:$0xff]  ;;  %v22752_v10 = vrot.slane %v16881_v59, %v16714_v55  ;;  %v22754_v37 = vld [vmem:[#allocation119_spill] sm:$0xff]  ;;  %v22760_v32 = vld [vmem:[#allocation126_spill] sm:$0xff] }
 0x3f3   : > { %22732 = vst [vmem:[#allocation302_spill] sm:$0xff] %v17770_v38  ;;  %22735 = vst [vmem:[#allocation306_spill] sm:$0xff] %v17776_v16  ;;  %v17794_v9 = vmul.f32 %v22743_v34, %v22742_v36  ;;  %v22755_v36 = vrot.slane %v16881_v59, %v16719_v60  ;;  %v22766_v59 = vld [vmem:[#allocation89_spill] sm:$0xff] }
 0x3f4   : > { %22738 = vst [vmem:[#allocation310_spill] sm:$0xff] %v17782_v52  ;;  %22741 = vst [vmem:[#allocation314_spill] sm:$0xff] %v17788_v4  ;;  %v17800_v16 = vmul.f32 %v22746_v18, %v22745_v13  ;;  %v17806_v31 = vmul.f32 %v22749_v39, %v22748_v40  ;;  %v17812_v4 = vmul.f32 %v22752_v10, %v22751_v48  ;;  %v22757_v13 = vld [vmem:[#allocation13_spill] sm:$0xff]  ;;  %v22763_v48 = vld [vmem:[#allocation14_spill] sm:$0xff] }
 0x3f5   : > { %22744 = vst [vmem:[#allocation318_spill] sm:$0xff] %v17794_v9  ;;  %v17818_v34 = vmul.f32 %v22755_v36, %v22754_v37  ;;  %v22758_v18 = vrot.slane %v16885_v28, %v16714_v55  ;;  %v22761_v40 = vrot.slane %v16885_v28, %v16719_v60  ;;  %v22764_v10 = vrot.slane %v16906_v2, %v16714_v55  ;;  %v22771_v28 = vld [vmem:[#allocation134_spill] sm:$0xff] }
 0x3f6   : > { %22747 = vst [vmem:[#allocation322_spill] sm:$0xff] %v17800_v16  ;;  %22750 = vst [vmem:[#allocation326_spill] sm:$0xff] %v17806_v31  ;;  %v22767_v37 = vrot.slane %v16906_v2, %v16719_v60  ;;  %v22775_v2 = vld [vmem:[#allocation142_spill] sm:$0xff] }
 0x3f7   : > { %22753 = vst [vmem:[#allocation330_spill] sm:$0xff] %v17812_v4  ;;  %22756 = vst [vmem:[#allocation334_spill] sm:$0xff] %v17818_v34  ;;  %v17824_v16 = vmul.f32 %v22758_v18, %v22757_v13  ;;  %v17830_v39 = vmul.f32 %v22761_v40, %v22760_v32  ;;  %v17836_v4 = vmul.f32 %v22764_v10, %v22763_v48  ;;  %v22769_v13 = vld [vmem:[#allocation15_spill] sm:$0xff]  ;;  %v22773_v48 = vld [vmem:[#allocation16_spill] sm:$0xff] }
 0x3f8   : > { %v17842_v36 = vmul.f32 %v22767_v37, %v22766_v59  ;;  %v22770_v18 = vrot.slane %v16860_v27, %v16714_v55  ;;  %v22772_v32 = vrot.slane %v16860_v27, %v16719_v60  ;;  %v22774_v10 = vrot.slane %v16891_v44, %v16714_v55  ;;  %v22779_v27 = vld [vmem:[#allocation151_spill] sm:$0xff] }
 0x3f9   : > { %22759 = vst [vmem:[#allocation287_spill] sm:$0xff] %v17824_v16  ;;  %22762 = vst [vmem:[#allocation338_spill] sm:$0xff] %v17830_v39  ;;  %v22776_v59 = vrot.slane %v16891_v44, %v16719_v60  ;;  %v22784_v44 = vld [vmem:[#allocation92_spill] sm:$0xff] }
 0x3fa   : > { %22765 = vst [vmem:[#allocation342_spill] sm:$0xff] %v17836_v4  ;;  %22768 = vst [vmem:[#allocation346_spill] sm:$0xff] %v17842_v36  ;;  %v17848_v16 = vmul.f32 %v22770_v18, %v22769_v13  ;;  %v17854_v40 = vmul.f32 %v22772_v32, %v22771_v28  ;;  %v17860_v4 = vmul.f32 %v22774_v10, %v22773_v48  ;;  %v22777_v13 = vld [vmem:[#allocation17_spill] sm:$0xff]  ;;  %v22781_v48 = vld [vmem:[#allocation18_spill] sm:$0xff] }
 0x3fb   : > { %v17866_v37 = vmul.f32 %v22776_v59, %v22775_v2  ;;  %v22778_v18 = vrot.slane %v16898_v26, %v16714_v55  ;;  %v22780_v28 = vrot.slane %v16898_v26, %v16719_v60  ;;  %v22782_v10 = vld [vmem:[#allocation261_spill] sm:$0xff]  ;;  %v22790_v26 = vld [vmem:[#allocation98_spill] sm:$0xff] }
 0x3fc   : > { %v22783_v39 = vrot.slane %v22782_v10, %v16714_v55  ;;  %v22785_v2 = vrot.slane %v22782_v10, %v16719_v60  ;;  %v22797_v10 = vld [vmem:[#allocation104_spill] sm:$0xff] }
 0x3fd   : > { %v17872_v36 = vmul.f32 %v22778_v18, %v22777_v13  ;;  %v17878_v32 = vmul.f32 %v22780_v28, %v22779_v27  ;;  %v22786_v13 = vld [vmem:[#allocation19_spill] sm:$0xff]  ;;  %v22787_v18 = vld [vmem:[#allocation249_spill] sm:$0xff] }
 0x3fe   : > { %v17884_v34 = vmul.f32 %v22783_v39, %v22781_v48  ;;  %v17890_v59 = vmul.f32 %v22785_v2, %v22784_v44  ;;  %v22788_v31 = vrot.slane %v22787_v18, %v16714_v55  ;;  %v22791_v27 = vrot.slane %v22787_v18, %v16719_v60  ;;  %v22793_v39 = vld [vmem:[#allocation20_spill] sm:$0xff]  ;;  %v22804_v18 = vld [vmem:[#allocation110_spill] sm:$0xff] }
 0x3ff   : > { %v22794_v48 = vld [vmem:[#allocation272_spill] sm:$0xff] }
 0x400   : > { %v17896_v9 = vmul.f32 %v22788_v31, %v22786_v13  ;;  %v17902_v28 = vmul.f32 %v22791_v27, %v22790_v26  ;;  %v22795_v52 = vrot.slane %v22794_v48, %v16714_v55  ;;  %v22798_v44 = vrot.slane %v22794_v48, %v16719_v60  ;;  %v22800_v31 = vld [vmem:[#allocation21_spill] sm:$0xff]  ;;  %v22801_v13 = vld [vmem:[#allocation276_spill] sm:$0xff] }
 0x401   : > { %v22802_v41 = vrot.slane %v22801_v13, %v16714_v55  ;;  %v22805_v26 = vrot.slane %v22801_v13, %v16719_v60  ;;  %v22811_v48 = vld [vmem:[#allocation116_spill] sm:$0xff] }
 0x402   : > { %22789 = vst [vmem:[#allocation291_spill] sm:$0xff] %v17896_v9  ;;  %22792 = vst [vmem:[#allocation295_spill] sm:$0xff] %v17902_v28  ;;  %v17908_v38 = vmul.f32 %v22795_v52, %v22793_v39  ;;  %v17914_v2 = vmul.f32 %v22798_v44, %v22797_v10  ;;  %v22807_v52 = vld [vmem:[#allocation23_spill] sm:$0xff]  ;;  %v22808_v39 = vld [vmem:[#allocation265_spill] sm:$0xff] }
 0x403   : > { %v17920_v9 = vmul.f32 %v22802_v41, %v22800_v31  ;;  %v17926_v27 = vmul.f32 %v22805_v26, %v22804_v18  ;;  %v22812_v10 = vrot.slane %v22808_v39, %v16719_v60  ;;  %v22814_v41 = vld [vmem:[#allocation25_spill] sm:$0xff]  ;;  %v22815_v31 = vrot.slane %v22602_v57, %v16714_v55  ;;  %v22817_v13 = vld [vmem:[#allocation120_spill] sm:$0xff] }
 0x404   : > { %22796 = vst [vmem:[#allocation299_spill] sm:$0xff] %v17908_v38  ;;  %22799 = vst [vmem:[#allocation303_spill] sm:$0xff] %v17914_v2  ;;  %v22809_v38 = vrot.slane %v22808_v39, %v16714_v55  ;;  %v22818_v18 = vrot.slane %v22602_v57, %v16719_v60  ;;  %v22823_v39 = vld [vmem:[#allocation97_spill] sm:$0xff]  ;;  %v22829_v57 = vld [vmem:[#allocation103_spill] sm:$0xff] }
 0x405   : > { %22803 = vst [vmem:[#allocation307_spill] sm:$0xff] %v17920_v9  ;;  %22806 = vst [vmem:[#allocation311_spill] sm:$0xff] %v17926_v27  ;;  %v17938_v44 = vmul.f32 %v22812_v10, %v22811_v48  ;;  %v17944_v9 = vmul.f32 %v22815_v31, %v22814_v41  ;;  %v22824_v48 = vrot.slane %v22603_v11, %v16719_v60  ;;  %v22826_v41 = vld [vmem:[#allocation28_spill] sm:$0xff] }
 0x406   : > { %v17932_v28 = vmul.f32 %v22809_v38, %v22807_v52  ;;  %v17950_v26 = vmul.f32 %v22818_v18, %v22817_v13  ;;  %v22820_v38 = vld [vmem:[#allocation27_spill] sm:$0xff]  ;;  %v22821_v52 = vrot.slane %v22603_v11, %v16714_v55  ;;  %v22827_v31 = vrot.slane %v22604_v7, %v16714_v55  ;;  %v22835_v11 = vld [vmem:[#allocation109_spill] sm:$0xff] }
 0x407   : > { %22813 = vst [vmem:[#allocation319_spill] sm:$0xff] %v17938_v44  ;;  %22816 = vst [vmem:[#allocation323_spill] sm:$0xff] %v17944_v9  ;;  %v17962_v10 = vmul.f32 %v22824_v48, %v22823_v39  ;;  %v22830_v13 = vrot.slane %v22604_v7, %v16719_v60  ;;  %v22836_v39 = vrot.slane %v22605_v25, %v16719_v60  ;;  %v22841_v7 = vld [vmem:[#allocation115_spill] sm:$0xff] }
 0x408   : > { %22810 = vst [vmem:[#allocation315_spill] sm:$0xff] %v17932_v28  ;;  %22819 = vst [vmem:[#allocation327_spill] sm:$0xff] %v17950_v26  ;;  %v17956_v28 = vmul.f32 %v22821_v52, %v22820_v38  ;;  %v17968_v9 = vmul.f32 %v22827_v31, %v22826_v41  ;;  %v22832_v38 = vld [vmem:[#allocation30_spill] sm:$0xff]  ;;  %v22833_v52 = vrot.slane %v22605_v25, %v16714_v55  ;;  %v22838_v41 = vld [vmem:[#allocation32_spill] sm:$0xff] }
 0x409   : > { %22825 = vst [vmem:[#allocation335_spill] sm:$0xff] %v17962_v10  ;;  %v17974_v18 = vmul.f32 %v22830_v13, %v22829_v57  ;;  %v17986_v48 = vmul.f32 %v22836_v39, %v22835_v11  ;;  %v22839_v31 = vld [vmem:[#allocation257_spill] sm:$0xff]  ;;  %v22846_v11 = vrot.slane %v16943_v24, %v16719_v60 }
 0x40a   : > { %22822 = vst [vmem:[#allocation331_spill] sm:$0xff] %v17956_v28  ;;  %22828 = vst [vmem:[#allocation339_spill] sm:$0xff] %v17968_v9  ;;  %v17980_v28 = vmul.f32 %v22833_v52, %v22832_v38  ;;  %v22840_v9 = vrot.slane %v22839_v31, %v16714_v55  ;;  %v22842_v57 = vrot.slane %v22839_v31, %v16719_v60  ;;  %v22843_v38 = vld [vmem:[#allocation34_spill] sm:$0xff]  ;;  %v22845_v25 = vld [vmem:[#allocation121_spill] sm:$0xff] }
 0x40b   : > { %22831 = vst [vmem:[#allocation343_spill] sm:$0xff] %v17974_v18  ;;  %22837 = vst [vmem:[#allocation348_spill] sm:$0xff] %v17986_v48  ;;  %v22844_v52 = vrot.slane %v16943_v24, %v16714_v55  ;;  %v18010_v39 = vmul.f32 %v22846_v11, %v22845_v25  ;;  %v22850_v31 = vld [vmem:[#allocation128_spill] sm:$0xff]  ;;  %v22856_v24 = vld [vmem:[#allocation91_spill] sm:$0xff] }
 0x40c   : > { %22834 = vst [vmem:[#allocation347_spill] sm:$0xff] %v17980_v28  ;;  %v17992_v10 = vmul.f32 %v22840_v9, %v22838_v41  ;;  %v17998_v13 = vmul.f32 %v22842_v57, %v22841_v7  ;;  %v22847_v9 = vld [vmem:[#allocation36_spill] sm:$0xff]  ;;  %v22848_v41 = vld [vmem:[#allocation226_spill] sm:$0xff] }
 0x40d   : > { %v18004_v28 = vmul.f32 %v22844_v52, %v22843_v38  ;;  %v22849_v48 = vrot.slane %v22848_v41, %v16714_v55  ;;  %v22851_v7 = vrot.slane %v22848_v41, %v16719_v60  ;;  %v22852_v38 = vld [vmem:[#allocation38_spill] sm:$0xff]  ;;  %v22862_v41 = vld [vmem:[#allocation136_spill] sm:$0xff] }
 0x40e   : > { %v22853_v52 = vld [vmem:[#allocation246_spill] sm:$0xff] }
 0x40f   : > { %v18016_v18 = vmul.f32 %v22849_v48, %v22847_v9  ;;  %v18022_v57 = vmul.f32 %v22851_v7, %v22850_v31  ;;  %v22854_v26 = vrot.slane %v22853_v52, %v16714_v55  ;;  %v22857_v25 = vrot.slane %v22853_v52, %v16719_v60  ;;  %v22858_v48 = vld [vmem:[#allocation40_spill] sm:$0xff]  ;;  %v22859_v9 = vld [vmem:[#allocation273_spill] sm:$0xff] }
 0x410   : > { %v22860_v27 = vrot.slane %v22859_v9, %v16714_v55  ;;  %v22863_v31 = vrot.slane %v22859_v9, %v16719_v60  ;;  %v22869_v52 = vld [vmem:[#allocation144_spill] sm:$0xff]  ;;  %v22875_v9 = vld [vmem:[#allocation127_spill] sm:$0xff] }
 0x411   : > { %v18028_v44 = vmul.f32 %v22854_v26, %v22852_v38  ;;  %v18034_v11 = vmul.f32 %v22857_v25, %v22856_v24  ;;  %v22865_v26 = vld [vmem:[#allocation42_spill] sm:$0xff]  ;;  %v22866_v38 = vld [vmem:[#allocation277_spill] sm:$0xff] }
 0x412   : > { %v18040_v2 = vmul.f32 %v22860_v27, %v22858_v48  ;;  %v18046_v7 = vmul.f32 %v22863_v31, %v22862_v41  ;;  %v22867_v42 = vrot.slane %v22866_v38, %v16714_v55  ;;  %v22870_v24 = vrot.slane %v22866_v38, %v16719_v60  ;;  %v22871_v27 = vld [vmem:[#allocation44_spill] sm:$0xff]  ;;  %v22872_v48 = vld [vmem:[#allocation230_spill] sm:$0xff] }
 0x413   : > { %22855 = vst [vmem:[#allocation352_spill] sm:$0xff] %v18028_v44  ;;  %v22876_v41 = vrot.slane %v22872_v48, %v16719_v60  ;;  %v22881_v38 = vld [vmem:[#allocation94_spill] sm:$0xff] }
 0x414   : > { %22861 = vst [vmem:[#allocation356_spill] sm:$0xff] %v18040_v2  ;;  %22864 = vst [vmem:[#allocation360_spill] sm:$0xff] %v18046_v7  ;;  %v18052_v44 = vmul.f32 %v22867_v42, %v22865_v26  ;;  %v18058_v25 = vmul.f32 %v22870_v24, %v22869_v52  ;;  %v22873_v2 = vrot.slane %v22872_v48, %v16714_v55  ;;  %v22877_v42 = vld [vmem:[#allocation46_spill] sm:$0xff]  ;;  %v22887_v48 = vld [vmem:[#allocation100_spill] sm:$0xff] }
 0x415   : > { %v18070_v31 = vmul.f32 %v22876_v41, %v22875_v9  ;;  %v22878_v26 = vld [vmem:[#allocation250_spill] sm:$0xff]  ;;  %v22888_v9 = vrot.slane %v22609_v46, %v16719_v60 }
 0x416   : > { %22868 = vst [vmem:[#allocation364_spill] sm:$0xff] %v18052_v44  ;;  %v18064_v3 = vmul.f32 %v22873_v2, %v22871_v27  ;;  %v22879_v44 = vrot.slane %v22878_v26, %v16714_v55  ;;  %v22882_v52 = vrot.slane %v22878_v26, %v16719_v60  ;;  %v22884_v2 = vld [vmem:[#allocation48_spill] sm:$0xff]  ;;  %v22885_v27 = vrot.slane %v22609_v46, %v16714_v55  ;;  %v22893_v26 = vld [vmem:[#allocation106_spill] sm:$0xff] }
 0x417   : > { %v18094_v41 = vmul.f32 %v22888_v9, %v22887_v48  ;;  %v22900_v46 = vld [vmem:[#allocation112_spill] sm:$0xff] }
 0x418   : > { %22874 = vst [vmem:[#allocation368_spill] sm:$0xff] %v18064_v3  ;;  %v18076_v7 = vmul.f32 %v22879_v44, %v22877_v42  ;;  %v18082_v24 = vmul.f32 %v22882_v52, %v22881_v38  ;;  %v18088_v3 = vmul.f32 %v22885_v27, %v22884_v2  ;;  %v22890_v44 = vld [vmem:[#allocation50_spill] sm:$0xff]  ;;  %v22891_v42 = vrot.slane %v22610_v51, %v16714_v55  ;;  %v22896_v2 = vld [vmem:[#allocation52_spill] sm:$0xff] }
 0x419   : > { %22889 = vst [vmem:[#allocation380_spill] sm:$0xff] %v18094_v41  ;;  %v22894_v38 = vrot.slane %v22610_v51, %v16719_v60  ;;  %v22897_v27 = vld [vmem:[#allocation242_spill] sm:$0xff]  ;;  %v22907_v51 = vld [vmem:[#allocation93_spill] sm:$0xff] }
 0x41a   : > { %22880 = vst [vmem:[#allocation372_spill] sm:$0xff] %v18076_v7  ;;  %22883 = vst [vmem:[#allocation376_spill] sm:$0xff] %v18082_v24  ;;  %v18100_v7 = vmul.f32 %v22891_v42, %v22890_v44  ;;  %v22901_v48 = vrot.slane %v22897_v27, %v16719_v60  ;;  %v22903_v44 = vld [vmem:[#allocation29_spill] sm:$0xff]  ;;  %v22904_v42 = vld [vmem:[#allocation258_spill] sm:$0xff] }
 0x41b   : > { %22886 = vst [vmem:[#allocation349_spill] sm:$0xff] %v18088_v3  ;;  %v18106_v52 = vmul.f32 %v22894_v38, %v22893_v26  ;;  %v22898_v3 = vrot.slane %v22897_v27, %v16714_v55  ;;  %v22908_v26 = vrot.slane %v22904_v42, %v16719_v60  ;;  %v22914_v27 = vld [vmem:[#allocation122_spill] sm:$0xff] }
 0x41c   : > { %22892 = vst [vmem:[#allocation384_spill] sm:$0xff] %v18100_v7  ;;  %v18118_v9 = vmul.f32 %v22901_v48, %v22900_v46  ;;  %v22905_v7 = vrot.slane %v22904_v42, %v16714_v55  ;;  %v22921_v42 = vld [vmem:[#allocation99_spill] sm:$0xff] }
 0x41d   : > { %22895 = vst [vmem:[#allocation388_spill] sm:$0xff] %v18106_v52  ;;  %v18112_v24 = vmul.f32 %v22898_v3, %v22896_v2  ;;  %v18130_v38 = vmul.f32 %v22908_v26, %v22907_v51  ;;  %v22910_v3 = vld [vmem:[#allocation54_spill] sm:$0xff] }
 0x41e   : > { %22902 = vst [vmem:[#allocation353_spill] sm:$0xff] %v18118_v9  ;;  %v18124_v41 = vmul.f32 %v22905_v7, %v22903_v44  ;;  %v22911_v2 = vld [vmem:[#allocation238_spill] sm:$0xff]  ;;  %v22917_v7 = vld [vmem:[#allocation56_spill] sm:$0xff] }
 0x41f   : > { %22899 = vst [vmem:[#allocation392_spill] sm:$0xff] %v18112_v24  ;;  %22909 = vst [vmem:[#allocation361_spill] sm:$0xff] %v18130_v38  ;;  %v22912_v24 = vrot.slane %v22911_v2, %v16714_v55  ;;  %v22915_v46 = vrot.slane %v22911_v2, %v16719_v60  ;;  %v22918_v44 = vld [vmem:[#allocation262_spill] sm:$0xff]  ;;  %v22928_v2 = vld [vmem:[#allocation105_spill] sm:$0xff] }
 0x420   : > { %22906 = vst [vmem:[#allocation357_spill] sm:$0xff] %v18124_v41  ;;  %v22919_v41 = vrot.slane %v22918_v44, %v16714_v55  ;;  %v22922_v51 = vrot.slane %v22918_v44, %v16719_v60  ;;  %v22934_v44 = vld [vmem:[#allocation111_spill] sm:$0xff] }
 0x421   : > { %v18136_v52 = vmul.f32 %v22912_v24, %v22910_v3  ;;  %v18142_v48 = vmul.f32 %v22915_v46, %v22914_v27  ;;  %v22924_v24 = vld [vmem:[#allocation58_spill] sm:$0xff] }
 0x422   : > { %v18148_v9 = vmul.f32 %v22919_v41, %v22917_v7  ;;  %v18154_v26 = vmul.f32 %v22922_v51, %v22921_v42  ;;  %v22925_v3 = vld [vmem:[#allocation270_spill] sm:$0xff]  ;;  %v22930_v41 = vld [vmem:[#allocation31_spill] sm:$0xff] }
 0x423   : > { %22913 = vst [vmem:[#allocation396_spill] sm:$0xff] %v18136_v52  ;;  %22916 = vst [vmem:[#allocation365_spill] sm:$0xff] %v18142_v48  ;;  %v22926_v38 = vrot.slane %v22925_v3, %v16714_v55  ;;  %v22929_v27 = vrot.slane %v22925_v3, %v16719_v60  ;;  %v22931_v7 = vld [vmem:[#allocation282_spill] sm:$0xff]  ;;  %v22941_v3 = vld [vmem:[#allocation117_spill] sm:$0xff] }
 0x424   : > { %22920 = vst [vmem:[#allocation369_spill] sm:$0xff] %v18148_v9  ;;  %22923 = vst [vmem:[#allocation373_spill] sm:$0xff] %v18154_v26  ;;  %v22932_v48 = vrot.slane %v22931_v7, %v16714_v55  ;;  %v22935_v42 = vrot.slane %v22931_v7, %v16719_v60  ;;  %v22947_v7 = vld [vmem:[#allocation123_spill] sm:$0xff] }
 0x425   : > { %v18160_v52 = vmul.f32 %v22926_v38, %v22924_v24  ;;  %v18166_v46 = vmul.f32 %v22929_v27, %v22928_v2  ;;  %v22937_v38 = vld [vmem:[#allocation33_spill] sm:$0xff]  ;;  %v22938_v24 = vld [vmem:[#allocation254_spill] sm:$0xff] }
 0x426   : > { %v18172_v9 = vmul.f32 %v22932_v48, %v22930_v41  ;;  %v18178_v51 = vmul.f32 %v22935_v42, %v22934_v44  ;;  %v22942_v2 = vrot.slane %v22938_v24, %v16719_v60  ;;  %v22944_v48 = vld [vmem:[#allocation35_spill] sm:$0xff]  ;;  %v22945_v41 = vrot.slane %v22616_v61, %v16714_v55 }
 0x427   : > { %22927 = vst [vmem:[#allocation377_spill] sm:$0xff] %v18160_v52  ;;  %v22939_v52 = vrot.slane %v22938_v24, %v16714_v55  ;;  %v22948_v44 = vrot.slane %v22616_v61, %v16719_v60  ;;  %v22954_v24 = vld [vmem:[#allocation130_spill] sm:$0xff] }
 0x428   : > { %22933 = vst [vmem:[#allocation400_spill] sm:$0xff] %v18172_v9  ;;  %22936 = vst [vmem:[#allocation404_spill] sm:$0xff] %v18178_v51  ;;  %v18190_v27 = vmul.f32 %v22942_v2, %v22941_v3  ;;  %v18196_v9 = vmul.f32 %v22945_v41, %v22944_v48  ;;  %v22957_v48 = vld [vmem:[#allocation39_spill] sm:$0xff]  ;;  %v22958_v41 = vrot.slane %v22618_v63, %v16714_v55  ;;  %v22960_v61 = vld [vmem:[#allocation138_spill] sm:$0xff] }
 0x429   : > { %v18184_v26 = vmul.f32 %v22939_v52, %v22937_v38  ;;  %v18202_v42 = vmul.f32 %v22948_v44, %v22947_v7  ;;  %v22950_v52 = vld [vmem:[#allocation37_spill] sm:$0xff]  ;;  %v22951_v38 = vld [vmem:[#allocation278_spill] sm:$0xff]  ;;  %v22961_v7 = vrot.slane %v22618_v63, %v16719_v60 }
 0x42a   : > { %22943 = vst [vmem:[#allocation381_spill] sm:$0xff] %v18190_v27  ;;  %22946 = vst [vmem:[#allocation385_spill] sm:$0xff] %v18196_v9  ;;  %v22955_v3 = vrot.slane %v22951_v38, %v16719_v60  ;;  %v18220_v9 = vmul.f32 %v22958_v41, %v22957_v48  ;;  %v22970_v48 = vld [vmem:[#allocation43_spill] sm:$0xff]  ;;  %v22971_v41 = vrot.slane %v17029_v33, %v16714_v55  ;;  %v22973_v63 = vld [vmem:[#allocation129_spill] sm:$0xff] }
 0x42b   : > { %22940 = vst [vmem:[#allocation408_spill] sm:$0xff] %v18184_v26  ;;  %22949 = vst [vmem:[#allocation389_spill] sm:$0xff] %v18202_v42  ;;  %v22952_v26 = vrot.slane %v22951_v38, %v16714_v55  ;;  %v18226_v44 = vmul.f32 %v22961_v7, %v22960_v61  ;;  %v22967_v38 = vld [vmem:[#allocation125_spill] sm:$0xff]  ;;  %v22974_v61 = vrot.slane %v17029_v33, %v16719_v60  ;;  %v22986_v33 = vld [vmem:[#allocation139_spill] sm:$0xff] }
 0x42c   : > { %v18214_v2 = vmul.f32 %v22955_v3, %v22954_v24  ;;  %22959 = vst [vmem:[#allocation350_spill] sm:$0xff] %v18220_v9  ;;  %v18244_v9 = vmul.f32 %v22971_v41, %v22970_v48  ;;  %v22983_v48 = vld [vmem:[#allocation47_spill] sm:$0xff]  ;;  %v22984_v41 = vrot.slane %v17054_v15, %v16714_v55 }
 0x42d   : > { %v18208_v51 = vmul.f32 %v22952_v26, %v22950_v52  ;;  %22962 = vst [vmem:[#allocation401_spill] sm:$0xff] %v18226_v44  ;;  %v22963_v26 = vld [vmem:[#allocation41_spill] sm:$0xff]  ;;  %v22964_v52 = vld [vmem:[#allocation223_spill] sm:$0xff]  ;;  %v18250_v7 = vmul.f32 %v22974_v61, %v22973_v63  ;;  %v22987_v63 = vrot.slane %v17054_v15, %v16719_v60  ;;  %v22996_v15 = vld [vmem:[#allocation152_spill] sm:$0xff] }
 0x42e   : > { %22956 = vst [vmem:[#allocation397_spill] sm:$0xff] %v18214_v2  ;;  %v22968_v24 = vrot.slane %v22964_v52, %v16719_v60  ;;  %22972 = vst [vmem:[#allocation354_spill] sm:$0xff] %v18244_v9  ;;  %v18268_v9 = vmul.f32 %v22984_v41, %v22983_v48  ;;  %v22994_v48 = vld [vmem:[#allocation51_spill] sm:$0xff]  ;;  %v22995_v41 = vrot.slane %v17046_v23, %v16714_v55 }
 0x42f   : > { %22953 = vst [vmem:[#allocation393_spill] sm:$0xff] %v18208_v51  ;;  %v22965_v51 = vrot.slane %v22964_v52, %v16714_v55  ;;  %22975 = vst [vmem:[#allocation358_spill] sm:$0xff] %v18250_v7  ;;  %v22980_v52 = vld [vmem:[#allocation131_spill] sm:$0xff]  ;;  %v18274_v61 = vmul.f32 %v22987_v63, %v22986_v33  ;;  %v22997_v33 = vrot.slane %v17046_v23, %v16719_v60  ;;  %v23007_v23 = vld [vmem:[#allocation176_spill] sm:$0xff] }
 0x430   : > { %v18238_v3 = vmul.f32 %v22968_v24, %v22967_v38  ;;  %22985 = vst [vmem:[#allocation370_spill] sm:$0xff] %v18268_v9  ;;  %v18292_v9 = vmul.f32 %v22995_v41, %v22994_v48  ;;  %v23004_v48 = vld [vmem:[#allocation55_spill] sm:$0xff]  ;;  %v23005_v41 = vrot.slane %v17068_v30, %v16714_v55 }
 0x431   : > { %v18232_v42 = vmul.f32 %v22965_v51, %v22963_v26  ;;  %v22976_v51 = vld [vmem:[#allocation45_spill] sm:$0xff]  ;;  %v22977_v26 = vld [vmem:[#allocation231_spill] sm:$0xff]  ;;  %22988 = vst [vmem:[#allocation374_spill] sm:$0xff] %v18274_v61  ;;  %v18298_v63 = vmul.f32 %v22997_v33, %v22996_v15  ;;  %v23008_v15 = vrot.slane %v17068_v30, %v16719_v60  ;;  %v23020_v30 = vld [vmem:[#allocation184_spill] sm:$0xff] }
 0x432   : > { %22969 = vst [vmem:[#allocation409_spill] sm:$0xff] %v18238_v3  ;;  %v22981_v38 = vrot.slane %v22977_v26, %v16719_v60  ;;  %v18316_v3 = vmul.f32 %v23005_v41, %v23004_v48  ;;  %v23016_v48 = vld [vmem:[#allocation59_spill] sm:$0xff] }
 0x433   : > { %22966 = vst [vmem:[#allocation405_spill] sm:$0xff] %v18232_v42  ;;  %v22978_v42 = vrot.slane %v22977_v26, %v16714_v55  ;;  %v22992_v26 = vld [vmem:[#allocation146_spill] sm:$0xff]  ;;  %v18322_v33 = vmul.f32 %v23008_v15, %v23007_v23  ;;  %v23017_v41 = vld [vmem:[#allocation243_spill] sm:$0xff] }
 0x434   : > { %v18262_v24 = vmul.f32 %v22981_v38, %v22980_v52  ;;  %23006 = vst [vmem:[#allocation382_spill] sm:$0xff] %v18316_v3  ;;  %v23018_v27 = vrot.slane %v23017_v41, %v16714_v55  ;;  %v23021_v23 = vrot.slane %v23017_v41, %v16719_v60  ;;  %v23034_v41 = vld [vmem:[#allocation188_spill] sm:$0xff] }
 0x435   : > { %v18256_v44 = vmul.f32 %v22978_v42, %v22976_v51  ;;  %v22989_v42 = vld [vmem:[#allocation49_spill] sm:$0xff]  ;;  %v22990_v51 = vld [vmem:[#allocation274_spill] sm:$0xff]  ;;  %23009 = vst [vmem:[#allocation386_spill] sm:$0xff] %v18322_v33 }
 0x436   : > { %22982 = vst [vmem:[#allocation366_spill] sm:$0xff] %v18262_v24  ;;  %v22993_v52 = vrot.slane %v22990_v51, %v16719_v60  ;;  %v18340_v3 = vmul.f32 %v23018_v27, %v23016_v48  ;;  %v18346_v15 = vmul.f32 %v23021_v23, %v23020_v30  ;;  %v23030_v27 = vld [vmem:[#allocation62_spill] sm:$0xff]  ;;  %v23031_v48 = vld [vmem:[#allocation263_spill] sm:$0xff] }
 0x437   : > { %22979 = vst [vmem:[#allocation362_spill] sm:$0xff] %v18256_v44  ;;  %v22991_v44 = vrot.slane %v22990_v51, %v16714_v55  ;;  %v23001_v51 = vld [vmem:[#allocation172_spill] sm:$0xff]  ;;  %v23035_v30 = vrot.slane %v23031_v48, %v16719_v60 }
 0x438   : > { %v18286_v38 = vmul.f32 %v22993_v52, %v22992_v26  ;;  %23019 = vst [vmem:[#allocation398_spill] sm:$0xff] %v18340_v3  ;;  %23022 = vst [vmem:[#allocation351_spill] sm:$0xff] %v18346_v15  ;;  %v23032_v3 = vrot.slane %v23031_v48, %v16714_v55  ;;  %v23046_v48 = vld [vmem:[#allocation196_spill] sm:$0xff] }
 0x439   : > { %v18280_v7 = vmul.f32 %v22991_v44, %v22989_v42  ;;  %v22998_v44 = vld [vmem:[#allocation53_spill] sm:$0xff]  ;;  %v22999_v42 = vld [vmem:[#allocation239_spill] sm:$0xff]  ;;  %v18370_v23 = vmul.f32 %v23035_v30, %v23034_v41  ;;  %v23047_v41 = vrot.slane %v22625_v49, %v16719_v60 }
 0x43a   : > { %v23000_v61 = vrot.slane %v22999_v42, %v16714_v55  ;;  %v23002_v26 = vrot.slane %v22999_v42, %v16719_v60  ;;  %v23013_v42 = vld [vmem:[#allocation180_spill] sm:$0xff] }
 0x43b   : > { %23036 = vst [vmem:[#allocation355_spill] sm:$0xff] %v18370_v23  ;;  %v18394_v30 = vmul.f32 %v23047_v41, %v23046_v48 }
 0x43c   : > { %v18304_v24 = vmul.f32 %v23000_v61, %v22998_v44  ;;  %v18310_v52 = vmul.f32 %v23002_v26, %v23001_v51  ;;  %v23010_v61 = vld [vmem:[#allocation57_spill] sm:$0xff]  ;;  %v23011_v44 = vrot.slane %v22623_v21, %v16714_v55  ;;  %v23014_v51 = vrot.slane %v22623_v21, %v16719_v60 }
 0x43d   : > { %v23027_v21 = vld [vmem:[#allocation133_spill] sm:$0xff]  ;;  %23048 = vst [vmem:[#allocation371_spill] sm:$0xff] %v18394_v30 }
 0x43e   : > { %23003 = vst [vmem:[#allocation378_spill] sm:$0xff] %v18310_v52  ;;  %v18328_v2 = vmul.f32 %v23011_v44, %v23010_v61  ;;  %v18334_v26 = vmul.f32 %v23014_v51, %v23013_v42  ;;  %v23023_v61 = vld [vmem:[#allocation60_spill] sm:$0xff]  ;;  %v23024_v44 = vld [vmem:[#allocation247_spill] sm:$0xff] }
 0x43f   : > { %v23028_v42 = vrot.slane %v23024_v44, %v16719_v60 }
 0x440   : > { %23012 = vst [vmem:[#allocation390_spill] sm:$0xff] %v18328_v2  ;;  %23015 = vst [vmem:[#allocation394_spill] sm:$0xff] %v18334_v26  ;;  %v23025_v2 = vrot.slane %v23024_v44, %v16714_v55  ;;  %v18364_v26 = vmul.f32 %v23032_v3, %v23030_v27  ;;  %v23040_v44 = vld [vmem:[#allocation192_spill] sm:$0xff]  ;;  %v23043_v3 = vld [vmem:[#allocation66_spill] sm:$0xff]  ;;  %v23044_v27 = vrot.slane %v22625_v49, %v16714_v55 }
 0x441   : > { %v18358_v51 = vmul.f32 %v23028_v42, %v23027_v21  ;;  %v23041_v21 = vrot.slane %v17071_v56, %v16719_v60  ;;  %v23060_v49 = vld [vmem:[#allocation141_spill] sm:$0xff] }
 0x442   : > { %v18352_v33 = vmul.f32 %v23025_v2, %v23023_v61  ;;  %23033 = vst [vmem:[#allocation410_spill] sm:$0xff] %v18364_v26  ;;  %v23037_v2 = vld [vmem:[#allocation64_spill] sm:$0xff]  ;;  %v23038_v61 = vrot.slane %v17071_v56, %v16714_v55  ;;  %v18388_v26 = vmul.f32 %v23044_v27, %v23043_v3  ;;  %v23056_v3 = vld [vmem:[#allocation70_spill] sm:$0xff]  ;;  %v23057_v27 = vld [vmem:[#allocation279_spill] sm:$0xff] }
 0x443   : > { %23029 = vst [vmem:[#allocation406_spill] sm:$0xff] %v18358_v51  ;;  %v18382_v42 = vmul.f32 %v23041_v21, %v23040_v44  ;;  %v23053_v56 = vld [vmem:[#allocation200_spill] sm:$0xff]  ;;  %v23061_v48 = vrot.slane %v23057_v27, %v16719_v60 }
 0x444   : > { %23026 = vst [vmem:[#allocation402_spill] sm:$0xff] %v18352_v33  ;;  %v18376_v33 = vmul.f32 %v23038_v61, %v23037_v2  ;;  %23045 = vst [vmem:[#allocation367_spill] sm:$0xff] %v18388_v26  ;;  %v23049_v2 = vld [vmem:[#allocation68_spill] sm:$0xff]  ;;  %v23050_v61 = vld [vmem:[#allocation267_spill] sm:$0xff]  ;;  %v23058_v26 = vrot.slane %v23057_v27, %v16714_v55 }
 0x445   : > { %23042 = vst [vmem:[#allocation363_spill] sm:$0xff] %v18382_v42  ;;  %v23054_v44 = vrot.slane %v23050_v61, %v16719_v60  ;;  %v18418_v41 = vmul.f32 %v23061_v48, %v23060_v49  ;;  %v23071_v27 = vld [vmem:[#allocation169_spill] sm:$0xff] }
 0x446   : > { %23039 = vst [vmem:[#allocation359_spill] sm:$0xff] %v18376_v33  ;;  %v23051_v33 = vrot.slane %v23050_v61, %v16714_v55  ;;  %v18412_v42 = vmul.f32 %v23058_v26, %v23056_v3  ;;  %v23066_v61 = vld [vmem:[#allocation147_spill] sm:$0xff]  ;;  %v23068_v26 = vld [vmem:[#allocation74_spill] sm:$0xff] }
 0x447   : > { %v18406_v21 = vmul.f32 %v23054_v44, %v23053_v56  ;;  %23062 = vst [vmem:[#allocation387_spill] sm:$0xff] %v18418_v41  ;;  %v23069_v3 = vld [vmem:[#allocation271_spill] sm:$0xff] }
 0x448   : > { %v18400_v23 = vmul.f32 %v23051_v33, %v23049_v2  ;;  %23059 = vst [vmem:[#allocation383_spill] sm:$0xff] %v18412_v42  ;;  %v23063_v33 = vld [vmem:[#allocation72_spill] sm:$0xff]  ;;  %v23064_v2 = vld [vmem:[#allocation251_spill] sm:$0xff]  ;;  %v23070_v42 = vrot.slane %v23069_v3, %v16714_v55  ;;  %v23072_v49 = vrot.slane %v23069_v3, %v16719_v60  ;;  %v23082_v3 = vld [vmem:[#allocation173_spill] sm:$0xff] }
 0x449   : > { %23055 = vst [vmem:[#allocation379_spill] sm:$0xff] %v18406_v21  ;;  %v23067_v56 = vrot.slane %v23064_v2, %v16719_v60 }
 0x44a   : > { %23052 = vst [vmem:[#allocation375_spill] sm:$0xff] %v18400_v23  ;;  %v23065_v23 = vrot.slane %v23064_v2, %v16714_v55  ;;  %v18436_v21 = vmul.f32 %v23070_v42, %v23068_v26  ;;  %v18442_v48 = vmul.f32 %v23072_v49, %v23071_v27  ;;  %v23076_v2 = vld [vmem:[#allocation204_spill] sm:$0xff]  ;;  %v23078_v42 = vld [vmem:[#allocation78_spill] sm:$0xff] }
 0x44b   : > { %v18430_v44 = vmul.f32 %v23067_v56, %v23066_v61  ;;  %v23079_v26 = vld [vmem:[#allocation292_spill] sm:$0xff] }
 0x44c   : > { %v18424_v30 = vmul.f32 %v23065_v23, %v23063_v33  ;;  %v23073_v23 = vld [vmem:[#allocation76_spill] sm:$0xff]  ;;  %v23074_v33 = vld [vmem:[#allocation283_spill] sm:$0xff]  ;;  %v23080_v15 = vrot.slane %v23079_v26, %v16714_v55  ;;  %v23083_v27 = vrot.slane %v23079_v26, %v16719_v60  ;;  %v23087_v26 = vld [vmem:[#allocation177_spill] sm:$0xff] }
 0x44d   : > { %v23075_v41 = vrot.slane %v23074_v33, %v16714_v55  ;;  %v23077_v61 = vrot.slane %v23074_v33, %v16719_v60  ;;  %v6806_v33 = vadd.f32 %v17716_v12, %v17704_v8  ;;  %v23089_v8 = vld [vmem:[#allocation82_spill] sm:$0xff]  ;;  %v23090_v12 = vrot.slane %v22631_v6, %v16714_v55 }
 0x44e   : > { %v18460_v52 = vmul.f32 %v23080_v15, %v23078_v42  ;;  %v18466_v49 = vmul.f32 %v23083_v27, %v23082_v3  ;;  %v23084_v15 = vld [vmem:[#allocation80_spill] sm:$0xff] }
 0x44f   : > { %v18448_v51 = vmul.f32 %v23075_v41, %v23073_v23  ;;  %v18454_v56 = vmul.f32 %v23077_v61, %v23076_v2  ;;  %v6784_v41 = vadd.f32 %v17572_v20, %v17560_v47  ;;  %v6795_v23 = vadd.f32 %v17578_v54, %v17566_v0  ;;  %v23085_v61 = vld [vmem:[#allocation259_spill] sm:$0xff] }
 0x450   : > { %23081 = vst [vmem:[#allocation391_spill] sm:$0xff] %v18460_v52  ;;  %v6817_v2 = vadd.f32 %v17722_v53, %v17710_v62  ;;  %v23086_v42 = vrot.slane %v23085_v61, %v16714_v55  ;;  %v23088_v3 = vrot.slane %v23085_v61, %v16719_v60  ;;  %v6839_v47 = vadd.f32 %v17866_v37, %v17854_v40  ;;  %v23091_v62 = vld [vmem:[#allocation181_spill] sm:$0xff]  ;;  %v23094_v61 = vld [vmem:[#allocation284_spill] sm:$0xff] }
 0x451   : > { %v6861_v0 = vadd.f32 %v18010_v39, %v17998_v13  ;;  %v18496_v54 = vmul.f32 %v23090_v12, %v23089_v8  ;;  %v23092_v53 = vrot.slane %v22631_v6, %v16719_v60  ;;  %v6796_v37 = vadd.f32 %v6795_v23, %v17590_v19  ;;  %v23096_v13 = vld [vmem:[#allocation185_spill] sm:$0xff]  ;;  %v23099_v8 = vld [vmem:[#allocation300_spill] sm:$0xff] }
 0x452   : > { %v18480_v52 = vmul.f32 %v23086_v42, %v23084_v15  ;;  %v18486_v20 = vmul.f32 %v23088_v3, %v23087_v26  ;;  %v23093_v15 = vld [vmem:[#allocation84_spill] sm:$0xff]  ;;  %v23095_v42 = vrot.slane %v23094_v61, %v16714_v55  ;;  %v23097_v39 = vrot.slane %v23094_v61, %v16719_v60  ;;  %v23098_v3 = vld [vmem:[#allocation61_spill] sm:$0xff] }
 0x453   : > { %v18502_v27 = vmul.f32 %v23092_v53, %v23091_v62  ;;  %v23100_v6 = vrot.slane %v23099_v8, %v16714_v55  ;;  %v23102_v62 = vld [vmem:[#allocation208_spill] sm:$0xff]  ;;  %v23103_v53 = vrot.slane %v23099_v8, %v16719_v60  ;;  %v6828_v19 = vadd.f32 %v17860_v4, %v17848_v16 }
 0x454   : > { %v18508_v40 = vmul.f32 %v23095_v42, %v23093_v15  ;;  %v18515_v26 = vmul.f32 %v23097_v39, %v23096_v13  ;;  %v6785_v23 = vadd.f32 %v6784_v41, %v17584_v45  ;;  %v6807_v61 = vadd.f32 %v6806_v33, %v17728_v50  ;;  %v23104_v39 = vld [vmem:[#allocation86_spill] sm:$0xff]  ;;  %v23107_v45 = vld [vmem:[#allocation212_spill] sm:$0xff] }
 0x455   : > { %v18521_v12 = vmul.f32 %v23100_v6, %v23098_v3  ;;  %v18527_v15 = vmul.f32 %v23103_v53, %v23102_v62  ;;  %v6818_v42 = vadd.f32 %v6817_v2, %v17734_v5  ;;  %v6850_v13 = vadd.f32 %v18004_v28, %v17992_v10  ;;  %v23110_v5 = vld [vmem:[#allocation88_spill] sm:$0xff] }
 0x456   : > { %v23105_v3 = vrot.slane %v22634_v1, %v16714_v55  ;;  %v6797_v8 = vadd.f32 %v6796_v37, %v17602_v29  ;;  %v6840_v62 = vadd.f32 %v6839_v47, %v17878_v32  ;;  %v6862_v4 = vadd.f32 %v6861_v0, %v18022_v57  ;;  %v23113_v41 = vld [vmem:[#allocation216_spill] sm:$0xff]  ;;  %v23116_v32 = vld [vmem:[#allocation90_spill] sm:$0xff]  ;;  %v23122_v37 = vld [vmem:[#allocation63_spill] sm:$0xff] }
 0x457   : > { %23101 = vst [vmem:[#allocation395_spill] sm:$0xff] %v18521_v12  ;;  %v23108_v16 = vrot.slane %v22634_v1, %v16719_v60  ;;  %v23111_v28 = vrot.slane %v17116_v22, %v16714_v55  ;;  %v23114_v29 = vrot.slane %v17116_v22, %v16719_v60  ;;  %v23117_v57 = vrot.slane %v22635_v17, %v16714_v55  ;;  %v23119_v1 = vld [vmem:[#allocation189_spill] sm:$0xff]  ;;  %v23123_v53 = vld [vmem:[#allocation308_spill] sm:$0xff] }
 0x458   : > { %v18540_v6 = vmul.f32 %v23105_v3, %v23104_v39  ;;  %v23120_v47 = vrot.slane %v22635_v17, %v16719_v60  ;;  %v23124_v39 = vrot.slane %v23123_v53, %v16714_v55  ;;  %v23126_v22 = vld [vmem:[#allocation193_spill] sm:$0xff]  ;;  %v6808_v17 = vadd.f32 %v6807_v61, %v17740_v14 }
 0x459   : > { %v18549_v50 = vmul.f32 %v23108_v16, %v23107_v45  ;;  %v18555_v10 = vmul.f32 %v23111_v28, %v23110_v5  ;;  %v18561_v33 = vmul.f32 %v23114_v29, %v23113_v41  ;;  %v18567_v2 = vmul.f32 %v23117_v57, %v23116_v32  ;;  %v23129_v28 = vld [vmem:[#allocation305_spill] sm:$0xff] }
 0x45a   : > { %23106 = vst [vmem:[#allocation399_spill] sm:$0xff] %v18540_v6  ;;  %v18573_v0 = vmul.f32 %v23120_v47, %v23119_v1  ;;  %v18579_v3 = vmul.f32 %v23124_v39, %v23122_v37  ;;  %v23127_v45 = vrot.slane %v23123_v53, %v16719_v60  ;;  %v6829_v5 = vadd.f32 %v6828_v19, %v17872_v36  ;;  %v23130_v57 = vld [vmem:[#allocation65_spill] sm:$0xff]  ;;  %v23131_v1 = vld [vmem:[#allocation296_spill] sm:$0xff]  ;;  %v23180_v6 = vld [vmem:[#allocation298_spill] sm:$0xff] }
 0x45b   : > { %23109 = vst [vmem:[#allocation403_spill] sm:$0xff] %v18549_v50  ;;  %23112 = vst [vmem:[#allocation407_spill] sm:$0xff] %v18555_v10  ;;  %v6786_v41 = vadd.f32 %v6785_v23, %v23129_v28  ;;  %v6819_v29 = vadd.f32 %v6818_v42, %v17746_v58  ;;  %v6851_v32 = vadd.f32 %v6850_v13, %v18016_v18  ;;  %v23133_v36 = vld [vmem:[#allocation197_spill] sm:$0xff]  ;;  %v23135_v23 = vld [vmem:[#allocation67_spill] sm:$0xff] }
 0x45c   : > { %23115 = vst [vmem:[#allocation411_spill] sm:$0xff] %v18561_v33  ;;  %23118 = vst [vmem:[#allocation412_spill] sm:$0xff] %v18567_v2  ;;  %v18585_v16 = vmul.f32 %v23127_v45, %v23126_v22  ;;  %v23132_v47 = vrot.slane %v23131_v1, %v16714_v55  ;;  %v6798_v39 = vadd.f32 %v6797_v8, %v17614_v35  ;;  %v23136_v58 = vld [vmem:[#allocation285_spill] sm:$0xff]  ;;  %v23141_v8 = vld [vmem:[#allocation316_spill] sm:$0xff] }
 0x45d   : > { %23121 = vst [vmem:[#allocation416_spill] sm:$0xff] %v18573_v0  ;;  %23125 = vst [vmem:[#allocation420_spill] sm:$0xff] %v18579_v3  ;;  %v6841_v53 = vadd.f32 %v6840_v62, %v17890_v59  ;;  %v6863_v22 = vadd.f32 %v6862_v4, %v18034_v11  ;;  %v23134_v19 = vrot.slane %v23131_v1, %v16719_v60  ;;  %v23138_v42 = vld [vmem:[#allocation201_spill] sm:$0xff]  ;;  %v23154_v2 = vld [vmem:[#allocation312_spill] sm:$0xff] }
 0x45e   : > { %23128 = vst [vmem:[#allocation413_spill] sm:$0xff] %v18585_v16  ;;  %v6760_v37 = vmul.f32 %v23132_v47, %v23130_v57  ;;  %v23137_v18 = vrot.slane %v23136_v58, %v16714_v55  ;;  %v23139_v13 = vrot.slane %v23136_v58, %v16719_v60  ;;  %v23140_v35 = vld [vmem:[#allocation69_spill] sm:$0xff]  ;;  %v23142_v59 = vrot.slane %v23141_v8, %v16714_v55  ;;  %v23145_v57 = vld [vmem:[#allocation71_spill] sm:$0xff]  ;;  %v23156_v16 = vld [vmem:[#allocation336_spill] sm:$0xff] }
 0x45f   : > { %v6761_v14 = vmul.f32 %v23134_v19, %v23133_v36  ;;  %v23143_v62 = vld [vmem:[#allocation205_spill] sm:$0xff]  ;;  %v23144_v4 = vrot.slane %v23141_v8, %v16719_v60  ;;  %v23148_v19 = vld [vmem:[#allocation135_spill] sm:$0xff]  ;;  %v23151_v8 = vld [vmem:[#allocation294_spill] sm:$0xff] }
 0x460   : > { %v6762_v61 = vmul.f32 %v23137_v18, %v23135_v23  ;;  %v6763_v45 = vmul.f32 %v23139_v13, %v23138_v42  ;;  %v6764_v11 = vmul.f32 %v23142_v59, %v23140_v35  ;;  %v23146_v1 = vld [vmem:[#allocation293_spill] sm:$0xff]  ;;  %v6830_v18 = vadd.f32 %v6829_v5, %v17884_v34  ;;  %v23158_v10 = vld [vmem:[#allocation360_spill] sm:$0xff] }
 0x461   : > { %v6765_v28 = vmul.f32 %v23144_v4, %v23143_v62  ;;  %v23147_v47 = vrot.slane %v23146_v1, %v16714_v55  ;;  %v23149_v23 = vrot.slane %v23146_v1, %v16719_v60  ;;  %v23150_v42 = vld [vmem:[#allocation309_spill] sm:$0xff]  ;;  %v6809_v35 = vadd.f32 %v6808_v17, %v17752_v43  ;;  %v23152_v62 = vld [vmem:[#allocation352_spill] sm:$0xff]  ;;  %v23161_v17 = vld [vmem:[#allocation75_spill] sm:$0xff] }
 0x462   : > { %v6787_v13 = vadd.f32 %v6786_v41, %v23150_v42  ;;  %v6820_v59 = vadd.f32 %v6819_v29, %v23151_v8  ;;  %v6852_v4 = vadd.f32 %v6851_v32, %v23152_v62  ;;  %v23153_v3 = vld [vmem:[#allocation73_spill] sm:$0xff]  ;;  %v6799_v1 = vadd.f32 %v6798_v39, %v23156_v16  ;;  %v23159_v5 = vld [vmem:[#allocation248_spill] sm:$0xff] }
 0x463   : > { %v18623_v36 = vmul.f32 %v23147_v47, %v23145_v57  ;;  %v18629_v58 = vmul.f32 %v23149_v23, %v23148_v19  ;;  %v23155_v57 = vrot.slane %v23154_v2, %v16714_v55  ;;  %v23157_v19 = vld [vmem:[#allocation295_spill] sm:$0xff]  ;;  %v6864_v34 = vadd.f32 %v6863_v22, %v23158_v10  ;;  %v23162_v29 = vld [vmem:[#allocation324_spill] sm:$0xff]  ;;  %v23183_v50 = vld [vmem:[#allocation81_spill] sm:$0xff] }
 0x464   : > { %v6842_v23 = vadd.f32 %v6841_v53, %v23157_v19  ;;  %v23160_v43 = vrot.slane %v23154_v2, %v16719_v60  ;;  %v23163_v32 = vrot.slane %v23162_v29, %v16714_v55  ;;  %v23165_v16 = vrot.slane %v23162_v29, %v16719_v60  ;;  %v23166_v53 = vld [vmem:[#allocation77_spill] sm:$0xff]  ;;  %v23167_v10 = vld [vmem:[#allocation328_spill] sm:$0xff]  ;;  %v23172_v19 = vld [vmem:[#allocation79_spill] sm:$0xff] }
 0x465   : > { %v18640_v47 = vmul.f32 %v23155_v57, %v23153_v3  ;;  %v23164_v3 = vld [vmem:[#allocation221_spill] sm:$0xff]  ;;  %v23168_v22 = vrot.slane %v23167_v10, %v16714_v55  ;;  %v23170_v2 = vld [vmem:[#allocation252_spill] sm:$0xff]  ;;  %v23171_v62 = vrot.slane %v23167_v10, %v16719_v60  ;;  %v6810_v10 = vadd.f32 %v6809_v35, %v23180_v6  ;;  %v23192_v35 = vld [vmem:[#allocation83_spill] sm:$0xff] }
 0x466   : > { %v18649_v41 = vmul.f32 %v23160_v43, %v23159_v5  ;;  %v18655_v42 = vmul.f32 %v23163_v32, %v23161_v17  ;;  %v18661_v39 = vmul.f32 %v23165_v16, %v23164_v3  ;;  %v23173_v5 = vld [vmem:[#allocation332_spill] sm:$0xff]  ;;  %v23178_v16 = vld [vmem:[#allocation291_spill] sm:$0xff] }
 0x467   : > { %v18667_v8 = vmul.f32 %v23168_v22, %v23166_v53  ;;  %v18673_v57 = vmul.f32 %v23171_v62, %v23170_v2  ;;  %v23174_v43 = vrot.slane %v23173_v5, %v16714_v55  ;;  %v23176_v29 = vld [vmem:[#allocation256_spill] sm:$0xff]  ;;  %v23177_v32 = vrot.slane %v23173_v5, %v16719_v60  ;;  %v23179_v22 = vld [vmem:[#allocation313_spill] sm:$0xff]  ;;  %v23181_v2 = vld [vmem:[#allocation302_spill] sm:$0xff] }
 0x468   : > { %v6831_v53 = vadd.f32 %v6830_v18, %v23178_v16  ;;  %v6788_v0 = vadd.f32 %v6787_v13, %v23179_v22  ;;  %v6821_v62 = vadd.f32 %v6820_v59, %v23181_v2  ;;  %v23182_v33 = vld [vmem:[#allocation356_spill] sm:$0xff]  ;;  %v6865_v18 = vadd.f32 %v6864_v34, %v18058_v25  ;;  %v23200_v25 = vld [vmem:[#allocation297_spill] sm:$0xff] }
 0x469   : > { %23169 = vst [vmem:[#allocation417_spill] sm:$0xff] %v18667_v8  ;;  %v18679_v17 = vmul.f32 %v23174_v43, %v23172_v19  ;;  %v18685_v3 = vmul.f32 %v23177_v32, %v23176_v29  ;;  %v6853_v12 = vadd.f32 %v6852_v4, %v23182_v33  ;;  %v23184_v8 = vld [vmem:[#allocation320_spill] sm:$0xff]  ;;  %v23188_v29 = vld [vmem:[#allocation303_spill] sm:$0xff]  ;;  %v23193_v33 = vld [vmem:[#allocation289_spill] sm:$0xff]  ;;  %v23201_v34 = vrot.slane %v23200_v25, %v16714_v55 }
 0x46a   : > { %v23185_v19 = vrot.slane %v23184_v8, %v16714_v55  ;;  %v6843_v32 = vadd.f32 %v6842_v23, %v23188_v29  ;;  %v23189_v16 = vld [vmem:[#allocation260_spill] sm:$0xff]  ;;  %v23190_v6 = vrot.slane %v23184_v8, %v16719_v60  ;;  %v23194_v59 = vrot.slane %v23193_v33, %v16714_v55  ;;  %v23199_v23 = vld [vmem:[#allocation85_spill] sm:$0xff]  ;;  %v23206_v29 = vld [vmem:[#allocation87_spill] sm:$0xff] }
 0x46b   : > { %23175 = vst [vmem:[#allocation421_spill] sm:$0xff] %v18679_v17  ;;  %v23187_v17 = vld [vmem:[#allocation344_spill] sm:$0xff]  ;;  %v18723_v22 = vmul.f32 %v23201_v34, %v23199_v23  ;;  %v23203_v8 = vld [vmem:[#allocation225_spill] sm:$0xff]  ;;  %v23204_v2 = vrot.slane %v23200_v25, %v16719_v60 }
 0x46c   : > { %v18696_v43 = vmul.f32 %v23185_v19, %v23183_v50  ;;  %v6800_v5 = vadd.f32 %v6799_v1, %v23187_v17  ;;  %v18705_v13 = vmul.f32 %v23190_v6, %v23189_v16  ;;  %v18711_v4 = vmul.f32 %v23194_v59, %v23192_v35  ;;  %v23196_v50 = vld [vmem:[#allocation264_spill] sm:$0xff]  ;;  %v23207_v16 = vld [vmem:[#allocation301_spill] sm:$0xff] }
 0x46d   : > { %v23197_v1 = vrot.slane %v23193_v33, %v16719_v60  ;;  %23202 = vst [vmem:[#allocation174_spill] sm:$0xff] %v18723_v22  ;;  %v18729_v19 = vmul.f32 %v23204_v2, %v23203_v8  ;;  %v23208_v6 = vrot.slane %v23207_v16, %v16714_v55  ;;  %v23210_v33 = vld [vmem:[#allocation229_spill] sm:$0xff]  ;;  %v23211_v59 = vrot.slane %v23207_v16, %v16719_v60  ;;  %v23213_v34 = vld [vmem:[#allocation340_spill] sm:$0xff]  ;;  %v23215_v8 = vld [vmem:[#allocation310_spill] sm:$0xff] }
 0x46e   : > { %23186 = vst [vmem:[#allocation424_spill] sm:$0xff] %v18696_v43  ;;  %23191 = vst [vmem:[#allocation213_spill] sm:$0xff] %v18705_v13  ;;  %v6789_v22 = vadd.f32 %v6788_v0, %v23213_v34  ;;  %v6822_v2 = vadd.f32 %v6821_v62, %v23215_v8  ;;  %v23219_v13 = vld [vmem:[#allocation396_spill] sm:$0xff]  ;;  %v23220_v60 = vld [vmem:[#allocation369_spill] sm:$0xff]  ;;  %v6894_v0 = vadd.f32 %v18292_v9, %v18280_v7 }
 0x46f   : > { %23195 = vst [vmem:[#allocation182_spill] sm:$0xff] %v18711_v4  ;;  %v18717_v17 = vmul.f32 %v23197_v1, %v23196_v50  ;;  %23205 = vst [vmem:[#allocation186_spill] sm:$0xff] %v18729_v19  ;;  %v18735_v35 = vmul.f32 %v23208_v6, %v23206_v29  ;;  %v18741_v50 = vmul.f32 %v23211_v59, %v23210_v33  ;;  %v23212_v1 = vld [vmem:[#allocation299_spill] sm:$0xff]  ;;  %v23214_v4 = vld [vmem:[#allocation306_spill] sm:$0xff] }
 0x470   : > { %v6832_v23 = vadd.f32 %v6831_v53, %v23212_v1  ;;  %v6811_v25 = vadd.f32 %v6810_v10, %v23214_v4  ;;  %v23216_v19 = vld [vmem:[#allocation364_spill] sm:$0xff]  ;;  %v23218_v29 = vld [vmem:[#allocation311_spill] sm:$0xff]  ;;  %v6872_v16 = vadd.f32 %v23220_v60, %v23219_v13  ;;  %v23221_v33 = vld [vmem:[#allocation365_spill] sm:$0xff]  ;;  %v6905_v10 = vadd.f32 %v18298_v63, %v18286_v38 }
 0x471   : > { %23198 = vst [vmem:[#allocation217_spill] sm:$0xff] %v18717_v17  ;;  %23209 = vst [vmem:[#allocation198_spill] sm:$0xff] %v18735_v35  ;;  %v6854_v43 = vadd.f32 %v6853_v12, %v23216_v19  ;;  %v23217_v17 = vld [vmem:[#allocation321_spill] sm:$0xff]  ;;  %v6844_v6 = vadd.f32 %v6843_v32, %v23218_v29  ;;  %v6866_v35 = vadd.f32 %v6865_v18, %v18070_v31  ;;  %v23225_v7 = vld [vmem:[#allocation318_spill] sm:$0xff] }
 0x472   : > { %v6801_v55 = vadd.f32 %v6800_v5, %v23217_v17  ;;  %v23222_v59 = vld [vmem:[#allocation373_spill] sm:$0xff]  ;;  %v6916_v12 = vadd.f32 %v18436_v21, %v18424_v30  ;;  %v6927_v31 = vadd.f32 %v18442_v48, %v18430_v44  ;;  %v6938_v32 = vadd.f32 %v6762_v61, %v6760_v37  ;;  %v23224_v17 = vld [vmem:[#allocation378_spill] sm:$0xff]  ;;  %v23226_v1 = vld [vmem:[#allocation319_spill] sm:$0xff] }
 0x473   : > { %v6883_v53 = vadd.f32 %v23222_v59, %v23221_v33  ;;  %v23223_v62 = vld [vmem:[#allocation377_spill] sm:$0xff]  ;;  %v6949_v18 = vadd.f32 %v6763_v45, %v6761_v14  ;;  %v6895_v4 = vadd.f32 %v6894_v0, %v18304_v24  ;;  %v6906_v19 = vadd.f32 %v6905_v10, %v23224_v17  ;;  %v23227_v8 = vld [vmem:[#allocation400_spill] sm:$0xff]  ;;  %v23229_v14 = vld [vmem:[#allocation386_spill] sm:$0xff] }
 0x474   : > { %v6873_v5 = vadd.f32 %v6872_v16, %v23223_v62  ;;  %v6917_v9 = vadd.f32 %v6916_v12, %v18448_v51  ;;  %v6823_v38 = vadd.f32 %v6822_v2, %v23225_v7  ;;  %v6928_v63 = vadd.f32 %v6927_v31, %v18454_v56  ;;  %v23228_v48 = vld [vmem:[#allocation404_spill] sm:$0xff]  ;;  %v23230_v61 = vld [vmem:[#allocation382_spill] sm:$0xff]  ;;  %v23231_v45 = vld [vmem:[#allocation391_spill] sm:$0xff] }
 0x475   : > { %v6884_v13 = vadd.f32 %v6883_v53, %v18166_v46  ;;  %v6939_v30 = vadd.f32 %v6938_v32, %v6764_v11  ;;  %v6950_v21 = vadd.f32 %v6949_v18, %v6765_v28  ;;  %v6845_v34 = vadd.f32 %v6844_v6, %v23226_v1  ;;  %v23232_v60 = vld [vmem:[#allocation376_spill] sm:$0xff]  ;;  %v23233_v11 = vld [vmem:[#allocation381_spill] sm:$0xff]  ;;  %v23234_v16 = vld [vmem:[#allocation394_spill] sm:$0xff] }
 0x476   : > { %v6874_v44 = vadd.f32 %v6873_v5, %v23227_v8  ;;  %v6907_v46 = vadd.f32 %v6906_v19, %v23229_v14  ;;  %v6896_v24 = vadd.f32 %v6895_v4, %v23230_v61  ;;  %v6918_v29 = vadd.f32 %v6917_v9, %v23231_v45  ;;  %v23235_v59 = vld [vmem:[#allocation329_spill] sm:$0xff]  ;;  %v23236_v0 = vld [vmem:[#allocation326_spill] sm:$0xff]  ;;  %v23237_v5 = vld [vmem:[#allocation327_spill] sm:$0xff] }
 0x477   : > { %v6885_v37 = vadd.f32 %v6884_v13, %v23228_v48  ;;  %v6929_v51 = vadd.f32 %v6928_v63, %v18466_v49  ;;  %v6951_v2 = vadd.f32 %v6950_v21, %v18629_v58  ;;  %v6867_v56 = vadd.f32 %v6866_v35, %v23232_v60  ;;  %v23238_v31 = vld [vmem:[#allocation408_spill] sm:$0xff]  ;;  %v23239_v32 = vld [vmem:[#allocation389_spill] sm:$0xff]  ;;  %v23240_v18 = vld [vmem:[#allocation351_spill] sm:$0xff] }
 0x478   : > { %v6908_v6 = vadd.f32 %v6907_v46, %v23234_v16  ;;  %v6940_v33 = vadd.f32 %v6939_v30, %v18623_v36  ;;  %v6802_v53 = vadd.f32 %v6801_v55, %v23235_v59  ;;  %v6824_v10 = vadd.f32 %v6823_v38, %v23236_v0  ;;  %v23241_v4 = vld [vmem:[#allocation390_spill] sm:$0xff]  ;;  %v23242_v9 = vld [vmem:[#allocation380_spill] sm:$0xff]  ;;  %v23243_v7 = vld [vmem:[#allocation397_spill] sm:$0xff] }
 0x479   : > { %v6886_v28 = vadd.f32 %v6885_v37, %v23233_v11  ;;  %v6930_v12 = vadd.f32 %v6929_v51, %v18486_v20  ;;  %v6952_v62 = vadd.f32 %v6951_v2, %v18649_v41  ;;  %v6846_v49 = vadd.f32 %v6845_v34, %v23237_v5  ;;  %v23244_v38 = vld [vmem:[#allocation406_spill] sm:$0xff]  ;;  %v23245_v21 = vld [vmem:[#allocation317_spill] sm:$0xff]  ;;  %v23246_v34 = vld [vmem:[#allocation307_spill] sm:$0xff] }
 0x47a   : > { %v6875_v58 = vadd.f32 %v6874_v44, %v23238_v31  ;;  %v6909_v13 = vadd.f32 %v6908_v6, %v23240_v18  ;;  %v6897_v17 = vadd.f32 %v6896_v24, %v23241_v4  ;;  %v6919_v36 = vadd.f32 %v6918_v29, %v18480_v52  ;;  %v23247_v48 = vld [vmem:[#allocation286_spill] sm:$0xff]  ;;  %v23249_v14 = vld [vmem:[#allocation368_spill] sm:$0xff]  ;;  %v23250_v61 = vld [vmem:[#allocation385_spill] sm:$0xff] }
 0x47b   : > { %v6887_v35 = vadd.f32 %v6886_v28, %v23239_v32  ;;  %v6931_v55 = vadd.f32 %v6930_v12, %v18502_v27  ;;  %v6953_v19 = vadd.f32 %v6952_v62, %v18661_v39  ;;  %v6868_v20 = vadd.f32 %v6867_v56, %v23242_v9  ;;  %v23248_v37 = vld [vmem:[#allocation334_spill] sm:$0xff]  ;;  %v23252_v51 = vld [vmem:[#allocation335_spill] sm:$0xff]  ;;  %v23254_v60 = vld [vmem:[#allocation388_spill] sm:$0xff] }
 0x47c   : > { %v6910_v63 = vadd.f32 %v6909_v13, %v23244_v38  ;;  %v6941_v30 = vadd.f32 %v6940_v33, %v18640_v47  ;;  %v6790_v1 = vadd.f32 %v6789_v22, %v23245_v21  ;;  %v6833_v8 = vadd.f32 %v6832_v23, %v23246_v34  ;;  %v23251_v45 = vld [vmem:[#allocation314_spill] sm:$0xff]  ;;  %v23255_v56 = vld [vmem:[#allocation401_spill] sm:$0xff]  ;;  %v23256_v11 = vld [vmem:[#allocation355_spill] sm:$0xff] }
 0x47d   : > { %v6888_v41 = vadd.f32 %v6887_v35, %v23243_v7  ;;  %v6932_v44 = vadd.f32 %v6931_v55, %v18515_v26  ;;  %v6954_v52 = vadd.f32 %v6953_v19, %v18673_v57  ;;  %v6803_v27 = vadd.f32 %v6802_v53, %v23247_v48  ;;  %v23253_v2 = vld [vmem:[#allocation398_spill] sm:$0xff]  ;;  %v23257_v6 = vld [vmem:[#allocation325_spill] sm:$0xff]  ;;  %v23258_v33 = vld [vmem:[#allocation315_spill] sm:$0xff] }
 0x47e   : > { %v6825_v39 = vadd.f32 %v6824_v10, %v23248_v37  ;;  %v6855_v46 = vadd.f32 %v6854_v43, %v23249_v14  ;;  %v6876_v24 = vadd.f32 %v6875_v58, %v23250_v61  ;;  %v6812_v29 = vadd.f32 %v6811_v25, %v23251_v45  ;;  %v23259_v0 = vld [vmem:[#allocation341_spill] sm:$0xff]  ;;  %v23260_v12 = vld [vmem:[#allocation338_spill] sm:$0xff]  ;;  %v23261_v62 = vld [vmem:[#allocation372_spill] sm:$0xff] }
 0x47f   : > { %v6847_v47 = vadd.f32 %v6846_v49, %v23252_v51  ;;  %v6898_v22 = vadd.f32 %v6897_v17, %v23253_v2  ;;  %v6920_v23 = vadd.f32 %v6919_v36, %v18496_v54  ;;  %v6869_v26 = vadd.f32 %v6868_v20, %v23254_v60  ;;  %v23262_v49 = vld [vmem:[#allocation393_spill] sm:$0xff]  ;;  %v23263_v58 = vld [vmem:[#allocation322_spill] sm:$0xff]  ;;  %v23264_v35 = vld [vmem:[#allocation343_spill] sm:$0xff] }
 0x480   : > { %v6889_v57 = vadd.f32 %v6888_v41, %v23255_v56  ;;  %v6911_v28 = vadd.f32 %v6910_v63, %v23256_v11  ;;  %v6942_v16 = vadd.f32 %v6941_v30, %v18655_v42  ;;  %v6791_v43 = vadd.f32 %v6790_v1, %v23257_v6  ;;  %v23265_v18 = vld [vmem:[#allocation402_spill] sm:$0xff]  ;;  %v23266_v17 = vld [vmem:[#allocation353_spill] sm:$0xff]  ;;  %v23268_v55 = vld [vmem:[#allocation363_spill] sm:$0xff] }
 0x481   : > { %v6834_v59 = vadd.f32 %v6833_v8, %v23258_v33  ;;  %v6933_v25 = vadd.f32 %v6932_v44, %v18527_v15  ;;  %v6955_v53 = vadd.f32 %v6954_v52, %v18685_v3  ;;  %v6804_v10 = vadd.f32 %v6803_v27, %v23259_v0  ;;  %v23267_v36 = vld [vmem:[#allocation409_spill] sm:$0xff]  ;;  %v23271_v38 = vld [vmem:[#allocation323_spill] sm:$0xff]  ;;  %v23274_v8 = vld [vmem:[#allocation290_spill] sm:$0xff] }
 0x482   : > { %v6826_v54 = vadd.f32 %v6825_v39, %v23260_v12  ;;  %v6856_v5 = vadd.f32 %v6855_v46, %v23261_v62  ;;  %v6877_v31 = vadd.f32 %v6876_v24, %v23262_v49  ;;  %v6813_v32 = vadd.f32 %v6812_v29, %v23263_v58  ;;  %v23269_v9 = vld [vmem:[#allocation417_spill] sm:$0xff]  ;;  %v23272_v30 = vld [vmem:[#allocation403_spill] sm:$0xff]  ;;  %v23275_v52 = vld [vmem:[#allocation346_spill] sm:$0xff] }
 0x483   : > { %v6848_v42 = vadd.f32 %v6847_v47, %v23264_v35  ;;  %v6899_v13 = vadd.f32 %v6898_v22, %v23265_v18  ;;  %v6921_v4 = vadd.f32 %v6920_v23, %v18508_v40  ;;  %v6870_v15 = vadd.f32 %v6869_v26, %v23266_v17  ;;  %v23270_v7 = vld [vmem:[#allocation333_spill] sm:$0xff]  ;;  %v23277_v37 = vld [vmem:[#allocation350_spill] sm:$0xff]  ;;  %v23279_v61 = vld [vmem:[#allocation348_spill] sm:$0xff] }
 0x484   : > { %v6890_v3 = vadd.f32 %v6889_v57, %v23267_v36  ;;  %v6912_v19 = vadd.f32 %v6911_v28, %v23268_v55  ;;  %v6943_v20 = vadd.f32 %v6942_v16, %v23269_v9  ;;  %v6792_v41 = vadd.f32 %v6791_v43, %v23270_v7  ;;  %v23273_v1 = vld [vmem:[#allocation213_spill] sm:$0xff]  ;;  %v23278_v14 = vld [vmem:[#allocation330_spill] sm:$0xff]  ;;  %v23281_v51 = vld [vmem:[#allocation395_spill] sm:$0xff] }
 0x485   : > { %v6835_v63 = vadd.f32 %v6834_v59, %v23271_v38  ;;  %v6934_v21 = vadd.f32 %v6933_v25, %v23272_v30  ;;  %v6956_v34 = vadd.f32 %v6955_v53, %v23273_v1  ;;  %v6805_v44 = vadd.f32 %v6804_v10, %v23274_v8  ;;  %v23276_v48 = vld [vmem:[#allocation349_spill] sm:$0xff]  ;;  %v23280_v45 = vld [vmem:[#allocation410_spill] sm:$0xff]  ;;  %v23284_v26 = vld [vmem:[#allocation371_spill] sm:$0xff] }
 0x486   : > { %v6827_v40 = vadd.f32 %v6826_v54, %v23275_v52  ;;  %v6857_v27 = vadd.f32 %v6856_v5, %v23276_v48  ;;  %v6878_v39 = vadd.f32 %v6877_v31, %v23277_v37  ;;  %v6814_v46 = vadd.f32 %v6813_v32, %v23278_v14  ;;  %v23282_v2 = vld [vmem:[#allocation361_spill] sm:$0xff]  ;;  %v23283_v23 = vld [vmem:[#allocation358_spill] sm:$0xff]  ;;  %v23287_v6 = vld [vmem:[#allocation331_spill] sm:$0xff] }
 0x487   : > { %v6849_v24 = vadd.f32 %v6848_v42, %v23279_v61  ;;  %v6900_v29 = vadd.f32 %v6899_v13, %v23280_v45  ;;  %v6922_v47 = vadd.f32 %v6921_v4, %v23281_v51  ;;  %v6871_v22 = vadd.f32 %v6870_v15, %v23282_v2  ;;  %v23285_v57 = vld [vmem:[#allocation421_spill] sm:$0xff]  ;;  %v23288_v33 = vld [vmem:[#allocation411_spill] sm:$0xff]  ;;  %v23290_v0 = vld [vmem:[#allocation384_spill] sm:$0xff] }
 0x488   : > { %v6891_v60 = vadd.f32 %v6890_v3, %v23283_v23  ;;  %v6913_v56 = vadd.f32 %v6912_v19, %v23284_v26  ;;  %v6944_v11 = vadd.f32 %v6943_v20, %v23285_v57  ;;  %v23286_v28 = vld [vmem:[#allocation337_spill] sm:$0xff]  ;;  %v6836_v43 = vadd.f32 %v6835_v63, %v23287_v6  ;;  %v23292_v49 = vld [vmem:[#allocation287_spill] sm:$0xff]  ;;  %v23295_v13 = vld [vmem:[#allocation366_spill] sm:$0xff] }
 0x489   : > { %v6793_v16 = vadd.f32 %v6792_v41, %v23286_v28  ;;  %v6935_v59 = vadd.f32 %v6934_v21, %v23288_v33  ;;  %v23289_v25 = vld [vmem:[#allocation217_spill] sm:$0xff]  ;;  %v6858_v10 = vadd.f32 %v6857_v27, %v23290_v0  ;;  %v6966_v62 = vrot.slane %v6805_v44, 4  ;;  %v23293_v58 = vld [vmem:[#allocation359_spill] sm:$0xff]  ;;  %v23297_v36 = vld [vmem:[#allocation424_spill] sm:$0xff] }
 0x48a   : > { %v6957_v53 = vadd.f32 %v6956_v34, %v23289_v25  ;;  %v23291_v12 = vld [vmem:[#allocation405_spill] sm:$0xff]  ;;  %v6978_v5 = vrot.slane %v6827_v40, 4  ;;  %v6815_v31 = vadd.f32 %v6814_v46, %v23292_v49  ;;  %v6901_v32 = vadd.f32 %v6900_v29, %v23293_v58  ;;  %v23294_v35 = vld [vmem:[#allocation399_spill] sm:$0xff]  ;;  %v23300_v41 = vld [vmem:[#allocation416_spill] sm:$0xff] }
 0x48b   : > { %v6879_v54 = vadd.f32 %v6878_v39, %v23291_v12  ;;  %v6923_v42 = vadd.f32 %v6922_v47, %v23294_v35  ;;  %v6990_v18 = vrot.slane %v6849_v24, 4  ;;  %v6892_v4 = vadd.f32 %v6891_v60, %v23295_v13  ;;  %v23296_v17 = vld [vmem:[#allocation379_spill] sm:$0xff]  ;;  %v23298_v19 = vld [vmem:[#allocation345_spill] sm:$0xff]  ;;  %v23301_v63 = vld [vmem:[#allocation186_spill] sm:$0xff] }
 0x48c   : > { %v6914_v15 = vadd.f32 %v6913_v56, %v23296_v17  ;;  %v6945_v3 = vadd.f32 %v6944_v11, %v23297_v36  ;;  %v7002_v55 = vrot.slane %v6871_v22, 4  ;;  %v6794_v9 = vadd.f32 %v6793_v16, %v23298_v19  ;;  %v23299_v20 = vld [vmem:[#allocation339_spill] sm:$0xff]  ;;  %v23302_v21 = vld [vmem:[#allocation392_spill] sm:$0xff]  ;;  %v23303_v34 = vld [vmem:[#allocation354_spill] sm:$0xff] }
 0x48d   : > { %v6837_v7 = vadd.f32 %v6836_v43, %v23299_v20  ;;  %v6936_v38 = vadd.f32 %v6935_v59, %v23300_v41  ;;  %v6958_v30 = vadd.f32 %v6957_v53, %v23301_v63  ;;  %v6859_v1 = vadd.f32 %v6858_v10, %v23302_v21  ;;  %v23304_v27 = vld [vmem:[#allocation342_spill] sm:$0xff]  ;;  %v23305_v39 = vld [vmem:[#allocation367_spill] sm:$0xff]  ;;  %v23311_v11 = vld [vmem:[#allocation413_spill] sm:$0xff] }
 0x48e   : > { %v6880_v8 = vadd.f32 %v6879_v54, %v23303_v34  ;;  %v6967_v52 = vadd.f32 %v6966_v62, %v6805_v44  ;;  %v6979_v48 = vadd.f32 %v6978_v5, %v6827_v40  ;;  %v6816_v37 = vadd.f32 %v6815_v31, %v23304_v27  ;;  %v23306_v46 = vld [vmem:[#allocation407_spill] sm:$0xff]  ;;  %v23307_v29 = vld [vmem:[#allocation374_spill] sm:$0xff]  ;;  %v23312_v16 = vld [vmem:[#allocation357_spill] sm:$0xff] }
 0x48f   : > { %v6902_v14 = vadd.f32 %v6901_v32, %v23305_v39  ;;  %v6924_v61 = vadd.f32 %v6923_v42, %v23306_v46  ;;  %v6991_v45 = vadd.f32 %v6990_v18, %v6849_v24  ;;  %v6893_v51 = vadd.f32 %v6892_v4, %v23307_v29  ;;  %v23308_v47 = vld [vmem:[#allocation387_spill] sm:$0xff]  ;;  %v23309_v23 = vld [vmem:[#allocation182_spill] sm:$0xff]  ;;  %v23315_v0 = vld [vmem:[#allocation412_spill] sm:$0xff] }
 0x490   : > { %v6915_v2 = vadd.f32 %v6914_v15, %v23308_v47  ;;  %v6946_v60 = vadd.f32 %v6945_v3, %v23309_v23  ;;  %v7003_v26 = vadd.f32 %v7002_v55, %v6871_v22  ;;  %v23310_v56 = vld [vmem:[#allocation347_spill] sm:$0xff]  ;;  %v6937_v28 = vadd.f32 %v6936_v38, %v23311_v11  ;;  %v23313_v43 = vld [vmem:[#allocation362_spill] sm:$0xff]  ;;  %v23319_v46 = vld [vmem:[#allocation420_spill] sm:$0xff] }
 0x491   : > { %v6838_v57 = vadd.f32 %v6837_v7, %v23310_v56  ;;  %v6959_v44 = vadd.f32 %v6958_v30, %v18741_v50  ;;  %v6960_v40 = vrot.slane %v6794_v9, 4  ;;  %v6860_v6 = vadd.f32 %v6859_v1, %v23312_v16  ;;  %v23314_v25 = vld [vmem:[#allocation375_spill] sm:$0xff]  ;;  %v23316_v22 = vld [vmem:[#allocation174_spill] sm:$0xff] }
 0x492   : > { %v6881_v33 = vadd.f32 %v6880_v8, %v23313_v43  ;;  %v6968_v59 = vrot.slane %v6967_v52, 2  ;;  %v6980_v24 = vrot.slane %v6979_v48, 2  ;;  %v6903_v53 = vadd.f32 %v6902_v14, %v23314_v25  ;;  %v23317_v8 = vld [vmem:[#allocation370_spill] sm:$0xff]  ;;  %v23318_v39 = vld [vmem:[#allocation383_spill] sm:$0xff] }
 0x493   : > { %v6925_v10 = vadd.f32 %v6924_v61, %v23315_v0  ;;  %v6972_v12 = vrot.slane %v6816_v37, 4  ;;  %v6992_v54 = vrot.slane %v6991_v45, 2  ;;  %v6947_v62 = vadd.f32 %v6946_v60, %v23316_v22  ;;  %v7057_v43 = vld [vmem:[%s19042_s3 + $0x8] sm:$0xff]  ;;  %v7075_v0 = vld [vmem:[%s19042_s3 + $0x98] sm:$0xff]  ;;  %v7058_v22 = vld [vmem:[%s19042_s3 + $0x10] sm:$0xff] }
 0x494   : > { %v7004_v5 = vrot.slane %v7003_v26, 2  ;;  %v7014_v49 = vrot.slane %v6893_v51, 4  ;;  %v7026_v31 = vrot.slane %v6915_v2, 4  ;;  %v6961_v58 = vadd.f32 %v6960_v40, %v6794_v9 }
 0x495   : > { %v6984_v50 = vrot.slane %v6838_v57, 4  ;;  %v7038_v32 = vrot.slane %v6937_v28, 4  ;;  %v7050_v35 = vrot.slane %v6959_v44, 4  ;;  %v6969_v42 = vadd.f32 %v6968_v59, %v6967_v52 }
 0x496   : > { %v6981_v18 = vadd.f32 %v6980_v24, %v6979_v48  ;;  %v7015_v13 = vadd.f32 %v7014_v49, %v6893_v51  ;;  %v7027_v4 = vadd.f32 %v7026_v31, %v6915_v2  ;;  %v6973_v17 = vadd.f32 %v6972_v12, %v6816_v37  ;;  %v23320_v51 = vld [vmem:[#allocation198_spill] sm:$0xff] }
 0x497   : > { %v6993_v15 = vadd.f32 %v6992_v54, %v6991_v45  ;;  %v7039_v36 = vadd.f32 %v7038_v32, %v6937_v28  ;;  %v7051_v3 = vadd.f32 %v7050_v35, %v6959_v44  ;;  %v6996_v55 = vrot.slane %v6860_v6, 4  ;;  %v7072_v28 = vld [vmem:[%s19042_s3 + $0x80] sm:$0xff]  ;;  %v7077_v32 = vld [vmem:[%s19042_s3 + $0xa8] sm:$0xff] }
 0x498   : > { %v7005_v19 = vadd.f32 %v7004_v5, %v7003_v26  ;;  %v7016_v20 = vrot.slane %v7015_v13, 2  ;;  %v7028_v7 = vrot.slane %v7027_v4, 2  ;;  %v6962_v41 = vrot.slane %v6961_v58, 2 }
 0x499   : > { %v18878_v38 = vadd.f32 %v6984_v50, %v6838_v57  ;;  %v7040_v63 = vrot.slane %v7039_v36, 2  ;;  %v7052_v9 = vrot.slane %v7051_v3, 2  ;;  %v6970_v30 = vrot.slane %v6969_v42, 1  ;;  %v7076_v50 = vld [vmem:[%s19042_s3 + $0xa0] sm:$0xff] }
 0x49a   : > { %v6982_v21 = vrot.slane %v6981_v18, 1  ;;  %v7017_v1 = vadd.f32 %v7016_v20, %v7015_v13  ;;  %v7029_v34 = vadd.f32 %v7028_v7, %v7027_v4  ;;  %v6882_v52 = vadd.f32 %v6881_v33, %v23317_v8  ;;  %v7073_v33 = vld [vmem:[%s19042_s3 + $0x88] sm:$0xff] }
 0x49b   : > { %v6974_v48 = vrot.slane %v6973_v17, 2  ;;  %v6994_v27 = vrot.slane %v6993_v15, 1  ;;  %v7041_v37 = vadd.f32 %v7040_v63, %v7039_v36  ;;  %v6904_v14 = vadd.f32 %v6903_v53, %v23318_v39  ;;  %v7074_v53 = vld [vmem:[%s19042_s3 + $0x90] sm:$0xff]  ;;  %v7061_v20 = vld [vmem:[%s19042_s3 + $0x28] sm:$0xff] }
 0x49c   : > { %v18883_v61 = vadd.f32 %v6925_v10, %v23319_v46  ;;  %v7006_v45 = vrot.slane %v7005_v19, 1  ;;  %v7053_v29 = vadd.f32 %v7052_v9, %v7051_v3  ;;  %v18886_v47 = vadd.f32 %v6947_v62, %v23320_v51  ;;  %v7059_v62 = vld [vmem:[%s19042_s3 + $0x18] sm:$0xff] }
 0x49d   : > { %v18888_v2 = vadd.f32 %v6996_v55, %v6860_v6  ;;  %v7018_v23 = vrot.slane %v7017_v1, 1  ;;  %v7030_v60 = vrot.slane %v7029_v34, 1  ;;  %v18890_v26 = vadd.f32 %v6962_v41, %v6961_v58  ;;  %v7056_v6 = vld [vmem:[%s19042_s3] sm:$0xff]  ;;  %v7063_v46 = vld [vmem:[%s19042_s3 + $0x38] sm:$0xff] }
 0x49e   : > { %v6971_v56 = vadd.f32 %v6970_v30, %v6969_v42  ;;  %v6983_v57 = vadd.f32 %v6982_v21, %v6981_v18  ;;  %v6986_v11 = vrot.slane %v18878_v38, 2  ;;  %v18896_v44 = vadd.f32 %v6974_v48, %v6973_v17  ;;  %v7079_v21 = vld [vmem:[%s19042_s3 + $0xb8] sm:$0xff] }
 0x49f   : > { %v6995_v40 = vadd.f32 %v6994_v27, %v6993_v15  ;;  %v7042_v16 = vrot.slane %v7041_v37, 1  ;;  %v7007_v59 = vadd.f32 %v7006_v45, %v7005_v19  ;;  %v7008_v24 = vrot.slane %v6882_v52, 4  ;;  %v7060_v19 = vld [vmem:[%s19042_s3 + $0x20] sm:$0xff] }
 0x4a0   : > { %v7054_v25 = vrot.slane %v7053_v29, 1  ;;  %v7019_v10 = vadd.f32 %v7018_v23, %v7017_v1  ;;  %v7020_v12 = vrot.slane %v6904_v14, 4  ;;  %v7031_v54 = vadd.f32 %v7030_v60, %v7029_v34  ;;  %v7080_v23 = vld [vmem:[%s19042_s3 + $0xc0] sm:$0xff] }
 0x4a1   : > { %v7125_v5 = vsel %vm7111_vm1, %v6983_v57, %v6971_v56  ;;  %v10252_v49 = vpack.c.bf16 %v7073_v33, %v7072_v28  ;;  %v10254_v31 = vpack.c.bf16 %v7057_v43, %v7056_v6  ;;  %v7043_v58 = vadd.f32 %v7042_v16, %v7041_v37  ;;  %v7082_v43 = vld [vmem:[%s19042_s3 + $0xd0] sm:$0xff] }
 0x4a2   : > { %v7126_v35 = vsel %vm7113_vm2, %v6995_v40, %v7125_v5  ;;  %v10256_v42 = vpack.c.bf16 %v7075_v0, %v7074_v53  ;;  %v7009_v18 = vadd.f32 %v7008_v24, %v6882_v52  ;;  %v7055_v13 = vadd.f32 %v7054_v25, %v7053_v29  ;;  %v7084_v5 = vld [vmem:[%s19042_s3 + $0xe0] sm:$0xff] }
 0x4a3   : > { %v7127_v4 = vsel %vm7115_vm3, %v7007_v59, %v7126_v35  ;;  %10253 = vmatprep.subr.bf16.mxu0 %v10252_v49  ;;  %v6998_v17 = vrot.slane %v18888_v2, 2  ;;  %v10258_v36 = vpack.c.bf16 %v7059_v62, %v7058_v22  ;;  %v6987_v3 = vadd.f32 %v6986_v11, %v18878_v38  ;;  %v7078_v38 = vld [vmem:[%s19042_s3 + $0xb0] sm:$0xff]  ;;  %v7085_v49 = vld [vmem:[%s19042_s3 + $0xe8] sm:$0xff] }
 0x4a4   : > { %v7128_v15 = vsel %vm7117_vm4, %v7019_v10, %v7127_v4  ;;  %10255 = vmatpush3.bf16.msra.mxu0 %v10254_v31  ;;  %v7032_v55 = vrot.slane %v18883_v61, 4  ;;  %v10260_v41 = vpack.c.bf16 %v7077_v32, %v7076_v50  ;;  %v6964_v63 = vrot.slane %v18890_v26, 1  ;;  %v7066_v10 = vld [vmem:[%s19042_s3 + $0x50] sm:$0xff] }
 0x4a5   : > { %v7129_v7 = vsel %vm7119_vm5, %v7031_v54, %v7128_v15  ;;  %10257 = vmatprep.subr.bf16.mxu0 %v10256_v42  ;;  %v6976_v9 = vrot.slane %v18896_v44, 1  ;;  %v7021_v30 = vadd.f32 %v7020_v12, %v6904_v14  ;;  %v7010_v34 = vrot.slane %v7009_v18, 2  ;;  %v7062_v14 = vld [vmem:[%s19042_s3 + $0x30] sm:$0xff]  ;;  %v7067_v12 = vld [vmem:[%s19042_s3 + $0x58] sm:$0xff]  ;;  %v7068_v42 = vld [vmem:[%s19042_s3 + $0x60] sm:$0xff] }
 0x4a6   : > { %v7130_v1 = vsel %vm7121_vm6, %v7043_v58, %v7129_v7  ;;  %v6999_v52 = vadd.f32 %v6998_v17, %v18888_v2  ;;  %v7044_v48 = vrot.slane %v18886_v47, 4  ;;  %v10262_v27 = vpack.c.bf16 %v7061_v20, %v7060_v19  ;;  %v7086_v17 = vld [vmem:[%s19042_s3 + $0xf0] sm:$0xff]  ;;  %v7087_v15 = vld [vmem:[%s19042_s3 + $0xf8] sm:$0xff] }
 0x4a7   : > { %v7131_v8 = vsel %vm7123_vm7, %v7055_v13, %v7130_v1  ;;  %v6988_v37 = vrot.slane %v6987_v3, 1  ;;  %v7033_v39 = vadd.f32 %v7032_v55, %v18883_v61  ;;  %v10264_v45 = vpack.c.bf16 %v7079_v21, %v7078_v38  ;;  %v7081_v61 = vld [vmem:[%s19042_s3 + $0xc8] sm:$0xff]  ;;  %v7070_v20 = vld [vmem:[%s19042_s3 + $0x70] sm:$0xff]  ;;  %v7071_v7 = vld [vmem:[%s19042_s3 + $0x78] sm:$0xff] }
 0x4a8   : > { %10259 = vmatpush3.bf16.msra.mxu0 %v10258_v36  ;;  %7198 = vmatprep.mubr.f32.mxu0 %v7131_v8  ;;  %v6965_v29 = vadd.f32 %v6964_v63, %v18890_v26  ;;  %v6977_v51 = vadd.f32 %v6976_v9, %v18896_v44  ;;  %v7022_v2 = vrot.slane %v7021_v30, 2  ;;  %v7011_v60 = vadd.f32 %v7010_v34, %v7009_v18  ;;  %v7064_v26 = vld [vmem:[%s19042_s3 + $0x40] sm:$0xff]  ;;  %v7065_v44 = vld [vmem:[%s19042_s3 + $0x48] sm:$0xff] }
 0x4a9   : > { %10261 = vmatprep.subr.bf16.mxu0 %v10260_v41  ;;  %v7000_v56 = vrot.slane %v6999_v52, 1  ;;  %v7045_v57 = vadd.f32 %v7044_v48, %v18886_v47  ;;  %v10266_v11 = vpack.c.bf16 %v7063_v46, %v7062_v14  ;;  %v6989_v28 = vadd.f32 %v6988_v37, %v6987_v3  ;;  %v7083_v47 = vld [vmem:[%s19042_s3 + $0xd8] sm:$0xff]  ;;  %v7069_v18 = vld [vmem:[%s19042_s3 + $0x68] sm:$0xff]  ;;  %v7335_v34 = vld [vmem:[#allocation3] ss:$0 sm:$0xff] }
 0x4aa   : > { %v7034_v40 = vrot.slane %v7033_v39, 2  ;;  %v10268_v16 = vpack.c.bf16 %v7081_v61, %v7080_v23  ;;  %v7023_v6 = vadd.f32 %v7022_v2, %v7021_v30  ;;  %v7112_v33 = vsel %vm7111_vm1, %v6977_v51, %v6965_v29 }
 0x4ab   : > { %v7012_v59 = vrot.slane %v7011_v60, 1  ;;  %v7001_v24 = vadd.f32 %v7000_v56, %v6999_v52  ;;  %v7046_v25 = vrot.slane %v7045_v57, 2  ;;  %v10270_v53 = vpack.c.bf16 %v7065_v44, %v7064_v26 }
 0x4ac   : > { %10263 = vmatpush3.bf16.msra.mxu0 %v10262_v27  ;;  %v7035_v0 = vadd.f32 %v7034_v40, %v7033_v39  ;;  %v7114_v54 = vsel %vm7113_vm2, %v6989_v28, %v7112_v33  ;;  %v10272_v22 = vpack.c.bf16 %v7083_v47, %v7082_v43  ;;  %v7024_v62 = vrot.slane %v7023_v6, 1 }
 0x4ad   : > { %10265 = vmatprep.subr.bf16.mxu0 %v10264_v45  ;;  %v7013_v31 = vadd.f32 %v7012_v59, %v7011_v60  ;;  %v7047_v58 = vadd.f32 %v7046_v25, %v7045_v57  ;;  %v7116_v50 = vsel %vm7115_vm3, %v7001_v24, %v7114_v54  ;;  %v10274_v32 = vpack.c.bf16 %v7067_v12, %v7066_v10 }
 0x4ae   : > { %v7036_v35 = vrot.slane %v7035_v0, 1  ;;  %v10276_v13 = vpack.c.bf16 %v7085_v49, %v7084_v5  ;;  %v7025_v4 = vadd.f32 %v7024_v62, %v7023_v6  ;;  %v10278_v55 = vpack.c.bf16 %v7069_v18, %v7068_v42 }
 0x4af   : > { %v7118_v36 = vsel %vm7117_vm4, %v7013_v31, %v7116_v50  ;;  %v7048_v3 = vrot.slane %v7047_v58, 1  ;;  %v10280_v41 = vpack.c.bf16 %v7087_v15, %v7086_v17  ;;  %v10282_v30 = vpack.c.bf16 %v7071_v7, %v7070_v20 }
 0x4b0   : > { %10267 = vmatpush3.bf16.msra.mxu0 %v10266_v11  ;;  %v7037_v19 = vadd.f32 %v7036_v35, %v7035_v0  ;;  %v7120_v63 = vsel %vm7119_vm5, %v7025_v4, %v7118_v36 }
 0x4b1   : > { %10269 = vmatprep.subr.bf16.mxu0 %v10268_v16  ;;  %v7049_v9 = vadd.f32 %v7048_v3, %v7047_v58 }
 0x4b2   : > { %v7122_v38 = vsel %vm7121_vm6, %v7037_v19, %v7120_v63 }
 0x4b3   : > { %v7124_v21 = vsel %vm7123_vm7, %v7049_v9, %v7122_v38 }
 0x4b4   : > { %10271 = vmatpush3.bf16.msra.mxu0 %v10270_v53 }
 0x4b5   : > { %10273 = vmatprep.subr.bf16.mxu0 %v10272_v22 }
 0x4b8   : > { %10275 = vmatpush3.bf16.msra.mxu0 %v10274_v32 }
 0x4b9   : > { %10277 = vmatprep.subr.bf16.mxu0 %v10276_v13 }
 0x4bc   : > { %10279 = vmatpush3.bf16.msra.mxu0 %v10278_v55 }
 0x4bd   : > { %10281 = vmatprep.subr.bf16.mxu0 %v10280_v41 }
 0x4c0   : > { %10283 = vmatpush3.bf16.msra.mxu0 %v10282_v30 }
 0x4c3   : > { %7199 = vmatmul.mubr.f32.vlgmr.msra.gmra.mrb[0].mxu0 %v7124_v21 }
 0x596   : > { %v10249_v1 = vpop.f32.mrb[0].mxu0 }
 0x597   : > { %v10250_v8 = vpop.f32.mrb[1].mxu0 }
 0x598   : > { %v10251_v52 = vadd.f32 %v10250_v8, %v10249_v1 }
 0x59a   : > { %v7201_v48 = vadd.f32 %v10251_v52, %v7335_v34 }
 0x59c   : > { %7205 = vst.msk [vmem:[%s335_s6] sm:$0xff] %vm7204_vm8, %v7201_v48 }
 0x59d PF: > { %s23_s25 = sadd.s32 1, %s10563_s25   ;;  %s23321_s20 = smov %s10547_s21 }
 0x59e   : > { %p20_p4 = scmp.ge.s32.totalorder %s23_s25, 4   ;;  %s23322_s21 = smov %s10551_s22 }
 0x59f   : > { %s23323_s22 = smov %s10648_s30  ;;  %s23324_s23 = smov %s10559_s24 }
 0x5a0   : > { %s23325_s24 = smov %s23327_s26  ;;  %22 = sbr.rel (!%p20_p4) target bundleno = 9 (0x9), region = 104 }
 0x5a7   :  { %7225 = vsyncpa [#allocation5], 1 }
 0x5a8   :  { %7227 = vsyncpa [#allocation5 + $0x1], 1 }
 0x5a9   :  { %7228 = vsyncpa [#allocation7], 1 }
 0x5aa   :  { %7230 = vsyncpa [#allocation7 + $0x1], 1 }

</bundles_post_ra>
